<compile_context>
chip_gen: v5e
topology: v5e:2x2
jax: 0.10.0
libtpu: 0.0.40
codegen_flags: <defaults>
</compile_context>

<pallas_src>
import math
import functools

import jax
import jax.numpy as jnp
from jax.experimental import pallas as pl
from jax.experimental.pallas import tpu as pltpu


# ----------------------------------------------------------------------------
# Helpers
# ----------------------------------------------------------------------------
def _round_up(x, m):
    return (x + m - 1) // m * m


def _vmem_full(n):
    return [pl.BlockSpec(memory_space=pltpu.MemorySpace.VMEM) for _ in range(n)]


@functools.lru_cache(maxsize=1)
def _vmem_cap_bytes():
    """Physical VMEM capacity (v5e/v6e: 128 MiB, v7x: 64 MiB)."""
    try:
        info = pltpu.get_tpu_info()
        cap = int(getattr(info, "vmem_capacity_bytes", 0) or 0)
        if cap > 0:
            return cap
    except Exception:
        pass
    return 64 << 20          # conservative fallback (v7x physical VMEM)


def _cparams(grid_sems, est_bytes):
    """CompilerParams with a generation-aware VMEM budget + grid semantics."""
    cap = _vmem_cap_bytes()
    limit = int(min(max(int(est_bytes) + (8 << 20), 32 << 20), int(cap * 0.85)))
    if grid_sems is None:
        return pltpu.CompilerParams(vmem_limit_bytes=limit)
    return pltpu.CompilerParams(dimension_semantics=grid_sems,
                                vmem_limit_bytes=limit)


def _layer_norm(z, g, b):
    # biased variance, eps=1e-5 (matches PyTorch nn.LayerNorm defaults)
    mu = jnp.mean(z, axis=-1, keepdims=True)
    var = jnp.mean(jnp.square(z - mu), axis=-1, keepdims=True)
    return (z - mu) * jax.lax.rsqrt(var + 1e-5) * g + b


def get_timestep_embedding(timesteps, embedding_dim):
    half = embedding_dim // 2
    emb = math.log(10000.0) / (half - 1)
    freqs = jnp.exp(jnp.arange(half, dtype=jnp.float32) * -emb)
    arg = timesteps.astype(jnp.float32)[:, None] * freqs[None, :]
    emb = jnp.concatenate([jnp.sin(arg), jnp.cos(arg)], axis=1)
    if embedding_dim % 2 == 1:
        emb = jnp.pad(emb, ((0, 0), (0, 1)))
    return emb  # [B, embedding_dim]


# ----------------------------------------------------------------------------
# Kernel 1: fused embedding  (one-hot token gather + positional + conditioning)
#   grid over batch; conditioning MLP / text projection are computed in-kernel
#   on the per-batch row, so the whole input build is a single pallas_call.
# ----------------------------------------------------------------------------
def embed_kernel(ids_ref, tok_ref, pos_ref, tsin_ref, txt_ref,
                 wt1_ref, bt1_ref, wt2_ref, bt2_ref, wtx_ref, btx_ref, o_ref):
    b = pl.program_id(0)
    N, E = o_ref.shape
    V = tok_ref.shape[0]

    # Token embedding as a one-hot bf16 MXU matmul (vocab is small).
    # TODO(synk): manual DMA row gather from HBM for large vocabularies.
    ids = ids_ref[...]                                           # (N, 1) int32
    onehot = (ids == jax.lax.broadcasted_iota(jnp.int32, (N, V), 1))
    tok = jnp.dot(onehot.astype(jnp.bfloat16), tok_ref[...],
                  preferred_element_type=jnp.float32)            # (N, E)

    # Fused conditioning: timestep MLP (Linear-ReLU-Linear) + text projection.
    tsin = tsin_ref[pl.ds(b, 1), :]                              # (1, E)
    txt = txt_ref[pl.ds(b, 1), :]                                # (1, T)
    h = jnp.dot(tsin.astype(jnp.bfloat16), wt1_ref[...],
                preferred_element_type=jnp.float32) + bt1_ref[...]
    h = jnp.maximum(h, 0.0)
    t_emb = jnp.dot(h.astype(jnp.bfloat16), wt2_ref[...],
                    preferred_element_type=jnp.float32) + bt2_ref[...]
    t_cond = jnp.dot(txt.astype(jnp.bfloat16), wtx_ref[...],
                     preferred_element_type=jnp.float32) + btx_ref[...]

    o_ref[...] = tok + pos_ref[...] + (t_emb + t_cond)           # (N, E)


def embed_stage(ids3, tok_bf16, pos, t_sin, text_emb, p):
    B, N, _ = ids3.shape
    V, E = tok_bf16.shape
    T = text_emb.shape[1]
    est = (4 * N * E * 4                 # out blocks (double-buffered)
           + V * E * 2 + N * E * 4       # token table + pos
           + N * V * (4 + 2)             # iota + one-hot
           + 2 * N * E * 4               # tok / sum intermediates
           + 2 * E * E * 2 + T * E * 2   # cond weights (bf16)
           + B * (E + T) * 4 + 8 * E * 4)
    return pl.pallas_call(
        embed_kernel,
        grid=(B,),
        out_shape=jax.ShapeDtypeStruct((B, N, E), jnp.float32),
        in_specs=[pl.BlockSpec((None, N, 1), lambda b: (b, 0, 0))]  # ids
                 + _vmem_full(10),
        out_specs=pl.BlockSpec((None, N, E), lambda b: (b, 0, 0)),
        compiler_params=_cparams(("parallel",), est),
    )(ids3, tok_bf16, pos, t_sin, text_emb,
      p['wt1'], p['bt1'], p['wt2'], p['bt2'], p['wtx'], p['btx'])


# ----------------------------------------------------------------------------
# Kernel 2: fused encoder layer
#   self-attention + residual + LN1 + FFN + residual + LN2, grid over batch.
# ----------------------------------------------------------------------------
def layer_kernel(x_ref, wqkv_ref, bqkv_ref, wo_ref, bo_ref, g1_ref, beta1_ref,
                 w1_ref, b1_ref, w2_ref, b2_ref, g2_ref, beta2_ref,
                 o_ref, *, num_heads):
    x = x_ref[...]                                      # (N, E) f32
    N, E = x.shape
    H = num_heads
    Dh = E // H
    scale = 1.0 / math.sqrt(Dh)

    # ---- self-attention ----------------------------------------------------
    qkv = jnp.dot(x.astype(jnp.bfloat16), wqkv_ref[...],
                  preferred_element_type=jnp.float32) + bqkv_ref[...]  # (N,3E)
    # softmax scale folded into q (O(N*E), not O(H*N^2))
    q = (qkv[:, 0:E] * scale).reshape(N, H, Dh)
    k = qkv[:, E:2 * E].reshape(N, H, Dh)
    v = qkv[:, 2 * E:3 * E].reshape(N, H, Dh)
    # one up-front head-major transpose, reused by both batched einsums
    qh = jnp.transpose(q, (1, 0, 2)).astype(jnp.bfloat16)   # (H, N, Dh)
    kh = jnp.transpose(k, (1, 0, 2)).astype(jnp.bfloat16)
    vh = jnp.transpose(v, (1, 0, 2)).astype(jnp.bfloat16)

    # TODO(synk): flash-style KV tiling (online softmax) for long sequences so
    # the (H, N, N) f32 scores never materialize (v7x VMEM is the first limit).
    s = jnp.einsum('hnd,hmd->hnm', qh, kh,
                   preferred_element_type=jnp.float32)       # (H, N, N)
    s = s - jnp.max(s, axis=-1, keepdims=True)
    prob = jnp.exp(s)
    prob = prob * pl.reciprocal(jnp.sum(prob, axis=-1, keepdims=True),
                                approx=True)
    ctx = jnp.einsum('hnm,hmd->hnd', prob.astype(jnp.bfloat16), vh,
                     preferred_element_type=jnp.float32)     # (H, N, Dh)
    ctx = jnp.transpose(ctx, (1, 0, 2)).reshape(N, E)

    attn = jnp.dot(ctx.astype(jnp.bfloat16), wo_ref[...],
                   preferred_element_type=jnp.float32) + bo_ref[...]

    # residual (dropout = identity at inference) + LayerNorm1, f32 elementwise
    y = _layer_norm(x + attn, g1_ref[...], beta1_ref[...])

    # ---- feed-forward (row-wise, so it reuses the same resident tile) ------
    h = jnp.dot(y.astype(jnp.bfloat16), w1_ref[...],
                preferred_element_type=jnp.float32) + b1_ref[...]
    h = jnp.maximum(h, 0.0)
    f = jnp.dot(h.astype(jnp.bfloat16), w2_ref[...],
                preferred_element_type=jnp.float32) + b2_ref[...]

    o_ref[...] = _layer_norm(y + f, g2_ref[...], beta2_ref[...])


def encoder_layer(x3, lp, num_heads, ff_dim):
    B, N, E = x3.shape
    H = num_heads
    F = ff_dim
    est = (4 * N * E * 4                              # x / out blocks (2x buf)
           + 2 * (3 * E * E + E * E + 2 * E * F)      # bf16 weights
           + 4 * (8 * E + 2 * F)                      # biases / LN params
           + N * 3 * E * (4 + 2)                      # qkv f32 + bf16 copies
           + 3 * H * N * N * 4                        # scores / probs
           + 2 * N * E * 4                            # ctx / attn out
           + N * F * (4 + 2 + 4))                     # FFN hidden
    spec = pl.BlockSpec((None, N, E), lambda b: (b, 0, 0))
    return pl.pallas_call(
        functools.partial(layer_kernel, num_heads=num_heads),
        grid=(B,),
        out_shape=jax.ShapeDtypeStruct((B, N, E), jnp.float32),
        in_specs=[spec] + _vmem_full(12),
        out_specs=spec,
        compiler_params=_cparams(("parallel",), est),
    )(x3, lp['wqkv'], lp['bqkv'], lp['wo'], lp['bo'], lp['g1'], lp['beta1'],
      lp['w1'], lp['b1'], lp['w2'], lp['b2'], lp['g2'], lp['beta2'])


# ----------------------------------------------------------------------------
# Kernel 3: output projection E -> num_tokens  (row-tiled x vocab-tiled)
# ----------------------------------------------------------------------------
def out_proj_kernel(x_ref, w_ref, b_ref, o_ref):
    o_ref[...] = jnp.dot(x_ref[...].astype(jnp.bfloat16), w_ref[...],
                         preferred_element_type=jnp.float32) + b_ref[...]


def out_proj(x2, w, b, tm, tv):
    R, E = x2.shape
    Vp = w.shape[1]
    est = (2 * tm * E * 4 + 2 * E * tv * 2 + 2 * tm * tv * 4
           + tm * E * 2 + 2 * tv * 4)
    return pl.pallas_call(
        out_proj_kernel,
        grid=(R // tm, Vp // tv),
        out_shape=jax.ShapeDtypeStruct((R, Vp), jnp.float32),
        in_specs=[pl.BlockSpec((tm, E), lambda i, j: (i, 0)),
                  pl.BlockSpec((E, tv), lambda i, j: (0, j)),
                  pl.BlockSpec((1, tv), lambda i, j: (0, j))],
        out_specs=pl.BlockSpec((tm, tv), lambda i, j: (i, j)),
        compiler_params=_cparams(("parallel", "parallel"), est),
    )(x2, w, b)


# ----------------------------------------------------------------------------
# Parameter init (deterministic, synthetic) and full forward
# ----------------------------------------------------------------------------
def init_params(key, num_tokens, embed_dim, num_layers, max_seq_len,
                ff_dim=2048, text_dim=512):
    keys = jax.random.split(key, 8 + num_layers)
    scale = 0.02

    def rand(k, shape, dtype=jnp.float32):
        return (jax.random.normal(k, shape, jnp.float32) * scale).astype(dtype)

    bf16 = jnp.bfloat16
    params = dict(
        tok=rand(keys[0], (num_tokens, embed_dim)),
        pos=rand(keys[1], (1, max_seq_len, embed_dim)),
        wt1=rand(keys[2], (embed_dim, embed_dim), bf16),
        bt1=jnp.zeros((1, embed_dim), jnp.float32),
        wt2=rand(keys[3], (embed_dim, embed_dim), bf16),
        bt2=jnp.zeros((1, embed_dim), jnp.float32),
        wtx=rand(keys[4], (text_dim, embed_dim), bf16),
        btx=jnp.zeros((1, embed_dim), jnp.float32),
        w_out=rand(keys[5], (embed_dim, num_tokens), bf16),
        b_out=jnp.zeros((1, num_tokens), jnp.float32),
        layers=[],
    )
    for l in range(num_layers):
        lk = jax.random.split(keys[8 + l], 4)
        params['layers'].append(dict(
            wqkv=rand(lk[0], (embed_dim, 3 * embed_dim), bf16),
            bqkv=jnp.zeros((1, 3 * embed_dim), jnp.float32),
            wo=rand(lk[1], (embed_dim, embed_dim), bf16),
            bo=jnp.zeros((1, embed_dim), jnp.float32),
            g1=jnp.ones((1, embed_dim), jnp.float32),
            beta1=jnp.zeros((1, embed_dim), jnp.float32),
            w1=rand(lk[2], (embed_dim, ff_dim), bf16),
            b1=jnp.zeros((1, ff_dim), jnp.float32),
            w2=rand(lk[3], (ff_dim, embed_dim), bf16),
            b2=jnp.zeros((1, embed_dim), jnp.float32),
            g2=jnp.ones((1, embed_dim), jnp.float32),
            beta2=jnp.zeros((1, embed_dim), jnp.float32),
        ))
    return params


def diffusion_transformer_forward(params, x_t, t, text_emb, num_heads):
    B, N = x_t.shape
    V, E = params['tok'].shape
    max_seq_len = params['pos'].shape[1]
    ff_dim = params['layers'][0]['w1'].shape[1]

    # sinusoidal timestep features: tiny scalar math stays in plain JAX
    t_sin = get_timestep_embedding(t, E)                        # [B, E]

    if N <= max_seq_len:
        pos = params['pos'][0, :N, :]                           # [N, E]
    else:
        pos = jnp.zeros((N, E), jnp.float32)                    # PyTorch skips add

    ids3 = x_t.astype(jnp.int32).reshape(B, N, 1)
    tok_bf16 = params['tok'].astype(jnp.bfloat16)
    x3 = embed_stage(ids3, tok_bf16, pos, t_sin, text_emb, params)  # [B, N, E]

    # (PyTorch runs the encoder on [N,B,E]; computing on [B,N,E] is identical.)
    for lp in params['layers']:
        x3 = encoder_layer(x3, lp, num_heads, ff_dim)           # fused layer

    # output projection: flatten + pad ONCE, outside the layer loop
    rows = B * N
    rows8 = _round_up(rows, 8)
    tm = min(512, rows8)
    rows_p = _round_up(rows8, tm)
    x2 = x3.reshape(rows, E)
    if rows_p != rows:
        x2 = jnp.pad(x2, ((0, rows_p - rows), (0, 0)))

    w_out, b_out = params['w_out'], params['b_out']
    Vp = _round_up(V, 128)                                      # lane-dense vocab
    if Vp != V:
        w_out = jnp.pad(w_out, ((0, 0), (0, Vp - V)))
        b_out = jnp.pad(b_out, ((0, 0), (0, Vp - V)))
    tv = next(tt for tt in (512, 256, 128) if Vp % tt == 0)

    logits = out_proj(x2, w_out, b_out, tm, tv)                 # [rows_p, Vp]
    return logits[:rows, :V].reshape(B, N, V)


if __name__ == "__main__":
    B, N = 2, 8
    num_tokens = 128       # lane-dense vocab (multiple of 128)
    embed_dim = 128        # lane-dense embed dim
    num_layers = 2
    num_heads = 4
    max_seq_len = 16
    ff_dim = 2048          # nn.TransformerEncoderLayer default dim_feedforward

    key = jax.random.PRNGKey(0)
    k_ids, k_t, k_txt, k_params = jax.random.split(key, 4)

    x_t = jax.random.randint(k_ids, (B, N), 0, num_tokens, dtype=jnp.int32)
    t = jax.random.randint(k_t, (B,), 1, 100, dtype=jnp.int32)
    text_emb = jax.random.normal(k_txt, (B, 512), jnp.float32)

    params = init_params(k_params, num_tokens, embed_dim, num_layers,
                         max_seq_len, ff_dim=ff_dim)

    fwd = jax.jit(functools.partial(diffusion_transformer_forward,
                                    num_heads=num_heads))
    logits = fwd(params, x_t, t, text_emb)
    logits = jax.block_until_ready(logits)
    assert logits.shape == (B, N, num_tokens)
    assert logits.dtype == jnp.float32
    assert bool(jnp.all(jnp.isfinite(logits)))
    print("KERNEL_OK")
</pallas_src>

<mosaic_0001>
module attributes {stable_mosaic.version = 11 : i64} {
  func.func @layer_kernel(%arg0: i32, %arg1: memref<1x8x128xf32, #tpu.memory_space<vmem>>, %arg2: memref<128x384xbf16, #tpu.memory_space<vmem>>, %arg3: memref<1x384xf32, #tpu.memory_space<vmem>>, %arg4: memref<128x128xbf16, #tpu.memory_space<vmem>>, %arg5: memref<1x128xf32, #tpu.memory_space<vmem>>, %arg6: memref<1x128xf32, #tpu.memory_space<vmem>>, %arg7: memref<1x128xf32, #tpu.memory_space<vmem>>, %arg8: memref<128x2048xbf16, #tpu.memory_space<vmem>>, %arg9: memref<1x2048xf32, #tpu.memory_space<vmem>>, %arg10: memref<2048x128xbf16, #tpu.memory_space<vmem>>, %arg11: memref<1x128xf32, #tpu.memory_space<vmem>>, %arg12: memref<1x128xf32, #tpu.memory_space<vmem>>, %arg13: memref<1x128xf32, #tpu.memory_space<vmem>>, %arg14: memref<1x8x128xf32, #tpu.memory_space<vmem>>) attributes {dimension_semantics = [#tpu.dimension_semantics<parallel>], iteration_bounds = array<i64: 2>, scalar_prefetch = 0 : i64, scratch_operands = 0 : i64, tpu.core_type = #tpu.core_type<tc>, window_params = [{transform_indices = @transform_0, window_bounds = array<i64: 1, 8, 128>}, {pipeline_mode = #tpu.pipeline_mode<synchronous>, transform_indices = @transform_1, window_bounds = array<i64: 128, 384>}, {pipeline_mode = #tpu.pipeline_mode<synchronous>, transform_indices = @transform_2, window_bounds = array<i64: 1, 384>}, {pipeline_mode = #tpu.pipeline_mode<synchronous>, transform_indices = @transform_3, window_bounds = array<i64: 128, 128>}, {pipeline_mode = #tpu.pipeline_mode<synchronous>, transform_indices = @transform_4, window_bounds = array<i64: 1, 128>}, {pipeline_mode = #tpu.pipeline_mode<synchronous>, transform_indices = @transform_5, window_bounds = array<i64: 1, 128>}, {pipeline_mode = #tpu.pipeline_mode<synchronous>, transform_indices = @transform_6, window_bounds = array<i64: 1, 128>}, {pipeline_mode = #tpu.pipeline_mode<synchronous>, transform_indices = @transform_7, window_bounds = array<i64: 128, 2048>}, {pipeline_mode = #tpu.pipeline_mode<synchronous>, transform_indices = @transform_8, window_bounds = array<i64: 1, 2048>}, {pipeline_mode = #tpu.pipeline_mode<synchronous>, transform_indices = @transform_9, window_bounds = array<i64: 2048, 128>}, {pipeline_mode = #tpu.pipeline_mode<synchronous>, transform_indices = @transform_10, window_bounds = array<i64: 1, 128>}, {pipeline_mode = #tpu.pipeline_mode<synchronous>, transform_indices = @transform_11, window_bounds = array<i64: 1, 128>}, {pipeline_mode = #tpu.pipeline_mode<synchronous>, transform_indices = @transform_12, window_bounds = array<i64: 1, 128>}, {transform_indices = @transform_13, window_bounds = array<i64: 1, 8, 128>}]} {
    %c0 = arith.constant 0 : index
    %c0_0 = arith.constant 0 : index
    %c0_1 = arith.constant 0 : index
    %0 = vector.load %arg1[%c0, %c0_0, %c0_1] : memref<1x8x128xf32, #tpu.memory_space<vmem>>, vector<1x8x128xf32>
    %1 = vector.shape_cast %0 : vector<1x8x128xf32> to vector<8x128xf32>
    %2 = arith.truncf %1 : vector<8x128xf32> to vector<8x128xbf16>
    %c0_2 = arith.constant 0 : index
    %c0_3 = arith.constant 0 : index
    %3 = vector.load %arg2[%c0_2, %c0_3] : memref<128x384xbf16, #tpu.memory_space<vmem>>, vector<128x384xbf16>
    %cst = arith.constant dense<0.000000e+00> : vector<8x384xf32>
    %4 = tpu.matmul %2, %3, %cst {dimension_numbers = #tpu.dot_dimension_numbers<[1], [0], [0], [1], [0, 0, 1, 1], [], []>} : vector<8x128xbf16>, vector<128x384xbf16>, vector<8x384xf32> -> vector<8x384xf32>
    %c0_4 = arith.constant 0 : index
    %c0_5 = arith.constant 0 : index
    %5 = vector.load %arg3[%c0_4, %c0_5] : memref<1x384xf32, #tpu.memory_space<vmem>>, vector<1x384xf32>
    %6 = vector.broadcast %5 : vector<1x384xf32> to vector<8x384xf32>
    %7 = arith.addf %4, %6 : vector<8x384xf32>
    %8 = vector.extract_strided_slice %7 {offsets = [0, 0], sizes = [8, 128], strides = [1, 1]} : vector<8x384xf32> to vector<8x128xf32>
    %cst_6 = arith.constant 0.176776692 : f32
    %9 = vector.broadcast %cst_6 : f32 to vector<8x128xf32>
    %10 = arith.mulf %8, %9 : vector<8x128xf32>
    %11 = vector.shape_cast %10 : vector<8x128xf32> to vector<8x4x32xf32>
    %12 = vector.extract_strided_slice %7 {offsets = [0, 128], sizes = [8, 128], strides = [1, 1]} : vector<8x384xf32> to vector<8x128xf32>
    %13 = vector.shape_cast %12 : vector<8x128xf32> to vector<8x4x32xf32>
    %14 = vector.extract_strided_slice %7 {offsets = [0, 256], sizes = [8, 128], strides = [1, 1]} : vector<8x384xf32> to vector<8x128xf32>
    %15 = vector.shape_cast %14 : vector<8x128xf32> to vector<8x4x32xf32>
    %16 = tpu.transpose %11, [1, 0, 2] : vector<8x4x32xf32> -> vector<4x8x32xf32>
    %17 = arith.truncf %16 : vector<4x8x32xf32> to vector<4x8x32xbf16>
    %18 = tpu.transpose %13, [1, 0, 2] : vector<8x4x32xf32> -> vector<4x8x32xf32>
    %19 = arith.truncf %18 : vector<4x8x32xf32> to vector<4x8x32xbf16>
    %20 = tpu.transpose %15, [1, 0, 2] : vector<8x4x32xf32> -> vector<4x8x32xf32>
    %21 = arith.truncf %20 : vector<4x8x32xf32> to vector<4x8x32xbf16>
    "tpu.trace_start"() <{level = 10 : i32, message = "hnd,hmd->hnm"}> : () -> ()
    %cst_7 = arith.constant dense<0.000000e+00> : vector<4x8x8xf32>
    %22 = tpu.matmul %17, %19, %cst_7 {dimension_numbers = #tpu.dot_dimension_numbers<[2], [2], [1], [1], [0, 0, 0, 1, 1, 1], [0], [0]>} : vector<4x8x32xbf16>, vector<4x8x32xbf16>, vector<4x8x8xf32> -> vector<4x8x8xf32>
    "tpu.trace_stop"() : () -> ()
    %cst_8 = arith.constant dense<0xFF800000> : vector<4x8xf32>
    %23 = vector.multi_reduction <maximumf>, %22, %cst_8 [2] : vector<4x8x8xf32> to vector<4x8xf32>
    %24 = vector.shape_cast %23 : vector<4x8xf32> to vector<4x8x1xf32>
    %25 = vector.broadcast %24 : vector<4x8x1xf32> to vector<4x8x8xf32>
    %26 = arith.subf %22, %25 : vector<4x8x8xf32>
    %27 = math.exp %26 : vector<4x8x8xf32>
    %cst_9 = arith.constant dense<0.000000e+00> : vector<4x8xf32>
    %28 = vector.multi_reduction <add>, %27, %cst_9 [2] : vector<4x8x8xf32> to vector<4x8xf32>
    %29 = vector.shape_cast %28 : vector<4x8xf32> to vector<4x8x1xf32>
    %30 = tpu.reciprocal %29 {approx = true} : vector<4x8x1xf32> -> vector<4x8x1xf32>
    %31 = vector.broadcast %30 : vector<4x8x1xf32> to vector<4x8x8xf32>
    %32 = arith.mulf %27, %31 : vector<4x8x8xf32>
    %33 = arith.truncf %32 : vector<4x8x8xf32> to vector<4x8x8xbf16>
    "tpu.trace_start"() <{level = 10 : i32, message = "hnm,hmd->hnd"}> : () -> ()
    %cst_10 = arith.constant dense<0.000000e+00> : vector<4x8x32xf32>
    %34 = tpu.matmul %33, %21, %cst_10 {dimension_numbers = #tpu.dot_dimension_numbers<[2], [1], [1], [2], [0, 0, 0, 1, 1, 2], [0], [0]>} : vector<4x8x8xbf16>, vector<4x8x32xbf16>, vector<4x8x32xf32> -> vector<4x8x32xf32>
    "tpu.trace_stop"() : () -> ()
    %35 = tpu.transpose %34, [1, 0, 2] : vector<4x8x32xf32> -> vector<8x4x32xf32>
    %36 = vector.shape_cast %35 : vector<8x4x32xf32> to vector<8x128xf32>
    %37 = arith.truncf %36 : vector<8x128xf32> to vector<8x128xbf16>
    %c0_11 = arith.constant 0 : index
    %c0_12 = arith.constant 0 : index
    %38 = vector.load %arg4[%c0_11, %c0_12] : memref<128x128xbf16, #tpu.memory_space<vmem>>, vector<128x128xbf16>
    %cst_13 = arith.constant dense<0.000000e+00> : vector<8x128xf32>
    %39 = tpu.matmul %37, %38, %cst_13 {dimension_numbers = #tpu.dot_dimension_numbers<[1], [0], [0], [1], [0, 0, 1, 1], [], []>} : vector<8x128xbf16>, vector<128x128xbf16>, vector<8x128xf32> -> vector<8x128xf32>
    %c0_14 = arith.constant 0 : index
    %c0_15 = arith.constant 0 : index
    %40 = vector.load %arg5[%c0_14, %c0_15] : memref<1x128xf32, #tpu.memory_space<vmem>>, vector<1x128xf32>
    %41 = vector.broadcast %40 : vector<1x128xf32> to vector<8x128xf32>
    %42 = arith.addf %39, %41 : vector<8x128xf32>
    %43 = arith.addf %1, %42 : vector<8x128xf32>
    %c0_16 = arith.constant 0 : index
    %c0_17 = arith.constant 0 : index
    %44 = vector.load %arg6[%c0_16, %c0_17] : memref<1x128xf32, #tpu.memory_space<vmem>>, vector<1x128xf32>
    %c0_18 = arith.constant 0 : index
    %c0_19 = arith.constant 0 : index
    %45 = vector.load %arg7[%c0_18, %c0_19] : memref<1x128xf32, #tpu.memory_space<vmem>>, vector<1x128xf32>
    %cst_20 = arith.constant dense<0.000000e+00> : vector<8xf32>
    %46 = vector.multi_reduction <add>, %43, %cst_20 [1] : vector<8x128xf32> to vector<8xf32>
    %47 = vector.shape_cast %46 : vector<8xf32> to vector<8x1xf32>
    %cst_21 = arith.constant 1.280000e+02 : f32
    %48 = vector.broadcast %cst_21 : f32 to vector<8x1xf32>
    %49 = arith.divf %47, %48 : vector<8x1xf32>
    %50 = vector.broadcast %49 : vector<8x1xf32> to vector<8x128xf32>
    %51 = arith.subf %43, %50 : vector<8x128xf32>
    %52 = arith.mulf %51, %51 : vector<8x128xf32>
    %cst_22 = arith.constant dense<0.000000e+00> : vector<8xf32>
    %53 = vector.multi_reduction <add>, %52, %cst_22 [1] : vector<8x128xf32> to vector<8xf32>
    %54 = vector.shape_cast %53 : vector<8xf32> to vector<8x1xf32>
    %cst_23 = arith.constant 1.280000e+02 : f32
    %55 = vector.broadcast %cst_23 : f32 to vector<8x1xf32>
    %56 = arith.divf %54, %55 : vector<8x1xf32>
    %57 = vector.broadcast %49 : vector<8x1xf32> to vector<8x128xf32>
    %58 = arith.subf %43, %57 : vector<8x128xf32>
    %cst_24 = arith.constant 9.99999974E-6 : f32
    %59 = vector.broadcast %cst_24 : f32 to vector<8x1xf32>
    %60 = arith.addf %56, %59 : vector<8x1xf32>
    %61 = math.rsqrt %60 : vector<8x1xf32>
    %62 = vector.broadcast %61 : vector<8x1xf32> to vector<8x128xf32>
    %63 = arith.mulf %58, %62 : vector<8x128xf32>
    %64 = vector.broadcast %44 : vector<1x128xf32> to vector<8x128xf32>
    %65 = arith.mulf %63, %64 : vector<8x128xf32>
    %66 = vector.broadcast %45 : vector<1x128xf32> to vector<8x128xf32>
    %67 = arith.addf %65, %66 : vector<8x128xf32>
    %68 = arith.truncf %67 : vector<8x128xf32> to vector<8x128xbf16>
    %c0_25 = arith.constant 0 : index
    %c0_26 = arith.constant 0 : index
    %69 = vector.load %arg8[%c0_25, %c0_26] : memref<128x2048xbf16, #tpu.memory_space<vmem>>, vector<128x2048xbf16>
    %cst_27 = arith.constant dense<0.000000e+00> : vector<8x2048xf32>
    %70 = tpu.matmul %68, %69, %cst_27 {dimension_numbers = #tpu.dot_dimension_numbers<[1], [0], [0], [1], [0, 0, 1, 1], [], []>} : vector<8x128xbf16>, vector<128x2048xbf16>, vector<8x2048xf32> -> vector<8x2048xf32>
    %c0_28 = arith.constant 0 : index
    %c0_29 = arith.constant 0 : index
    %71 = vector.load %arg9[%c0_28, %c0_29] : memref<1x2048xf32, #tpu.memory_space<vmem>>, vector<1x2048xf32>
    %72 = vector.broadcast %71 : vector<1x2048xf32> to vector<8x2048xf32>
    %73 = arith.addf %70, %72 : vector<8x2048xf32>
    %cst_30 = arith.constant 0.000000e+00 : f32
    %74 = vector.broadcast %cst_30 : f32 to vector<8x2048xf32>
    %75 = arith.maximumf %73, %74 : vector<8x2048xf32>
    %76 = arith.truncf %75 : vector<8x2048xf32> to vector<8x2048xbf16>
    %c0_31 = arith.constant 0 : index
    %c0_32 = arith.constant 0 : index
    %77 = vector.load %arg10[%c0_31, %c0_32] : memref<2048x128xbf16, #tpu.memory_space<vmem>>, vector<2048x128xbf16>
    %cst_33 = arith.constant dense<0.000000e+00> : vector<8x128xf32>
    %78 = tpu.matmul %76, %77, %cst_33 {dimension_numbers = #tpu.dot_dimension_numbers<[1], [0], [0], [1], [0, 0, 1, 1], [], []>} : vector<8x2048xbf16>, vector<2048x128xbf16>, vector<8x128xf32> -> vector<8x128xf32>
    %c0_34 = arith.constant 0 : index
    %c0_35 = arith.constant 0 : index
    %79 = vector.load %arg11[%c0_34, %c0_35] : memref<1x128xf32, #tpu.memory_space<vmem>>, vector<1x128xf32>
    %80 = vector.broadcast %79 : vector<1x128xf32> to vector<8x128xf32>
    %81 = arith.addf %78, %80 : vector<8x128xf32>
    %82 = arith.addf %67, %81 : vector<8x128xf32>
    %c0_36 = arith.constant 0 : index
    %c0_37 = arith.constant 0 : index
    %83 = vector.load %arg12[%c0_36, %c0_37] : memref<1x128xf32, #tpu.memory_space<vmem>>, vector<1x128xf32>
    %c0_38 = arith.constant 0 : index
    %c0_39 = arith.constant 0 : index
    %84 = vector.load %arg13[%c0_38, %c0_39] : memref<1x128xf32, #tpu.memory_space<vmem>>, vector<1x128xf32>
    %cst_40 = arith.constant dense<0.000000e+00> : vector<8xf32>
    %85 = vector.multi_reduction <add>, %82, %cst_40 [1] : vector<8x128xf32> to vector<8xf32>
    %86 = vector.shape_cast %85 : vector<8xf32> to vector<8x1xf32>
    %cst_41 = arith.constant 1.280000e+02 : f32
    %87 = vector.broadcast %cst_41 : f32 to vector<8x1xf32>
    %88 = arith.divf %86, %87 : vector<8x1xf32>
    %89 = vector.broadcast %88 : vector<8x1xf32> to vector<8x128xf32>
    %90 = arith.subf %82, %89 : vector<8x128xf32>
    %91 = arith.mulf %90, %90 : vector<8x128xf32>
    %cst_42 = arith.constant dense<0.000000e+00> : vector<8xf32>
    %92 = vector.multi_reduction <add>, %91, %cst_42 [1] : vector<8x128xf32> to vector<8xf32>
    %93 = vector.shape_cast %92 : vector<8xf32> to vector<8x1xf32>
    %cst_43 = arith.constant 1.280000e+02 : f32
    %94 = vector.broadcast %cst_43 : f32 to vector<8x1xf32>
    %95 = arith.divf %93, %94 : vector<8x1xf32>
    %96 = vector.broadcast %88 : vector<8x1xf32> to vector<8x128xf32>
    %97 = arith.subf %82, %96 : vector<8x128xf32>
    %cst_44 = arith.constant 9.99999974E-6 : f32
    %98 = vector.broadcast %cst_44 : f32 to vector<8x1xf32>
    %99 = arith.addf %95, %98 : vector<8x1xf32>
    %100 = math.rsqrt %99 : vector<8x1xf32>
    %101 = vector.broadcast %100 : vector<8x1xf32> to vector<8x128xf32>
    %102 = arith.mulf %97, %101 : vector<8x128xf32>
    %103 = vector.broadcast %83 : vector<1x128xf32> to vector<8x128xf32>
    %104 = arith.mulf %102, %103 : vector<8x128xf32>
    %105 = vector.broadcast %84 : vector<1x128xf32> to vector<8x128xf32>
    %106 = arith.addf %104, %105 : vector<8x128xf32>
    %c0_45 = arith.constant 0 : index
    %c0_46 = arith.constant 0 : index
    %c0_47 = arith.constant 0 : index
    %107 = vector.load %arg14[%c0_45, %c0_46, %c0_47] : memref<1x8x128xf32, #tpu.memory_space<vmem>>, vector<1x8x128xf32>
    %108 = vector.shape_cast %107 : vector<1x8x128xf32> to vector<8x128xf32>
    %109 = vector.shape_cast %106 : vector<8x128xf32> to vector<1x8x128xf32>
    tpu.vector_store %arg14[%c0_45, %c0_46, %c0_47], %109 {strides = array<i32>} : memref<1x8x128xf32, #tpu.memory_space<vmem>>, vector<1x8x128xf32>,
    return
  }
  func.func @transform_0(%arg0: i32) -> (i32, i32, i32) {
    %c0_i32 = arith.constant 0 : i32
    %c0_i32_0 = arith.constant 0 : i32
    %c0_i32_1 = arith.constant 0 : i32
    return %arg0, %c0_i32, %c0_i32_0 : i32, i32, i32
  }
  func.func @transform_1(%arg0: i32) -> (i32, i32) {
    %c0_i32 = arith.constant 0 : i32
    %c0_i32_0 = arith.constant 0 : i32
    %c0_i32_1 = arith.constant 0 : i32
    return %c0_i32, %c0_i32_0 : i32, i32
  }
  func.func @transform_2(%arg0: i32) -> (i32, i32) {
    %c0_i32 = arith.constant 0 : i32
    %c0_i32_0 = arith.constant 0 : i32
    %c0_i32_1 = arith.constant 0 : i32
    return %c0_i32, %c0_i32_0 : i32, i32
  }
  func.func @transform_3(%arg0: i32) -> (i32, i32) {
    %c0_i32 = arith.constant 0 : i32
    %c0_i32_0 = arith.constant 0 : i32
    %c0_i32_1 = arith.constant 0 : i32
    return %c0_i32, %c0_i32_0 : i32, i32
  }
  func.func @transform_4(%arg0: i32) -> (i32, i32) {
    %c0_i32 = arith.constant 0 : i32
    %c0_i32_0 = arith.constant 0 : i32
    %c0_i32_1 = arith.constant 0 : i32
    return %c0_i32, %c0_i32_0 : i32, i32
  }
  func.func @transform_5(%arg0: i32) -> (i32, i32) {
    %c0_i32 = arith.constant 0 : i32
    %c0_i32_0 = arith.constant 0 : i32
    %c0_i32_1 = arith.constant 0 : i32
    return %c0_i32, %c0_i32_0 : i32, i32
  }
  func.func @transform_6(%arg0: i32) -> (i32, i32) {
    %c0_i32 = arith.constant 0 : i32
    %c0_i32_0 = arith.constant 0 : i32
    %c0_i32_1 = arith.constant 0 : i32
    return %c0_i32, %c0_i32_0 : i32, i32
  }
  func.func @transform_7(%arg0: i32) -> (i32, i32) {
    %c0_i32 = arith.constant 0 : i32
    %c0_i32_0 = arith.constant 0 : i32
    %c0_i32_1 = arith.constant 0 : i32
    return %c0_i32, %c0_i32_0 : i32, i32
  }
  func.func @transform_8(%arg0: i32) -> (i32, i32) {
    %c0_i32 = arith.constant 0 : i32
    %c0_i32_0 = arith.constant 0 : i32
    %c0_i32_1 = arith.constant 0 : i32
    return %c0_i32, %c0_i32_0 : i32, i32
  }
  func.func @transform_9(%arg0: i32) -> (i32, i32) {
    %c0_i32 = arith.constant 0 : i32
    %c0_i32_0 = arith.constant 0 : i32
    %c0_i32_1 = arith.constant 0 : i32
    return %c0_i32, %c0_i32_0 : i32, i32
  }
  func.func @transform_10(%arg0: i32) -> (i32, i32) {
    %c0_i32 = arith.constant 0 : i32
    %c0_i32_0 = arith.constant 0 : i32
    %c0_i32_1 = arith.constant 0 : i32
    return %c0_i32, %c0_i32_0 : i32, i32
  }
  func.func @transform_11(%arg0: i32) -> (i32, i32) {
    %c0_i32 = arith.constant 0 : i32
    %c0_i32_0 = arith.constant 0 : i32
    %c0_i32_1 = arith.constant 0 : i32
    return %c0_i32, %c0_i32_0 : i32, i32
  }
  func.func @transform_12(%arg0: i32) -> (i32, i32) {
    %c0_i32 = arith.constant 0 : i32
    %c0_i32_0 = arith.constant 0 : i32
    %c0_i32_1 = arith.constant 0 : i32
    return %c0_i32, %c0_i32_0 : i32, i32
  }
  func.func @transform_13(%arg0: i32) -> (i32, i32, i32) {
    %c0_i32 = arith.constant 0 : i32
    %c0_i32_0 = arith.constant 0 : i32
    %c0_i32_1 = arith.constant 0 : i32
    return %arg0, %c0_i32, %c0_i32_0 : i32, i32, i32
  }
}

module attributes {stable_mosaic.version = 11 : i64} {
  func.func @layer_kernel(%arg0: i32, %arg1: memref<1x8x128xf32, #tpu.memory_space<vmem>>, %arg2: memref<128x384xbf16, #tpu.memory_space<vmem>>, %arg3: memref<1x384xf32, #tpu.memory_space<vmem>>, %arg4: memref<128x128xbf16, #tpu.memory_space<vmem>>, %arg5: memref<1x128xf32, #tpu.memory_space<vmem>>, %arg6: memref<1x128xf32, #tpu.memory_space<vmem>>, %arg7: memref<1x128xf32, #tpu.memory_space<vmem>>, %arg8: memref<128x2048xbf16, #tpu.memory_space<vmem>>, %arg9: memref<1x2048xf32, #tpu.memory_space<vmem>>, %arg10: memref<2048x128xbf16, #tpu.memory_space<vmem>>, %arg11: memref<1x128xf32, #tpu.memory_space<vmem>>, %arg12: memref<1x128xf32, #tpu.memory_space<vmem>>, %arg13: memref<1x128xf32, #tpu.memory_space<vmem>>, %arg14: memref<1x8x128xf32, #tpu.memory_space<vmem>>) attributes {dimension_semantics = [#tpu.dimension_semantics<parallel>], iteration_bounds = array<i64: 2>, scalar_prefetch = 0 : i64, scratch_operands = 0 : i64, tpu.core_type = #tpu.core_type<tc>, window_params = [{transform_indices = @transform_0, window_bounds = array<i64: 1, 8, 128>}, {pipeline_mode = #tpu.pipeline_mode<synchronous>, transform_indices = @transform_1, window_bounds = array<i64: 128, 384>}, {pipeline_mode = #tpu.pipeline_mode<synchronous>, transform_indices = @transform_2, window_bounds = array<i64: 1, 384>}, {pipeline_mode = #tpu.pipeline_mode<synchronous>, transform_indices = @transform_3, window_bounds = array<i64: 128, 128>}, {pipeline_mode = #tpu.pipeline_mode<synchronous>, transform_indices = @transform_4, window_bounds = array<i64: 1, 128>}, {pipeline_mode = #tpu.pipeline_mode<synchronous>, transform_indices = @transform_5, window_bounds = array<i64: 1, 128>}, {pipeline_mode = #tpu.pipeline_mode<synchronous>, transform_indices = @transform_6, window_bounds = array<i64: 1, 128>}, {pipeline_mode = #tpu.pipeline_mode<synchronous>, transform_indices = @transform_7, window_bounds = array<i64: 128, 2048>}, {pipeline_mode = #tpu.pipeline_mode<synchronous>, transform_indices = @transform_8, window_bounds = array<i64: 1, 2048>}, {pipeline_mode = #tpu.pipeline_mode<synchronous>, transform_indices = @transform_9, window_bounds = array<i64: 2048, 128>}, {pipeline_mode = #tpu.pipeline_mode<synchronous>, transform_indices = @transform_10, window_bounds = array<i64: 1, 128>}, {pipeline_mode = #tpu.pipeline_mode<synchronous>, transform_indices = @transform_11, window_bounds = array<i64: 1, 128>}, {pipeline_mode = #tpu.pipeline_mode<synchronous>, transform_indices = @transform_12, window_bounds = array<i64: 1, 128>}, {transform_indices = @transform_13, window_bounds = array<i64: 1, 8, 128>}]} {
    %c0 = arith.constant 0 : index
    %c0_0 = arith.constant 0 : index
    %c0_1 = arith.constant 0 : index
    %0 = vector.load %arg1[%c0, %c0_0, %c0_1] : memref<1x8x128xf32, #tpu.memory_space<vmem>>, vector<1x8x128xf32>
    %1 = vector.shape_cast %0 : vector<1x8x128xf32> to vector<8x128xf32>
    %2 = arith.truncf %1 : vector<8x128xf32> to vector<8x128xbf16>
    %c0_2 = arith.constant 0 : index
    %c0_3 = arith.constant 0 : index
    %3 = vector.load %arg2[%c0_2, %c0_3] : memref<128x384xbf16, #tpu.memory_space<vmem>>, vector<128x384xbf16>
    %cst = arith.constant dense<0.000000e+00> : vector<8x384xf32>
    %4 = tpu.matmul %2, %3, %cst {dimension_numbers = #tpu.dot_dimension_numbers<[1], [0], [0], [1], [0, 0, 1, 1], [], []>} : vector<8x128xbf16>, vector<128x384xbf16>, vector<8x384xf32> -> vector<8x384xf32>
    %c0_4 = arith.constant 0 : index
    %c0_5 = arith.constant 0 : index
    %5 = vector.load %arg3[%c0_4, %c0_5] : memref<1x384xf32, #tpu.memory_space<vmem>>, vector<1x384xf32>
    %6 = vector.broadcast %5 : vector<1x384xf32> to vector<8x384xf32>
    %7 = arith.addf %4, %6 : vector<8x384xf32>
    %8 = vector.extract_strided_slice %7 {offsets = [0, 0], sizes = [8, 128], strides = [1, 1]} : vector<8x384xf32> to vector<8x128xf32>
    %cst_6 = arith.constant 0.176776692 : f32
    %9 = vector.broadcast %cst_6 : f32 to vector<8x128xf32>
    %10 = arith.mulf %8, %9 : vector<8x128xf32>
    %11 = vector.shape_cast %10 : vector<8x128xf32> to vector<8x4x32xf32>
    %12 = vector.extract_strided_slice %7 {offsets = [0, 128], sizes = [8, 128], strides = [1, 1]} : vector<8x384xf32> to vector<8x128xf32>
    %13 = vector.shape_cast %12 : vector<8x128xf32> to vector<8x4x32xf32>
    %14 = vector.extract_strided_slice %7 {offsets = [0, 256], sizes = [8, 128], strides = [1, 1]} : vector<8x384xf32> to vector<8x128xf32>
    %15 = vector.shape_cast %14 : vector<8x128xf32> to vector<8x4x32xf32>
    %16 = tpu.transpose %11, [1, 0, 2] : vector<8x4x32xf32> -> vector<4x8x32xf32>
    %17 = arith.truncf %16 : vector<4x8x32xf32> to vector<4x8x32xbf16>
    %18 = tpu.transpose %13, [1, 0, 2] : vector<8x4x32xf32> -> vector<4x8x32xf32>
    %19 = arith.truncf %18 : vector<4x8x32xf32> to vector<4x8x32xbf16>
    %20 = tpu.transpose %15, [1, 0, 2] : vector<8x4x32xf32> -> vector<4x8x32xf32>
    %21 = arith.truncf %20 : vector<4x8x32xf32> to vector<4x8x32xbf16>
    "tpu.trace_start"() <{level = 10 : i32, message = "hnd,hmd->hnm"}> : () -> ()
    %cst_7 = arith.constant dense<0.000000e+00> : vector<4x8x8xf32>
    %22 = tpu.matmul %17, %19, %cst_7 {dimension_numbers = #tpu.dot_dimension_numbers<[2], [2], [1], [1], [0, 0, 0, 1, 1, 1], [0], [0]>} : vector<4x8x32xbf16>, vector<4x8x32xbf16>, vector<4x8x8xf32> -> vector<4x8x8xf32>
    "tpu.trace_stop"() : () -> ()
    %cst_8 = arith.constant dense<0xFF800000> : vector<4x8xf32>
    %23 = vector.multi_reduction <maximumf>, %22, %cst_8 [2] : vector<4x8x8xf32> to vector<4x8xf32>
    %24 = vector.shape_cast %23 : vector<4x8xf32> to vector<4x8x1xf32>
    %25 = vector.broadcast %24 : vector<4x8x1xf32> to vector<4x8x8xf32>
    %26 = arith.subf %22, %25 : vector<4x8x8xf32>
    %27 = math.exp %26 : vector<4x8x8xf32>
    %cst_9 = arith.constant dense<0.000000e+00> : vector<4x8xf32>
    %28 = vector.multi_reduction <add>, %27, %cst_9 [2] : vector<4x8x8xf32> to vector<4x8xf32>
    %29 = vector.shape_cast %28 : vector<4x8xf32> to vector<4x8x1xf32>
    %30 = tpu.reciprocal %29 {approx = true} : vector<4x8x1xf32> -> vector<4x8x1xf32>
    %31 = vector.broadcast %30 : vector<4x8x1xf32> to vector<4x8x8xf32>
    %32 = arith.mulf %27, %31 : vector<4x8x8xf32>
    %33 = arith.truncf %32 : vector<4x8x8xf32> to vector<4x8x8xbf16>
    "tpu.trace_start"() <{level = 10 : i32, message = "hnm,hmd->hnd"}> : () -> ()
    %cst_10 = arith.constant dense<0.000000e+00> : vector<4x8x32xf32>
    %34 = tpu.matmul %33, %21, %cst_10 {dimension_numbers = #tpu.dot_dimension_numbers<[2], [1], [1], [2], [0, 0, 0, 1, 1, 2], [0], [0]>} : vector<4x8x8xbf16>, vector<4x8x32xbf16>, vector<4x8x32xf32> -> vector<4x8x32xf32>
    "tpu.trace_stop"() : () -> ()
    %35 = tpu.transpose %34, [1, 0, 2] : vector<4x8x32xf32> -> vector<8x4x32xf32>
    %36 = vector.shape_cast %35 : vector<8x4x32xf32> to vector<8x128xf32>
    %37 = arith.truncf %36 : vector<8x128xf32> to vector<8x128xbf16>
    %c0_11 = arith.constant 0 : index
    %c0_12 = arith.constant 0 : index
    %38 = vector.load %arg4[%c0_11, %c0_12] : memref<128x128xbf16, #tpu.memory_space<vmem>>, vector<128x128xbf16>
    %cst_13 = arith.constant dense<0.000000e+00> : vector<8x128xf32>
    %39 = tpu.matmul %37, %38, %cst_13 {dimension_numbers = #tpu.dot_dimension_numbers<[1], [0], [0], [1], [0, 0, 1, 1], [], []>} : vector<8x128xbf16>, vector<128x128xbf16>, vector<8x128xf32> -> vector<8x128xf32>
    %c0_14 = arith.constant 0 : index
    %c0_15 = arith.constant 0 : index
    %40 = vector.load %arg5[%c0_14, %c0_15] : memref<1x128xf32, #tpu.memory_space<vmem>>, vector<1x128xf32>
    %41 = vector.broadcast %40 : vector<1x128xf32> to vector<8x128xf32>
    %42 = arith.addf %39, %41 : vector<8x128xf32>
    %43 = arith.addf %1, %42 : vector<8x128xf32>
    %c0_16 = arith.constant 0 : index
    %c0_17 = arith.constant 0 : index
    %44 = vector.load %arg6[%c0_16, %c0_17] : memref<1x128xf32, #tpu.memory_space<vmem>>, vector<1x128xf32>
    %c0_18 = arith.constant 0 : index
    %c0_19 = arith.constant 0 : index
    %45 = vector.load %arg7[%c0_18, %c0_19] : memref<1x128xf32, #tpu.memory_space<vmem>>, vector<1x128xf32>
    %cst_20 = arith.constant dense<0.000000e+00> : vector<8xf32>
    %46 = vector.multi_reduction <add>, %43, %cst_20 [1] : vector<8x128xf32> to vector<8xf32>
    %47 = vector.shape_cast %46 : vector<8xf32> to vector<8x1xf32>
    %cst_21 = arith.constant 1.280000e+02 : f32
    %48 = vector.broadcast %cst_21 : f32 to vector<8x1xf32>
    %49 = arith.divf %47, %48 : vector<8x1xf32>
    %50 = vector.broadcast %49 : vector<8x1xf32> to vector<8x128xf32>
    %51 = arith.subf %43, %50 : vector<8x128xf32>
    %52 = arith.mulf %51, %51 : vector<8x128xf32>
    %cst_22 = arith.constant dense<0.000000e+00> : vector<8xf32>
    %53 = vector.multi_reduction <add>, %52, %cst_22 [1] : vector<8x128xf32> to vector<8xf32>
    %54 = vector.shape_cast %53 : vector<8xf32> to vector<8x1xf32>
    %cst_23 = arith.constant 1.280000e+02 : f32
    %55 = vector.broadcast %cst_23 : f32 to vector<8x1xf32>
    %56 = arith.divf %54, %55 : vector<8x1xf32>
    %57 = vector.broadcast %49 : vector<8x1xf32> to vector<8x128xf32>
    %58 = arith.subf %43, %57 : vector<8x128xf32>
    %cst_24 = arith.constant 9.99999974E-6 : f32
    %59 = vector.broadcast %cst_24 : f32 to vector<8x1xf32>
    %60 = arith.addf %56, %59 : vector<8x1xf32>
    %61 = math.rsqrt %60 : vector<8x1xf32>
    %62 = vector.broadcast %61 : vector<8x1xf32> to vector<8x128xf32>
    %63 = arith.mulf %58, %62 : vector<8x128xf32>
    %64 = vector.broadcast %44 : vector<1x128xf32> to vector<8x128xf32>
    %65 = arith.mulf %63, %64 : vector<8x128xf32>
    %66 = vector.broadcast %45 : vector<1x128xf32> to vector<8x128xf32>
    %67 = arith.addf %65, %66 : vector<8x128xf32>
    %68 = arith.truncf %67 : vector<8x128xf32> to vector<8x128xbf16>
    %c0_25 = arith.constant 0 : index
    %c0_26 = arith.constant 0 : index
    %69 = vector.load %arg8[%c0_25, %c0_26] : memref<128x2048xbf16, #tpu.memory_space<vmem>>, vector<128x2048xbf16>
    %cst_27 = arith.constant dense<0.000000e+00> : vector<8x2048xf32>
    %70 = tpu.matmul %68, %69, %cst_27 {dimension_numbers = #tpu.dot_dimension_numbers<[1], [0], [0], [1], [0, 0, 1, 1], [], []>} : vector<8x128xbf16>, vector<128x2048xbf16>, vector<8x2048xf32> -> vector<8x2048xf32>
    %c0_28 = arith.constant 0 : index
    %c0_29 = arith.constant 0 : index
    %71 = vector.load %arg9[%c0_28, %c0_29] : memref<1x2048xf32, #tpu.memory_space<vmem>>, vector<1x2048xf32>
    %72 = vector.broadcast %71 : vector<1x2048xf32> to vector<8x2048xf32>
    %73 = arith.addf %70, %72 : vector<8x2048xf32>
    %cst_30 = arith.constant 0.000000e+00 : f32
    %74 = vector.broadcast %cst_30 : f32 to vector<8x2048xf32>
    %75 = arith.maximumf %73, %74 : vector<8x2048xf32>
    %76 = arith.truncf %75 : vector<8x2048xf32> to vector<8x2048xbf16>
    %c0_31 = arith.constant 0 : index
    %c0_32 = arith.constant 0 : index
    %77 = vector.load %arg10[%c0_31, %c0_32] : memref<2048x128xbf16, #tpu.memory_space<vmem>>, vector<2048x128xbf16>
    %cst_33 = arith.constant dense<0.000000e+00> : vector<8x128xf32>
    %78 = tpu.matmul %76, %77, %cst_33 {dimension_numbers = #tpu.dot_dimension_numbers<[1], [0], [0], [1], [0, 0, 1, 1], [], []>} : vector<8x2048xbf16>, vector<2048x128xbf16>, vector<8x128xf32> -> vector<8x128xf32>
    %c0_34 = arith.constant 0 : index
    %c0_35 = arith.constant 0 : index
    %79 = vector.load %arg11[%c0_34, %c0_35] : memref<1x128xf32, #tpu.memory_space<vmem>>, vector<1x128xf32>
    %80 = vector.broadcast %79 : vector<1x128xf32> to vector<8x128xf32>
    %81 = arith.addf %78, %80 : vector<8x128xf32>
    %82 = arith.addf %67, %81 : vector<8x128xf32>
    %c0_36 = arith.constant 0 : index
    %c0_37 = arith.constant 0 : index
    %83 = vector.load %arg12[%c0_36, %c0_37] : memref<1x128xf32, #tpu.memory_space<vmem>>, vector<1x128xf32>
    %c0_38 = arith.constant 0 : index
    %c0_39 = arith.constant 0 : index
    %84 = vector.load %arg13[%c0_38, %c0_39] : memref<1x128xf32, #tpu.memory_space<vmem>>, vector<1x128xf32>
    %cst_40 = arith.constant dense<0.000000e+00> : vector<8xf32>
    %85 = vector.multi_reduction <add>, %82, %cst_40 [1] : vector<8x128xf32> to vector<8xf32>
    %86 = vector.shape_cast %85 : vector<8xf32> to vector<8x1xf32>
    %cst_41 = arith.constant 1.280000e+02 : f32
    %87 = vector.broadcast %cst_41 : f32 to vector<8x1xf32>
    %88 = arith.divf %86, %87 : vector<8x1xf32>
    %89 = vector.broadcast %88 : vector<8x1xf32> to vector<8x128xf32>
    %90 = arith.subf %82, %89 : vector<8x128xf32>
    %91 = arith.mulf %90, %90 : vector<8x128xf32>
    %cst_42 = arith.constant dense<0.000000e+00> : vector<8xf32>
    %92 = vector.multi_reduction <add>, %91, %cst_42 [1] : vector<8x128xf32> to vector<8xf32>
    %93 = vector.shape_cast %92 : vector<8xf32> to vector<8x1xf32>
    %cst_43 = arith.constant 1.280000e+02 : f32
    %94 = vector.broadcast %cst_43 : f32 to vector<8x1xf32>
    %95 = arith.divf %93, %94 : vector<8x1xf32>
    %96 = vector.broadcast %88 : vector<8x1xf32> to vector<8x128xf32>
    %97 = arith.subf %82, %96 : vector<8x128xf32>
    %cst_44 = arith.constant 9.99999974E-6 : f32
    %98 = vector.broadcast %cst_44 : f32 to vector<8x1xf32>
    %99 = arith.addf %95, %98 : vector<8x1xf32>
    %100 = math.rsqrt %99 : vector<8x1xf32>
    %101 = vector.broadcast %100 : vector<8x1xf32> to vector<8x128xf32>
    %102 = arith.mulf %97, %101 : vector<8x128xf32>
    %103 = vector.broadcast %83 : vector<1x128xf32> to vector<8x128xf32>
    %104 = arith.mulf %102, %103 : vector<8x128xf32>
    %105 = vector.broadcast %84 : vector<1x128xf32> to vector<8x128xf32>
    %106 = arith.addf %104, %105 : vector<8x128xf32>
    %c0_45 = arith.constant 0 : index
    %c0_46 = arith.constant 0 : index
    %c0_47 = arith.constant 0 : index
    %107 = vector.load %arg14[%c0_45, %c0_46, %c0_47] : memref<1x8x128xf32, #tpu.memory_space<vmem>>, vector<1x8x128xf32>
    %108 = vector.shape_cast %107 : vector<1x8x128xf32> to vector<8x128xf32>
    %109 = vector.shape_cast %106 : vector<8x128xf32> to vector<1x8x128xf32>
    tpu.vector_store %arg14[%c0_45, %c0_46, %c0_47], %109 {strides = array<i32>} : memref<1x8x128xf32, #tpu.memory_space<vmem>>, vector<1x8x128xf32>,
    return
  }
  func.func @transform_0(%arg0: i32) -> (i32, i32, i32) {
    %c0_i32 = arith.constant 0 : i32
    %c0_i32_0 = arith.constant 0 : i32
    %c0_i32_1 = arith.constant 0 : i32
    return %arg0, %c0_i32, %c0_i32_0 : i32, i32, i32
  }
  func.func @transform_1(%arg0: i32) -> (i32, i32) {
    %c0_i32 = arith.constant 0 : i32
    %c0_i32_0 = arith.constant 0 : i32
    %c0_i32_1 = arith.constant 0 : i32
    return %c0_i32, %c0_i32_0 : i32, i32
  }
  func.func @transform_2(%arg0: i32) -> (i32, i32) {
    %c0_i32 = arith.constant 0 : i32
    %c0_i32_0 = arith.constant 0 : i32
    %c0_i32_1 = arith.constant 0 : i32
    return %c0_i32, %c0_i32_0 : i32, i32
  }
  func.func @transform_3(%arg0: i32) -> (i32, i32) {
    %c0_i32 = arith.constant 0 : i32
    %c0_i32_0 = arith.constant 0 : i32
    %c0_i32_1 = arith.constant 0 : i32
    return %c0_i32, %c0_i32_0 : i32, i32
  }
  func.func @transform_4(%arg0: i32) -> (i32, i32) {
    %c0_i32 = arith.constant 0 : i32
    %c0_i32_0 = arith.constant 0 : i32
    %c0_i32_1 = arith.constant 0 : i32
    return %c0_i32, %c0_i32_0 : i32, i32
  }
  func.func @transform_5(%arg0: i32) -> (i32, i32) {
    %c0_i32 = arith.constant 0 : i32
    %c0_i32_0 = arith.constant 0 : i32
    %c0_i32_1 = arith.constant 0 : i32
    return %c0_i32, %c0_i32_0 : i32, i32
  }
  func.func @transform_6(%arg0: i32) -> (i32, i32) {
    %c0_i32 = arith.constant 0 : i32
    %c0_i32_0 = arith.constant 0 : i32
    %c0_i32_1 = arith.constant 0 : i32
    return %c0_i32, %c0_i32_0 : i32, i32
  }
  func.func @transform_7(%arg0: i32) -> (i32, i32) {
    %c0_i32 = arith.constant 0 : i32
    %c0_i32_0 = arith.constant 0 : i32
    %c0_i32_1 = arith.constant 0 : i32
    return %c0_i32, %c0_i32_0 : i32, i32
  }
  func.func @transform_8(%arg0: i32) -> (i32, i32) {
    %c0_i32 = arith.constant 0 : i32
    %c0_i32_0 = arith.constant 0 : i32
    %c0_i32_1 = arith.constant 0 : i32
    return %c0_i32, %c0_i32_0 : i32, i32
  }
  func.func @transform_9(%arg0: i32) -> (i32, i32) {
    %c0_i32 = arith.constant 0 : i32
    %c0_i32_0 = arith.constant 0 : i32
    %c0_i32_1 = arith.constant 0 : i32
    return %c0_i32, %c0_i32_0 : i32, i32
  }
  func.func @transform_10(%arg0: i32) -> (i32, i32) {
    %c0_i32 = arith.constant 0 : i32
    %c0_i32_0 = arith.constant 0 : i32
    %c0_i32_1 = arith.constant 0 : i32
    return %c0_i32, %c0_i32_0 : i32, i32
  }
  func.func @transform_11(%arg0: i32) -> (i32, i32) {
    %c0_i32 = arith.constant 0 : i32
    %c0_i32_0 = arith.constant 0 : i32
    %c0_i32_1 = arith.constant 0 : i32
    return %c0_i32, %c0_i32_0 : i32, i32
  }
  func.func @transform_12(%arg0: i32) -> (i32, i32) {
    %c0_i32 = arith.constant 0 : i32
    %c0_i32_0 = arith.constant 0 : i32
    %c0_i32_1 = arith.constant 0 : i32
    return %c0_i32, %c0_i32_0 : i32, i32
  }
  func.func @transform_13(%arg0: i32) -> (i32, i32, i32) {
    %c0_i32 = arith.constant 0 : i32
    %c0_i32_0 = arith.constant 0 : i32
    %c0_i32_1 = arith.constant 0 : i32
    return %arg0, %c0_i32, %c0_i32_0 : i32, i32, i32
  }
}

module attributes {stable_mosaic.version = 11 : i64} {
  func.func @embed_kernel(%arg0: i32, %arg1: memref<1x8x1xi32, #tpu.memory_space<vmem>>, %arg2: memref<128x128xbf16, #tpu.memory_space<vmem>>, %arg3: memref<8x128xf32, #tpu.memory_space<vmem>>, %arg4: memref<2x128xf32, #tpu.memory_space<vmem>>, %arg5: memref<2x512xf32, #tpu.memory_space<vmem>>, %arg6: memref<128x128xbf16, #tpu.memory_space<vmem>>, %arg7: memref<1x128xf32, #tpu.memory_space<vmem>>, %arg8: memref<128x128xbf16, #tpu.memory_space<vmem>>, %arg9: memref<1x128xf32, #tpu.memory_space<vmem>>, %arg10: memref<512x128xbf16, #tpu.memory_space<vmem>>, %arg11: memref<1x128xf32, #tpu.memory_space<vmem>>, %arg12: memref<1x8x128xf32, #tpu.memory_space<vmem>>) attributes {dimension_semantics = [#tpu.dimension_semantics<parallel>], iteration_bounds = array<i64: 2>, scalar_prefetch = 0 : i64, scratch_operands = 0 : i64, tpu.core_type = #tpu.core_type<tc>, window_params = [{transform_indices = @transform_0, window_bounds = array<i64: 1, 8, 1>}, {pipeline_mode = #tpu.pipeline_mode<synchronous>, transform_indices = @transform_1, window_bounds = array<i64: 128, 128>}, {pipeline_mode = #tpu.pipeline_mode<synchronous>, transform_indices = @transform_2, window_bounds = array<i64: 8, 128>}, {pipeline_mode = #tpu.pipeline_mode<synchronous>, transform_indices = @transform_3, window_bounds = array<i64: 2, 128>}, {pipeline_mode = #tpu.pipeline_mode<synchronous>, transform_indices = @transform_4, window_bounds = array<i64: 2, 512>}, {pipeline_mode = #tpu.pipeline_mode<synchronous>, transform_indices = @transform_5, window_bounds = array<i64: 128, 128>}, {pipeline_mode = #tpu.pipeline_mode<synchronous>, transform_indices = @transform_6, window_bounds = array<i64: 1, 128>}, {pipeline_mode = #tpu.pipeline_mode<synchronous>, transform_indices = @transform_7, window_bounds = array<i64: 128, 128>}, {pipeline_mode = #tpu.pipeline_mode<synchronous>, transform_indices = @transform_8, window_bounds = array<i64: 1, 128>}, {pipeline_mode = #tpu.pipeline_mode<synchronous>, transform_indices = @transform_9, window_bounds = array<i64: 512, 128>}, {pipeline_mode = #tpu.pipeline_mode<synchronous>, transform_indices = @transform_10, window_bounds = array<i64: 1, 128>}, {transform_indices = @transform_11, window_bounds = array<i64: 1, 8, 128>}]} {
    %c0 = arith.constant 0 : index
    %c0_0 = arith.constant 0 : index
    %c0_1 = arith.constant 0 : index
    %0 = vector.load %arg1[%c0, %c0_0, %c0_1] : memref<1x8x1xi32, #tpu.memory_space<vmem>>, vector<1x8x1xi32>
    %1 = vector.shape_cast %0 : vector<1x8x1xi32> to vector<8x1xi32>
    %2 = tpu.iota {dimensions = array<i32: 1>} : vector<8x128xi32>
    %3 = vector.broadcast %1 : vector<8x1xi32> to vector<8x128xi32>
    %4 = arith.cmpi eq, %3, %2 : vector<8x128xi32>
    %5 = arith.extui %4 : vector<8x128xi1> to vector<8x128xi32>
    %6 = arith.sitofp %5 : vector<8x128xi32> to vector<8x128xf32>
    %7 = arith.truncf %6 : vector<8x128xf32> to vector<8x128xbf16>
    %c0_2 = arith.constant 0 : index
    %c0_3 = arith.constant 0 : index
    %8 = vector.load %arg2[%c0_2, %c0_3] : memref<128x128xbf16, #tpu.memory_space<vmem>>, vector<128x128xbf16>
    %cst = arith.constant dense<0.000000e+00> : vector<8x128xf32>
    %9 = tpu.matmul %7, %8, %cst {dimension_numbers = #tpu.dot_dimension_numbers<[1], [0], [0], [1], [0, 0, 1, 1], [], []>} : vector<8x128xbf16>, vector<128x128xbf16>, vector<8x128xf32> -> vector<8x128xf32>
    %10 = arith.index_cast %arg0 : i32 to index
    %c0_4 = arith.constant 0 : index
    %11 = vector.load %arg4[%10, %c0_4] : memref<2x128xf32, #tpu.memory_space<vmem>>, vector<1x128xf32>
    %12 = arith.index_cast %arg0 : i32 to index
    %c0_5 = arith.constant 0 : index
    %13 = vector.load %arg5[%12, %c0_5] : memref<2x512xf32, #tpu.memory_space<vmem>>, vector<1x512xf32>
    %14 = arith.truncf %11 : vector<1x128xf32> to vector<1x128xbf16>
    %c0_6 = arith.constant 0 : index
    %c0_7 = arith.constant 0 : index
    %15 = vector.load %arg6[%c0_6, %c0_7] : memref<128x128xbf16, #tpu.memory_space<vmem>>, vector<128x128xbf16>
    %cst_8 = arith.constant dense<0.000000e+00> : vector<1x128xf32>
    %16 = tpu.matmul %14, %15, %cst_8 {dimension_numbers = #tpu.dot_dimension_numbers<[1], [0], [0], [1], [0, 0, 1, 1], [], []>} : vector<1x128xbf16>, vector<128x128xbf16>, vector<1x128xf32> -> vector<1x128xf32>
    %c0_9 = arith.constant 0 : index
    %c0_10 = arith.constant 0 : index
    %17 = vector.load %arg7[%c0_9, %c0_10] : memref<1x128xf32, #tpu.memory_space<vmem>>, vector<1x128xf32>
    %18 = arith.addf %16, %17 : vector<1x128xf32>
    %cst_11 = arith.constant 0.000000e+00 : f32
    %19 = vector.broadcast %cst_11 : f32 to vector<1x128xf32>
    %20 = arith.maximumf %18, %19 : vector<1x128xf32>
    %21 = arith.truncf %20 : vector<1x128xf32> to vector<1x128xbf16>
    %c0_12 = arith.constant 0 : index
    %c0_13 = arith.constant 0 : index
    %22 = vector.load %arg8[%c0_12, %c0_13] : memref<128x128xbf16, #tpu.memory_space<vmem>>, vector<128x128xbf16>
    %cst_14 = arith.constant dense<0.000000e+00> : vector<1x128xf32>
    %23 = tpu.matmul %21, %22, %cst_14 {dimension_numbers = #tpu.dot_dimension_numbers<[1], [0], [0], [1], [0, 0, 1, 1], [], []>} : vector<1x128xbf16>, vector<128x128xbf16>, vector<1x128xf32> -> vector<1x128xf32>
    %c0_15 = arith.constant 0 : index
    %c0_16 = arith.constant 0 : index
    %24 = vector.load %arg9[%c0_15, %c0_16] : memref<1x128xf32, #tpu.memory_space<vmem>>, vector<1x128xf32>
    %25 = arith.addf %23, %24 : vector<1x128xf32>
    %26 = arith.truncf %13 : vector<1x512xf32> to vector<1x512xbf16>
    %c0_17 = arith.constant 0 : index
    %c0_18 = arith.constant 0 : index
    %27 = vector.load %arg10[%c0_17, %c0_18] : memref<512x128xbf16, #tpu.memory_space<vmem>>, vector<512x128xbf16>
    %cst_19 = arith.constant dense<0.000000e+00> : vector<1x128xf32>
    %28 = tpu.matmul %26, %27, %cst_19 {dimension_numbers = #tpu.dot_dimension_numbers<[1], [0], [0], [1], [0, 0, 1, 1], [], []>} : vector<1x512xbf16>, vector<512x128xbf16>, vector<1x128xf32> -> vector<1x128xf32>
    %c0_20 = arith.constant 0 : index
    %c0_21 = arith.constant 0 : index
    %29 = vector.load %arg11[%c0_20, %c0_21] : memref<1x128xf32, #tpu.memory_space<vmem>>, vector<1x128xf32>
    %30 = arith.addf %28, %29 : vector<1x128xf32>
    %c0_22 = arith.constant 0 : index
    %c0_23 = arith.constant 0 : index
    %31 = vector.load %arg3[%c0_22, %c0_23] : memref<8x128xf32, #tpu.memory_space<vmem>>, vector<8x128xf32>
    %32 = arith.addf %9, %31 : vector<8x128xf32>
    %33 = arith.addf %25, %30 : vector<1x128xf32>
    %34 = vector.broadcast %33 : vector<1x128xf32> to vector<8x128xf32>
    %35 = arith.addf %32, %34 : vector<8x128xf32>
    %c0_24 = arith.constant 0 : index
    %c0_25 = arith.constant 0 : index
    %c0_26 = arith.constant 0 : index
    %36 = vector.load %arg12[%c0_24, %c0_25, %c0_26] : memref<1x8x128xf32, #tpu.memory_space<vmem>>, vector<1x8x128xf32>
    %37 = vector.shape_cast %36 : vector<1x8x128xf32> to vector<8x128xf32>
    %38 = vector.shape_cast %35 : vector<8x128xf32> to vector<1x8x128xf32>
    tpu.vector_store %arg12[%c0_24, %c0_25, %c0_26], %38 {strides = array<i32>} : memref<1x8x128xf32, #tpu.memory_space<vmem>>, vector<1x8x128xf32>,
    return
  }
  func.func @transform_0(%arg0: i32) -> (i32, i32, i32) {
    %c0_i32 = arith.constant 0 : i32
    %c0_i32_0 = arith.constant 0 : i32
    %c0_i32_1 = arith.constant 0 : i32
    return %arg0, %c0_i32, %c0_i32_0 : i32, i32, i32
  }
  func.func @transform_1(%arg0: i32) -> (i32, i32) {
    %c0_i32 = arith.constant 0 : i32
    %c0_i32_0 = arith.constant 0 : i32
    %c0_i32_1 = arith.constant 0 : i32
    return %c0_i32, %c0_i32_0 : i32, i32
  }
  func.func @transform_2(%arg0: i32) -> (i32, i32) {
    %c0_i32 = arith.constant 0 : i32
    %c0_i32_0 = arith.constant 0 : i32
    %c0_i32_1 = arith.constant 0 : i32
    return %c0_i32, %c0_i32_0 : i32, i32
  }
  func.func @transform_3(%arg0: i32) -> (i32, i32) {
    %c0_i32 = arith.constant 0 : i32
    %c0_i32_0 = arith.constant 0 : i32
    %c0_i32_1 = arith.constant 0 : i32
    return %c0_i32, %c0_i32_0 : i32, i32
  }
  func.func @transform_4(%arg0: i32) -> (i32, i32) {
    %c0_i32 = arith.constant 0 : i32
    %c0_i32_0 = arith.constant 0 : i32
    %c0_i32_1 = arith.constant 0 : i32
    return %c0_i32, %c0_i32_0 : i32, i32
  }
  func.func @transform_5(%arg0: i32) -> (i32, i32) {
    %c0_i32 = arith.constant 0 : i32
    %c0_i32_0 = arith.constant 0 : i32
    %c0_i32_1 = arith.constant 0 : i32
    return %c0_i32, %c0_i32_0 : i32, i32
  }
  func.func @transform_6(%arg0: i32) -> (i32, i32) {
    %c0_i32 = arith.constant 0 : i32
    %c0_i32_0 = arith.constant 0 : i32
    %c0_i32_1 = arith.constant 0 : i32
    return %c0_i32, %c0_i32_0 : i32, i32
  }
  func.func @transform_7(%arg0: i32) -> (i32, i32) {
    %c0_i32 = arith.constant 0 : i32
    %c0_i32_0 = arith.constant 0 : i32
    %c0_i32_1 = arith.constant 0 : i32
    return %c0_i32, %c0_i32_0 : i32, i32
  }
  func.func @transform_8(%arg0: i32) -> (i32, i32) {
    %c0_i32 = arith.constant 0 : i32
    %c0_i32_0 = arith.constant 0 : i32
    %c0_i32_1 = arith.constant 0 : i32
    return %c0_i32, %c0_i32_0 : i32, i32
  }
  func.func @transform_9(%arg0: i32) -> (i32, i32) {
    %c0_i32 = arith.constant 0 : i32
    %c0_i32_0 = arith.constant 0 : i32
    %c0_i32_1 = arith.constant 0 : i32
    return %c0_i32, %c0_i32_0 : i32, i32
  }
  func.func @transform_10(%arg0: i32) -> (i32, i32) {
    %c0_i32 = arith.constant 0 : i32
    %c0_i32_0 = arith.constant 0 : i32
    %c0_i32_1 = arith.constant 0 : i32
    return %c0_i32, %c0_i32_0 : i32, i32
  }
  func.func @transform_11(%arg0: i32) -> (i32, i32, i32) {
    %c0_i32 = arith.constant 0 : i32
    %c0_i32_0 = arith.constant 0 : i32
    %c0_i32_1 = arith.constant 0 : i32
    return %arg0, %c0_i32, %c0_i32_0 : i32, i32, i32
  }
}

module attributes {stable_mosaic.version = 11 : i64} {
  func.func @out_proj_kernel(%arg0: i32, %arg1: i32, %arg2: memref<16x128xf32, #tpu.memory_space<vmem>>, %arg3: memref<128x128xbf16, #tpu.memory_space<vmem>>, %arg4: memref<1x128xf32, #tpu.memory_space<vmem>>, %arg5: memref<16x128xf32, #tpu.memory_space<vmem>>) attributes {dimension_semantics = [#tpu.dimension_semantics<parallel>, #tpu.dimension_semantics<parallel>], iteration_bounds = array<i64: 1, 1>, scalar_prefetch = 0 : i64, scratch_operands = 0 : i64, tpu.core_type = #tpu.core_type<tc>, window_params = [{transform_indices = @transform_0, window_bounds = array<i64: 16, 128>}, {transform_indices = @transform_1, window_bounds = array<i64: 128, 128>}, {transform_indices = @transform_2, window_bounds = array<i64: 1, 128>}, {transform_indices = @transform_3, window_bounds = array<i64: 16, 128>}]} {
    %c0 = arith.constant 0 : index
    %c0_0 = arith.constant 0 : index
    %0 = vector.load %arg2[%c0, %c0_0] : memref<16x128xf32, #tpu.memory_space<vmem>>, vector<16x128xf32>
    %1 = arith.truncf %0 : vector<16x128xf32> to vector<16x128xbf16>
    %c0_1 = arith.constant 0 : index
    %c0_2 = arith.constant 0 : index
    %2 = vector.load %arg3[%c0_1, %c0_2] : memref<128x128xbf16, #tpu.memory_space<vmem>>, vector<128x128xbf16>
    %cst = arith.constant dense<0.000000e+00> : vector<16x128xf32>
    %3 = tpu.matmul %1, %2, %cst {dimension_numbers = #tpu.dot_dimension_numbers<[1], [0], [0], [1], [0, 0, 1, 1], [], []>} : vector<16x128xbf16>, vector<128x128xbf16>, vector<16x128xf32> -> vector<16x128xf32>
    %c0_3 = arith.constant 0 : index
    %c0_4 = arith.constant 0 : index
    %4 = vector.load %arg4[%c0_3, %c0_4] : memref<1x128xf32, #tpu.memory_space<vmem>>, vector<1x128xf32>
    %5 = vector.broadcast %4 : vector<1x128xf32> to vector<16x128xf32>
    %6 = arith.addf %3, %5 : vector<16x128xf32>
    %c0_5 = arith.constant 0 : index
    %c0_6 = arith.constant 0 : index
    %7 = vector.load %arg5[%c0_5, %c0_6] : memref<16x128xf32, #tpu.memory_space<vmem>>, vector<16x128xf32>
    tpu.vector_store %arg5[%c0_5, %c0_6], %6 {strides = array<i32>} : memref<16x128xf32, #tpu.memory_space<vmem>>, vector<16x128xf32>,
    return
  }
  func.func @transform_0(%arg0: i32, %arg1: i32) -> (i32, i32) {
    %c0_i32 = arith.constant 0 : i32
    %c0_i32_0 = arith.constant 0 : i32
    return %arg0, %c0_i32 : i32, i32
  }
  func.func @transform_1(%arg0: i32, %arg1: i32) -> (i32, i32) {
    %c0_i32 = arith.constant 0 : i32
    %c0_i32_0 = arith.constant 0 : i32
    return %c0_i32, %arg1 : i32, i32
  }
  func.func @transform_2(%arg0: i32, %arg1: i32) -> (i32, i32) {
    %c0_i32 = arith.constant 0 : i32
    %c0_i32_0 = arith.constant 0 : i32
    return %c0_i32, %arg1 : i32, i32
  }
  func.func @transform_3(%arg0: i32, %arg1: i32) -> (i32, i32) {
    %c0_i32 = arith.constant 0 : i32
    return %arg0, %arg1 : i32, i32
  }
}

</mosaic_0001>

<bundles_post_ra>
// kernel: diffusion_transformer_forward.7
= control target key start
LH: loop header
LB: loop body
LE: loop exit
PB: predicated region body
PF: predicated region fallthrough
CT: control target
= control target key end

     0   :  { %8 = vsyncpa [#allocation3], 0  ;;  %s277_s0 = inlined_call_operand.vmem [shape: f32[16,128], index: 0, kind: input, shape index: {}]   ;;  %s278_s1 = inlined_call_operand.hbm [shape: bf16[128,128], index: 1, kind: input, shape index: {}]   ;;  %s279_s2 = inlined_call_operand.vmem [shape: f32[1,128], index: 2, kind: input, shape index: {}]   ;;  %s280_s3 = inlined_call_operand.hbm [shape: f32[16,128], index: 3, kind: output, shape index: {}]  }
   0x1   :  { %9 = vsyncpa [#allocation4], 0  ;;  %s16_s14 = sshll.u32 %s278_s1, 4  ;;  %s236_s15 = smov [#allocation2]   ;;  %s17_s14 = int_to_ptr.hbm [resolvable:$true] %s16_s14 }
   0x2   :  { %s18_s16 = sshll.u32 %s236_s15, 4  ;;  %s237_s17 = smov 64   ;;  %s19_s16 = int_to_ptr.vmem [resolvable:$true] %s18_s16 }
   0x3   :  { %s238_s18 = smov 4  }
   0x4   :  { %24 = dma.hbm_to_vmem [thread:$0]  %s17_s14, 1024, %s19_s16, [#allocation3], %s237_s17, %s237_s17, %s238_s18  }
   0x5   :  { %232 = dma.done.wait [#allocation3], 1024  }
   0x6   :  { %233 = vsyncadd [#allocation3], 4294966272  ;;  %v176_v0 = vld [vmem:[#allocation2 + $0x38] sm:$0xff]  ;;  %v175_v1 = vld [vmem:[#allocation2 + $0x30] sm:$0xff]  ;;  %s239_s24 = smov [#allocation5]   ;;  %s124_s28 = sshll.u32 %s280_s3, 4  ;;  %s125_s28 = int_to_ptr.hbm [resolvable:$true] %s124_s28 }
   0x7   :  { %102 = vmatpush.bf16.msra.mxu0 %v176_v0  ;;  %v174_v2 = vld [vmem:[#allocation2 + $0x28] sm:$0xff]  ;;  %v173_v3 = vld [vmem:[#allocation2 + $0x20] sm:$0xff]  ;;  %v172_v4 = vld [vmem:[#allocation2 + $0x18] sm:$0xff]  ;;  %s122_s25 = sshll.u32 %s239_s24, 4  ;;  %s241_s29 = smov 8   ;;  %s123_s25 = int_to_ptr.vmem [resolvable:$true] %s122_s25 }
   0x8   :  { %v171_v5 = vld [vmem:[#allocation2 + $0x10] sm:$0xff]  ;;  %v170_v6 = vld [vmem:[#allocation2 + $0x8] sm:$0xff]  ;;  %v169_v7 = vld [vmem:[#allocation2] sm:$0xff] }
   0x9   :  { %v31_v8 = vld [vmem:[%s277_s0] sm:$0xff]  ;;  %v32_v9 = vld [vmem:[%s277_s0 + $0x8] sm:$0xff]  ;;  %s240_s0 = smov 128  }
   0xa   :  { %v33_v10 = vpack.c.bf16 %v32_v9, %v31_v8  ;;  %v183_v11 = vld [vmem:[%s279_s2] ss:$0 sm:$0xff] }
   0xb   :  { %103 = vmatpush.bf16.msra.mxu0 %v175_v1 }
   0xf   :  { %104 = vmatpush.bf16.msra.mxu0 %v174_v2 }
  0x13   :  { %105 = vmatpush.bf16.msra.mxu0 %v173_v3 }
  0x17   :  { %106 = vmatpush.bf16.msra.mxu0 %v172_v4 }
  0x1b   :  { %107 = vmatpush.bf16.msra.mxu0 %v171_v5 }
  0x1f   :  { %108 = vmatpush.bf16.msra.mxu0 %v170_v6 }
  0x23   :  { %109 = vmatpush.bf16.msra.mxu0 %v169_v7 }
  0x26   :  { %110 = vmatmul.bf16.vlgmr.msra.gmra.mxu0 %v33_v10 }
  0xa3   :  { %v111_v12 = vpop.f32.mrf.mxu0 }
  0xa4   :  { %v112_v13 = vadd.f32 %v183_v11, %v111_v12 }
  0xa6   :  { %116 = vst [vmem:[#allocation5] sm:$0xff] %v112_v13 }
  0xab   :  { %v113_v14 = vpop.f32.mrf.mxu0 }
  0xac   :  { %v114_v15 = vadd.f32 %v183_v11, %v113_v14 }
  0xae   :  { %117 = vst [vmem:[#allocation5 + $0x8] sm:$0xff] %v114_v15 }
  0xaf   :  { %130 = dma.vmem_to_hbm [thread:$0]  %s123_s25, 256, %s125_s28, [#allocation4], %s240_s0, %s240_s0, %s241_s29  }
  0xb0   :  { %234 = dma.done.wait [#allocation4], 256  }
  0xb1   :  { %235 = vsyncadd [#allocation4], 4294967040 }
  0xb2   :  { %135 = vsyncpa [#allocation3], 1 }
  0xb3   :  { %136 = vsyncpa [#allocation4], 1 }

// kernel: diffusion_transformer_forward.4
= control target key start
LH: loop header
LB: loop body
LE: loop exit
PB: predicated region body
PF: predicated region fallthrough
CT: control target
= control target key end

     0   :  { %16 = vsyncpa [#allocation3], 0  ;;  %s1729_s0 = inlined_call_operand.vmem [shape: s32[2,8,1], index: 0, kind: input, shape index: {}]   ;;  %s1730_s1 = inlined_call_operand.vmem [shape: bf16[128,128], index: 1, kind: input, shape index: {}]   ;;  %s1731_s2 = inlined_call_operand.vmem [shape: f32[8,128], index: 2, kind: input, shape index: {}]   ;;  %s1732_s3 = inlined_call_operand.vmem [shape: f32[2,128], index: 3, kind: input, shape index: {}]   ;;  %s1733_s4 = inlined_call_operand.vmem [shape: f32[2,512], index: 4, kind: input, shape index: {}]   ;;  %s1734_s5 = inlined_call_operand.hbm [shape: bf16[128,128], index: 5, kind: input, shape index: {}]   ;;  %s1735_s6 = inlined_call_operand.vmem [shape: f32[1,128], index: 6, kind: input, shape index: {}]   ;;  %s1736_s7 = inlined_call_operand.hbm [shape: bf16[128,128], index: 7, kind: input, shape index: {}]   ;;  %s1737_s8 = inlined_call_operand.vmem [shape: f32[1,128], index: 8, kind: input, shape index: {}]   ;;  %s1738_s9 = inlined_call_operand.hbm [shape: bf16[512,128], index: 9, kind: input, shape index: {}]   ;;  %s1739_s10 = inlined_call_operand.vmem [shape: f32[1,128], index: 10, kind: input, shape index: {}]   ;;  %s1740_s11 = inlined_call_operand.vmem [shape: f32[2,8,128], index: 11, kind: output, shape index: {}]  }
   0x1   :  { %17 = vsyncpa [#allocation5], 0  ;;  %s1622_s17 = smov 0  }
   0x2 LB: > { %s1628_s18 = sadd.s32 4294967295, %s1553_s17   ;;  %p1106_p0 = scmp.ge.s32.totalorder %s1553_s17, 1  ;;  %s1553_s17 = sphi %s1622_s17, %s23_s17  }
   0x3   : > { %p290_p1 = scmp.lt.s32.totalorder %s1553_s17, 3  ;;  %p1427_p2 = scmp.eq.s32.totalorder %s1628_s18, 0 }
   0x4   : > { %s330_s21 = sshll.u32 %s1736_s7, 4  ;;  %s313_s25 = sshll.u32 %s1734_s5, 4  ;;  %s331_s21 = int_to_ptr.hbm [resolvable:$true] %s330_s21  ;;  %s314_s25 = int_to_ptr.hbm [resolvable:$true] %s313_s25 }
   0x5   : > { %p1636_p3 = pnand %p1106_p0, %p290_p1  ;;  %s1555_s26 = smov [#allocation4]  }
   0x6   : > { %s332_s27 = sshll.u32 %s1555_s26, 4  ;;  %s1556_s28 = smov [#allocation2]   ;;  %s333_s27 = int_to_ptr.vmem [resolvable:$true] %s332_s27 }
   0x7   : > { %p1417_p4 = pneg %p1636_p3  ;;  %s315_s29 = sshll.u32 %s1556_s28, 4  ;;  %s316_s29 = int_to_ptr.vmem [resolvable:$true] %s315_s29 }
   0x8   : > { %s347_s13 = sshll.u32 %s1738_s9, 4  ;;  %s1557_s14 = smov 64   ;;  %s348_s13 = int_to_ptr.hbm [resolvable:$true] %s347_s13 }
   0x9   : > { %p1418_p5 = pnand %p1427_p2, %p1417_p4  ;;  %s1558_s15 = smov 4  }
   0xa   : > { %s1559_s16 = smov [#allocation6]   ;;  %375 = sbr.rel (%p1636_p3) target bundleno = 333 (0x14d), region = 64 }
   0xb   : > { %1423 = dma.hbm_to_vmem [thread:$0]  (!%p1418_p5), %s331_s21, 1024, %s333_s27, [#allocation5], %s1557_s14, %s1557_s14, %s1558_s15  }
   0xc   : > { %1420 = dma.hbm_to_vmem [thread:$0]  (!%p1418_p5), %s314_s25, 1024, %s316_s29, [#allocation3], %s1557_s14, %s1557_s14, %s1558_s15  }
   0xd   : > { %s349_s19 = sshll.u32 %s1559_s16, 4  ;;  %s350_s19 = int_to_ptr.vmem [resolvable:$true] %s349_s19 }
   0xe   : > { %1426 = dma.hbm_to_vmem [thread:$0]  (!%p1418_p5), %s348_s13, 4096, %s350_s19, [#allocation5], %s1557_s14, %s1557_s14, %s1558_s15  }
   0xf   : > { %1544 = dma.done.wait (%p1427_p2), [#allocation3], 1024  }
  0x10   : > { %1546 = vsyncadd (%p1427_p2), [#allocation3], 4294966272 }
  0x11   : > { %1548 = dma.done.wait (%p1427_p2), [#allocation5], 5120  }
  0x12   : > { %1550 = vsyncadd (%p1427_p2), [#allocation5], 4294962176  ;;  %p424_p6 = scmp.lt.s32.totalorder %s1628_s18, 1  ;;  %v1364_v0 = vld [vmem:[#allocation2 + $0x38] sm:$0xff]  ;;  %v1363_v1 = vld [vmem:[#allocation2 + $0x30] sm:$0xff]  ;;  %v1560_v2 = vmov 0   ;;  %s458_s15 = scalar_lea.vmem %s1732_s3, %s1628_s18  ;;  %v433_v59 = vlaneseq }
  0x13   : > { %535 = vmatpush.bf16.msra.mxu0 %v1364_v0  ;;  %1448 = vset.pattern.permute.xlu0 %v1560_v2  ;;  %v1380_v4 = vld [vmem:[#allocation6 + $0x38] sm:$0xff]  ;;  %v1379_v6 = vld [vmem:[#allocation6 + $0x30] sm:$0xff]  ;;  %v1362_v7 = vld [vmem:[#allocation2 + $0x28] sm:$0xff]  ;;  %s460_s25 = sshra.s32 %s1628_s18, 1  ;;  %s463_s26 = sand.u32 1, %s1628_s18 }
  0x14   : > { %s1662_s20 = scalar_select %p424_p6, %s1628_s18, 1  ;;  %v1372_v5 = vld [vmem:[#allocation4 + $0x38] sm:$0xff]  ;;  %898 = vmatpush.bf16.msra.mxu2 %v1380_v4  ;;  %v1371_v8 = vld [vmem:[#allocation4 + $0x30] sm:$0xff]  ;;  %v1378_v11 = vld [vmem:[#allocation6 + $0x28] sm:$0xff]  ;;  %v434_v61 = vand.u32 127, %v433_v59 }
  0x15   : > { %615 = vmatpush.bf16.msra.mxu1 %v1372_v5  ;;  %v1388_v9 = vld [vmem:[#allocation6 + $0x78] sm:$0xff]  ;;  %v1387_v10 = vld [vmem:[#allocation6 + $0x70] sm:$0xff]  ;;  %v1361_v12 = vld [vmem:[#allocation2 + $0x20] sm:$0xff]  ;;  %s1356_s27 = sshll.u32 %s460_s25, 3 }
  0x16   : > { %s1115_s21 = sshll.u32 %s1662_s20, 3  ;;  %911 = vmatpush.bf16.msra.mxu3 %v1388_v9  ;;  %v1370_v13 = vld [vmem:[#allocation4 + $0x28] sm:$0xff]  ;;  %v1377_v15 = vld [vmem:[#allocation6 + $0x20] sm:$0xff]  ;;  %v1360_v16 = vld [vmem:[#allocation2 + $0x18] sm:$0xff]  ;;  %s466_s28 = sadd.s32 %s1356_s27, %s463_s26 }
  0x17   : > { %s427_s24 = scalar_lea.vmem %s1729_s0, %s1115_s21  ;;  %536 = vmatpush.bf16.msra.mxu0 %v1363_v1  ;;  %v1386_v14 = vld [vmem:[#allocation6 + $0x68] sm:$0xff]  ;;  %v1369_v17 = vld [vmem:[#allocation4 + $0x20] sm:$0xff]  ;;  %v1376_v19 = vld [vmem:[#allocation6 + $0x18] sm:$0xff]  ;;  %s467_s12 = scalar_lea.vmem %s1733_s4, %s466_s28 }
  0x18   : > { %v432_v3 = vld [vmem:[%s427_s24] sm:$0xff]  ;;  %899 = vmatpush.bf16.msra.mxu2 %v1379_v6  ;;  %v1359_v20 = vld [vmem:[#allocation2 + $0x10] sm:$0xff]  ;;  %v1368_v21 = vld [vmem:[#allocation4 + $0x18] sm:$0xff]  ;;  %s431_s29 = scalar_lea.vmem %s1740_s11, %s1115_s21 }
  0x19   : > { %436 = vperm.xlu0 %1448, %v432_v3   ;;  %616 = vmatpush.bf16.msra.mxu1 %v1371_v8  ;;  %v1385_v18 = vld [vmem:[#allocation6 + $0x60] sm:$0xff]  ;;  %v1384_v22 = vld [vmem:[#allocation6 + $0x58] sm:$0xff]  ;;  %v1375_v23 = vld [vmem:[#allocation6 + $0x10] sm:$0xff]  ;;  %v1561_v3 = vmov 1.0|1.0  }
  0x1a   : > { %912 = vmatpush.bf16.msra.mxu3 %v1387_v10  ;;  %v1358_v24 = vld [vmem:[#allocation2 + $0x8] sm:$0xff]  ;;  %v1367_v25 = vld [vmem:[#allocation4 + $0x10] sm:$0xff]  ;;  %v1679_v28 = vld [vmem:[%s467_s12] ss:$2 sm:$0xf] }
  0x1b   : > { %537 = vmatpush.bf16.msra.mxu0 %v1362_v7  ;;  %v1383_v26 = vld [vmem:[#allocation6 + $0x50] sm:$0xff]  ;;  %v1374_v27 = vld [vmem:[#allocation6 + $0x8] sm:$0xff]  ;;  %v1357_v29 = vld [vmem:[#allocation2] sm:$0xff]  ;;  %v629_v33 = vperm.slane %v1679_v28, 0  ;;  %v630_v54 = vperm.slane %v1679_v28, 1  ;;  %v631_v1 = vperm.slane %v1679_v28, 2 }
  0x1c   : > { %900 = vmatpush.bf16.msra.mxu2 %v1378_v11  ;;  %v459_v30 = vld [vmem:[%s458_s15] sm:$0x1]  ;;  %v1366_v31 = vld [vmem:[#allocation4 + $0x8] sm:$0xff]  ;;  %v1396_v32 = vld [vmem:[#allocation6 + $0xb8] sm:$0xff] }
  0x1d   : > { %617 = vmatpush.bf16.msra.mxu1 %v1370_v13  ;;  %v1382_v34 = vld [vmem:[#allocation6 + $0x48] sm:$0xff]  ;;  %v469_v35 = vpack.c.bf16 %v459_v30, %v459_v30  ;;  %v1373_v36 = vld [vmem:[#allocation6] sm:$0xff]  ;;  %v1355_v37 = vld [vmem:[%s1730_s1 + $0x38] sm:$0xff]  ;;  %v637_v41 = vpack.c.bf16 %v629_v33, %v629_v33  ;;  %v638_v56 = vpack.c.bf16 %v630_v54, %v630_v54  ;;  %v639_v4 = vpack.c.bf16 %v631_v1, %v631_v1 }
  0x1e   : > { %913 = vmatpush.bf16.msra.mxu3 %v1386_v14  ;;  %v1365_v38 = vld [vmem:[#allocation4] sm:$0xff]  ;;  %v1395_v39 = vld [vmem:[#allocation6 + $0xb0] sm:$0xff]  ;;  %v1404_v40 = vld [vmem:[#allocation6 + $0xf8] sm:$0xff]  ;;  %v632_v14 = vperm.slane %v1679_v28, 3 }
  0x1f   : > { %538 = vmatpush.bf16.msra.mxu0 %v1361_v12  ;;  %v1354_v42 = vld [vmem:[%s1730_s1 + $0x30] sm:$0xff]  ;;  %v1394_v43 = vld [vmem:[#allocation6 + $0xa8] sm:$0xff]  ;;  %v1393_v46 = vld [vmem:[#allocation6 + $0xa0] sm:$0xff] }
  0x20   : > { %901 = vmatpush.bf16.msra.mxu2 %v1377_v15  ;;  %v1403_v44 = vld [vmem:[#allocation6 + $0xf0] sm:$0xff]  ;;  %v1353_v45 = vld [vmem:[%s1730_s1 + $0x28] sm:$0xff]  ;;  %v1352_v47 = vld [vmem:[%s1730_s1 + $0x20] sm:$0xff] }
  0x21   : > { %618 = vmatpush.bf16.msra.mxu1 %v1369_v17  ;;  %v1392_v48 = vld [vmem:[#allocation6 + $0x98] sm:$0xff]  ;;  %v1350_v50 = vld [vmem:[%s1730_s1 + $0x10] sm:$0xff]  ;;  %v1402_v51 = vld [vmem:[#allocation6 + $0xe8] sm:$0xff] }
  0x22   : > { %914 = vmatpush.bf16.msra.mxu3 %v1385_v18  ;;  %v1351_v49 = vld [vmem:[%s1730_s1 + $0x18] sm:$0xff]  ;;  %v1381_v52 = vld [vmem:[#allocation6 + $0x40] sm:$0xff]  ;;  %v1391_v53 = vld [vmem:[#allocation6 + $0x90] sm:$0xff] }
  0x23   : > { %539 = vmatpush.bf16.msra.mxu0 %v1360_v16  ;;  %v1349_v55 = vld [vmem:[%s1730_s1 + $0x8] sm:$0xff]  ;;  %v1401_v57 = vld [vmem:[#allocation6 + $0xe0] sm:$0xff]  ;;  %v1400_v62 = vld [vmem:[#allocation6 + $0xd8] sm:$0xff]  ;;  %v640_v16 = vpack.c.bf16 %v632_v14, %v632_v14 }
  0x24   : > { %902 = vmatpush.bf16.msra.mxu2 %v1376_v19  ;;  %v1390_v58 = vld [vmem:[#allocation6 + $0x88] sm:$0xff]  ;;  %v1348_v60 = vld [vmem:[%s1730_s1] sm:$0xff]  ;;  %v1399_v2 = vld [vmem:[#allocation6 + $0xd0] sm:$0xff] }
  0x25   : > { %619 = vmatpush.bf16.msra.mxu1 %v1368_v21  ;;  %v1389_v0 = vld [vmem:[#allocation6 + $0x80] sm:$0xff]  ;;  %v1398_v5 = vld [vmem:[#allocation6 + $0xc8] sm:$0xff] }
  0x26   : > { %915 = vmatpush.bf16.msra.mxu3 %v1384_v22  ;;  %v1397_v6 = vld [vmem:[#allocation6 + $0xc0] sm:$0xff] }
  0x27   : > { %540 = vmatpush.bf16.msra.mxu0 %v1359_v20  ;;  %v486_v7 = vld [vmem:[%s1735_s6] sm:$0x1] }
  0x28   : > { %903 = vmatpush.bf16.msra.mxu2 %v1375_v23  ;;  %v566_v28 = vld [vmem:[%s1737_s8] sm:$0x1] }
  0x29   : > { %620 = vmatpush.bf16.msra.mxu1 %v1367_v25  ;;  %v950_v33 = vld [vmem:[%s1731_s2] sm:$0xff] }
  0x2a   : > { %916 = vmatpush.bf16.msra.mxu3 %v1383_v26 }
  0x2b   : > { %541 = vmatpush.bf16.msra.mxu0 %v1358_v24  ;;  %v705_v24 = vld [vmem:[%s1739_s10] sm:$0x1] }
  0x2c   : > { %904 = vmatpush.bf16.msra.mxu2 %v1374_v27 }
  0x2d   : > { %621 = vmatpush.bf16.msra.mxu1 %v1366_v31 }
  0x2e   : > { %917 = vmatpush.bf16.msra.mxu3 %v1382_v34 }
  0x2f   : > { %542 = vmatpush.bf16.msra.mxu0 %v1357_v29 }
  0x30   : > { %905 = vmatpush.bf16.msra.mxu2 %v1373_v36 }
  0x31   : > { %622 = vmatpush.bf16.msra.mxu1 %v1365_v38 }
  0x32   : > { %543 = vmatmul.bf16.vlgmr.msra.gmra.mxu0 %v469_v35  ;;  %918 = vmatpush.bf16.msra.mxu3 %v1381_v52 }
  0x33   : > { %924 = vmatpush.bf16.msrb.mxu0 %v1396_v32  ;;  %906 = vmatmul.bf16.vlgmr.msra.gmra.mxu2 %v637_v41 }
  0x34   : > { %999 = vmatpush.bf16.msrb.mxu2 %v1355_v37 }
  0x35   : > { %937 = vmatpush.bf16.msrb.mxu1 %v1404_v40  ;;  %919 = vmatmul.bf16.vlgmr.msra.gmra.mxu3 %v638_v56 }
  0x37   : > { %925 = vmatpush.bf16.msrb.mxu0 %v1395_v39 }
  0x38   : > { %1000 = vmatpush.bf16.msrb.mxu2 %v1354_v42 }
  0x39   : > { %938 = vmatpush.bf16.msrb.mxu1 %v1403_v44 }
  0x3b   : > { %926 = vmatpush.bf16.msrb.mxu0 %v1394_v43 }
  0x3c   : > { %1001 = vmatpush.bf16.msrb.mxu2 %v1353_v45 }
  0x3d   : > { %939 = vmatpush.bf16.msrb.mxu1 %v1402_v51 }
  0x3f   : > { %927 = vmatpush.bf16.msrb.mxu0 %v1393_v46 }
  0x40   : > { %1002 = vmatpush.bf16.msrb.mxu2 %v1352_v47 }
  0x41   : > { %940 = vmatpush.bf16.msrb.mxu1 %v1401_v57 }
  0x43   : > { %928 = vmatpush.bf16.msrb.mxu0 %v1392_v48 }
  0x44   : > { %1003 = vmatpush.bf16.msrb.mxu2 %v1351_v49 }
  0x45   : > { %941 = vmatpush.bf16.msrb.mxu1 %v1400_v62 }
  0x47   : > { %929 = vmatpush.bf16.msrb.mxu0 %v1391_v53 }
  0x48   : > { %1004 = vmatpush.bf16.msrb.mxu2 %v1350_v50 }
  0x49   : > { %942 = vmatpush.bf16.msrb.mxu1 %v1399_v2 }
  0x4b   : > { %930 = vmatpush.bf16.msrb.mxu0 %v1390_v58 }
  0x4c   : > { %1005 = vmatpush.bf16.msrb.mxu2 %v1349_v55 }
  0x4d   : > { %943 = vmatpush.bf16.msrb.mxu1 %v1398_v5 }
  0x4f   : > { %931 = vmatpush.bf16.msrb.mxu0 %v1389_v0 }
  0x50   : > { %1006 = vmatpush.bf16.msrb.mxu2 %v1348_v60 }
  0x51   : > { %944 = vmatpush.bf16.msrb.mxu1 %v1397_v6 }
  0x52   : > { %932 = vmatmul.bf16.vlgmr.msrb.gmra.mxu0 %v639_v4 }
  0x8b   : > { %v437_v63 = vpop.permute.xlu0 %436 }
  0x8c   : > { %vm438_vm0 = vcmp.eq.s32.totalorder %v437_v63, %v434_v61 }
  0x8d   : > { %vm1344_vm1 = vmpackc.low %vm438_vm0, %vm438_vm0 }
  0x8e   : > { %1345 = vmatmul.msk.bf16.vlgmr.msrb.gmra.mxu2 %vm1344_vm1, %v1561_v3 }
  0xaf   : > { %v544_v8 = vpop.f32.mrf.mxu0 }
  0xb0   : > { %v545_v9 = vadd.f32 %v544_v8, %v486_v7 }
  0xb2   : > { %v548_v10 = vmax.f32 %v545_v9, 0.0 }
  0xb4   : > { %v549_v11 = vpack.c.bf16 %v548_v10, %v548_v10 }
  0xb6   : > { %623 = vmatmul.bf16.vlgmr.msra.gmra.mxu1 %v549_v11  ;;  %v907_v13 = vpop.f32.mrf.mxu2 }
  0xb7   : > { %v546_v12 = vpop.f32.mrf.mxu0  ;;  %v908_v25 = vadd.f32 %v907_v13, %v705_v24 }
  0xb8   : > { %v920_v17 = vpop.f32.mrf.mxu3 }
  0xb9   : > { %v921_v27 = vadd.f32 %v920_v17, %v908_v25 }
  0xbe   : > { %v909_v15 = vpop.f32.mrf.mxu2 }
  0xc0   : > { %v922_v20 = vpop.f32.mrf.mxu3 }
  0xc6   : > { %945 = vmatmul.bf16.vlgmr.msrb.gmra.mxu1 %v640_v16 }
  0xcf   : > { %v933_v18 = vpop.f32.mrf.mxu0 }
  0xd0   : > { %v934_v29 = vadd.f32 %v933_v18, %v921_v27 }
  0xd7   : > { %v935_v21 = vpop.f32.mrf.mxu0 }
 0x111   : > { %v1008_v19 = vpop.f32.mrf.mxu2 }
 0x112   : > { %v1009_v35 = vadd.f32 %v1008_v19, %v950_v33 }
 0x119   : > { %v1010_v22 = vpop.f32.mrf.mxu2 }
 0x133   : > { %v624_v23 = vpop.f32.mrf.mxu1 }
 0x134   : > { %v625_v31 = vadd.f32 %v624_v23, %v566_v28 }
 0x13b   : > { %v626_v26 = vpop.f32.mrf.mxu1 }
 0x143   : > { %v946_v30 = vpop.f32.mrf.mxu1 }
 0x144   : > { %v947_v32 = vadd.f32 %v946_v30, %v934_v29 }
 0x146   : > { %v1012_v34 = vadd.f32 %v947_v32, %v625_v31 }
 0x148   : > { %v1013_v36 = vperm.slane %v1012_v34, 0 }
 0x14a   : > { %v1014_v37 = vadd.f32 %v1013_v36, %v1009_v35 }
 0x14b   : > { %v948_v38 = vpop.f32.mrf.mxu1 }
 0x14c   : > { %1015 = vst [vmem:[%s431_s29] sm:$0xff] %v1014_v37 }
 0x14d PF: > { %s23_s17 = sadd.s32 1, %s1553_s17  }
 0x14e   : > { %p20_p7 = scmp.ge.s32.totalorder %s23_s17, 4  }
 0x150   :  { %22 = sbr.rel (!%p20_p7) target bundleno = 2 (0x2), region = 109 }
 0x155   :  { %1035 = vsyncpa [#allocation3], 1 }
 0x156   :  { %1037 = vsyncpa [#allocation3 + $0x1], 1 }
 0x157   :  { %1038 = vsyncpa [#allocation5], 1 }

// kernel: diffusion_transformer_forward.5
= control target key start
LH: loop header
LB: loop body
LE: loop exit
PB: predicated region body
PF: predicated region fallthrough
CT: control target
= control target key end

     0   :  { %s6562_s0 = inlined_call_operand.vmem [shape: f32[2,8,128], index: 0, kind: input, shape index: {}]   ;;  %s6563_s1 = inlined_call_operand.vmem [shape: bf16[128,384], index: 1, kind: input, shape index: {}]   ;;  %s6564_s2 = inlined_call_operand.vmem [shape: f32[1,384], index: 2, kind: input, shape index: {}]   ;;  %s6565_s3 = inlined_call_operand.hbm [shape: bf16[128,128], index: 3, kind: input, shape index: {}]   ;;  %s6566_s4 = inlined_call_operand.vmem [shape: f32[1,128], index: 4, kind: input, shape index: {}]   ;;  %s6567_s5 = inlined_call_operand.hbm [shape: f32[1,128], index: 5, kind: input, shape index: {}]   ;;  %s6568_s6 = inlined_call_operand.hbm [shape: f32[1,128], index: 6, kind: input, shape index: {}]   ;;  %s6569_s7 = inlined_call_operand.hbm [shape: bf16[128,2048], index: 7, kind: input, shape index: {}]   ;;  %s6570_s8 = inlined_call_operand.vmem [shape: f32[1,2048], index: 8, kind: input, shape index: {}]   ;;  %s6571_s9 = inlined_call_operand.hbm [shape: bf16[2048,128], index: 9, kind: input, shape index: {}]   ;;  %s6572_s10 = inlined_call_operand.hbm [shape: f32[1,128], index: 10, kind: input, shape index: {}]   ;;  %s6573_s11 = inlined_call_operand.hbm [shape: f32[1,128], index: 11, kind: input, shape index: {}]   ;;  %s6574_s12 = inlined_call_operand.hbm [shape: f32[1,128], index: 12, kind: input, shape index: {}]   ;;  %s6575_s13 = inlined_call_operand.vmem [shape: f32[2,8,128], index: 13, kind: output, shape index: {}]  }
   0x1   :  { %6576 = sst [smem:[#allocation20_spill]] %s6567_s5 }
   0x2   :  { %6577 = sst [smem:[#allocation21_spill]] %s6569_s7 }
   0x3   :  { %18 = vsyncpa [#allocation3], 0 }
   0x4   :  { %19 = vsyncpa [#allocation5], 0 }
   0x5   :  { %20 = vsyncpa [#allocation8], 0 }
   0x6   :  { %21 = vsyncpa [#allocation11], 0 }
   0x7   :  { %22 = vsyncpa [#allocation14], 0  ;;  %s5992_s25 = smov 0  }
   0x8 LB: > { %s6578_s5 = sld [smem:[#allocation20_spill]]  ;;  %s6001_s29 = sadd.s32 4294967295, %s5903_s25   ;;  %s5903_s25 = sphi %s5992_s25, %s28_s25  }
   0x9   : > { %p4040_p0 = scmp.ge.s32.totalorder %s5903_s25, 1  ;;  %p337_p1 = scmp.lt.s32.totalorder %s5903_s25, 3 }
   0xa   : > { %p5568_p2 = scmp.eq.s32.totalorder %s6001_s29, 0  ;;  %s5905_s14 = smov [#allocation4]  }
   0xb   : > { %p6006_p3 = pnand %p4040_p0, %p337_p1  ;;  %s374_s15 = sshll.u32 %s5905_s14, 4  ;;  %s375_s15 = int_to_ptr.vmem [resolvable:$true] %s374_s15 }
   0xc   : > { %s6580_s7 = sld [smem:[#allocation21_spill]]  ;;  %s5906_s20 = smov [#allocation7]  }
   0xd   : > { %p5543_p4 = pneg %p6006_p3  ;;  %s397_s21 = sshll.u32 %s5906_s20, 4  ;;  %s398_s21 = int_to_ptr.vmem [resolvable:$true] %s397_s21 }
   0xe   : > { %s372_s28 = sshll.u32 %s6578_s5, 4  ;;  %s427_s24 = sshll.u32 %s6572_s10, 4  ;;  %s373_s28 = int_to_ptr.hbm [resolvable:$true] %s372_s28  ;;  %s428_s24 = int_to_ptr.hbm [resolvable:$true] %s427_s24 }
   0xf   : > { %p6017_p5 = pnand %p5568_p2, %p5543_p4  ;;  %s5907_s26 = smov 1024  }
  0x10   : > { %s5908_s27 = smov 64   ;;  %s5909_s14 = smov [#allocation10]  }
  0x11   : > { %5549 = dma.hbm_to_vmem [thread:$0]  (!%p6017_p5), %s373_s28, 16, %s375_s15, [#allocation5]  }
  0x12   : > { %s395_s18 = sshll.u32 %s6580_s7, 4  ;;  %s429_s16 = sshll.u32 %s5909_s14, 4  ;;  %s396_s18 = int_to_ptr.hbm [resolvable:$true] %s395_s18  ;;  %s430_s16 = int_to_ptr.vmem [resolvable:$true] %s429_s16 }
  0x13   : > { %5555 = dma.hbm_to_vmem [thread:$0]  (!%p6017_p5), %s396_s18, 16384, %s398_s21, [#allocation8], %s5907_s26, %s5907_s26, %s5908_s27  }
  0x14   : > { %s354_s20 = sshll.u32 %s6565_s3, 4  ;;  %s5910_s22 = smov [#allocation2]   ;;  %s355_s20 = int_to_ptr.hbm [resolvable:$true] %s354_s20 }
  0x15   : > { %5561 = dma.hbm_to_vmem [thread:$0]  (!%p6017_p5), %s428_s24, 16, %s430_s16, [#allocation11]  }
  0x16   : > { %s356_s28 = sshll.u32 %s5910_s22, 4  ;;  %s384_s7 = sshll.u32 %s6568_s6, 4  ;;  %s357_s28 = int_to_ptr.vmem [resolvable:$true] %s356_s28  ;;  %s385_s7 = int_to_ptr.hbm [resolvable:$true] %s384_s7 }
  0x17   : > { %s5911_s18 = smov 4   ;;  %s412_s26 = sshll.u32 %s6571_s9, 4  ;;  %s413_s26 = int_to_ptr.hbm [resolvable:$true] %s412_s26 }
  0x18   : > { %5546 = dma.hbm_to_vmem [thread:$0]  (!%p6017_p5), %s355_s20, 1024, %s357_s28, [#allocation3], %s5908_s27, %s5908_s27, %s5911_s18  }
  0x19   : > { %s5912_s14 = smov [#allocation6]   ;;  %s5913_s16 = smov [#allocation9]  }
  0x1a   : > { %s386_s24 = sshll.u32 %s5912_s14, 4  ;;  %s414_s17 = sshll.u32 %s5913_s16, 4  ;;  %s387_s24 = int_to_ptr.vmem [resolvable:$true] %s386_s24  ;;  %s415_s17 = int_to_ptr.vmem [resolvable:$true] %s414_s17 }
  0x1b   : > { %5552 = dma.hbm_to_vmem [thread:$0]  (!%p6017_p5), %s385_s7, 16, %s387_s24, [#allocation5]  }
  0x1c   : > { %s439_s23 = sshll.u32 %s6573_s11, 4  ;;  %s451_s5 = sshll.u32 %s6574_s12, 4  ;;  %s440_s23 = int_to_ptr.hbm [resolvable:$true] %s439_s23  ;;  %s452_s5 = int_to_ptr.hbm [resolvable:$true] %s451_s5 }
  0x1d   : > { %5558 = dma.hbm_to_vmem [thread:$0]  (!%p6017_p5), %s413_s26, 16384, %s415_s17, [#allocation8], %s5908_s27, %s5908_s27, %s5911_s18  }
  0x1e   : > { %s5914_s21 = smov [#allocation12]   ;;  %s5915_s7 = smov [#allocation13]  }
  0x1f   : > { %s441_s14 = sshll.u32 %s5914_s21, 4  ;;  %s453_s24 = sshll.u32 %s5915_s7, 4  ;;  %s442_s14 = int_to_ptr.vmem [resolvable:$true] %s441_s14  ;;  %s454_s24 = int_to_ptr.vmem [resolvable:$true] %s453_s24 }
  0x20   : > { %5564 = dma.hbm_to_vmem [thread:$0]  (!%p6017_p5), %s440_s23, 16, %s442_s14, [#allocation11]  }
  0x21   : > { %5567 = dma.hbm_to_vmem [thread:$0]  (!%p6017_p5), %s452_s5, 16, %s454_s24, [#allocation14]  }
  0x22   : > { %473 = sbr.rel (%p6006_p3) target bundleno = 2078 (0x81e), region = 72 }
  0x27   : > { %5882 = dma.done.wait (%p5568_p2), [#allocation3], 1024  }
  0x28   : > { %5884 = vsyncadd (%p5568_p2), [#allocation3], 4294966272 }
  0x29   : > { %5886 = dma.done.wait (%p5568_p2), [#allocation5], 32  }
  0x2a   : > { %5888 = vsyncadd (%p5568_p2), [#allocation5], 4294967264 }
  0x2b   : > { %5890 = dma.done.wait (%p5568_p2), [#allocation8], 32768  }
  0x2c   : > { %5892 = vsyncadd (%p5568_p2), [#allocation8], 4294934528 }
  0x2d   : > { %5894 = dma.done.wait (%p5568_p2), [#allocation11], 32  }
  0x2e   : > { %5896 = vsyncadd (%p5568_p2), [#allocation11], 4294967264 }
  0x2f   : > { %5898 = dma.done.wait (%p5568_p2), [#allocation14], 16  }
  0x30   : > { %5900 = vsyncadd (%p5568_p2), [#allocation14], 4294967280  ;;  %v4147_v0 = vld [vmem:[%s6563_s1 + $0xa8] sm:$0xf]  ;;  %v5245_v1 = vld [vmem:[%s6563_s1 + $0xb0] sm:$0xf0] }
  0x31   : > { %v5244_v2 = vld [vmem:[%s6563_s1 + $0xac] sm:$0xf]  ;;  %v4148_v3 = vor.u32 %v5245_v1, %v4147_v0  ;;  %v4149_v4 = vld [vmem:[%s6563_s1 + $0xb4] sm:$0xf0]  ;;  %v4135_v5 = vld [vmem:[%s6563_s1 + $0x90] sm:$0xf] }
  0x32   : > { %v5242_v6 = vld [vmem:[%s6563_s1 + $0x98] sm:$0xf0]  ;;  %v4152_v7 = vor.u32 %v5244_v2, %v4149_v4  ;;  %v5241_v8 = vld [vmem:[%s6563_s1 + $0x94] sm:$0xf]  ;;  %v4137_v9 = vld [vmem:[%s6563_s1 + $0x9c] sm:$0xf0] }
  0x33   : > { %730 = vmatpush.bf16.msra.mxu0 %v4148_v3  ;;  %v4136_v10 = vor.u32 %v5242_v6, %v4135_v5  ;;  %v4140_v11 = vor.u32 %v5241_v8, %v4137_v9  ;;  %v4123_v12 = vld [vmem:[%s6563_s1 + $0x78] sm:$0xf]  ;;  %v5239_v13 = vld [vmem:[%s6563_s1 + $0x80] sm:$0xf0]  ;;  %v5238_v14 = vld [vmem:[%s6563_s1 + $0x7c] sm:$0xf] }
  0x34   : > { %743 = vmatpush.bf16.msra.mxu1 %v4152_v7  ;;  %v4125_v15 = vld [vmem:[%s6563_s1 + $0x84] sm:$0xf0]  ;;  %v4124_v16 = vor.u32 %v5239_v13, %v4123_v12  ;;  %v4111_v18 = vld [vmem:[%s6563_s1 + $0x60] sm:$0xf]  ;;  %v5236_v19 = vld [vmem:[%s6563_s1 + $0x68] sm:$0xf0] }
  0x35   : > { %v4128_v17 = vor.u32 %v5238_v14, %v4125_v15  ;;  %v5235_v20 = vld [vmem:[%s6563_s1 + $0x64] sm:$0xf]  ;;  %v4113_v21 = vld [vmem:[%s6563_s1 + $0x6c] sm:$0xf0]  ;;  %v4099_v22 = vld [vmem:[%s6563_s1 + $0x48] sm:$0xf]  ;;  %v4112_v23 = vor.u32 %v5236_v19, %v4111_v18 }
  0x36   : > { %p551_p6 = scmp.lt.s32.totalorder %s6001_s29, 1  ;;  %v5233_v24 = vld [vmem:[%s6563_s1 + $0x50] sm:$0xf0]  ;;  %v4116_v25 = vor.u32 %v5235_v20, %v4113_v21  ;;  %v5232_v26 = vld [vmem:[%s6563_s1 + $0x4c] sm:$0xf]  ;;  %s5916_s27 = smov 32  }
  0x37   : > { %731 = vmatpush.bf16.msra.mxu0 %v4136_v10  ;;  %v4101_v27 = vld [vmem:[%s6563_s1 + $0x54] sm:$0xf0]  ;;  %v4100_v28 = vor.u32 %v5233_v24, %v4099_v22  ;;  %v4087_v30 = vld [vmem:[%s6563_s1 + $0x30] sm:$0xf]  ;;  %v5230_v31 = vld [vmem:[%s6563_s1 + $0x38] sm:$0xf0] }
  0x38   : > { %744 = vmatpush.bf16.msra.mxu1 %v4140_v11  ;;  %v4104_v29 = vor.u32 %v5232_v26, %v4101_v27  ;;  %v5229_v32 = vld [vmem:[%s6563_s1 + $0x34] sm:$0xf]  ;;  %v4089_v33 = vld [vmem:[%s6563_s1 + $0x3c] sm:$0xf0]  ;;  %s6583_s29 = smov (!%p551_p6, %s6001_s29), 1  ;;  %v4088_v34 = vor.u32 %v5230_v31, %v4087_v30  ;;  %s5917_s18 = smov 96  }
  0x39   : > { %v4092_v35 = vor.u32 %v5229_v32, %v4089_v33  ;;  %v4075_v36 = vld [vmem:[%s6563_s1 + $0x18] sm:$0xf]  ;;  %v5227_v37 = vld [vmem:[%s6563_s1 + $0x20] sm:$0xf0]  ;;  %v5226_v38 = vld [vmem:[%s6563_s1 + $0x1c] sm:$0xf] }
  0x3a   : > { %v4077_v39 = vld [vmem:[%s6563_s1 + $0x24] sm:$0xf0]  ;;  %s4059_s16 = sshll.u32 %s6583_s29, 3  ;;  %v4076_v40 = vor.u32 %v5227_v37, %v4075_v36  ;;  %v4063_v42 = vld [vmem:[%s6563_s1] sm:$0xf]  ;;  %s5918_s26 = smov 64  }
  0x3b   : > { %732 = vmatpush.bf16.msra.mxu0 %v4124_v16  ;;  %v4080_v41 = vor.u32 %v5226_v38, %v4077_v39  ;;  %v5224_v43 = vld [vmem:[%s6563_s1 + $0x8] sm:$0xf0]  ;;  %s554_s5 = scalar_lea.vmem %s6562_s0, %s4059_s16  ;;  %v5223_v44 = vld [vmem:[%s6563_s1 + $0x4] sm:$0xf]  ;;  %v4065_v45 = vld [vmem:[%s6563_s1 + $0xc] sm:$0xf0]  ;;  %s558_s30 = scalar_lea.vmem %s6575_s13, %s4059_s16 }
  0x3c   : > { %745 = vmatpush.bf16.msra.mxu1 %v4128_v17  ;;  %v4064_v46 = vor.u32 %v5224_v43, %v4063_v42  ;;  %v6190_v47 = vld [vmem:[%s554_s5] sm:$0xff]  ;;  %v4068_v48 = vor.u32 %v5223_v44, %v4065_v45  ;;  %v5919_v61 = vmov 1983009808   ;;  %vm781_vm0 = vcmask 1047556  }
  0x3d   : > { %v6194_v49 = vpack.c.bf16 %v6190_v47, %v6190_v47  ;;  %v6201_v50 = vld [vmem:[%s6564_s2] sm:$0x7]  ;;  %v786_v62 = vunpack.c.l.s4 %v5919_v61  ;;  %v5920_v10 = vmov 1934713408   ;;  %vm1143_vm1 = vcmask 261120  }
  0x3e   : > { %v596_v51 = vperm.slane %v6201_v50, 0  ;;  %v597_v52 = vperm.slane %v6201_v50, 1  ;;  %v810_v11 = vunpack.c.l.s4 %v5920_v10  ;;  %vm1220_vm2 = vcmask 64512  }
  0x3f   : > { %733 = vmatpush.bf16.msra.mxu0 %v4112_v23  ;;  %v6212_v6 = vunpack.c.0.s8 %v786_v62  ;;  %vm1272_vm3 = vcmask 1043456   ;;  %vm1469_vm4 = vcmask 523264   ;;  %vm1471_vm5 = vcmask 785408  }
  0x40   : > { %746 = vmatpush.bf16.msra.mxu1 %v4116_v25  ;;  %v6221_v19 = vunpack.c.0.s8 %v810_v11 }
  0x43   : > { %734 = vmatpush.bf16.msra.mxu0 %v4100_v28 }
  0x44   : > { %747 = vmatpush.bf16.msra.mxu1 %v4104_v29 }
  0x47   : > { %735 = vmatpush.bf16.msra.mxu0 %v4088_v34 }
  0x48   : > { %748 = vmatpush.bf16.msra.mxu1 %v4092_v35 }
  0x4b   : > { %736 = vmatpush.bf16.msra.mxu0 %v4076_v40 }
  0x4c   : > { %749 = vmatpush.bf16.msra.mxu1 %v4080_v41 }
  0x4f   : > { %737 = vmatpush.bf16.msra.mxu0 %v4064_v46 }
  0x50   : > { %750 = vmatpush.bf16.msra.mxu1 %v4068_v48 }
  0x52   : > { %738 = vmatmul.bf16.vlgmr.msra.gmra.mxu0 %v6194_v49 }
  0x53   : > { %751 = vmatmul.bf16.vlgmr.msra.gmra.mxu1 %v6194_v49 }
  0xcf   : > { %v739_v53 = vpop.f32.mrf.mxu0 }
  0xd0   : > { %v740_v54 = vadd.f32 %v739_v53, %v596_v51  ;;  %v752_v55 = vpop.f32.mrf.mxu1 }
  0xd1   : > { %v753_v56 = vadd.f32 %v752_v55, %v597_v52 }
  0xd2   : > { %v769_v57 = vmul.f32 0.17677669, %v740_v54 }
  0xd3   : > { %844 = vrot.lane.b32.xlu1 %v753_v56, %s5916_s27  ;;  %838 = vrot.lane.b32.xlu0 %v753_v56, %s5917_s18  ;;  %v849_v17 = vrot.slane %v753_v56, 4 }
  0xd4   : > { %774 = vrot.lane.b32.xlu2 %v769_v57, %s5918_s26  ;;  %v783_v4 = vrot.slane %v769_v57, 4 }
  0xd7   : > { %v741_v58 = vpop.f32.mrf.mxu0 }
  0xd8   : > { %v754_v59 = vpop.f32.mrf.mxu1 }
  0xdb   : > { %841 = vrot.lane.b32.xlu0 %v753_v56, %s5918_s26  ;;  %771 = vrot.lane.b32.xlu1 %v769_v57, %s5917_s18 }
  0xdc   : > { %777 = vrot.lane.b32.xlu2 %v769_v57, %s5916_s27 }
 0x12e   : > { %v775_v60 = vpop.permute.xlu2 %774 }
 0x12f   : > { %v780_v63 = vrot.slane %v775_v60, 4  ;;  %v784_v12 = vsel %vm781_vm0, %v775_v60, %v783_v4 }
 0x130   : > { %v792_v18 = vperm.slane %v784_v12, %v6212_v6 }
 0x131   : > { %v782_v7 = vsel %vm781_vm0, %v780_v63, %v769_v57 }
 0x132   : > { %v788_v14 = vperm.slane %v782_v7, %v6212_v6  ;;  %v819_v37 = vrot.slane %v792_v18, 4 }
 0x134   : > { %v807_v29 = vrot.slane %v788_v14, 4 }
 0x136   : > { %v778_v8 = vpop.permute.xlu2 %777 }
 0x137   : > { %v793_v15 = vrot.slane %v778_v8, 4 }
 0x145   : > { %v845_v0 = vpop.permute.xlu1 %844  ;;  %v839_v1 = vpop.permute.xlu0 %838 }
 0x146   : > { %v859_v2 = vrot.slane %v845_v0, 4  ;;  %v861_v3 = vrot.slane %v839_v1, 4 }
 0x148   : > { %v862_v5 = vsel %vm781_vm0, %v845_v0, %v861_v3  ;;  %v860_v9 = vsel %vm781_vm0, %v859_v2, %v839_v1 }
 0x149   : > { %v870_v13 = vperm.slane %v862_v5, %v6212_v6  ;;  %v866_v16 = vperm.slane %v860_v9, %v6212_v6 }
 0x14b   : > { %v883_v26 = vrot.slane %v870_v13, 4  ;;  %v871_v30 = vrot.slane %v866_v16, 4 }
 0x14d   : > { %v842_v20 = vpop.permute.xlu0 %841  ;;  %v772_v21 = vpop.permute.xlu1 %771 }
 0x14e   : > { %v847_v22 = vrot.slane %v842_v20, 4  ;;  %v850_v23 = vsel %vm781_vm0, %v842_v20, %v849_v17  ;;  %v794_v24 = vsel %vm781_vm0, %v793_v15, %v772_v21  ;;  %v795_v25 = vrot.slane %v772_v21, 4 }
 0x14f   : > { %v858_v27 = vperm.slane %v850_v23, %v6212_v6  ;;  %v800_v28 = vperm.slane %v794_v24, %v6212_v6 }
 0x150   : > { %v848_v31 = vsel %vm781_vm0, %v847_v22, %v753_v56  ;;  %v796_v32 = vsel %vm781_vm0, %v778_v8, %v795_v25 }
 0x151   : > { %v854_v33 = vperm.slane %v848_v31, %v6212_v6  ;;  %v884_v34 = vsel %vm781_vm0, %v883_v26, %v858_v27  ;;  %v885_v35 = vrot.slane %v858_v27, 4  ;;  %v804_v36 = vperm.slane %v796_v32, %v6212_v6 }
 0x152   : > { %v890_v38 = vperm.slane %v884_v34, %v6221_v19  ;;  %v805_v39 = vrot.slane %v800_v28, 4  ;;  %v808_v40 = vsel %vm781_vm0, %v800_v28, %v807_v29 }
 0x153   : > { %v872_v41 = vsel %vm781_vm0, %v871_v30, %v854_v33  ;;  %v873_v42 = vrot.slane %v854_v33, 4  ;;  %v886_v43 = vsel %vm781_vm0, %v870_v13, %v885_v35  ;;  %v816_v44 = vperm.slane %v808_v40, %v6221_v19 }
 0x154   : > { %v878_v45 = vperm.slane %v872_v41, %v6221_v19  ;;  %v894_v46 = vperm.slane %v886_v43, %v6221_v19  ;;  %v899_v48 = vrot.slane %v890_v38, 4  ;;  %v806_v51 = vsel %vm781_vm0, %v805_v39, %v788_v14  ;;  %v4155_v41 = vld [vmem:[%s6563_s1 + $0xb0] sm:$0xf] }
 0x155   : > { %v874_v52 = vsel %vm781_vm0, %v866_v16, %v873_v42  ;;  %v812_v53 = vperm.slane %v806_v51, %v6221_v19  ;;  %v817_v54 = vrot.slane %v804_v36, 4  ;;  %v820_v55 = vsel %vm781_vm0, %v804_v36, %v819_v37  ;;  %v5246_v42 = vld [vmem:[%s6563_s1 + $0xb8] sm:$0xf0] }
 0x156   : > { %v882_v56 = vperm.slane %v874_v52, %v6221_v19  ;;  %v895_v57 = vrot.slane %v878_v45, 4  ;;  %v900_v58 = vsel %vm781_vm0, 0.0, %v899_v48  ;;  %v901_v59 = vrot.slane %v894_v46, 4 }
 0x157   : > { %v818_v60 = vsel %vm781_vm0, %v817_v54, %v792_v18  ;;  %v828_v61 = vperm.slane %v820_v55, %v6221_v19  ;;  %v829_v62 = vrot.slane %v812_v53, 4  ;;  %v831_v63 = vrot.slane %v816_v44, 4 }
 0x158   : > { %v896_v0 = vsel %vm781_vm0, 0.0, %v895_v57  ;;  %v897_v1 = vrot.slane %v882_v56, 4  ;;  %v902_v2 = vsel %vm781_vm0, 0.0, %v901_v59  ;;  %v1038_v3 = vsel %vm781_vm0, %v901_v59, %v890_v38 }
 0x159   : > { %v1042_v4 = vperm.slane %v1038_v3, %v6212_v6  ;;  %v1043_v5 = vrot.slane %v902_v2, 4  ;;  %v824_v7 = vperm.slane %v818_v60, %v6221_v19  ;;  %v830_v8 = vsel %vm781_vm0, 0.0, %v829_v62 }
 0x15a   : > { %v898_v9 = vsel %vm781_vm0, 0.0, %v897_v1  ;;  %v832_v10 = vsel %vm781_vm0, 0.0, %v831_v63  ;;  %v835_v11 = vrot.slane %v828_v61, 4  ;;  %v969_v12 = vsel %vm781_vm0, %v831_v63, %v812_v53 }
 0x15b   : > { %v1032_v13 = vrot.slane %v898_v9, 4  ;;  %v1044_v14 = vsel %vm781_vm0, %v1043_v5, %v900_v58  ;;  %v833_v15 = vrot.slane %v824_v7, 4  ;;  %v974_v16 = vrot.slane %v832_v10, 4  ;;  %v5243_v5 = vld [vmem:[%s6563_s1 + $0xa0] sm:$0xf0] }
 0x15c   : > { %v1048_v17 = vperm.slane %v1044_v14, %v6212_v6  ;;  %v836_v18 = vsel %vm781_vm0, 0.0, %v835_v11  ;;  %v1027_v20 = vsel %vm781_vm0, %v897_v1, %v878_v45  ;;  %v1063_v21 = vrot.slane %v1042_v4, 4 }
 0x15d   : > { %v834_v22 = vsel %vm781_vm0, 0.0, %v833_v15  ;;  %v975_v23 = vsel %vm781_vm0, %v974_v16, %v830_v8  ;;  %v985_v24 = vrot.slane %v836_v18, 4  ;;  %v1031_v25 = vperm.slane %v1027_v20, %v6212_v6  ;;  %v5240_v16 = vld [vmem:[%s6563_s1 + $0x88] sm:$0xf0] }
 0x15e   : > { %v1033_v26 = vsel %vm781_vm0, %v1032_v13, %v896_v0  ;;  %v1061_v27 = vrot.slane %v1048_v17, 4  ;;  %v1064_v28 = vsel %vm781_vm0, %v1048_v17, %v1063_v21  ;;  %v973_v29 = vperm.slane %v969_v12, %v6212_v6 }
 0x15f   : > { %v1037_v30 = vperm.slane %v1033_v26, %v6212_v6  ;;  %v1051_v31 = vrot.slane %v1031_v25, 4  ;;  %v1072_v32 = vperm.slane %v1064_v28, %v6221_v19  ;;  %v979_v33 = vperm.slane %v975_v23, %v6212_v6 }
 0x160   : > { %v1062_v34 = vsel %vm781_vm0, %v1061_v27, %v1042_v4  ;;  %v980_v35 = vsel %vm781_vm0, %v835_v11, %v824_v7  ;;  %v986_v36 = vsel %vm781_vm0, %v985_v24, %v834_v22  ;;  %v993_v37 = vrot.slane %v973_v29, 4  ;;  %v4143_v4 = vld [vmem:[%s6563_s1 + $0x98] sm:$0xf]  ;;  %v4131_v11 = vld [vmem:[%s6563_s1 + $0x80] sm:$0xf] }
 0x161   : > { %v1049_v38 = vrot.slane %v1037_v30, 4  ;;  %v1068_v39 = vperm.slane %v1062_v34, %v6221_v19  ;;  %v1052_v40 = vsel %vm781_vm0, %v1037_v30, %v1051_v31  ;;  %v984_v44 = vperm.slane %v980_v35, %v6212_v6  ;;  %v5237_v30 = vld [vmem:[%s6563_s1 + $0x70] sm:$0xf0]  ;;  %v4107_v31 = vld [vmem:[%s6563_s1 + $0x50] sm:$0xf] }
 0x162   : > { %v1060_v43 = vperm.slane %v1052_v40, %v6221_v19  ;;  %v990_v45 = vperm.slane %v986_v36, %v6212_v6  ;;  %v991_v46 = vrot.slane %v979_v33, 4  ;;  %v994_v52 = vsel %vm781_vm0, %v979_v33, %v993_v37  ;;  %v5234_v33 = vld [vmem:[%s6563_s1 + $0x58] sm:$0xf0]  ;;  %v4095_v35 = vld [vmem:[%s6563_s1 + $0x38] sm:$0xf] }
 0x163   : > { %v1050_v48 = vsel %vm781_vm0, %v1049_v38, %v1031_v25  ;;  %v1073_v51 = vrot.slane %v1068_v39, 4  ;;  %v4156_v53 = vor.u32 %v5246_v42, %v4155_v41  ;;  %v1077_v55 = vrot.slane %v1072_v32, 4  ;;  %v5231_v36 = vld [vmem:[%s6563_s1 + $0x40] sm:$0xf0]  ;;  %v5228_v40 = vld [vmem:[%s6563_s1 + $0x28] sm:$0xf0] }
 0x164   : > { %v1056_v54 = vperm.slane %v1050_v48, %v6221_v19  ;;  %v1079_v56 = vrot.slane %v1060_v43, 4  ;;  %v1003_v57 = vrot.slane %v990_v45, 4  ;;  %v6287_v58 = vperm.slane %v994_v52, %v6221_v19 }
 0x165   : > { %v1005_v59 = vrot.slane %v984_v44, 4  ;;  %756 = vmatpush.bf16.msra.mxu2 %v4156_v53  ;;  %v992_v2 = vsel %vm781_vm0, %v991_v46, %v973_v29  ;;  %v1078_v10 = vsel %vm781_vm0, %v1077_v55, %v1060_v43  ;;  %v4144_v20 = vor.u32 %v5243_v5, %v4143_v4  ;;  %v4119_v29 = vld [vmem:[%s6563_s1 + $0x68] sm:$0xf] }
 0x166   : > { %v1074_v60 = vsel %vm781_vm0, %v1073_v51, %v1056_v54  ;;  %v1080_v61 = vsel %vm781_vm0, %v1072_v32, %v1079_v56  ;;  %v1075_v62 = vrot.slane %v1056_v54, 4  ;;  %v1004_v63 = vsel %vm781_vm0, %v1003_v57, %v984_v44  ;;  %v4071_v43 = vld [vmem:[%s6563_s1 + $0x8] sm:$0xf]  ;;  %v5225_v44 = vld [vmem:[%s6563_s1 + $0x10] sm:$0xf0] }
 0x167   : > { %v1081_v0 = vpack.c.bf16 %v1074_v60, %v1074_v60  ;;  %v1084_v1 = vpack.c.bf16 %v1080_v61, %v1080_v61  ;;  %v1010_v3 = vperm.slane %v1004_v63, %v6221_v19  ;;  %v1006_v8 = vsel %vm781_vm0, %v990_v45, %v1005_v59 }
 0x168   : > { %v1076_v7 = vsel %vm781_vm0, %v1068_v39, %v1075_v62  ;;  %v1021_v9 = vrot.slane %v6287_v58, 4  ;;  %v998_v17 = vperm.slane %v992_v2, %v6221_v19  ;;  %v1014_v18 = vperm.slane %v1006_v8, %v6221_v19  ;;  %v4083_v39 = vld [vmem:[%s6563_s1 + $0x20] sm:$0xf] }
 0x169   : > { %v1148_v12 = vsel %vm1143_vm1, %v1081_v0, 0  ;;  %v1205_v13 = vsel %vm1143_vm1, %v1084_v1, 0  ;;  %v1082_v14 = vpack.c.bf16 %v1076_v7, %v1076_v7  ;;  %v1015_v15 = vrot.slane %v1010_v3, 4  ;;  %757 = vmatpush.bf16.msra.mxu2 %v4144_v20 }
 0x16a   : > { %1157 = vmatpush.bf16.xpose.msra.mxu3 %v1148_v12  ;;  %1214 = vmatpush.bf16.xpose.msrb.mxu0 %v1205_v13  ;;  %v1083_v22 = vpack.c.bf16 %v1078_v10, %v1078_v10  ;;  %v1022_v24 = vsel %vm781_vm0, %v1014_v18, %v1021_v9  ;;  %v4132_v25 = vor.u32 %v5240_v16, %v4131_v11  ;;  %v1017_v37 = vrot.slane %v998_v17, 4 }
 0x16b   : > { %v1167_v21 = vsel %vm1143_vm1, %v1082_v14, 0  ;;  %v1016_v23 = vsel %vm781_vm0, %v1015_v15, %v998_v17  ;;  %v1026_v27 = vpack.c.bf16 %v1022_v24, %v1022_v24  ;;  %v4120_v32 = vor.u32 %v5237_v30, %v4119_v29 }
 0x16c   : > { %v1023_v26 = vpack.c.bf16 %v1016_v23, %v1016_v23  ;;  %v1186_v28 = vsel %vm1143_vm1, %v1083_v22, 0  ;;  %v4108_v34 = vor.u32 %v5234_v33, %v4107_v31  ;;  %v4096_v38 = vor.u32 %v5231_v36, %v4095_v35 }
 0x16d   : > { %758 = vmatpush.bf16.msra.mxu2 %v4132_v25  ;;  %v1018_v41 = vsel %vm781_vm0, %v1010_v3, %v1017_v37  ;;  %v4084_v42 = vor.u32 %v5228_v40, %v4083_v39  ;;  %v4072_v46 = vor.u32 %v5225_v44, %v4071_v43  ;;  %v1019_v48 = vrot.slane %v1014_v18, 4 }
 0x16e   : > { %v1024_v45 = vpack.c.bf16 %v1018_v41, %v1018_v41 }
 0x16f   : > { %v1020_v51 = vsel %vm781_vm0, %v1019_v48, %v6287_v58  ;;  %v598_v58 = vperm.slane %v6201_v50, 2 }
 0x170   : > { %v1025_v52 = vpack.c.bf16 %v1020_v51, %v1020_v51 }
 0x171   : > { %4157 = vmatmul.msk.bf16.vlgmr.msra.gmra.mxu3 %vm1143_vm1, %v1023_v26  ;;  %4160 = vmatmul.msk.bf16.vlgmr.msrb.gmra.mxu0 %vm1143_vm1, %v1026_v27 }
 0x172   : > { %1176 = vmatpush.bf16.xpose.msrb.mxu3 %v1167_v21  ;;  %759 = vmatpush.bf16.msra.mxu2 %v4120_v32 }
 0x176   : > { %760 = vmatpush.bf16.msra.mxu2 %v4108_v34 }
 0x17a   : > { %1195 = vmatpush.bf16.xpose.msra.mxu3 %v1186_v28  ;;  %761 = vmatpush.bf16.msra.mxu2 %v4096_v38 }
 0x17e   : > { %762 = vmatpush.bf16.msra.mxu2 %v4084_v42 }
 0x181   : > { %4158 = vmatmul.msk.bf16.vlgmr.msrb.gmra.mxu3 %vm1143_vm1, %v1024_v45 }
 0x182   : > { %763 = vmatpush.bf16.msra.mxu2 %v4072_v46 }
 0x185   : > { %764 = vmatmul.bf16.vlgmr.msra.gmra.mxu2 %v6194_v49 }
 0x191   : > { %4159 = vmatmul.msk.bf16.vlgmr.msra.gmra.mxu3 %vm1143_vm1, %v1025_v52 }
 0x1ee   : > { %v1216_v53 = vpop.f32.mrf.mxu0 }
 0x1ef   : > { %v1230_v54 = vsel %vm1220_vm2, %v1216_v53, -inf }
 0x1f0   : > { %1231 = vmax.xlane.f32.xlu2 %v1230_v54 }
 0x1f4   : > { %v1159_v55 = vpop.f32.mrf.mxu3 }
 0x1f5   : > { %v1221_v56 = vsel %vm1220_vm2, %v1159_v55, -inf }
 0x1f6   : > { %v1218_v57 = vpop.f32.mrf.mxu0  ;;  %1222 = vmax.xlane.f32.xlu0 %v1221_v56 }
 0x1fc   : > { %v1161_v59 = vpop.f32.mrf.mxu3 }
 0x204   : > { %v1178_v60 = vpop.f32.mrf.mxu3 }
 0x205   : > { %v1224_v49 = vsel %vm1220_vm2, %v1178_v60, -inf }
 0x206   : > { %1225 = vmax.xlane.f32.xlu2 %v1224_v49 }
 0x208   : > { %v765_v61 = vpop.f32.mrf.mxu2 }
 0x209   : > { %v766_v62 = vadd.f32 %v765_v61, %v598_v58 }
 0x20b   : > { %904 = vrot.lane.b32.xlu0 %v766_v62, %s5917_s18  ;;  %v915_v33 = vrot.slane %v766_v62, 4 }
 0x20c   : > { %v1180_v63 = vpop.f32.mrf.mxu3 }
 0x210   : > { %v767_v0 = vpop.f32.mrf.mxu2 }
 0x214   : > { %v1197_v1 = vpop.f32.mrf.mxu3 }
 0x215   : > { %v1227_v2 = vsel %vm1220_vm2, %v1197_v1, -inf }
 0x216   : > { %1228 = vmax.xlane.f32.xlu1 %v1227_v2 }
 0x21c   : > { %v1199_v3 = vpop.f32.mrf.mxu3 }
 0x21e   : > { %910 = vrot.lane.b32.xlu2 %v766_v62, %s5916_s27 }
 0x22f   : > { %907 = vrot.lane.b32.xlu1 %v766_v62, %s5918_s26 }
 0x263   : > { %v1232_v4 = vpop.xlane.xlu2 %1231 }
 0x264   : > { %v1236_v8 = vsub.f32 %v1216_v53, %v1232_v4 }
 0x266   : > { %v1243_v9 = vmul.f32 1.442695, %v1236_v8 }
 0x269   : > { %v1223_v5 = vpop.xlane.xlu0 %1222 }
 0x26a   : > { %v1233_v7 = vsub.f32 %v1159_v55, %v1223_v5 }
 0x26c   : > { %v1237_v50 = vmul.f32 1.442695, %v1233_v7 }
 0x26e   : > { %5615 = vpow2.f32 %v1237_v50 }
 0x26f   : > { %5617 = vpow2.f32 %v1243_v9 }
 0x274   : > { %v6364_v10 = vpop.eup %5615 }
 0x275   : > { %v1245_v11 = vsel %vm1220_vm2, %v6364_v10, 0.0  ;;  %v6368_v13 = vpop.eup %5617 }
 0x276   : > { %1246 = vadd.xlane.f32.xlu0 %v1245_v11  ;;  %v1254_v16 = vsel %vm1220_vm2, %v6368_v13, 0.0 }
 0x279   : > { %v1226_v12 = vpop.xlane.xlu2 %1225 }
 0x27a   : > { %v1234_v14 = vsub.f32 %v1178_v60, %v1226_v12 }
 0x27c   : > { %v1239_v15 = vmul.f32 1.442695, %v1234_v14 }
 0x27d   : > { %v905_v23 = vpop.permute.xlu0 %904 }
 0x27e   : > { %5619 = vpow2.f32 %v1239_v15  ;;  %1255 = vadd.xlane.f32.xlu0 %v1254_v16  ;;  %v927_v27 = vrot.slane %v905_v23, 4 }
 0x281   : > { %v911_v26 = vpop.permute.xlu2 %910 }
 0x282   : > { %v925_v28 = vrot.slane %v911_v26, 4  ;;  %v928_v29 = vsel %vm781_vm0, %v911_v26, %v927_v27 }
 0x283   : > { %v936_v31 = vperm.slane %v928_v29, %v6212_v6 }
 0x284   : > { %v6372_v17 = vpop.eup %5619  ;;  %v926_v30 = vsel %vm781_vm0, %v925_v28, %v905_v23 }
 0x285   : > { %v1248_v18 = vsel %vm1220_vm2, %v6372_v17, 0.0  ;;  %v932_v32 = vperm.slane %v926_v30, %v6212_v6  ;;  %v949_v34 = vrot.slane %v936_v31, 4 }
 0x286   : > { %1249 = vadd.xlane.f32.xlu2 %v1248_v18 }
 0x287   : > { %v937_v38 = vrot.slane %v932_v32, 4 }
 0x289   : > { %v1229_v20 = vpop.xlane.xlu1 %1228 }
 0x28a   : > { %v1235_v21 = vsub.f32 %v1197_v1, %v1229_v20 }
 0x28c   : > { %v1241_v22 = vmul.f32 1.442695, %v1235_v21 }
 0x28e   : > { %5621 = vpow2.f32 %v1241_v22 }
 0x294   : > { %v6376_v24 = vpop.eup %5621 }
 0x295   : > { %v1251_v25 = vsel %vm1220_vm2, %v6376_v24, 0.0 }
 0x296   : > { %1252 = vadd.xlane.f32.xlu1 %v1251_v25 }
 0x2a1   : > { %v908_v35 = vpop.permute.xlu1 %907 }
 0x2a2   : > { %v913_v36 = vrot.slane %v908_v35, 4  ;;  %v916_v37 = vsel %vm781_vm0, %v908_v35, %v915_v33 }
 0x2a3   : > { %v924_v39 = vperm.slane %v916_v37, %v6212_v6 }
 0x2a4   : > { %v914_v40 = vsel %vm781_vm0, %v913_v36, %v766_v62 }
 0x2a5   : > { %v920_v41 = vperm.slane %v914_v40, %v6212_v6  ;;  %v950_v42 = vsel %vm781_vm0, %v949_v34, %v924_v39  ;;  %v951_v43 = vrot.slane %v924_v39, 4 }
 0x2a6   : > { %v956_v44 = vperm.slane %v950_v42, %v6221_v19 }
 0x2a7   : > { %v938_v45 = vsel %vm781_vm0, %v937_v38, %v920_v41  ;;  %v939_v46 = vrot.slane %v920_v41, 4  ;;  %v952_v48 = vsel %vm781_vm0, %v936_v31, %v951_v43 }
 0x2a8   : > { %v944_v51 = vperm.slane %v938_v45, %v6221_v19  ;;  %v960_v52 = vperm.slane %v952_v48, %v6221_v19  ;;  %v965_v55 = vrot.slane %v956_v44, 4 }
 0x2a9   : > { %v940_v53 = vsel %vm781_vm0, %v932_v32, %v939_v46 }
 0x2aa   : > { %v948_v54 = vperm.slane %v940_v53, %v6221_v19  ;;  %v967_v56 = vrot.slane %v960_v52, 4  ;;  %v961_v57 = vrot.slane %v944_v51, 4  ;;  %v966_v63 = vsel %vm781_vm0, 0.0, %v965_v55 }
 0x2ac   : > { %v963_v59 = vrot.slane %v948_v54, 4  ;;  %v968_v60 = vsel %vm781_vm0, 0.0, %v967_v56  ;;  %v1096_v49 = vsel %vm781_vm0, %v967_v56, %v956_v44  ;;  %v962_v5 = vsel %vm781_vm0, 0.0, %v961_v57 }
 0x2ad   : > { %v1100_v58 = vperm.slane %v1096_v49, %v6212_v6  ;;  %v1101_v61 = vrot.slane %v968_v60, 4 }
 0x2ae   : > { %v964_v62 = vsel %vm781_vm0, 0.0, %v963_v59  ;;  %v1085_v0 = vsel %vm781_vm0, %v963_v59, %v944_v51 }
 0x2af   : > { %v1090_v1 = vrot.slane %v964_v62, 4  ;;  %v1102_v2 = vsel %vm781_vm0, %v1101_v61, %v966_v63  ;;  %v1121_v3 = vrot.slane %v1100_v58, 4  ;;  %v1089_v4 = vperm.slane %v1085_v0, %v6212_v6 }
 0x2b0   : > { %v1106_v7 = vperm.slane %v1102_v2, %v6212_v6 }
 0x2b1   : > { %v1091_v8 = vsel %vm781_vm0, %v1090_v1, %v962_v5  ;;  %v1109_v50 = vrot.slane %v1089_v4, 4 }
 0x2b2   : > { %v1095_v9 = vperm.slane %v1091_v8, %v6212_v6  ;;  %v1122_v11 = vsel %vm781_vm0, %v1106_v7, %v1121_v3  ;;  %v1119_v12 = vrot.slane %v1106_v7, 4 }
 0x2b3   : > { %v1130_v14 = vperm.slane %v1122_v11, %v6221_v19 }
 0x2b4   : > { %v1110_v15 = vsel %vm781_vm0, %v1095_v9, %v1109_v50  ;;  %v1107_v16 = vrot.slane %v1095_v9, 4  ;;  %v1120_v18 = vsel %vm781_vm0, %v1119_v12, %v1100_v58 }
 0x2b5   : > { %v1118_v20 = vperm.slane %v1110_v15, %v6221_v19  ;;  %v1135_v21 = vrot.slane %v1130_v14, 4  ;;  %v1126_v22 = vperm.slane %v1120_v18, %v6221_v19 }
 0x2b6   : > { %v1108_v23 = vsel %vm781_vm0, %v1107_v16, %v1089_v4 }
 0x2b7   : > { %v1136_v25 = vsel %vm781_vm0, %v1135_v21, %v1118_v20  ;;  %v1114_v26 = vperm.slane %v1108_v23, %v6221_v19  ;;  %v1131_v27 = vrot.slane %v1126_v22, 4  ;;  %v1137_v28 = vrot.slane %v1118_v20, 4 }
 0x2b8   : > { %v1141_v29 = vpack.c.bf16 %v1136_v25, %v1136_v25 }
 0x2b9   : > { %v1132_v30 = vsel %vm781_vm0, %v1131_v27, %v1114_v26  ;;  %v1133_v31 = vrot.slane %v1114_v26, 4  ;;  %v1138_v32 = vsel %vm781_vm0, %v1130_v14, %v1137_v28 }
 0x2ba   : > { %v1312_v33 = vsel %vm1272_vm3, %v1141_v29, 0  ;;  %v1139_v34 = vpack.c.bf16 %v1132_v30, %v1132_v30  ;;  %v1142_v35 = vpack.c.bf16 %v1138_v32, %v1138_v32 }
 0x2bb   : > { %1321 = vmatpush.bf16.msrb.mxu3 %v1312_v33  ;;  %v1134_v36 = vsel %vm781_vm0, %v1126_v22, %v1133_v31 }
 0x2bc   : > { %v1274_v37 = vsel %vm1272_vm3, %v1139_v34, 0  ;;  %v1331_v38 = vsel %vm1272_vm3, %v1142_v35, 0  ;;  %v1140_v39 = vpack.c.bf16 %v1134_v36, %v1134_v36 }
 0x2bd   : > { %1283 = vmatpush.bf16.msrb.mxu2 %v1274_v37  ;;  %1340 = vmatpush.bf16.msra.mxu0 %v1331_v38 }
 0x2be   : > { %v1293_v40 = vsel %vm1272_vm3, %v1140_v39, 0 }
 0x2c1   : > { %1302 = vmatpush.bf16.msra.mxu2 %v1293_v40 }
 0x2e9   : > { %v1247_v41 = vpop.xlane.xlu0 %1246 }
 0x2ea   : > { %5623 = vrcp.f32 %v1247_v41 }
 0x2f0   : > { %v5624_v42 = vpop.eup %5623 }
 0x2f1   : > { %v1261_v43 = vmul.f32 %v5624_v42, %v6364_v10  ;;  %v1256_v44 = vpop.xlane.xlu0 %1255 }
 0x2f2   : > { %5625 = vrcp.f32 %v1256_v44 }
 0x2f3   : > { %v1265_v45 = vpack.c.bf16 %v1261_v43, %v1261_v43 }
 0x2f5   : > { %4161 = vmatmul.msk.bf16.vlgmr.msrb.gmra.mxu2 %vm1220_vm2, %v1265_v45 }
 0x2f8   : > { %v5626_v46 = vpop.eup %5625 }
 0x2f9   : > { %v1264_v48 = vmul.f32 %v5626_v46, %v6368_v13  ;;  %v1250_v51 = vpop.xlane.xlu2 %1249 }
 0x2fa   : > { %5627 = vrcp.f32 %v1250_v51 }
 0x2fb   : > { %v1268_v52 = vpack.c.bf16 %v1264_v48, %v1264_v48 }
 0x2fd   : > { %4164 = vmatmul.msk.bf16.vlgmr.msra.gmra.mxu0 %vm1220_vm2, %v1268_v52 }
 0x300   : > { %v5628_v53 = vpop.eup %5627 }
 0x301   : > { %v1262_v54 = vmul.f32 %v5628_v53, %v6372_v17 }
 0x303   : > { %v1266_v55 = vpack.c.bf16 %v1262_v54, %v1262_v54 }
 0x305   : > { %4162 = vmatmul.msk.bf16.vlgmr.msra.gmra.mxu2 %vm1220_vm2, %v1266_v55 }
 0x309   : > { %v1253_v10 = vpop.xlane.xlu1 %1252 }
 0x30a   : > { %5629 = vrcp.f32 %v1253_v10 }
 0x310   : > { %v5630_v56 = vpop.eup %5629 }
 0x311   : > { %v1263_v57 = vmul.f32 %v5630_v56, %v6376_v24 }
 0x313   : > { %v1267_v59 = vpack.c.bf16 %v1263_v57, %v1263_v57 }
 0x315   : > { %4163 = vmatmul.msk.bf16.vlgmr.msrb.gmra.mxu3 %vm1220_vm2, %v1267_v59 }
 0x378   : > { %v1285_v13 = vpop.f32.mrf.mxu2 }
 0x379   : > { %v1348_v3 = vrot.slane %v1285_v13, 4 }
 0x37a   : > { %v1342_v60 = vpop.f32.mrf.mxu0 }
 0x37b   : > { %v1358_v0 = vrot.slane %v1342_v60, 4 }
 0x380   : > { %v1287_v49 = vpop.f32.mrf.mxu2 }
 0x382   : > { %v1344_v58 = vpop.f32.mrf.mxu0 }
 0x388   : > { %v1304_v61 = vpop.f32.mrf.mxu2 }
 0x389   : > { %v1360_v62 = vrot.slane %v1304_v61, 4  ;;  %v1359_v1 = vsel %vm781_vm0, %v1358_v0, %v1304_v61 }
 0x38a   : > { %v1365_v24 = vperm.slane %v1359_v1, %v6212_v6  ;;  %v5253_v1 = vld [vmem:[#allocation2 + $0x30] sm:$0xff] }
 0x38b   : > { %v1361_v17 = vsel %vm781_vm0, %v1342_v60, %v1360_v62 }
 0x38c   : > { %v1369_v2 = vperm.slane %v1361_v17, %v6212_v6  ;;  %v1370_v11 = vrot.slane %v1365_v24, 4  ;;  %v5254_v17 = vld [vmem:[#allocation2 + $0x38] sm:$0xff] }
 0x38d   : > { %1542 = vmatpush.bf16.msrb.mxu1 %v5254_v17  ;;  %v5328_v17 = vld [vmem:[#allocation7 + $0x244] sm:$0xf0] }
 0x38e   : > { %v1382_v8 = vrot.slane %v1369_v2, 4 }
 0x390   : > { %v1306_v63 = vpop.f32.mrf.mxu2 }
 0x391   : > { %1543 = vmatpush.bf16.msrb.mxu1 %v5253_v1  ;;  %v5320_v1 = vld [vmem:[#allocation7 + $0x20c] sm:$0xf] }
 0x398   : > { %v1323_v4 = vpop.f32.mrf.mxu3 }
 0x399   : > { %v1346_v5 = vrot.slane %v1323_v4, 4  ;;  %v1349_v7 = vsel %vm781_vm0, %v1323_v4, %v1348_v3  ;;  %v5250_v3 = vld [vmem:[#allocation2 + $0x18] sm:$0xff]  ;;  %v5248_v4 = vld [vmem:[#allocation2 + $0x8] sm:$0xff] }
 0x39a   : > { %v1357_v50 = vperm.slane %v1349_v7, %v6212_v6 }
 0x39b   : > { %v1347_v9 = vsel %vm781_vm0, %v1346_v5, %v1285_v13  ;;  %v5247_v5 = vld [vmem:[#allocation2] sm:$0xff] }
 0x39c   : > { %v1353_v12 = vperm.slane %v1347_v9, %v6212_v6  ;;  %v1383_v14 = vsel %vm781_vm0, %v1382_v8, %v1357_v50  ;;  %v1384_v15 = vrot.slane %v1357_v50, 4 }
 0x39d   : > { %v1389_v16 = vperm.slane %v1383_v14, %v6221_v19 }
 0x39e   : > { %v1371_v18 = vsel %vm781_vm0, %v1370_v11, %v1353_v12  ;;  %v1372_v20 = vrot.slane %v1353_v12, 4  ;;  %v1385_v21 = vsel %vm781_vm0, %v1369_v2, %v1384_v15  ;;  %v5252_v2 = vld [vmem:[#allocation2 + $0x28] sm:$0xff]  ;;  %v5609_v15 = vld [vmem:[%s6566_s4] ss:$0 sm:$0xff] }
 0x39f   : > { %v1377_v22 = vperm.slane %v1371_v18, %v6221_v19  ;;  %v1393_v23 = vperm.slane %v1385_v21, %v6221_v19  ;;  %v1398_v28 = vrot.slane %v1389_v16, 4  ;;  %1544 = vmatpush.bf16.msrb.mxu1 %v5252_v2  ;;  %v4465_v2 = vld [vmem:[#allocation7 + $0x248] sm:$0xf0] }
 0x3a0   : > { %v1373_v25 = vsel %vm781_vm0, %v1365_v24, %v1372_v20  ;;  %v1325_v26 = vpop.f32.mrf.mxu3  ;;  %v5249_v24 = vld [vmem:[#allocation2 + $0x10] sm:$0xff] }
 0x3a1   : > { %v1381_v27 = vperm.slane %v1373_v25, %v6221_v19  ;;  %v1400_v29 = vrot.slane %v1393_v23, 4  ;;  %v1394_v30 = vrot.slane %v1377_v22, 4  ;;  %v1399_v37 = vsel %vm781_vm0, 0.0, %v1398_v28  ;;  %v4647_v26 = vld [vmem:[#allocation7 + $0x380] sm:$0xf] }
 0x3a2   : > { %v5367_v28 = vld [vmem:[#allocation7 + $0x384] sm:$0xf] }
 0x3a3   : > { %v1396_v31 = vrot.slane %v1381_v27, 4  ;;  %v1401_v32 = vsel %vm781_vm0, 0.0, %v1400_v29  ;;  %v1413_v33 = vsel %vm781_vm0, %v1400_v29, %v1389_v16  ;;  %v1395_v43 = vsel %vm781_vm0, 0.0, %v1394_v30  ;;  %v5375_v27 = vld [vmem:[#allocation7 + $0x3bc] sm:$0xf0] }
 0x3a4   : > { %v1417_v34 = vperm.slane %v1413_v33, %v6212_v6  ;;  %v1418_v35 = vrot.slane %v1401_v32, 4  ;;  %v4648_v29 = vor.u32 %v5375_v27, %v4647_v26  ;;  %v4649_v30 = vld [vmem:[#allocation7 + $0x3c0] sm:$0xf0]  ;;  %v5376_v32 = vld [vmem:[#allocation7 + $0x3c4] sm:$0xf0] }
 0x3a5   : > { %v1397_v36 = vsel %vm781_vm0, 0.0, %v1396_v31  ;;  %v1402_v38 = vsel %vm781_vm0, %v1396_v31, %v1377_v22  ;;  %v5921_v22 = vmov 128.0   ;;  %v4655_v31 = vld [vmem:[#allocation7 + $0x388] sm:$0xf]  ;;  %v4652_v33 = vor.u32 %v5367_v28, %v4649_v30  ;;  %v5295_v26 = vld [vmem:[#allocation7 + $0x13c] sm:$0xf0] }
 0x3a6   : > { %v1419_v39 = vsel %vm781_vm0, %v1418_v35, %v1399_v37  ;;  %v1406_v40 = vperm.slane %v1402_v38, %v6212_v6  ;;  %v1407_v41 = vrot.slane %v1397_v36, 4  ;;  %v1438_v42 = vrot.slane %v1417_v34, 4  ;;  %v4657_v35 = vld [vmem:[#allocation7 + $0x3c8] sm:$0xf0]  ;;  %v4583_v36 = vld [vmem:[#allocation7 + $0x300] sm:$0xf]  ;;  %2398 = vmatpush.bf16.msrb.mxu2 %v4648_v29 }
 0x3a7   : > { %v1423_v44 = vperm.slane %v1419_v39, %v6212_v6  ;;  %5631 = vrcp.f32 %v5921_v22  ;;  %v5359_v38 = vld [vmem:[#allocation7 + $0x33c] sm:$0xf0]  ;;  %v5351_v39 = vld [vmem:[#allocation7 + $0x304] sm:$0xf]  ;;  %2411 = vmatpush.bf16.msra.mxu3 %v4652_v33  ;;  %v4335_v30 = vld [vmem:[#allocation7 + $0x108] sm:$0xf] }
 0x3a8   : > { %v1408_v45 = vsel %vm781_vm0, %v1407_v41, %v1395_v43  ;;  %v1426_v46 = vrot.slane %v1406_v40, 4  ;;  %v4584_v41 = vor.u32 %v5359_v38, %v4583_v36  ;;  %v4591_v43 = vld [vmem:[#allocation7 + $0x308] sm:$0xf]  ;;  %v5287_v27 = vld [vmem:[#allocation7 + $0x104] sm:$0xf] }
 0x3a9   : > { %v1412_v48 = vperm.slane %v1408_v45, %v6212_v6  ;;  %v1439_v51 = vsel %vm781_vm0, %v1423_v44, %v1438_v42  ;;  %v1436_v52 = vrot.slane %v1423_v44, 4  ;;  %v5360_v44 = vld [vmem:[#allocation7 + $0x344] sm:$0xf0]  ;;  %v5352_v45 = vld [vmem:[#allocation7 + $0x30c] sm:$0xf] }
 0x3aa   : > { %v1447_v53 = vperm.slane %v1439_v51, %v6221_v19  ;;  %v4519_v51 = vld [vmem:[#allocation7 + $0x280] sm:$0xf]  ;;  %2399 = vmatpush.bf16.msrb.mxu2 %v4584_v41  ;;  %v4329_v29 = vld [vmem:[#allocation7 + $0x140] sm:$0xf0]  ;;  %v4337_v33 = vld [vmem:[#allocation7 + $0x148] sm:$0xf0] }
 0x3ab   : > { %v1427_v54 = vsel %vm781_vm0, %v1412_v48, %v1426_v46  ;;  %v1424_v55 = vrot.slane %v1412_v48, 4  ;;  %v1437_v10 = vsel %vm781_vm0, %v1436_v52, %v1417_v34  ;;  %v5368_v34 = vld [vmem:[#allocation7 + $0x38c] sm:$0xf]  ;;  %v4592_v46 = vor.u32 %v5360_v44, %v4591_v43  ;;  %v5343_v52 = vld [vmem:[#allocation7 + $0x2bc] sm:$0xf0] }
 0x3ac   : > { %v1435_v56 = vperm.slane %v1427_v54, %v6221_v19  ;;  %v1452_v57 = vrot.slane %v1447_v53, 4  ;;  %v1443_v59 = vperm.slane %v1437_v10, %v6221_v19  ;;  %v4660_v37 = vor.u32 %v5368_v34, %v4657_v35  ;;  %v4593_v48 = vld [vmem:[#allocation7 + $0x348] sm:$0xf0]  ;;  %v5335_v54 = vld [vmem:[#allocation7 + $0x284] sm:$0xf] }
 0x3ad   : > { %v1425_v13 = vsel %vm781_vm0, %v1424_v55, %v1406_v40  ;;  %v6483_v23 = vpop.eup %5631  ;;  %v4585_v40 = vld [vmem:[#allocation7 + $0x340] sm:$0xf0]  ;;  %v4527_v10 = vld [vmem:[#allocation7 + $0x288] sm:$0xf]  ;;  %v4332_v35 = vor.u32 %v5287_v27, %v4329_v29  ;;  %v5279_v38 = vld [vmem:[#allocation7 + $0xbc] sm:$0xf0] }
 0x3ae   : > { %v1453_v60 = vsel %vm781_vm0, %v1452_v57, %v1435_v56  ;;  %v1454_v6 = vrot.slane %v1435_v56, 4  ;;  %v1431_v49 = vperm.slane %v1425_v13, %v6221_v19  ;;  %v1448_v58 = vrot.slane %v1443_v59, 4  ;;  %v5251_v19 = vld [vmem:[#allocation2 + $0x20] sm:$0xff]  ;;  %v4521_v55 = vld [vmem:[#allocation7 + $0x2c0] sm:$0xf0] }
 0x3af   : > { %1461 = vrot.lane.b32.xlu0 %v1453_v60, %s5918_s26  ;;  %1545 = vmatpush.bf16.msrb.mxu1 %v5251_v19  ;;  %v6486_v25 = vmul.f32 128.0, %v6483_v23  ;;  %v4588_v42 = vor.u32 %v5351_v39, %v4585_v40  ;;  %v4520_v56 = vor.u32 %v5343_v52, %v4519_v51  ;;  %v5344_v57 = vld [vmem:[#allocation7 + $0x2c4] sm:$0xf0]  ;;  %v4529_v13 = vld [vmem:[#allocation7 + $0x2c8] sm:$0xf0]  ;;  %v4524_v60 = vor.u32 %v5335_v54, %v4521_v55 }
 0x3b0   : > { %v1455_v61 = vsel %vm781_vm0, %v1447_v53, %v1454_v6  ;;  %v1450_v62 = vrot.slane %v1431_v49, 4  ;;  %v1449_v63 = vsel %vm781_vm0, %v1448_v58, %v1431_v49  ;;  %v4596_v53 = vor.u32 %v5352_v45, %v4593_v48  ;;  %v4455_v49 = vld [vmem:[#allocation7 + $0x200] sm:$0xf]  ;;  %v5271_v39 = vld [vmem:[#allocation7 + $0x84] sm:$0xf] }
 0x3b1   : > { %1465 = vrot.lane.b32.xlu2 %v1455_v61, %s5917_s18  ;;  %2412 = vmatpush.bf16.msra.mxu3 %v4588_v42  ;;  %v4528_v6 = vor.u32 %v5344_v57, %v4527_v10  ;;  %v5327_v58 = vld [vmem:[#allocation7 + $0x23c] sm:$0xf0]  ;;  %v5319_v61 = vld [vmem:[#allocation7 + $0x204] sm:$0xf]  ;;  %v1562_v19 = vsub.f32 1.0, %v6486_v25  ;;  %vm1565_vm6 = vweird.f32 %v6483_v23 }
 0x3b2   : > { %v1451_v0 = vsel %vm781_vm0, %v1443_v59, %v1450_v62  ;;  %v5336_v59 = vld [vmem:[#allocation7 + $0x28c] sm:$0xf]  ;;  %2400 = vmatpush.bf16.msrb.mxu2 %v4520_v56  ;;  %v4327_v25 = vld [vmem:[#allocation7 + $0x100] sm:$0xf]  ;;  %v4265_v41 = vld [vmem:[#allocation7 + $0xc0] sm:$0xf0] }
 0x3b3   : > { %1457 = vrot.lane.b32.xlu1 %v1451_v0, %s5916_s27  ;;  %1546 = vmatpush.bf16.msrb.mxu1 %v5250_v3  ;;  %v4532_v62 = vor.u32 %v5336_v59, %v4529_v13  ;;  %v4463_v0 = vld [vmem:[#allocation7 + $0x208] sm:$0xf]  ;;  %v4456_v3 = vor.u32 %v5327_v58, %v4455_v49  ;;  %v4328_v34 = vor.u32 %v5295_v26, %v4327_v25  ;;  %v5272_v44 = vld [vmem:[#allocation7 + $0x8c] sm:$0xf]  ;;  %v4199_v56 = vld [vmem:[#allocation7] sm:$0xf] }
 0x3b4   : > { %v4271_v42 = vld [vmem:[#allocation7 + $0x88] sm:$0xf]  ;;  %v4273_v45 = vld [vmem:[#allocation7 + $0xc8] sm:$0xf0]  ;;  %v4268_v51 = vor.u32 %v5271_v39, %v4265_v41  ;;  %v5263_v57 = vld [vmem:[#allocation7 + $0x3c] sm:$0xf0] }
 0x3b5   : > { %2413 = vmatpush.bf16.msra.mxu3 %v4524_v60  ;;  %v5280_v43 = vld [vmem:[#allocation7 + $0xc4] sm:$0xf0]  ;;  %v4276_v54 = vor.u32 %v5272_v44, %v4273_v45  ;;  %v5255_v59 = vld [vmem:[#allocation7 + $0x4] sm:$0xf]  ;;  %v4200_v13 = vor.u32 %v5263_v57, %v4199_v56  ;;  %v4609_v25 = vld [vmem:[#allocation7 + $0x358] sm:$0xf0] }
 0x3b6   : > { %2401 = vmatpush.bf16.msrb.mxu2 %v4456_v3  ;;  %v4272_v52 = vor.u32 %v5280_v43, %v4271_v42  ;;  %v4201_v60 = vld [vmem:[#allocation7 + $0x40] sm:$0xf0]  ;;  %v5264_v49 = vld [vmem:[#allocation7 + $0x44] sm:$0xf0]  ;;  %v5345_v29 = vld [vmem:[#allocation7 + $0x2cc] sm:$0xf0] }
 0x3b7   : > { %1547 = vmatpush.bf16.msrb.mxu1 %v5249_v24  ;;  %v4204_v58 = vor.u32 %v5255_v59, %v4201_v60  ;;  %v4471_v39 = vld [vmem:[#allocation7 + $0x210] sm:$0xf]  ;;  %v5321_v41 = vld [vmem:[#allocation7 + $0x214] sm:$0xf]  ;;  %v4479_v44 = vld [vmem:[#allocation7 + $0x218] sm:$0xf] }
 0x3b8   : > { %v4473_v43 = vld [vmem:[#allocation7 + $0x250] sm:$0xf0]  ;;  %v5330_v45 = vld [vmem:[#allocation7 + $0x254] sm:$0xf0] }
 0x3b9   : > { %v5305_v56 = vld [vmem:[#allocation7 + $0x194] sm:$0xf]  ;;  %v5314_v60 = vld [vmem:[#allocation7 + $0x1d4] sm:$0xf0] }
 0x3ba   : > { %v4409_v59 = vld [vmem:[#allocation7 + $0x1d0] sm:$0xf0] }
 0x3bb   : > { %1548 = vmatpush.bf16.msrb.mxu1 %v5248_v4  ;;  %v4464_v4 = vor.u32 %v5328_v17, %v4463_v0  ;;  %v5377_v17 = vld [vmem:[#allocation7 + $0x3cc] sm:$0xf0] }
 0x3bf   : > { %1549 = vmatpush.bf16.msrb.mxu1 %v5247_v5  ;;  %v4391_v5 = vld [vmem:[#allocation7 + $0x180] sm:$0xf] }
 0x3c3   : > { %2437 = vmatpush.bf16.msra.mxu1 %v4660_v37  ;;  %v4263_v37 = vld [vmem:[#allocation7 + $0x80] sm:$0xf] }
 0x3c4   : > { %v4264_v48 = vor.u32 %v5279_v38, %v4263_v37  ;;  %v4545_v37 = vld [vmem:[#allocation7 + $0x2d8] sm:$0xf0] }
 0x3c7   : > { %2438 = vmatpush.bf16.msra.mxu1 %v4596_v53 }
 0x3cb   : > { %2439 = vmatpush.bf16.msra.mxu1 %v4532_v62  ;;  %v5256_v62 = vld [vmem:[#allocation7 + $0xc] sm:$0xf] }
 0x40b   : > { %v1466_v9 = vpop.permute.xlu2 %1465 }
 0x421   : > { %v1462_v8 = vpop.permute.xlu0 %1461 }
 0x425   : > { %v1458_v7 = vpop.permute.xlu1 %1457 }
 0x426   : > { %v1468_v50 = vsel %vm1143_vm1, %v1449_v63, %v1458_v7  ;;  %v4457_v63 = vld [vmem:[#allocation7 + $0x240] sm:$0xf0]  ;;  %v5311_v7 = vld [vmem:[#allocation7 + $0x1bc] sm:$0xf0] }
 0x427   : > { %v1470_v11 = vsel %vm1469_vm4, %v1468_v50, %v1462_v8  ;;  %v4460_v24 = vor.u32 %v5319_v61, %v4457_v63  ;;  %v5303_v8 = vld [vmem:[#allocation7 + $0x184] sm:$0xf]  ;;  %v4468_v50 = vor.u32 %v5320_v1, %v4465_v2  ;;  %v4209_v63 = vld [vmem:[#allocation7 + $0x48] sm:$0xf0]  ;;  %v5369_v1 = vld [vmem:[#allocation7 + $0x394] sm:$0xf] }
 0x428   : > { %v1472_v12 = vsel %vm1471_vm5, %v1470_v11, %v1466_v9  ;;  %v4393_v9 = vld [vmem:[#allocation7 + $0x1c0] sm:$0xf0]  ;;  %v4399_v11 = vld [vmem:[#allocation7 + $0x188] sm:$0xf]  ;;  %v4212_v0 = vor.u32 %v5256_v62, %v4209_v63  ;;  %v4665_v2 = vld [vmem:[#allocation7 + $0x3d0] sm:$0xf0] }
 0x429   : > { %v1473_v14 = vpack.c.bf16 %v1472_v12, %v1472_v12  ;;  %v5312_v12 = vld [vmem:[#allocation7 + $0x1c4] sm:$0xf0]  ;;  %2414 = vmatpush.bf16.msra.mxu3 %v4460_v24  ;;  %2440 = vmatpush.bf16.msra.mxu1 %v4468_v50  ;;  %v4668_v3 = vor.u32 %v5369_v1, %v4665_v2  ;;  %v4671_v24 = vld [vmem:[#allocation7 + $0x398] sm:$0xf]  ;;  %v4599_v50 = vld [vmem:[#allocation7 + $0x310] sm:$0xf] }
 0x42a   : > { %v4400_v22 = vor.u32 %v5312_v12, %v4399_v11  ;;  %v4343_v63 = vld [vmem:[#allocation7 + $0x110] sm:$0xf]  ;;  %v4345_v1 = vld [vmem:[#allocation7 + $0x150] sm:$0xf0]  ;;  %v4351_v2 = vld [vmem:[#allocation7 + $0x118] sm:$0xf] }
 0x42b   : > { %1550 = vmatmul.bf16.vlgmr.msrb.gmra.mxu1 %v1473_v14  ;;  %v5304_v14 = vld [vmem:[#allocation7 + $0x18c] sm:$0xf] }
 0x4a8   : > { %v1551_v16 = vpop.f32.mrf.mxu1 }
 0x4a9   : > { %v1552_v18 = vadd.f32 %v5609_v15, %v1551_v16  ;;  %v4401_v15 = vld [vmem:[#allocation7 + $0x1c8] sm:$0xf0]  ;;  %v1563_v16 = vmul.f32 %v6483_v23, %v1562_v19 }
 0x4aa   : > { %v4404_v28 = vor.u32 %v5304_v14, %v4401_v15  ;;  %v5353_v14 = vld [vmem:[#allocation7 + $0x314] sm:$0xf] }
 0x4ab   : > { %v6480_v20 = vadd.f32 %v1552_v18, %v6190_v47  ;;  %v4656_v47 = vor.u32 %v5376_v32, %v4655_v31  ;;  %v4392_v18 = vor.u32 %v5311_v7, %v4391_v5  ;;  %v5296_v31 = vld [vmem:[#allocation7 + $0x144] sm:$0xf0]  ;;  %v5288_v32 = vld [vmem:[#allocation7 + $0x10c] sm:$0xf]  ;;  %v5370_v5 = vld [vmem:[#allocation7 + $0x39c] sm:$0xf] }
 0x4ac   : > { %v4336_v36 = vor.u32 %v5296_v31, %v4335_v30  ;;  %2441 = vmatpush.bf16.msra.mxu1 %v4404_v28  ;;  %v4340_v40 = vor.u32 %v5288_v32, %v4337_v33  ;;  %v4601_v15 = vld [vmem:[#allocation7 + $0x350] sm:$0xf0]  ;;  %v4535_v28 = vld [vmem:[#allocation7 + $0x290] sm:$0xf]  ;;  %v4543_v33 = vld [vmem:[#allocation7 + $0x298] sm:$0xf] }
 0x4ad   : > { %1558 = vadd.xlane.f32.xlu0 %v6480_v20  ;;  %2424 = vmatpush.bf16.msrb.mxu0 %v4656_v47  ;;  %v1564_v47 = vadd.f32 %v6483_v23, %v1563_v16  ;;  %v4607_v16 = vld [vmem:[#allocation7 + $0x318] sm:$0xf]  ;;  %v5337_v30 = vld [vmem:[#allocation7 + $0x294] sm:$0xf]  ;;  %v4536_v31 = vor.u32 %v5345_v29, %v4535_v28 }
 0x4ae   : > { %2402 = vmatpush.bf16.msrb.mxu2 %v4392_v18  ;;  %v4604_v18 = vor.u32 %v5353_v14, %v4601_v15  ;;  %v4537_v32 = vld [vmem:[#allocation7 + $0x2d0] sm:$0xf0]  ;;  %v4287_v15 = vld [vmem:[#allocation7 + $0x98] sm:$0xf] }
 0x4b0   : > { %v1553_v21 = vpop.f32.mrf.mxu1  ;;  %2442 = vmatpush.bf16.msra.mxu1 %v4340_v40  ;;  %v5329_v40 = vld [vmem:[#allocation7 + $0x24c] sm:$0xf0] }
 0x4b1   : > { %2425 = vmatpush.bf16.msrb.mxu0 %v4592_v46  ;;  %v4396_v21 = vor.u32 %v5303_v8, %v4393_v9  ;;  %v6493_v46 = vsel %vm1565_vm6, %v6483_v23, %v1564_v47  ;;  %v4673_v8 = vld [vmem:[#allocation7 + $0x3d8] sm:$0xf0]  ;;  %v5361_v9 = vld [vmem:[#allocation7 + $0x34c] sm:$0xf0]  ;;  %v5346_v47 = vld [vmem:[#allocation7 + $0x2d4] sm:$0xf0]  ;;  %v4472_v42 = vor.u32 %v5329_v40, %v4471_v39 }
 0x4b2   : > { %2403 = vmatpush.bf16.msrb.mxu2 %v4328_v34  ;;  %v4676_v11 = vor.u32 %v5370_v5, %v4673_v8  ;;  %v4600_v12 = vor.u32 %v5361_v9, %v4599_v50  ;;  %v4540_v34 = vor.u32 %v5337_v30, %v4537_v32  ;;  %v4353_v5 = vld [vmem:[#allocation7 + $0x158] sm:$0xf0]  ;;  %v5281_v9 = vld [vmem:[#allocation7 + $0xcc] sm:$0xf0]  ;;  %v5257_v30 = vld [vmem:[#allocation7 + $0x14] sm:$0xf] }
 0x4b3   : > { %2415 = vmatpush.bf16.msra.mxu3 %v4396_v21  ;;  %v5362_v21 = vld [vmem:[#allocation7 + $0x354] sm:$0xf0] }
 0x4b4   : > { %2443 = vmatpush.bf16.msra.mxu1 %v4276_v54  ;;  %v4608_v26 = vor.u32 %v5362_v21, %v4607_v16  ;;  %v5282_v16 = vld [vmem:[#allocation7 + $0xd4] sm:$0xf0] }
 0x4b5   : > { %2426 = vmatpush.bf16.msrb.mxu0 %v4528_v6  ;;  %v4207_v6 = vld [vmem:[#allocation7 + $0x8] sm:$0xf]  ;;  %v4288_v29 = vor.u32 %v5282_v16, %v4287_v15  ;;  %v5340_v16 = vld [vmem:[#allocation7 + $0x2ac] sm:$0xf] }
 0x4b6   : > { %2404 = vmatpush.bf16.msrb.mxu2 %v4264_v48  ;;  %v4208_v61 = vor.u32 %v5264_v49, %v4207_v6  ;;  %v4476_v48 = vor.u32 %v5321_v41, %v4473_v43  ;;  %v4412_v6 = vor.u32 %v5305_v56, %v4409_v59  ;;  %v5371_v56 = vld [vmem:[#allocation7 + $0x3a4] sm:$0xf]  ;;  %v4687_v59 = vld [vmem:[#allocation7 + $0x3a8] sm:$0xf] }
 0x4b7   : > { %2416 = vmatpush.bf16.msra.mxu3 %v4332_v35  ;;  %v4544_v35 = vor.u32 %v5346_v47, %v4543_v33  ;;  %v4223_v33 = vld [vmem:[#allocation7 + $0x18] sm:$0xf]  ;;  %v5348_v15 = vld [vmem:[#allocation7 + $0x2e4] sm:$0xf0] }
 0x4b8   : > { %2444 = vmatpush.bf16.msra.mxu1 %v4212_v0  ;;  %v5289_v0 = vld [vmem:[#allocation7 + $0x114] sm:$0xf]  ;;  %v5266_v47 = vld [vmem:[#allocation7 + $0x54] sm:$0xf0] }
 0x4b9   : > { %2427 = vmatpush.bf16.msrb.mxu0 %v4464_v4  ;;  %v5378_v4 = vld [vmem:[#allocation7 + $0x3d4] sm:$0xf0] }
 0x4ba   : > { %2405 = vmatpush.bf16.msrb.mxu2 %v4200_v13  ;;  %v4672_v7 = vor.u32 %v5378_v4, %v4671_v24  ;;  %v4415_v13 = vld [vmem:[#allocation7 + $0x198] sm:$0xf]  ;;  %v5290_v4 = vld [vmem:[#allocation7 + $0x11c] sm:$0xf] }
 0x4bb   : > { %2417 = vmatpush.bf16.msra.mxu3 %v4268_v51  ;;  %v4480_v51 = vor.u32 %v5330_v45, %v4479_v44  ;;  %v4416_v49 = vor.u32 %v5314_v60, %v4415_v13  ;;  %v4356_v50 = vor.u32 %v5290_v4, %v4353_v5  ;;  %v5380_v60 = vld [vmem:[#allocation7 + $0x3e4] sm:$0xf0] }
 0x4bc   : > { %2489 = vmatpush.bf16.msrb.mxu1 %v4676_v11  ;;  %v5273_v11 = vld [vmem:[#allocation7 + $0x94] sm:$0xf] }
 0x4bd   : > { %2428 = vmatpush.bf16.msrb.mxu0 %v4400_v22  ;;  %v5354_v22 = vld [vmem:[#allocation7 + $0x31c] sm:$0xf] }
 0x4be   : > { %v4612_v27 = vor.u32 %v5354_v22, %v4609_v25  ;;  %v4289_v25 = vld [vmem:[#allocation7 + $0xd8] sm:$0xf0] }
 0x4bf   : > { %2418 = vmatpush.bf16.msra.mxu3 %v4204_v58  ;;  %v5306_v58 = vld [vmem:[#allocation7 + $0x19c] sm:$0xf] }
 0x4c0   : > { %2490 = vmatpush.bf16.msrb.mxu1 %v4612_v27  ;;  %v5265_v27 = vld [vmem:[#allocation7 + $0x4c] sm:$0xf0] }
 0x4c1   : > { %2429 = vmatpush.bf16.msrb.mxu0 %v4336_v36  ;;  %v5338_v36 = vld [vmem:[#allocation7 + $0x29c] sm:$0xf] }
 0x4c2   : > { %v4548_v38 = vor.u32 %v5338_v36, %v4545_v37 }
 0x4c3   : > { %2463 = vmatpush.bf16.msrb.mxu3 %v4668_v3  ;;  %v4348_v3 = vor.u32 %v5289_v0, %v4345_v1  ;;  %v4617_v1 = vld [vmem:[#allocation7 + $0x360] sm:$0xf0] }
 0x4c4   : > { %2491 = vmatpush.bf16.msrb.mxu1 %v4548_v38  ;;  %v4224_v38 = vor.u32 %v5266_v47, %v4223_v33  ;;  %v5324_v33 = vld [vmem:[#allocation7 + $0x22c] sm:$0xf] }
 0x4c5   : > { %2430 = vmatpush.bf16.msrb.mxu0 %v4272_v52  ;;  %v5322_v52 = vld [vmem:[#allocation7 + $0x21c] sm:$0xf]  ;;  %v4497_v47 = vld [vmem:[#allocation7 + $0x268] sm:$0xf0] }
 0x4c7   : > { %2464 = vmatpush.bf16.msrb.mxu3 %v4604_v18  ;;  %v5274_v18 = vld [vmem:[#allocation7 + $0x9c] sm:$0xf] }
 0x4c8   : > { %v4292_v32 = vor.u32 %v5274_v18, %v4289_v25  ;;  %v4561_v18 = vld [vmem:[#allocation7 + $0x2e8] sm:$0xf0]  ;;  %v4487_v25 = vld [vmem:[#allocation7 + $0x220] sm:$0xf] }
 0x4c9   : > { %2431 = vmatpush.bf16.msrb.mxu0 %v4208_v61  ;;  %v4417_v61 = vld [vmem:[#allocation7 + $0x1d8] sm:$0xf0] }
 0x4ca   : > { %v4420_v62 = vor.u32 %v5306_v58, %v4417_v61 }
 0x4cb   : > { %2465 = vmatpush.bf16.msrb.mxu3 %v4540_v34  ;;  %v5258_v34 = vld [vmem:[#allocation7 + $0x1c] sm:$0xf] }
 0x4cd   : > { %2476 = vmatpush.bf16.msra.mxu0 %v4672_v7  ;;  %v4279_v7 = vld [vmem:[#allocation7 + $0x90] sm:$0xf] }
 0x4ce   : > { %v4280_v21 = vor.u32 %v5281_v9, %v4279_v7  ;;  %v4551_v7 = vld [vmem:[#allocation7 + $0x2a0] sm:$0xf] }
 0x4cf   : > { %2466 = vmatpush.bf16.msrb.mxu3 %v4476_v48  ;;  %v5610_v48 = vld [vmem:[#allocation4] ss:$0 sm:$0xff] }
 0x4d1   : > { %2477 = vmatpush.bf16.msra.mxu0 %v4608_v26  ;;  %v4215_v26 = vld [vmem:[#allocation7 + $0x10] sm:$0xf] }
 0x4d2   : > { %v4216_v36 = vor.u32 %v5265_v27, %v4215_v26  ;;  %v5331_v26 = vld [vmem:[#allocation7 + $0x25c] sm:$0xf0] }
 0x4d3   : > { %2467 = vmatpush.bf16.msrb.mxu3 %v4412_v6  ;;  %v5372_v6 = vld [vmem:[#allocation7 + $0x3ac] sm:$0xf] }
 0x4d5   : > { %2478 = vmatpush.bf16.msra.mxu0 %v4544_v35  ;;  %v4225_v35 = vld [vmem:[#allocation7 + $0x58] sm:$0xf0] }
 0x4d6   : > { %v4228_v39 = vor.u32 %v5258_v34, %v4225_v35  ;;  %v4488_v34 = vor.u32 %v5331_v26, %v4487_v25  ;;  %v4697_v25 = vld [vmem:[#allocation7 + $0x3f0] sm:$0xf0]  ;;  %v4703_v26 = vld [vmem:[#allocation7 + $0x3b8] sm:$0xf] }
 0x4d7   : > { %2468 = vmatpush.bf16.msrb.mxu3 %v4348_v3  ;;  %v5356_v3 = vld [vmem:[#allocation7 + $0x32c] sm:$0xf] }
 0x4d9   : > { %2479 = vmatpush.bf16.msra.mxu0 %v4480_v51 }
 0x4dd   : > { %2480 = vmatpush.bf16.msra.mxu0 %v4416_v49  ;;  %v4689_v49 = vld [vmem:[#allocation7 + $0x3e8] sm:$0xf0] }
 0x4de   : > { %v4692_v0 = vor.u32 %v5372_v6, %v4689_v49  ;;  %v4369_v6 = vld [vmem:[#allocation7 + $0x168] sm:$0xf0] }
 0x520   : > { %v1559_v53 = vpop.xlane.xlu0 %1558 }
 0x521   : > { %v1567_v55 = vmul.f32 %v6493_v46, %v1559_v53  ;;  %v4481_v53 = vld [vmem:[#allocation7 + $0x258] sm:$0xf0] }
 0x522   : > { %v4484_v54 = vor.u32 %v5322_v52, %v4481_v53  ;;  %v5611_v52 = vld [vmem:[#allocation6] ss:$0 sm:$0xff] }
 0x523   : > { %v6497_v10 = vsub.f32 %v6480_v20, %v1567_v55  ;;  %v4663_v20 = vld [vmem:[#allocation7 + $0x390] sm:$0xf] }
 0x524   : > { %v4664_v19 = vor.u32 %v5377_v17, %v4663_v20  ;;  %v4407_v55 = vld [vmem:[#allocation7 + $0x190] sm:$0xf]  ;;  %2492 = vmatpush.bf16.msrb.mxu1 %v4484_v54 }
 0x525   : > { %v1569_v23 = vmul.f32 %v6497_v10, %v6497_v10  ;;  %v5297_v20 = vld [vmem:[#allocation7 + $0x14c] sm:$0xf0] }
 0x526   : > { %2450 = vmatpush.bf16.msra.mxu2 %v4664_v19  ;;  %v4344_v17 = vor.u32 %v5297_v20, %v4343_v63  ;;  %v5298_v19 = vld [vmem:[#allocation7 + $0x154] sm:$0xf0]  ;;  %v4615_v63 = vld [vmem:[#allocation7 + $0x320] sm:$0xf] }
 0x527   : > { %1570 = vadd.xlane.f32.xlu1 %v1569_v23  ;;  %v5313_v23 = vld [vmem:[#allocation7 + $0x1cc] sm:$0xf0]  ;;  %v4352_v24 = vor.u32 %v5298_v19, %v4351_v2  ;;  %v5363_v20 = vld [vmem:[#allocation7 + $0x35c] sm:$0xf0]  ;;  %v4623_v2 = vld [vmem:[#allocation7 + $0x328] sm:$0xf] }
 0x528   : > { %v4408_v57 = vor.u32 %v5313_v23, %v4407_v55  ;;  %2493 = vmatpush.bf16.msrb.mxu1 %v4420_v62  ;;  %v4679_v55 = vld [vmem:[#allocation7 + $0x3a0] sm:$0xf]  ;;  %v5364_v19 = vld [vmem:[#allocation7 + $0x364] sm:$0xf0]  ;;  %v4616_v4 = vor.u32 %v5363_v20, %v4615_v63 }
 0x529   : > { %2481 = vmatpush.bf16.msra.mxu0 %v4352_v24  ;;  %v5379_v23 = vld [vmem:[#allocation7 + $0x3dc] sm:$0xf0]  ;;  %v4625_v24 = vld [vmem:[#allocation7 + $0x368] sm:$0xf0] }
 0x52a   : > { %2451 = vmatpush.bf16.msra.mxu2 %v4600_v12  ;;  %v4281_v12 = vld [vmem:[#allocation7 + $0xd0] sm:$0xf0]  ;;  %v4680_v61 = vor.u32 %v5379_v23, %v4679_v55  ;;  %v4628_v9 = vor.u32 %v5356_v3, %v4625_v24  ;;  %v5291_v23 = vld [vmem:[#allocation7 + $0x124] sm:$0xf]  ;;  %v5283_v63 = vld [vmem:[#allocation7 + $0xdc] sm:$0xf0] }
 0x52b   : > { %v4284_v22 = vor.u32 %v5273_v11, %v4281_v12  ;;  %v5339_v11 = vld [vmem:[#allocation7 + $0x2a4] sm:$0xf]  ;;  %v4305_v3 = vld [vmem:[#allocation7 + $0xe8] sm:$0xf0]  ;;  %v4231_v24 = vld [vmem:[#allocation7 + $0x20] sm:$0xf] }
 0x52c   : > { %2494 = vmatpush.bf16.msrb.mxu1 %v4356_v50  ;;  %v4624_v50 = vor.u32 %v5364_v19, %v4623_v2  ;;  %v4553_v12 = vld [vmem:[#allocation7 + $0x2e0] sm:$0xf0]  ;;  %v5284_v2 = vld [vmem:[#allocation7 + $0xe4] sm:$0xf0]  ;;  %v5276_v19 = vld [vmem:[#allocation7 + $0xac] sm:$0xf] }
 0x52d   : > { %2469 = vmatpush.bf16.msrb.mxu3 %v4284_v22  ;;  %2482 = vmatpush.bf16.msra.mxu0 %v4288_v29  ;;  %v4556_v22 = vor.u32 %v5339_v11, %v4553_v12  ;;  %v5323_v29 = vld [vmem:[#allocation7 + $0x224] sm:$0xf]  ;;  %v4308_v11 = vor.u32 %v5276_v19, %v4305_v3  ;;  %v4239_v12 = vld [vmem:[#allocation7 + $0x28] sm:$0xf]  ;;  %v4513_v19 = vld [vmem:[#allocation7 + $0x278] sm:$0xf0] }
 0x52e   : > { %2452 = vmatpush.bf16.msra.mxu2 %v4536_v31  ;;  %v4217_v31 = vld [vmem:[#allocation7 + $0x50] sm:$0xf0] }
 0x52f   : > { %v4220_v37 = vor.u32 %v5257_v30, %v4217_v31  ;;  %v4489_v30 = vld [vmem:[#allocation7 + $0x260] sm:$0xf0]  ;;  %v4495_v31 = vld [vmem:[#allocation7 + $0x228] sm:$0xf] }
 0x530   : > { %2495 = vmatpush.bf16.msrb.mxu1 %v4292_v32  ;;  %v5332_v32 = vld [vmem:[#allocation7 + $0x264] sm:$0xf0]  ;;  %v4492_v35 = vor.u32 %v5323_v29, %v4489_v30  ;;  %v5382_v29 = vld [vmem:[#allocation7 + $0x3f4] sm:$0xf0]  ;;  %v5374_v30 = vld [vmem:[#allocation7 + $0x3bc] sm:$0xf] }
 0x531   : > { %2470 = vmatpush.bf16.msrb.mxu3 %v4220_v37  ;;  %2483 = vmatpush.bf16.msra.mxu0 %v4224_v38  ;;  %v5315_v37 = vld [vmem:[#allocation7 + $0x1dc] sm:$0xf0]  ;;  %v4496_v38 = vor.u32 %v5332_v32, %v4495_v31  ;;  %v4705_v31 = vld [vmem:[#allocation7 + $0x3f8] sm:$0xf0] }
 0x532   : > { %2453 = vmatpush.bf16.msra.mxu2 %v4472_v42 }
 0x534   : > { %2496 = vmatpush.bf16.msrb.mxu1 %v4228_v39  ;;  %v4500_v39 = vor.u32 %v5324_v33, %v4497_v47 }
 0x536   : > { %2454 = vmatpush.bf16.msra.mxu2 %v4408_v57  ;;  %v4681_v57 = vld [vmem:[#allocation7 + $0x3e0] sm:$0xf0] }
 0x537   : > { %v4684_v62 = vor.u32 %v5371_v56, %v4681_v57  ;;  %v4361_v56 = vld [vmem:[#allocation7 + $0x160] sm:$0xf0]  ;;  %v4367_v57 = vld [vmem:[#allocation7 + $0x128] sm:$0xf] }
 0x53a   : > { %2455 = vmatpush.bf16.msra.mxu2 %v4344_v17  ;;  %v5355_v17 = vld [vmem:[#allocation7 + $0x324] sm:$0xf] }
 0x53b   : > { %v4620_v5 = vor.u32 %v5355_v17, %v4617_v1  ;;  %v4297_v17 = vld [vmem:[#allocation7 + $0xe0] sm:$0xf0]  ;;  %v4303_v1 = vld [vmem:[#allocation7 + $0xa8] sm:$0xf] }
 0x53e   : > { %2456 = vmatpush.bf16.msra.mxu2 %v4280_v21 }
 0x542   : > { %2457 = vmatpush.bf16.msra.mxu2 %v4216_v36  ;;  %v4423_v36 = vld [vmem:[#allocation7 + $0x1a0] sm:$0xf] }
 0x59a   : > { %v1571_v8 = vpop.xlane.xlu1 %1570 }
 0x59b   : > { %v1572_v14 = vmul.f32 %v1571_v8, %v6493_v46  ;;  %v5347_v8 = vld [vmem:[#allocation7 + $0x2dc] sm:$0xf0] }
 0x59c   : > { %v4552_v21 = vor.u32 %v5347_v8, %v4551_v7  ;;  %v5267_v7 = vld [vmem:[#allocation7 + $0x5c] sm:$0xf0]  ;;  %v5259_v8 = vld [vmem:[#allocation7 + $0x24] sm:$0xf] }
 0x59d   : > { %v1573_v28 = vadd.f32 1e-05, %v1572_v14  ;;  %v4559_v14 = vld [vmem:[#allocation7 + $0x2a8] sm:$0xf] }
 0x59e   : > { %v4560_v27 = vor.u32 %v5348_v15, %v4559_v14  ;;  %v5268_v14 = vld [vmem:[#allocation7 + $0x64] sm:$0xf0]  ;;  %v5260_v15 = vld [vmem:[#allocation7 + $0x2c] sm:$0xf] }
 0x59f   : > { %5633 = vrsqrt.f32 %v1573_v28  ;;  %vm1580_vm8 = vweird.f32 %v1573_v28  ;;  %v4240_v32 = vor.u32 %v5268_v14, %v4239_v12  ;;  %v5318_v12 = vld [vmem:[#allocation7 + $0x1f4] sm:$0xf0]  ;;  %v5310_v14 = vld [vmem:[#allocation7 + $0x1bc] sm:$0xf] }
 0x5a5   : > { %v5634_v40 = vpop.eup %5633 }
 0x5a6   : > { %v1575_v41 = vmul.f32 %v5634_v40, %v1573_v28  ;;  %vm1581_vm7 = vweird.f32 %v5634_v40  ;;  %v4564_v28 = vor.u32 %v5340_v16, %v4561_v18  ;;  %v4241_v16 = vld [vmem:[#allocation7 + $0x68] sm:$0xf0]  ;;  %v4695_v18 = vld [vmem:[#allocation7 + $0x3b0] sm:$0xf] }
 0x5a7   : > { %vm1582_vm9 = vmor %vm1580_vm8, %vm1581_vm7  ;;  %v4244_v33 = vor.u32 %v5260_v15, %v4241_v16  ;;  %v4449_v15 = vld [vmem:[#allocation7 + $0x1f8] sm:$0xf0] }
 0x5a8   : > { %v1576_v42 = vmul.f32 %v5634_v40, %v1575_v41  ;;  %v4425_v41 = vld [vmem:[#allocation7 + $0x1e0] sm:$0xf0] }
 0x5aa   : > { %v1577_v43 = vmul.f32 0.5, %v1576_v42  ;;  %v4431_v42 = vld [vmem:[#allocation7 + $0x1a8] sm:$0xf] }
 0x5ac   : > { %v1578_v44 = vsub.f32 1.5, %v1577_v43  ;;  %v5316_v43 = vld [vmem:[#allocation7 + $0x1e4] sm:$0xf0] }
 0x5ae   : > { %v1579_v45 = vmul.f32 %v5634_v40, %v1578_v44  ;;  %v5308_v44 = vld [vmem:[#allocation7 + $0x1ac] sm:$0xf] }
 0x5b0   : > { %v1583_v51 = vsel %vm1582_vm9, %v5634_v40, %v1579_v45  ;;  %v5307_v40 = vld [vmem:[#allocation7 + $0x1a4] sm:$0xf]  ;;  %v4433_v45 = vld [vmem:[#allocation7 + $0x1e8] sm:$0xf0] }
 0x5b1   : > { %v1584_v53 = vmul.f32 %v1583_v51, %v6497_v10  ;;  %v4688_v10 = vor.u32 %v5380_v60, %v4687_v59  ;;  %v4428_v51 = vor.u32 %v5307_v40, %v4425_v41  ;;  %v4436_v55 = vor.u32 %v5308_v44, %v4433_v45  ;;  %v5300_v59 = vld [vmem:[#allocation7 + $0x164] sm:$0xf0]  ;;  %v5292_v60 = vld [vmem:[#allocation7 + $0x12c] sm:$0xf]  ;;  %v4633_v40 = vld [vmem:[#allocation7 + $0x370] sm:$0xf0] }
 0x5b2   : > { %v4368_v20 = vor.u32 %v5300_v59, %v4367_v57  ;;  %v4639_v41 = vld [vmem:[#allocation7 + $0x338] sm:$0xf]  ;;  %v4641_v44 = vld [vmem:[#allocation7 + $0x378] sm:$0xf0] }
 0x5b3   : > { %v1588_v54 = vmul.f32 %v5610_v48, %v1584_v53  ;;  %v4424_v48 = vor.u32 %v5315_v37, %v4423_v36  ;;  %v5299_v53 = vld [vmem:[#allocation7 + $0x15c] sm:$0xf0]  ;;  %v5365_v36 = vld [vmem:[#allocation7 + $0x36c] sm:$0xf0]  ;;  %v4704_v37 = vor.u32 %v5382_v29, %v4703_v26  ;;  %v5350_v57 = vld [vmem:[#allocation7 + $0x2f4] sm:$0xf0]  ;;  %v4452_v26 = vor.u32 %v5310_v14, %v4449_v15 }
 0x5b4   : > { %v5342_v59 = vld [vmem:[#allocation7 + $0x2bc] sm:$0xf]  ;;  %v4383_v29 = vld [vmem:[#allocation7 + $0x138] sm:$0xf]  ;;  %v5401_v14 = vld [vmem:[#allocation9 + $0x90] sm:$0xff] }
 0x5b5   : > { %v6503_v13 = vadd.f32 %v5611_v52, %v1588_v54  ;;  %v4359_v52 = vld [vmem:[#allocation7 + $0x120] sm:$0xf]  ;;  %v4432_v54 = vor.u32 %v5316_v43, %v4431_v42  ;;  %v5366_v42 = vld [vmem:[#allocation7 + $0x374] sm:$0xf0]  ;;  %v5358_v43 = vld [vmem:[#allocation7 + $0x33c] sm:$0xf] }
 0x5b6   : > { %v4360_v49 = vor.u32 %v5299_v53, %v4359_v52  ;;  %v5349_v52 = vld [vmem:[#allocation7 + $0x2ec] sm:$0xf0]  ;;  %v4640_v53 = vor.u32 %v5366_v42, %v4639_v41  ;;  %v5286_v41 = vld [vmem:[#allocation7 + $0xf4] sm:$0xf0]  ;;  %v5278_v42 = vld [vmem:[#allocation7 + $0xbc] sm:$0xf] }
 0x5b7   : > { %v6507_v58 = vpack.c.bf16 %v6503_v13, %v6503_v13  ;;  %v5409_v15 = vld [vmem:[#allocation9 + $0xd0] sm:$0xff] }
 0x5b9   : > { %2406 = vmatmul.bf16.vlgmr.msrb.gmra.mxu2 %v6507_v58  ;;  %2419 = vmatmul.bf16.vlgmr.msra.gmra.mxu3 %v6507_v58 }
 0x5ba   : > { %2432 = vmatmul.bf16.vlgmr.msrb.gmra.mxu0 %v6507_v58  ;;  %2445 = vmatmul.bf16.vlgmr.msra.gmra.mxu1 %v6507_v58 }
 0x5bb   : > { %2502 = vmatpush.bf16.msrb.mxu2 %v4680_v61  ;;  %2515 = vmatpush.bf16.msra.mxu3 %v4684_v62  ;;  %v4364_v61 = vor.u32 %v5291_v23, %v4361_v56  ;;  %v4295_v62 = vld [vmem:[#allocation7 + $0xa0] sm:$0xf]  ;;  %v4569_v23 = vld [vmem:[#allocation7 + $0x2f0] sm:$0xf0]  ;;  %v4575_v56 = vld [vmem:[#allocation7 + $0x2b8] sm:$0xf] }
 0x5bc   : > { %2528 = vmatpush.bf16.msrb.mxu0 %v4688_v10  ;;  %2541 = vmatpush.bf16.msra.mxu1 %v4692_v0  ;;  %v4372_v10 = vor.u32 %v5292_v60, %v4369_v6  ;;  %v5275_v0 = vld [vmem:[#allocation7 + $0xa4] sm:$0xf]  ;;  %v4577_v60 = vld [vmem:[#allocation7 + $0x2f8] sm:$0xf0] }
 0x5bf   : > { %2503 = vmatpush.bf16.msrb.mxu2 %v4616_v4  ;;  %2516 = vmatpush.bf16.msra.mxu3 %v4620_v5  ;;  %v4296_v4 = vor.u32 %v5283_v63, %v4295_v62  ;;  %v4300_v5 = vor.u32 %v5275_v0, %v4297_v17  ;;  %v5333_v62 = vld [vmem:[#allocation7 + $0x26c] sm:$0xf0]  ;;  %v4576_v63 = vor.u32 %v5350_v57, %v4575_v56  ;;  %v4505_v0 = vld [vmem:[#allocation7 + $0x270] sm:$0xf0]  ;;  %v4511_v17 = vld [vmem:[#allocation7 + $0x238] sm:$0xf] }
 0x5c0   : > { %2529 = vmatpush.bf16.msrb.mxu0 %v4624_v50  ;;  %2542 = vmatpush.bf16.msra.mxu1 %v4628_v9  ;;  %v4233_v50 = vld [vmem:[#allocation7 + $0x60] sm:$0xf0]  ;;  %v4304_v9 = vor.u32 %v5284_v2, %v4303_v1  ;;  %v5334_v1 = vld [vmem:[#allocation7 + $0x274] sm:$0xf0]  ;;  %v5326_v2 = vld [vmem:[#allocation7 + $0x23c] sm:$0xf] }
 0x5c1   : > { %v5270_v56 = vld [vmem:[#allocation7 + $0x74] sm:$0xf0]  ;;  %v5262_v57 = vld [vmem:[#allocation7 + $0x3c] sm:$0xf] }
 0x5c3   : > { %2504 = vmatpush.bf16.msrb.mxu2 %v4552_v21  ;;  %2517 = vmatpush.bf16.msra.mxu3 %v4556_v22  ;;  %v5381_v21 = vld [vmem:[#allocation7 + $0x3ec] sm:$0xf0]  ;;  %v5373_v22 = vld [vmem:[#allocation7 + $0x3b4] sm:$0xf] }
 0x5c4   : > { %2530 = vmatpush.bf16.msrb.mxu0 %v4560_v27  ;;  %2543 = vmatpush.bf16.msra.mxu1 %v4564_v28  ;;  %v4232_v27 = vor.u32 %v5267_v7, %v4231_v24  ;;  %v4236_v28 = vor.u32 %v5259_v8, %v4233_v50  ;;  %v4696_v47 = vor.u32 %v5381_v21, %v4695_v18  ;;  %v5309_v50 = vld [vmem:[#allocation7 + $0x1b4] sm:$0xf]  ;;  %v4375_v21 = vld [vmem:[#allocation7 + $0x130] sm:$0xf] }
 0x5c5   : > { %v4512_v7 = vor.u32 %v5334_v1, %v4511_v17  ;;  %v4516_v8 = vor.u32 %v5326_v2, %v4513_v19  ;;  %v5413_v17 = vld [vmem:[#allocation9 + $0xf0] sm:$0xff]  ;;  %v5404_v19 = vld [vmem:[#allocation9 + $0xa8] sm:$0xff] }
 0x5c6   : > { %v5389_v1 = vld [vmem:[#allocation9 + $0x30] sm:$0xff] }
 0x5c7   : > { %2505 = vmatpush.bf16.msrb.mxu2 %v4488_v34  ;;  %2518 = vmatpush.bf16.msra.mxu3 %v4492_v35  ;;  %v4700_v34 = vor.u32 %v5373_v22, %v4697_v25  ;;  %v4631_v35 = vld [vmem:[#allocation7 + $0x330] sm:$0xf] }
 0x5c8   : > { %2531 = vmatpush.bf16.msrb.mxu0 %v4496_v38  ;;  %2544 = vmatpush.bf16.msra.mxu1 %v4500_v39  ;;  %v4708_v38 = vor.u32 %v5374_v30, %v4705_v31  ;;  %v5357_v39 = vld [vmem:[#allocation7 + $0x334] sm:$0xf]  ;;  %v4632_v45 = vor.u32 %v5365_v36, %v4631_v35  ;;  %v5301_v22 = vld [vmem:[#allocation7 + $0x16c] sm:$0xf0]  ;;  %v5302_v30 = vld [vmem:[#allocation7 + $0x174] sm:$0xf0] }
 0x5c9   : > { %2458 = vmatmul.bf16.vlgmr.msra.gmra.mxu2 %v6507_v58  ;;  %2471 = vmatmul.bf16.vlgmr.msrb.gmra.mxu3 %v6507_v58  ;;  %v5294_v31 = vld [vmem:[#allocation7 + $0x13c] sm:$0xf]  ;;  %v5285_v35 = vld [vmem:[#allocation7 + $0xec] sm:$0xf0]  ;;  %v4384_v36 = vor.u32 %v5302_v30, %v4383_v29 }
 0x5ca   : > { %2484 = vmatmul.bf16.vlgmr.msra.gmra.mxu0 %v6507_v58  ;;  %2497 = vmatmul.bf16.vlgmr.msrb.gmra.mxu1 %v6507_v58  ;;  %v5397_v2 = vld [vmem:[#allocation9 + $0x70] sm:$0xff]  ;;  %v5438_v29 = vld [vmem:[#allocation9 + $0x1b8] sm:$0xff] }
 0x5cb   : > { %2506 = vmatpush.bf16.msrb.mxu2 %v4424_v48  ;;  %2519 = vmatpush.bf16.msra.mxu3 %v4428_v51  ;;  %v4636_v48 = vor.u32 %v5357_v39, %v4633_v40  ;;  %v4567_v51 = vld [vmem:[#allocation7 + $0x2b0] sm:$0xf]  ;;  %v4313_v39 = vld [vmem:[#allocation7 + $0xf0] sm:$0xf0]  ;;  %v4319_v40 = vld [vmem:[#allocation7 + $0xb8] sm:$0xf] }
 0x5cc   : > { %2532 = vmatpush.bf16.msrb.mxu0 %v4432_v54  ;;  %2545 = vmatpush.bf16.msra.mxu1 %v4436_v55  ;;  %v4644_v54 = vor.u32 %v5358_v43, %v4641_v44  ;;  %v5341_v55 = vld [vmem:[#allocation7 + $0x2b4] sm:$0xf]  ;;  %v4568_v6 = vor.u32 %v5349_v52, %v4567_v51  ;;  %v4321_v43 = vld [vmem:[#allocation7 + $0xf8] sm:$0xf0]  ;;  %v5269_v51 = vld [vmem:[#allocation7 + $0x6c] sm:$0xf0]  ;;  %v4320_v52 = vor.u32 %v5286_v41, %v4319_v40 }
 0x5cd   : > { %v5446_v30 = vld [vmem:[#allocation9 + $0x1f8] sm:$0xff]  ;;  %v5420_v40 = vld [vmem:[#allocation9 + $0x128] sm:$0xff] }
 0x5ce   : > { %v5428_v41 = vld [vmem:[#allocation9 + $0x168] sm:$0xff] }
 0x5cf   : > { %2507 = vmatpush.bf16.msrb.mxu2 %v4360_v49  ;;  %2520 = vmatpush.bf16.msra.mxu3 %v4364_v61  ;;  %v4572_v49 = vor.u32 %v5341_v55, %v4569_v23  ;;  %v4503_v61 = vld [vmem:[#allocation7 + $0x230] sm:$0xf]  ;;  %v4249_v55 = vld [vmem:[#allocation7 + $0x70] sm:$0xf0]  ;;  %v4255_v23 = vld [vmem:[#allocation7 + $0x38] sm:$0xf] }
 0x5d0   : > { %2533 = vmatpush.bf16.msrb.mxu0 %v4368_v20  ;;  %2546 = vmatpush.bf16.msra.mxu1 %v4372_v10  ;;  %v4580_v20 = vor.u32 %v5342_v59, %v4577_v60  ;;  %v5325_v10 = vld [vmem:[#allocation7 + $0x234] sm:$0xf]  ;;  %v4504_v3 = vor.u32 %v5333_v62, %v4503_v61  ;;  %v4257_v59 = vld [vmem:[#allocation7 + $0x78] sm:$0xf0] }
 0x5d1   : > { %v4508_v24 = vor.u32 %v5325_v10, %v4505_v0  ;;  %v4260_v61 = vor.u32 %v5262_v57, %v4257_v59  ;;  %v5406_v62 = vld [vmem:[#allocation9 + $0xb8] sm:$0xff]  ;;  %v5405_v0 = vld [vmem:[#allocation9 + $0xb0] sm:$0xff]  ;;  %v5432_v57 = vld [vmem:[#allocation9 + $0x188] sm:$0xff] }
 0x5d2   : > { %v5398_v10 = vld [vmem:[#allocation9 + $0x78] sm:$0xff]  ;;  %v5440_v59 = vld [vmem:[#allocation9 + $0x1c8] sm:$0xff] }
 0x5d3   : > { %2508 = vmatpush.bf16.msrb.mxu2 %v4296_v4  ;;  %2521 = vmatpush.bf16.msra.mxu3 %v4300_v5  ;;  %v4439_v4 = vld [vmem:[#allocation7 + $0x1b0] sm:$0xf] }
 0x5d4   : > { %2534 = vmatpush.bf16.msrb.mxu0 %v4304_v9  ;;  %2547 = vmatpush.bf16.msra.mxu1 %v4308_v11  ;;  %v5317_v5 = vld [vmem:[#allocation7 + $0x1ec] sm:$0xf0]  ;;  %v4441_v9 = vld [vmem:[#allocation7 + $0x1f0] sm:$0xf0]  ;;  %v4447_v11 = vld [vmem:[#allocation7 + $0x1b8] sm:$0xf] }
 0x5d5   : > { %v4440_v16 = vor.u32 %v5317_v5, %v4439_v4  ;;  %v4444_v18 = vor.u32 %v5309_v50, %v4441_v9  ;;  %v4448_v25 = vor.u32 %v5318_v12, %v4447_v11  ;;  %v5396_v4 = vld [vmem:[#allocation9 + $0x68] sm:$0xff]  ;;  %v5403_v5 = vld [vmem:[#allocation9 + $0xa0] sm:$0xff]  ;;  %v5402_v50 = vld [vmem:[#allocation9 + $0x98] sm:$0xff] }
 0x5d6   : > { %v5410_v9 = vld [vmem:[#allocation9 + $0xd8] sm:$0xff] }
 0x5d7   : > { %2509 = vmatpush.bf16.msrb.mxu2 %v4232_v27  ;;  %2522 = vmatpush.bf16.msra.mxu3 %v4236_v28  ;;  %v5293_v27 = vld [vmem:[#allocation7 + $0x134] sm:$0xf]  ;;  %v5386_v11 = vld [vmem:[#allocation9 + $0x18] sm:$0xff] }
 0x5d8   : > { %2535 = vmatpush.bf16.msrb.mxu0 %v4240_v32  ;;  %2548 = vmatpush.bf16.msra.mxu1 %v4244_v33  ;;  %v4377_v28 = vld [vmem:[#allocation7 + $0x170] sm:$0xf0]  ;;  %v4385_v32 = vld [vmem:[#allocation7 + $0x178] sm:$0xf0]  ;;  %v4376_v33 = vor.u32 %v5301_v22, %v4375_v21  ;;  %v5400_v21 = vld [vmem:[#allocation9 + $0x88] sm:$0xff] }
 0x5d9   : > { %v5394_v12 = vld [vmem:[#allocation9 + $0x58] sm:$0xff]  ;;  %v5408_v22 = vld [vmem:[#allocation9 + $0xc8] sm:$0xff] }
 0x5da   : > { %2510 = vmatmul.bf16.vlgmr.msrb.gmra.mxu2 %v6507_v58  ;;  %2523 = vmatmul.bf16.vlgmr.msra.gmra.mxu3 %v6507_v58 }
 0x5db   : > { %2554 = vmatpush.bf16.msra.mxu2 %v4696_v47  ;;  %2567 = vmatpush.bf16.msrb.mxu3 %v4700_v34  ;;  %v4380_v47 = vor.u32 %v5293_v27, %v4377_v28  ;;  %v4311_v34 = vld [vmem:[#allocation7 + $0xb0] sm:$0xf]  ;;  %v5399_v27 = vld [vmem:[#allocation9 + $0x80] sm:$0xff] }
 0x5dc   : > { %2580 = vmatpush.bf16.msra.mxu0 %v4704_v37  ;;  %2593 = vmatpush.bf16.msrb.mxu1 %v4708_v38  ;;  %v4388_v37 = vor.u32 %v5294_v31, %v4385_v32  ;;  %v5277_v38 = vld [vmem:[#allocation7 + $0xb4] sm:$0xf]  ;;  %v4312_v44 = vor.u32 %v5285_v35, %v4311_v34  ;;  %v5407_v28 = vld [vmem:[#allocation9 + $0xc0] sm:$0xff] }
 0x5dd   : > { %2536 = vmatmul.bf16.vlgmr.msrb.gmra.mxu0 %v6507_v58  ;;  %2549 = vmatmul.bf16.vlgmr.msra.gmra.mxu1 %v6507_v58  ;;  %v5383_v31 = vld [vmem:[#allocation9] sm:$0xff]  ;;  %v5437_v34 = vld [vmem:[#allocation9 + $0x1b0] sm:$0xff] }
 0x5de   : > { %v5391_v32 = vld [vmem:[#allocation9 + $0x40] sm:$0xff]  ;;  %v5445_v35 = vld [vmem:[#allocation9 + $0x1f0] sm:$0xff] }
 0x5df   : > { %2555 = vmatpush.bf16.msra.mxu2 %v4632_v45  ;;  %2568 = vmatpush.bf16.msrb.mxu3 %v4636_v48  ;;  %v4316_v45 = vor.u32 %v5277_v38, %v4313_v39  ;;  %v4247_v48 = vld [vmem:[#allocation7 + $0x30] sm:$0xf]  ;;  %v5436_v38 = vld [vmem:[#allocation9 + $0x1a8] sm:$0xff] }
 0x5e0   : > { %2581 = vmatpush.bf16.msra.mxu0 %v4640_v53  ;;  %2594 = vmatpush.bf16.msrb.mxu1 %v4644_v54  ;;  %v4324_v53 = vor.u32 %v5278_v42, %v4321_v43  ;;  %v5261_v54 = vld [vmem:[#allocation7 + $0x34] sm:$0xf]  ;;  %v4248_v60 = vor.u32 %v5269_v51, %v4247_v48  ;;  %v5444_v39 = vld [vmem:[#allocation9 + $0x1e8] sm:$0xff]  ;;  %v5435_v42 = vld [vmem:[#allocation9 + $0x1a0] sm:$0xff] }
 0x5e1   : > { %v5443_v43 = vld [vmem:[#allocation9 + $0x1e0] sm:$0xff]  ;;  %v5434_v48 = vld [vmem:[#allocation9 + $0x198] sm:$0xff] }
 0x5e2   : > { %v5442_v51 = vld [vmem:[#allocation9 + $0x1d8] sm:$0xff] }
 0x5e3   : > { %2556 = vmatpush.bf16.msra.mxu2 %v4568_v6  ;;  %2569 = vmatpush.bf16.msrb.mxu3 %v4572_v49  ;;  %v4252_v6 = vor.u32 %v5261_v54, %v4249_v55  ;;  %v4256_v49 = vor.u32 %v5270_v56, %v4255_v23  ;;  %v5433_v54 = vld [vmem:[#allocation9 + $0x190] sm:$0xff] }
 0x5e4   : > { %2582 = vmatpush.bf16.msra.mxu0 %v4576_v63  ;;  %2595 = vmatpush.bf16.msrb.mxu1 %v4580_v20  ;;  %v5414_v63 = vld [vmem:[#allocation9 + $0xf8] sm:$0xff]  ;;  %v5441_v55 = vld [vmem:[#allocation9 + $0x1d0] sm:$0xff] }
 0x5e5   : > { %v5390_v20 = vld [vmem:[#allocation9 + $0x38] sm:$0xff]  ;;  %v5417_v23 = vld [vmem:[#allocation9 + $0x110] sm:$0xff] }
 0x5e6   : > { %v5425_v56 = vld [vmem:[#allocation9 + $0x150] sm:$0xff] }
 0x5e7   : > { %2557 = vmatpush.bf16.msra.mxu2 %v4504_v3  ;;  %2570 = vmatpush.bf16.msrb.mxu3 %v4508_v24  ;;  %v5412_v3 = vld [vmem:[#allocation9 + $0xe8] sm:$0xff] }
 0x5e8   : > { %2583 = vmatpush.bf16.msra.mxu0 %v4512_v7  ;;  %2596 = vmatpush.bf16.msrb.mxu1 %v4516_v8  ;;  %v5388_v24 = vld [vmem:[#allocation9 + $0x28] sm:$0xff]  ;;  %v5411_v7 = vld [vmem:[#allocation9 + $0xe0] sm:$0xff] }
 0x5e9   : > { %v5387_v8 = vld [vmem:[#allocation9 + $0x20] sm:$0xff] }
 0x5eb   : > { %2558 = vmatpush.bf16.msra.mxu2 %v4440_v16  ;;  %2571 = vmatpush.bf16.msrb.mxu3 %v4444_v18  ;;  %v5385_v16 = vld [vmem:[#allocation9 + $0x10] sm:$0xff] }
 0x5ec   : > { %2584 = vmatpush.bf16.msra.mxu0 %v4448_v25  ;;  %2597 = vmatpush.bf16.msrb.mxu1 %v4452_v26  ;;  %v5393_v18 = vld [vmem:[#allocation9 + $0x50] sm:$0xff]  ;;  %v5384_v25 = vld [vmem:[#allocation9 + $0x8] sm:$0xff] }
 0x5ed   : > { %v5392_v26 = vld [vmem:[#allocation9 + $0x48] sm:$0xff] }
 0x5ef   : > { %2559 = vmatpush.bf16.msra.mxu2 %v4376_v33  ;;  %2572 = vmatpush.bf16.msrb.mxu3 %v4380_v47  ;;  %v5422_v33 = vld [vmem:[#allocation9 + $0x138] sm:$0xff] }
 0x5f0   : > { %2585 = vmatpush.bf16.msra.mxu0 %v4384_v36  ;;  %2598 = vmatpush.bf16.msrb.mxu1 %v4388_v37  ;;  %v5430_v47 = vld [vmem:[#allocation9 + $0x178] sm:$0xff]  ;;  %v5421_v36 = vld [vmem:[#allocation9 + $0x130] sm:$0xff] }
 0x5f1   : > { %v5429_v37 = vld [vmem:[#allocation9 + $0x170] sm:$0xff] }
 0x5f3   : > { %2560 = vmatpush.bf16.msra.mxu2 %v4312_v44  ;;  %2573 = vmatpush.bf16.msrb.mxu3 %v4316_v45  ;;  %v5419_v44 = vld [vmem:[#allocation9 + $0x120] sm:$0xff] }
 0x5f4   : > { %2586 = vmatpush.bf16.msra.mxu0 %v4320_v52  ;;  %2599 = vmatpush.bf16.msrb.mxu1 %v4324_v53  ;;  %v5427_v45 = vld [vmem:[#allocation9 + $0x160] sm:$0xff]  ;;  %v5418_v52 = vld [vmem:[#allocation9 + $0x118] sm:$0xff] }
 0x5f5   : > { %v5426_v53 = vld [vmem:[#allocation9 + $0x158] sm:$0xff] }
 0x5f7   : > { %2561 = vmatpush.bf16.msra.mxu2 %v4248_v60  ;;  %2574 = vmatpush.bf16.msrb.mxu3 %v4252_v6  ;;  %v5416_v60 = vld [vmem:[#allocation9 + $0x108] sm:$0xff] }
 0x5f8   : > { %2587 = vmatpush.bf16.msra.mxu0 %v4256_v49  ;;  %2600 = vmatpush.bf16.msrb.mxu1 %v4260_v61  ;;  %v5424_v6 = vld [vmem:[#allocation9 + $0x148] sm:$0xff]  ;;  %v5431_v49 = vld [vmem:[#allocation9 + $0x180] sm:$0xff] }
 0x5f9   : > { %v5439_v61 = vld [vmem:[#allocation9 + $0x1c0] sm:$0xff] }
 0x5fa   : > { %2562 = vmatmul.bf16.vlgmr.msra.gmra.mxu2 %v6507_v58  ;;  %2575 = vmatmul.bf16.vlgmr.msrb.gmra.mxu3 %v6507_v58 }
 0x5fb   : > { %2588 = vmatmul.bf16.vlgmr.msra.gmra.mxu0 %v6507_v58  ;;  %2601 = vmatmul.bf16.vlgmr.msrb.gmra.mxu1 %v6507_v58  ;;  %v5395_v58 = vld [vmem:[#allocation9 + $0x60] sm:$0xff] }
 0x5fc   : > { %3692 = vmatpush.bf16.msrb.mxu0 %v5406_v62  ;;  %3705 = vmatpush.bf16.msra.mxu1 %v5414_v63  ;;  %v5415_v62 = vld [vmem:[#allocation9 + $0x100] sm:$0xff] }
 0x5fd   : > { %3666 = vmatpush.bf16.msrb.mxu2 %v5390_v20  ;;  %3679 = vmatpush.bf16.msra.mxu3 %v5398_v10  ;;  %v5423_v63 = vld [vmem:[#allocation9 + $0x140] sm:$0xff] }
 0x5fe   : > { %v6528_v20 = vld [vmem:[%s6570_s8] sm:$0xff] }
 0x5ff   : > { %v1728_v10 = vperm.slane %v6528_v20, 2 }
 0x600   : > { %3693 = vmatpush.bf16.msrb.mxu0 %v5405_v0  ;;  %3706 = vmatpush.bf16.msra.mxu1 %v5413_v17  ;;  %v1729_v0 = vperm.slane %v6528_v20, 3 }
 0x601   : > { %3667 = vmatpush.bf16.msrb.mxu2 %v5389_v1  ;;  %3680 = vmatpush.bf16.msra.mxu3 %v5397_v2 }
 0x604   : > { %3694 = vmatpush.bf16.msrb.mxu0 %v5404_v19  ;;  %3707 = vmatpush.bf16.msra.mxu1 %v5412_v3  ;;  %v1726_v3 = vperm.slane %v6528_v20, 0 }
 0x605   : > { %3668 = vmatpush.bf16.msrb.mxu2 %v5388_v24  ;;  %3681 = vmatpush.bf16.msra.mxu3 %v5396_v4  ;;  %v1727_v24 = vperm.slane %v6528_v20, 1 }
 0x608   : > { %3695 = vmatpush.bf16.msrb.mxu0 %v5403_v5  ;;  %3708 = vmatpush.bf16.msra.mxu1 %v5411_v7  ;;  %v5470_v7 = vld [vmem:[#allocation9 + $0x2b8] sm:$0xff] }
 0x609   : > { %3669 = vmatpush.bf16.msrb.mxu2 %v5387_v8  ;;  %3682 = vmatpush.bf16.msra.mxu3 %v5395_v58  ;;  %v5478_v8 = vld [vmem:[#allocation9 + $0x2f8] sm:$0xff] }
 0x60c   : > { %3696 = vmatpush.bf16.msrb.mxu0 %v5402_v50  ;;  %3709 = vmatpush.bf16.msra.mxu1 %v5410_v9 }
 0x60d   : > { %3670 = vmatpush.bf16.msrb.mxu2 %v5386_v11  ;;  %3683 = vmatpush.bf16.msra.mxu3 %v5394_v12 }
 0x610   : > { %3697 = vmatpush.bf16.msrb.mxu0 %v5401_v14  ;;  %3710 = vmatpush.bf16.msra.mxu1 %v5409_v15 }
 0x611   : > { %3671 = vmatpush.bf16.msrb.mxu2 %v5385_v16  ;;  %3684 = vmatpush.bf16.msra.mxu3 %v5393_v18 }
 0x614   : > { %3698 = vmatpush.bf16.msrb.mxu0 %v5400_v21  ;;  %3711 = vmatpush.bf16.msra.mxu1 %v5408_v22  ;;  %v5469_v22 = vld [vmem:[#allocation9 + $0x2b0] sm:$0xff] }
 0x615   : > { %3672 = vmatpush.bf16.msrb.mxu2 %v5384_v25  ;;  %3685 = vmatpush.bf16.msra.mxu3 %v5392_v26  ;;  %v5477_v25 = vld [vmem:[#allocation9 + $0x2f0] sm:$0xff] }
 0x618   : > { %3699 = vmatpush.bf16.msrb.mxu0 %v5399_v27  ;;  %3712 = vmatpush.bf16.msra.mxu1 %v5407_v28  ;;  %v5454_v28 = vld [vmem:[#allocation9 + $0x238] sm:$0xff] }
 0x619   : > { %3673 = vmatpush.bf16.msrb.mxu2 %v5383_v31  ;;  %3686 = vmatpush.bf16.msra.mxu3 %v5391_v32  ;;  %v5476_v31 = vld [vmem:[#allocation9 + $0x2e8] sm:$0xff] }
 0x61c   : > { %3744 = vmatpush.bf16.msra.mxu0 %v5438_v29  ;;  %3757 = vmatpush.bf16.msrb.mxu1 %v5446_v30  ;;  %v5462_v29 = vld [vmem:[#allocation9 + $0x278] sm:$0xff]  ;;  %v5468_v30 = vld [vmem:[#allocation9 + $0x2a8] sm:$0xff] }
 0x61d   : > { %3718 = vmatpush.bf16.msra.mxu2 %v5422_v33  ;;  %3731 = vmatpush.bf16.msrb.mxu3 %v5430_v47  ;;  %v1732_v47 = vperm.slane %v6528_v20, 6 }
 0x620   : > { %3745 = vmatpush.bf16.msra.mxu0 %v5437_v34  ;;  %3758 = vmatpush.bf16.msrb.mxu1 %v5445_v35  ;;  %v1733_v34 = vperm.slane %v6528_v20, 7  ;;  %v5453_v35 = vld [vmem:[#allocation9 + $0x230] sm:$0xff] }
 0x621   : > { %3719 = vmatpush.bf16.msra.mxu2 %v5421_v36  ;;  %3732 = vmatpush.bf16.msrb.mxu3 %v5429_v37  ;;  %v5461_v36 = vld [vmem:[#allocation9 + $0x270] sm:$0xff] }
 0x624   : > { %3746 = vmatpush.bf16.msra.mxu0 %v5436_v38  ;;  %3759 = vmatpush.bf16.msrb.mxu1 %v5444_v39  ;;  %v5467_v39 = vld [vmem:[#allocation9 + $0x2a0] sm:$0xff] }
 0x625   : > { %3720 = vmatpush.bf16.msra.mxu2 %v5420_v40  ;;  %3733 = vmatpush.bf16.msrb.mxu3 %v5428_v41  ;;  %v5475_v40 = vld [vmem:[#allocation9 + $0x2e0] sm:$0xff] }
 0x628   : > { %3747 = vmatpush.bf16.msra.mxu0 %v5435_v42  ;;  %3760 = vmatpush.bf16.msrb.mxu1 %v5443_v43  ;;  %v5452_v43 = vld [vmem:[#allocation9 + $0x228] sm:$0xff] }
 0x629   : > { %3721 = vmatpush.bf16.msra.mxu2 %v5419_v44  ;;  %3734 = vmatpush.bf16.msrb.mxu3 %v5427_v45  ;;  %v5460_v44 = vld [vmem:[#allocation9 + $0x268] sm:$0xff]  ;;  %v1730_v45 = vperm.slane %v6528_v20, 4 }
 0x62c   : > { %3748 = vmatpush.bf16.msra.mxu0 %v5434_v48  ;;  %3761 = vmatpush.bf16.msrb.mxu1 %v5442_v51  ;;  %v1731_v48 = vperm.slane %v6528_v20, 5 }
 0x62d   : > { %3722 = vmatpush.bf16.msra.mxu2 %v5418_v52  ;;  %3735 = vmatpush.bf16.msrb.mxu3 %v5426_v53  ;;  %v5466_v53 = vld [vmem:[#allocation9 + $0x298] sm:$0xff] }
 0x630   : > { %3749 = vmatpush.bf16.msra.mxu0 %v5433_v54  ;;  %3762 = vmatpush.bf16.msrb.mxu1 %v5441_v55  ;;  %v5474_v54 = vld [vmem:[#allocation9 + $0x2d8] sm:$0xff] }
 0x631   : > { %3723 = vmatpush.bf16.msra.mxu2 %v5417_v23  ;;  %3736 = vmatpush.bf16.msrb.mxu3 %v5425_v56 }
 0x634   : > { %3750 = vmatpush.bf16.msra.mxu0 %v5432_v57  ;;  %3763 = vmatpush.bf16.msrb.mxu1 %v5440_v59 }
 0x635   : > { %3724 = vmatpush.bf16.msra.mxu2 %v5416_v60  ;;  %3737 = vmatpush.bf16.msrb.mxu3 %v5424_v6  ;;  %v5451_v6 = vld [vmem:[#allocation9 + $0x220] sm:$0xff] }
 0x637   : > { %v2433_v17 = vpop.f32.mrf.mxu0  ;;  %v2446_v1 = vpop.f32.mrf.mxu1 }
 0x638   : > { %3751 = vmatpush.bf16.msra.mxu0 %v5431_v49  ;;  %3764 = vmatpush.bf16.msrb.mxu1 %v5439_v61  ;;  %v2434_v2 = vadd.f32 %v2433_v17, %v1728_v10  ;;  %v2447_v19 = vadd.f32 %v2446_v1, %v1729_v0  ;;  %v5459_v49 = vld [vmem:[#allocation9 + $0x260] sm:$0xff]  ;;  %v5465_v10 = vld [vmem:[#allocation9 + $0x290] sm:$0xff] }
 0x639   : > { %3725 = vmatpush.bf16.msra.mxu2 %v5415_v62  ;;  %3738 = vmatpush.bf16.msrb.mxu3 %v5423_v63  ;;  %v5473_v0 = vld [vmem:[#allocation9 + $0x2d0] sm:$0xff] }
 0x63a   : > { %v2608_v4 = vmax.f32 %v2434_v2, 0.0  ;;  %v2609_v5 = vmax.f32 %v2447_v19, 0.0  ;;  %v5450_v2 = vld [vmem:[#allocation9 + $0x218] sm:$0xff] }
 0x63b   : > { %v5458_v19 = vld [vmem:[#allocation9 + $0x258] sm:$0xff] }
 0x63c   : > { %v2624_v58 = vpack.c.bf16 %v2608_v4, %v2608_v4  ;;  %v2625_v50 = vpack.c.bf16 %v2609_v5, %v2609_v5  ;;  %v2407_v9 = vpop.f32.mrf.mxu2  ;;  %v2420_v11 = vpop.f32.mrf.mxu3  ;;  %v6541_v4 = vld [vmem:[%s6570_s8 + $0x8] sm:$0xff] }
 0x63d   : > { %v2408_v12 = vadd.f32 %v2407_v9, %v1726_v3  ;;  %v2421_v14 = vadd.f32 %v2420_v11, %v1727_v24  ;;  %v5464_v3 = vld [vmem:[#allocation9 + $0x288] sm:$0xff]  ;;  %v1737_v9 = vperm.slane %v6541_v4, 3  ;;  %v5463_v11 = vld [vmem:[#allocation9 + $0x280] sm:$0xff] }
 0x63e   : > { %3700 = vmatmul.bf16.vlgmr.msrb.gmra.mxu0 %v2624_v58  ;;  %3713 = vmatmul.bf16.vlgmr.msra.gmra.mxu1 %v2625_v50  ;;  %v5472_v24 = vld [vmem:[#allocation9 + $0x2c8] sm:$0xff]  ;;  %v5457_v58 = vld [vmem:[#allocation9 + $0x250] sm:$0xff]  ;;  %v1736_v50 = vperm.slane %v6541_v4, 2 }
 0x63f   : > { %v2606_v15 = vmax.f32 %v2408_v12, 0.0  ;;  %v2607_v16 = vmax.f32 %v2421_v14, 0.0  ;;  %3796 = vmatpush.bf16.msrb.mxu0 %v5470_v7  ;;  %3809 = vmatpush.bf16.msra.mxu1 %v5478_v8  ;;  %v2435_v18 = vpop.f32.mrf.mxu0  ;;  %v2448_v21 = vpop.f32.mrf.mxu1  ;;  %v5449_v8 = vld [vmem:[#allocation9 + $0x210] sm:$0xff]  ;;  %v5471_v12 = vld [vmem:[#allocation9 + $0x2c0] sm:$0xff]  ;;  %v5502_v14 = vld [vmem:[#allocation9 + $0x3b8] sm:$0xff] }
 0x640   : > { %v5448_v21 = vld [vmem:[#allocation9 + $0x208] sm:$0xff] }
 0x641   : > { %v2622_v26 = vpack.c.bf16 %v2606_v15, %v2606_v15  ;;  %v2623_v27 = vpack.c.bf16 %v2607_v16, %v2607_v16  ;;  %v5510_v15 = vld [vmem:[#allocation9 + $0x3f8] sm:$0xff] }
 0x643   : > { %3797 = vmatpush.bf16.msrb.mxu0 %v5469_v22  ;;  %3810 = vmatpush.bf16.msra.mxu1 %v5477_v25  ;;  %v5456_v22 = vld [vmem:[#allocation9 + $0x248] sm:$0xff] }
 0x644   : > { %3674 = vmatmul.bf16.vlgmr.msrb.gmra.mxu2 %v2622_v26  ;;  %3687 = vmatmul.bf16.vlgmr.msra.gmra.mxu3 %v2623_v27  ;;  %v2409_v32 = vpop.f32.mrf.mxu2  ;;  %v2422_v33 = vpop.f32.mrf.mxu3  ;;  %v1734_v27 = vperm.slane %v6541_v4, 0 }
 0x645   : > { %3770 = vmatpush.bf16.msrb.mxu2 %v5454_v28  ;;  %3783 = vmatpush.bf16.msra.mxu3 %v5462_v29  ;;  %v1735_v28 = vperm.slane %v6541_v4, 1  ;;  %v5509_v32 = vld [vmem:[#allocation9 + $0x3f0] sm:$0xff] }
 0x647   : > { %3798 = vmatpush.bf16.msrb.mxu0 %v5468_v30  ;;  %3811 = vmatpush.bf16.msra.mxu1 %v5476_v31  ;;  %v2485_v37 = vpop.f32.mrf.mxu0  ;;  %v2498_v38 = vpop.f32.mrf.mxu1  ;;  %v5501_v31 = vld [vmem:[#allocation9 + $0x3b0] sm:$0xff] }
 0x648   : > { %v2486_v41 = vadd.f32 %v2485_v37, %v1732_v47  ;;  %v2499_v42 = vadd.f32 %v2498_v38, %v1733_v34  ;;  %v5455_v37 = vld [vmem:[#allocation9 + $0x240] sm:$0xff] }
 0x649   : > { %3771 = vmatpush.bf16.msrb.mxu2 %v5453_v35  ;;  %3784 = vmatpush.bf16.msra.mxu3 %v5461_v36  ;;  %v5447_v36 = vld [vmem:[#allocation9 + $0x200] sm:$0xff] }
 0x64a   : > { %v2612_v51 = vmax.f32 %v2486_v41, 0.0  ;;  %v2613_v52 = vmax.f32 %v2499_v42, 0.0  ;;  %v5494_v41 = vld [vmem:[#allocation9 + $0x378] sm:$0xff] }
 0x64b   : > { %3799 = vmatpush.bf16.msrb.mxu0 %v5467_v39  ;;  %3812 = vmatpush.bf16.msra.mxu1 %v5475_v40  ;;  %v5486_v40 = vld [vmem:[#allocation9 + $0x338] sm:$0xff] }
 0x64c   : > { %v2628_v55 = vpack.c.bf16 %v2612_v51, %v2612_v51  ;;  %v2629_v23 = vpack.c.bf16 %v2613_v52, %v2613_v52  ;;  %v2459_v56 = vpop.f32.mrf.mxu2  ;;  %v2472_v57 = vpop.f32.mrf.mxu3  ;;  %v5508_v51 = vld [vmem:[#allocation9 + $0x3e8] sm:$0xff] }
 0x64d   : > { %3772 = vmatpush.bf16.msrb.mxu2 %v5452_v43  ;;  %3785 = vmatpush.bf16.msra.mxu3 %v5460_v44  ;;  %v2460_v59 = vadd.f32 %v2459_v56, %v1730_v45  ;;  %v2473_v60 = vadd.f32 %v2472_v57, %v1731_v48  ;;  %v5500_v48 = vld [vmem:[#allocation9 + $0x3a8] sm:$0xff]  ;;  %v5507_v56 = vld [vmem:[#allocation9 + $0x3e0] sm:$0xff] }
 0x64e   : > { %3752 = vmatmul.bf16.vlgmr.msra.gmra.mxu0 %v2628_v55  ;;  %3765 = vmatmul.bf16.vlgmr.msrb.gmra.mxu1 %v2629_v23  ;;  %v5493_v55 = vld [vmem:[#allocation9 + $0x370] sm:$0xff]  ;;  %v5499_v23 = vld [vmem:[#allocation9 + $0x3a0] sm:$0xff] }
 0x64f   : > { %v2610_v61 = vmax.f32 %v2460_v59, 0.0  ;;  %v2611_v62 = vmax.f32 %v2473_v60, 0.0  ;;  %3800 = vmatpush.bf16.msrb.mxu0 %v5466_v53  ;;  %3813 = vmatpush.bf16.msra.mxu1 %v5474_v54  ;;  %v2487_v63 = vpop.f32.mrf.mxu0  ;;  %v2500_v20 = vpop.f32.mrf.mxu1  ;;  %v5485_v54 = vld [vmem:[#allocation9 + $0x330] sm:$0xff]  ;;  %v5484_v60 = vld [vmem:[#allocation9 + $0x328] sm:$0xff] }
 0x650   : > { %v5491_v63 = vld [vmem:[#allocation9 + $0x360] sm:$0xff]  ;;  %v5497_v20 = vld [vmem:[#allocation9 + $0x390] sm:$0xff] }
 0x651   : > { %v2626_v17 = vpack.c.bf16 %v2610_v61, %v2610_v61  ;;  %v2627_v1 = vpack.c.bf16 %v2611_v62, %v2611_v62  ;;  %3773 = vmatpush.bf16.msrb.mxu2 %v5451_v6  ;;  %3786 = vmatpush.bf16.msra.mxu3 %v5459_v49  ;;  %v5492_v6 = vld [vmem:[#allocation9 + $0x368] sm:$0xff]  ;;  %v5498_v49 = vld [vmem:[#allocation9 + $0x398] sm:$0xff]  ;;  %v5483_v62 = vld [vmem:[#allocation9 + $0x320] sm:$0xff] }
 0x652   : > { %v5506_v61 = vld [vmem:[#allocation9 + $0x3d8] sm:$0xff] }
 0x653   : > { %3801 = vmatpush.bf16.msrb.mxu0 %v5465_v10  ;;  %3814 = vmatpush.bf16.msra.mxu1 %v5473_v0  ;;  %v5505_v10 = vld [vmem:[#allocation9 + $0x3d0] sm:$0xff]  ;;  %v5482_v0 = vld [vmem:[#allocation9 + $0x318] sm:$0xff] }
 0x654   : > { %3726 = vmatmul.bf16.vlgmr.msra.gmra.mxu2 %v2626_v17  ;;  %3739 = vmatmul.bf16.vlgmr.msrb.gmra.mxu3 %v2627_v1  ;;  %v2461_v5 = vpop.f32.mrf.mxu2  ;;  %v2474_v7 = vpop.f32.mrf.mxu3  ;;  %v5490_v17 = vld [vmem:[#allocation9 + $0x358] sm:$0xff]  ;;  %v5496_v1 = vld [vmem:[#allocation9 + $0x388] sm:$0xff] }
 0x655   : > { %3774 = vmatpush.bf16.msrb.mxu2 %v5450_v2  ;;  %3787 = vmatpush.bf16.msra.mxu3 %v5458_v19  ;;  %v5504_v2 = vld [vmem:[#allocation9 + $0x3c8] sm:$0xff]  ;;  %v1740_v19 = vperm.slane %v6541_v4, 6  ;;  %v5489_v5 = vld [vmem:[#allocation9 + $0x350] sm:$0xff]  ;;  %v5495_v7 = vld [vmem:[#allocation9 + $0x380] sm:$0xff] }
 0x657   : > { %3802 = vmatpush.bf16.msrb.mxu0 %v5464_v3  ;;  %3815 = vmatpush.bf16.msra.mxu1 %v5472_v24  ;;  %v1741_v3 = vperm.slane %v6541_v4, 7  ;;  %v5481_v24 = vld [vmem:[#allocation9 + $0x310] sm:$0xff] }
 0x659   : > { %3775 = vmatpush.bf16.msrb.mxu2 %v5449_v8  ;;  %3788 = vmatpush.bf16.msra.mxu3 %v5457_v58  ;;  %v5503_v8 = vld [vmem:[#allocation9 + $0x3c0] sm:$0xff] }
 0x65a   : > { %v2537_v16 = vpop.f32.mrf.mxu0  ;;  %v2550_v18 = vpop.f32.mrf.mxu1 }
 0x65b   : > { %v2538_v25 = vadd.f32 %v2537_v16, %v1736_v50  ;;  %v2551_v26 = vadd.f32 %v2550_v18, %v1737_v9  ;;  %3803 = vmatpush.bf16.msrb.mxu0 %v5463_v11  ;;  %3816 = vmatpush.bf16.msra.mxu1 %v5471_v12  ;;  %v5480_v12 = vld [vmem:[#allocation9 + $0x308] sm:$0xff]  ;;  %v1739_v16 = vperm.slane %v6541_v4, 5 }
 0x65d   : > { %v2616_v29 = vmax.f32 %v2538_v25, 0.0  ;;  %v2617_v30 = vmax.f32 %v2551_v26, 0.0  ;;  %3776 = vmatpush.bf16.msrb.mxu2 %v5448_v21  ;;  %3789 = vmatpush.bf16.msra.mxu3 %v5456_v22  ;;  %v2511_v34 = vpop.f32.mrf.mxu2  ;;  %v2524_v35 = vpop.f32.mrf.mxu3 }
 0x65e   : > { %v2512_v38 = vadd.f32 %v2511_v34, %v1734_v27  ;;  %v2525_v39 = vadd.f32 %v2524_v35, %v1735_v28  ;;  %v5479_v28 = vld [vmem:[#allocation9 + $0x300] sm:$0xff] }
 0x65f   : > { %3848 = vmatpush.bf16.msra.mxu0 %v5502_v14  ;;  %3861 = vmatpush.bf16.msrb.mxu1 %v5510_v15  ;;  %v2632_v33 = vpack.c.bf16 %v2616_v29, %v2616_v29  ;;  %v2633_v47 = vpack.c.bf16 %v2617_v30, %v2617_v30  ;;  %v5488_v14 = vld [vmem:[#allocation9 + $0x348] sm:$0xff]  ;;  %v1738_v15 = vperm.slane %v6541_v4, 4  ;;  %v5487_v29 = vld [vmem:[#allocation9 + $0x340] sm:$0xff] }
 0x660   : > { %v2614_v42 = vmax.f32 %v2512_v38, 0.0  ;;  %v2615_v43 = vmax.f32 %v2525_v39, 0.0 }
 0x661   : > { %3804 = vmatmul.bf16.vlgmr.msrb.gmra.mxu0 %v2632_v33  ;;  %3817 = vmatmul.bf16.vlgmr.msra.gmra.mxu1 %v2633_v47 }
 0x662   : > { %v2539_v44 = vpop.f32.mrf.mxu0  ;;  %v2552_v45 = vpop.f32.mrf.mxu1  ;;  %3777 = vmatpush.bf16.msrb.mxu2 %v5447_v36  ;;  %3790 = vmatpush.bf16.msra.mxu3 %v5455_v37  ;;  %v2630_v52 = vpack.c.bf16 %v2614_v42, %v2614_v42  ;;  %v2631_v53 = vpack.c.bf16 %v2615_v43, %v2615_v43 }
 0x663   : > { %3849 = vmatpush.bf16.msra.mxu0 %v5501_v31  ;;  %3862 = vmatpush.bf16.msrb.mxu1 %v5509_v32 }
 0x665   : > { %3778 = vmatmul.bf16.vlgmr.msrb.gmra.mxu2 %v2630_v52  ;;  %3791 = vmatmul.bf16.vlgmr.msra.gmra.mxu3 %v2631_v53  ;;  %v2513_v57 = vpop.f32.mrf.mxu2  ;;  %v2526_v59 = vpop.f32.mrf.mxu3 }
 0x666   : > { %3822 = vmatpush.bf16.msra.mxu2 %v5486_v40  ;;  %3835 = vmatpush.bf16.msrb.mxu3 %v5494_v41 }
 0x667   : > { %3850 = vmatpush.bf16.msra.mxu0 %v5500_v48  ;;  %3863 = vmatpush.bf16.msrb.mxu1 %v5508_v51 }
 0x66a   : > { %3823 = vmatpush.bf16.msra.mxu2 %v5485_v54  ;;  %3836 = vmatpush.bf16.msrb.mxu3 %v5493_v55 }
 0x66b   : > { %3851 = vmatpush.bf16.msra.mxu0 %v5499_v23  ;;  %3864 = vmatpush.bf16.msrb.mxu1 %v5507_v56  ;;  %v5612_v23 = vld [vmem:[#allocation10] ss:$0 sm:$0xff] }
 0x66e   : > { %3824 = vmatpush.bf16.msra.mxu2 %v5484_v60  ;;  %3837 = vmatpush.bf16.msrb.mxu3 %v5492_v6 }
 0x66f   : > { %3852 = vmatpush.bf16.msra.mxu0 %v5498_v49  ;;  %3865 = vmatpush.bf16.msrb.mxu1 %v5506_v61 }
 0x672   : > { %3825 = vmatpush.bf16.msra.mxu2 %v5483_v62  ;;  %3838 = vmatpush.bf16.msrb.mxu3 %v5491_v63 }
 0x673   : > { %3853 = vmatpush.bf16.msra.mxu0 %v5497_v20  ;;  %3866 = vmatpush.bf16.msrb.mxu1 %v5505_v10 }
 0x676   : > { %3826 = vmatpush.bf16.msra.mxu2 %v5482_v0  ;;  %3839 = vmatpush.bf16.msrb.mxu3 %v5490_v17 }
 0x677   : > { %3854 = vmatpush.bf16.msra.mxu0 %v5496_v1  ;;  %3867 = vmatpush.bf16.msrb.mxu1 %v5504_v2 }
 0x678   : > { %v2589_v58 = vpop.f32.mrf.mxu0  ;;  %v2602_v50 = vpop.f32.mrf.mxu1 }
 0x679   : > { %v2590_v9 = vadd.f32 %v2589_v58, %v1740_v19  ;;  %v2603_v11 = vadd.f32 %v2602_v50, %v1741_v3 }
 0x67a   : > { %3827 = vmatpush.bf16.msra.mxu2 %v5481_v24  ;;  %3840 = vmatpush.bf16.msrb.mxu3 %v5489_v5 }
 0x67b   : > { %v2620_v18 = vmax.f32 %v2590_v9, 0.0  ;;  %v2621_v21 = vmax.f32 %v2603_v11, 0.0  ;;  %3855 = vmatpush.bf16.msra.mxu0 %v5495_v7  ;;  %3868 = vmatpush.bf16.msrb.mxu1 %v5503_v8 }
 0x67d   : > { %v2636_v22 = vpack.c.bf16 %v2620_v18, %v2620_v18  ;;  %v2637_v25 = vpack.c.bf16 %v2621_v21, %v2621_v21  ;;  %v2563_v26 = vpop.f32.mrf.mxu2  ;;  %v2576_v27 = vpop.f32.mrf.mxu3 }
 0x67e   : > { %3828 = vmatpush.bf16.msra.mxu2 %v5480_v12  ;;  %3841 = vmatpush.bf16.msrb.mxu3 %v5488_v14  ;;  %v2564_v30 = vadd.f32 %v2563_v26, %v1738_v15  ;;  %v2577_v31 = vadd.f32 %v2576_v27, %v1739_v16 }
 0x67f   : > { %3856 = vmatmul.bf16.vlgmr.msra.gmra.mxu0 %v2636_v22  ;;  %3869 = vmatmul.bf16.vlgmr.msrb.gmra.mxu1 %v2637_v25 }
 0x680   : > { %v2618_v32 = vmax.f32 %v2564_v30, 0.0  ;;  %v2619_v33 = vmax.f32 %v2577_v31, 0.0  ;;  %v2591_v47 = vpop.f32.mrf.mxu0  ;;  %v2604_v4 = vpop.f32.mrf.mxu1 }
 0x682   : > { %3829 = vmatpush.bf16.msra.mxu2 %v5479_v28  ;;  %3842 = vmatpush.bf16.msrb.mxu3 %v5487_v29  ;;  %v2634_v34 = vpack.c.bf16 %v2618_v32, %v2618_v32  ;;  %v2635_v35 = vpack.c.bf16 %v2619_v33, %v2619_v33 }
 0x685   : > { %3830 = vmatmul.bf16.vlgmr.msra.gmra.mxu2 %v2634_v34  ;;  %3843 = vmatmul.bf16.vlgmr.msrb.gmra.mxu3 %v2635_v35  ;;  %v2565_v36 = vpop.f32.mrf.mxu2  ;;  %v2578_v37 = vpop.f32.mrf.mxu3 }
 0x6bb   : > { %v3701_v38 = vpop.f32.mrf.mxu0  ;;  %v3714_v39 = vpop.f32.mrf.mxu1 }
 0x6c3   : > { %v3703_v40 = vpop.f32.mrf.mxu0  ;;  %v3716_v41 = vpop.f32.mrf.mxu1 }
 0x6c4   : > { %v5614_v40 = vld [vmem:[#allocation13] ss:$0 sm:$0xff] }
 0x6c7   : > { %v3675_v42 = vpop.f32.mrf.mxu2  ;;  %v3688_v43 = vpop.f32.mrf.mxu3 }
 0x6c8   : > { %v3676_v56 = vadd.f32 %v5612_v23, %v3675_v42 }
 0x6ca   : > { %v3689_v49 = vadd.f32 %v3688_v43, %v3676_v56 }
 0x6cb   : > { %v3753_v44 = vpop.f32.mrf.mxu0  ;;  %v3766_v45 = vpop.f32.mrf.mxu1 }
 0x6cc   : > { %v3702_v61 = vadd.f32 %v3701_v38, %v3689_v49  ;;  %v5613_v38 = vld [vmem:[#allocation12] ss:$0 sm:$0xff] }
 0x6ce   : > { %v3715_v20 = vadd.f32 %v3714_v39, %v3702_v61 }
 0x6cf   : > { %v3677_v48 = vpop.f32.mrf.mxu2  ;;  %v3690_v51 = vpop.f32.mrf.mxu3 }
 0x6d3   : > { %v3755_v52 = vpop.f32.mrf.mxu0  ;;  %v3768_v53 = vpop.f32.mrf.mxu1 }
 0x6d7   : > { %v3727_v54 = vpop.f32.mrf.mxu2  ;;  %v3740_v55 = vpop.f32.mrf.mxu3 }
 0x6d8   : > { %v3728_v17 = vadd.f32 %v3727_v54, %v3715_v20 }
 0x6da   : > { %v3741_v1 = vadd.f32 %v3740_v55, %v3728_v17 }
 0x6dc   : > { %v3754_v3 = vadd.f32 %v3753_v44, %v3741_v1 }
 0x6de   : > { %v3805_v57 = vpop.f32.mrf.mxu0  ;;  %v3818_v59 = vpop.f32.mrf.mxu1  ;;  %v3767_v24 = vadd.f32 %v3766_v45, %v3754_v3 }
 0x6df   : > { %v3729_v60 = vpop.f32.mrf.mxu2  ;;  %v3742_v6 = vpop.f32.mrf.mxu3 }
 0x6e6   : > { %v3807_v62 = vpop.f32.mrf.mxu0  ;;  %v3820_v63 = vpop.f32.mrf.mxu1 }
 0x6e8   : > { %v3779_v10 = vpop.f32.mrf.mxu2  ;;  %v3792_v0 = vpop.f32.mrf.mxu3 }
 0x6e9   : > { %v3780_v5 = vadd.f32 %v3779_v10, %v3767_v24 }
 0x6eb   : > { %v3793_v58 = vadd.f32 %v3792_v0, %v3780_v5 }
 0x6ed   : > { %v3806_v50 = vadd.f32 %v3805_v57, %v3793_v58 }
 0x6ef   : > { %v3819_v12 = vadd.f32 %v3818_v59, %v3806_v50 }
 0x6f0   : > { %v3781_v2 = vpop.f32.mrf.mxu2  ;;  %v3794_v19 = vpop.f32.mrf.mxu3 }
 0x6fc   : > { %v3857_v7 = vpop.f32.mrf.mxu0  ;;  %v3870_v8 = vpop.f32.mrf.mxu1 }
 0x704   : > { %v3859_v9 = vpop.f32.mrf.mxu0  ;;  %v3872_v11 = vpop.f32.mrf.mxu1 }
 0x708   : > { %v3831_v14 = vpop.f32.mrf.mxu2  ;;  %v3844_v15 = vpop.f32.mrf.mxu3 }
 0x709   : > { %v3832_v16 = vadd.f32 %v3831_v14, %v3819_v12 }
 0x70b   : > { %v3845_v18 = vadd.f32 %v3844_v15, %v3832_v16 }
 0x70d   : > { %v3858_v21 = vadd.f32 %v3857_v7, %v3845_v18 }
 0x70f   : > { %v3871_v22 = vadd.f32 %v3870_v8, %v3858_v21 }
 0x710   : > { %v3833_v25 = vpop.f32.mrf.mxu2  ;;  %v3846_v26 = vpop.f32.mrf.mxu3 }
 0x711   : > { %v3874_v27 = vadd.f32 %v3871_v22, %v6503_v13 }
 0x713   : > { %3877 = vadd.xlane.f32.xlu2 %v3874_v27 }
 0x786   : > { %v3878_v28 = vpop.xlane.xlu2 %3877 }
 0x787   : > { %v3879_v29 = vmul.f32 %v3878_v28, %v6493_v46 }
 0x789   : > { %v3880_v30 = vsub.f32 %v3874_v27, %v3879_v29 }
 0x78b   : > { %v3881_v31 = vmul.f32 %v3880_v30, %v3880_v30 }
 0x78d   : > { %3882 = vadd.xlane.f32.xlu0 %v3881_v31 }
 0x800   : > { %v3883_v32 = vpop.xlane.xlu0 %3882 }
 0x801   : > { %v3884_v33 = vmul.f32 %v3883_v32, %v6493_v46 }
 0x803   : > { %v3885_v47 = vadd.f32 1e-05, %v3884_v33 }
 0x805   : > { %5635 = vrsqrt.f32 %v3885_v47  ;;  %vm3892_vm11 = vweird.f32 %v3885_v47 }
 0x80b   : > { %v5636_v4 = vpop.eup %5635 }
 0x80c   : > { %v3887_v34 = vmul.f32 %v5636_v4, %v3885_v47  ;;  %vm3893_vm10 = vweird.f32 %v5636_v4 }
 0x80d   : > { %vm3894_vm12 = vmor %vm3892_vm11, %vm3893_vm10 }
 0x80e   : > { %v3888_v35 = vmul.f32 %v5636_v4, %v3887_v34 }
 0x810   : > { %v3889_v36 = vmul.f32 0.5, %v3888_v35 }
 0x812   : > { %v3890_v37 = vsub.f32 1.5, %v3889_v36 }
 0x814   : > { %v3891_v13 = vmul.f32 %v5636_v4, %v3890_v37 }
 0x816   : > { %v3895_v39 = vsel %vm3894_vm12, %v5636_v4, %v3891_v13 }
 0x817   : > { %v3896_v41 = vmul.f32 %v3895_v39, %v3880_v30 }
 0x819   : > { %v3900_v42 = vmul.f32 %v5613_v38, %v3896_v41 }
 0x81b   : > { %v3904_v46 = vadd.f32 %v5614_v40, %v3900_v42 }
 0x81d   : > { %3905 = vst [vmem:[%s558_s30] sm:$0xff] %v3904_v46 }
 0x81e PF: > { %s28_s25 = sadd.s32 1, %s5903_s25  }
 0x81f   : > { %p25_p7 = scmp.ge.s32.totalorder %s28_s25, 4  }
 0x821   :  { %27 = sbr.rel (!%p25_p7) target bundleno = 8 (0x8), region = 135 }
 0x826   :  { %3925 = vsyncpa [#allocation3], 1 }
 0x827   :  { %3927 = vsyncpa [#allocation3 + $0x1], 1 }
 0x828   :  { %3928 = vsyncpa [#allocation5], 1 }
 0x829   :  { %3929 = vsyncpa [#allocation8], 1 }
 0x82a   :  { %3930 = vsyncpa [#allocation11], 1 }
 0x82b   :  { %3931 = vsyncpa [#allocation14], 1 }

// kernel: diffusion_transformer_forward.6
= control target key start
LH: loop header
LB: loop body
LE: loop exit
PB: predicated region body
PF: predicated region fallthrough
CT: control target
= control target key end

     0   :  { %s6351_s0 = inlined_call_operand.vmem [shape: f32[2,8,128], index: 0, kind: input, shape index: {}]   ;;  %s6352_s1 = inlined_call_operand.hbm [shape: bf16[128,384], index: 1, kind: input, shape index: {}]   ;;  %s6353_s2 = inlined_call_operand.vmem [shape: f32[1,384], index: 2, kind: input, shape index: {}]   ;;  %s6354_s3 = inlined_call_operand.hbm [shape: bf16[128,128], index: 3, kind: input, shape index: {}]   ;;  %s6355_s4 = inlined_call_operand.vmem [shape: f32[1,128], index: 4, kind: input, shape index: {}]   ;;  %s6356_s5 = inlined_call_operand.vmem [shape: f32[1,128], index: 5, kind: input, shape index: {}]   ;;  %s6357_s6 = inlined_call_operand.hbm [shape: f32[1,128], index: 6, kind: input, shape index: {}]   ;;  %s6358_s7 = inlined_call_operand.hbm [shape: bf16[128,2048], index: 7, kind: input, shape index: {}]   ;;  %s6359_s8 = inlined_call_operand.vmem [shape: f32[1,2048], index: 8, kind: input, shape index: {}]   ;;  %s6360_s9 = inlined_call_operand.hbm [shape: bf16[2048,128], index: 9, kind: input, shape index: {}]   ;;  %s6361_s10 = inlined_call_operand.hbm [shape: f32[1,128], index: 10, kind: input, shape index: {}]   ;;  %s6362_s11 = inlined_call_operand.vmem [shape: f32[1,128], index: 11, kind: input, shape index: {}]   ;;  %s6363_s12 = inlined_call_operand.hbm [shape: f32[1,128], index: 12, kind: input, shape index: {}]   ;;  %s6364_s13 = inlined_call_operand.vmem [shape: f32[2,8,128], index: 13, kind: output, shape index: {}]  }
   0x1   :  { %6367 = sst [smem:[#allocation17_spill]] %s6354_s3 }
   0x2   :  { %6368 = sst [smem:[#allocation18_spill]] %s6358_s7 }
   0x3   :  { %18 = vsyncpa [#allocation3], 0 }
   0x4   :  { %19 = vsyncpa [#allocation5], 0 }
   0x5   :  { %20 = vsyncpa [#allocation8], 0 }
   0x6   :  { %21 = vsyncpa [#allocation11], 0  ;;  %s5926_s25 = smov 0  }
   0x7 LB: > { %s6369_s3 = sld [smem:[#allocation17_spill]]  ;;  %s5935_s29 = sadd.s32 4294967295, %s5836_s25   ;;  %s5836_s25 = sphi %s5926_s25, %s27_s25  }
   0x8   : > { %p4017_p0 = scmp.ge.s32.totalorder %s5836_s25, 1  ;;  %p336_p1 = scmp.lt.s32.totalorder %s5836_s25, 3 }
   0x9   : > { %p5536_p2 = scmp.eq.s32.totalorder %s5935_s29, 0  ;;  %s5838_s14 = smov [#allocation4]  }
   0xa   : > { %p5940_p3 = pnand %p4017_p0, %p336_p1  ;;  %s366_s15 = sshll.u32 %s5838_s14, 4  ;;  %s367_s15 = int_to_ptr.vmem [resolvable:$true] %s366_s15 }
   0xb   : > { %s6371_s7 = sld [smem:[#allocation18_spill]]  ;;  %s5839_s20 = smov [#allocation7]  }
   0xc   : > { %p5514_p4 = pneg %p5940_p3  ;;  %s398_s21 = sshll.u32 %s5839_s20, 4  ;;  %s399_s21 = int_to_ptr.vmem [resolvable:$true] %s398_s21 }
   0xd   : > { %s364_s28 = sshll.u32 %s6369_s3, 4  ;;  %s6365_s22 = smov 64   ;;  %s365_s28 = int_to_ptr.hbm [resolvable:$true] %s364_s28 }
   0xe   : > { %p5951_p5 = pnand %p5536_p2, %p5514_p4  ;;  %s6366_s23 = smov 4  }
   0xf   : > { %s5842_s24 = smov 1024   ;;  %s428_s14 = sshll.u32 %s6361_s10, 4  ;;  %s429_s14 = int_to_ptr.hbm [resolvable:$true] %s428_s14 }
  0x10   : > { %5520 = dma.hbm_to_vmem [thread:$0]  (!%p5951_p5), %s365_s28, 1024, %s367_s15, [#allocation5], %s6365_s22, %s6365_s22, %s6366_s23  }
  0x11   : > { %s396_s18 = sshll.u32 %s6371_s7, 4  ;;  %s5843_s16 = smov [#allocation10]   ;;  %s397_s18 = int_to_ptr.hbm [resolvable:$true] %s396_s18 }
  0x12   : > { %5526 = dma.hbm_to_vmem [thread:$0]  (!%p5951_p5), %s397_s18, 16384, %s399_s21, [#allocation8], %s5842_s24, %s5842_s24, %s6365_s22  }
  0x13   : > { %s430_s17 = sshll.u32 %s5843_s16, 4  ;;  %s347_s7 = sshll.u32 %s6352_s1, 4  ;;  %s431_s17 = int_to_ptr.vmem [resolvable:$true] %s430_s17  ;;  %s348_s7 = int_to_ptr.hbm [resolvable:$true] %s347_s7 }
  0x14   : > { %5532 = dma.hbm_to_vmem [thread:$0]  (!%p5951_p5), %s429_s14, 16, %s431_s17, [#allocation11]  }
  0x15   : > { %s5844_s28 = smov [#allocation2]   ;;  %s5845_s18 = smov 192  }
  0x16   : > { %s349_s15 = sshll.u32 %s5844_s28, 4  ;;  %s5846_s21 = smov 12   ;;  %s350_s15 = int_to_ptr.vmem [resolvable:$true] %s349_s15 }
  0x17   : > { %5517 = dma.hbm_to_vmem [thread:$0]  (!%p5951_p5), %s348_s7, 3072, %s350_s15, [#allocation3], %s5845_s18, %s5845_s18, %s5846_s21  }
  0x18   : > { %s385_s27 = sshll.u32 %s6357_s6, 4  ;;  %s5847_s3 = smov [#allocation6]   ;;  %s386_s27 = int_to_ptr.hbm [resolvable:$true] %s385_s27 }
  0x19   : > { %s387_s16 = sshll.u32 %s5847_s3, 4  ;;  %s413_s17 = sshll.u32 %s6360_s9, 4  ;;  %s388_s16 = int_to_ptr.vmem [resolvable:$true] %s387_s16  ;;  %s414_s17 = int_to_ptr.hbm [resolvable:$true] %s413_s17 }
  0x1a   : > { %5523 = dma.hbm_to_vmem [thread:$0]  (!%p5951_p5), %s386_s27, 16, %s388_s16, [#allocation5]  }
  0x1b   : > { %s5848_s28 = smov [#allocation9]   ;;  %s443_s15 = sshll.u32 %s6363_s12, 4  ;;  %s444_s15 = int_to_ptr.hbm [resolvable:$true] %s443_s15 }
  0x1c   : > { %s415_s22 = sshll.u32 %s5848_s28, 4  ;;  %s6373_s18 = smov 4   ;;  %s416_s22 = int_to_ptr.vmem [resolvable:$true] %s415_s22 }
  0x1d   : > { %s6374_s21 = smov 64   ;;  %s5849_s24 = smov [#allocation12]  }
  0x1e   : > { %5529 = dma.hbm_to_vmem [thread:$0]  (!%p5951_p5), %s414_s17, 16384, %s416_s22, [#allocation8], %s6374_s21, %s6374_s21, %s6373_s18  }
  0x1f   : > { %s445_s26 = sshll.u32 %s5849_s24, 4  ;;  %465 = sbr.rel (%p5940_p3) target bundleno = 2073 (0x819), region = 72  ;;  %s446_s26 = int_to_ptr.vmem [resolvable:$true] %s445_s26 }
  0x20   : > { %5535 = dma.hbm_to_vmem [thread:$0]  (!%p5951_p5), %s444_s15, 16, %s446_s26, [#allocation11]  }
  0x24   : > { %5819 = dma.done.wait (%p5536_p2), [#allocation3], 3072  }
  0x25   : > { %5821 = vsyncadd (%p5536_p2), [#allocation3], 4294964224 }
  0x26   : > { %5823 = dma.done.wait (%p5536_p2), [#allocation5], 1040  }
  0x27   : > { %5825 = vsyncadd (%p5536_p2), [#allocation5], 4294966256 }
  0x28   : > { %5827 = dma.done.wait (%p5536_p2), [#allocation8], 32768  }
  0x29   : > { %5829 = vsyncadd (%p5536_p2), [#allocation8], 4294934528 }
  0x2a   : > { %5831 = dma.done.wait (%p5536_p2), [#allocation11], 32  }
  0x2b   : > { %5833 = vsyncadd (%p5536_p2), [#allocation11], 4294967264  ;;  %v4122_v0 = vld [vmem:[#allocation2 + $0xa8] sm:$0xf]  ;;  %v5220_v1 = vld [vmem:[#allocation2 + $0xb0] sm:$0xf0] }
  0x2c   : > { %v5219_v2 = vld [vmem:[#allocation2 + $0xac] sm:$0xf]  ;;  %v4123_v3 = vor.u32 %v5220_v1, %v4122_v0  ;;  %v4124_v4 = vld [vmem:[#allocation2 + $0xb4] sm:$0xf0]  ;;  %v4110_v5 = vld [vmem:[#allocation2 + $0x90] sm:$0xf] }
  0x2d   : > { %v5217_v6 = vld [vmem:[#allocation2 + $0x98] sm:$0xf0]  ;;  %v4127_v7 = vor.u32 %v5219_v2, %v4124_v4  ;;  %v5216_v8 = vld [vmem:[#allocation2 + $0x94] sm:$0xf]  ;;  %v4112_v9 = vld [vmem:[#allocation2 + $0x9c] sm:$0xf0] }
  0x2e   : > { %717 = vmatpush.bf16.msra.mxu0 %v4123_v3  ;;  %v4111_v10 = vor.u32 %v5217_v6, %v4110_v5  ;;  %v4115_v11 = vor.u32 %v5216_v8, %v4112_v9  ;;  %v4098_v12 = vld [vmem:[#allocation2 + $0x78] sm:$0xf]  ;;  %v5214_v13 = vld [vmem:[#allocation2 + $0x80] sm:$0xf0]  ;;  %v5213_v14 = vld [vmem:[#allocation2 + $0x7c] sm:$0xf] }
  0x2f   : > { %730 = vmatpush.bf16.msra.mxu1 %v4127_v7  ;;  %v4100_v15 = vld [vmem:[#allocation2 + $0x84] sm:$0xf0]  ;;  %v4099_v16 = vor.u32 %v5214_v13, %v4098_v12  ;;  %v4086_v18 = vld [vmem:[#allocation2 + $0x60] sm:$0xf]  ;;  %v5211_v19 = vld [vmem:[#allocation2 + $0x68] sm:$0xf0] }
  0x30   : > { %v4103_v17 = vor.u32 %v5213_v14, %v4100_v15  ;;  %v5210_v20 = vld [vmem:[#allocation2 + $0x64] sm:$0xf]  ;;  %v4088_v21 = vld [vmem:[#allocation2 + $0x6c] sm:$0xf0]  ;;  %v4074_v22 = vld [vmem:[#allocation2 + $0x48] sm:$0xf]  ;;  %v4087_v23 = vor.u32 %v5211_v19, %v4086_v18 }
  0x31   : > { %p538_p6 = scmp.lt.s32.totalorder %s5935_s29, 1  ;;  %v5208_v24 = vld [vmem:[#allocation2 + $0x50] sm:$0xf0]  ;;  %v4091_v25 = vor.u32 %v5210_v20, %v4088_v21  ;;  %v5207_v26 = vld [vmem:[#allocation2 + $0x4c] sm:$0xf]  ;;  %s5850_s16 = smov 32  }
  0x32   : > { %718 = vmatpush.bf16.msra.mxu0 %v4111_v10  ;;  %v4076_v27 = vld [vmem:[#allocation2 + $0x54] sm:$0xf0]  ;;  %v4075_v28 = vor.u32 %v5208_v24, %v4074_v22  ;;  %v4062_v30 = vld [vmem:[#allocation2 + $0x30] sm:$0xf]  ;;  %v5205_v31 = vld [vmem:[#allocation2 + $0x38] sm:$0xf0] }
  0x33   : > { %731 = vmatpush.bf16.msra.mxu1 %v4115_v11  ;;  %v4079_v29 = vor.u32 %v5207_v26, %v4076_v27  ;;  %v5204_v32 = vld [vmem:[#allocation2 + $0x34] sm:$0xf]  ;;  %v4064_v33 = vld [vmem:[#allocation2 + $0x3c] sm:$0xf0]  ;;  %s6376_s29 = smov (!%p538_p6, %s5935_s29), 1  ;;  %v4063_v34 = vor.u32 %v5205_v31, %v4062_v30  ;;  %s5851_s20 = smov 96  }
  0x34   : > { %v4067_v35 = vor.u32 %v5204_v32, %v4064_v33  ;;  %v4050_v36 = vld [vmem:[#allocation2 + $0x18] sm:$0xf]  ;;  %v5202_v37 = vld [vmem:[#allocation2 + $0x20] sm:$0xf0]  ;;  %v5201_v38 = vld [vmem:[#allocation2 + $0x1c] sm:$0xf] }
  0x35   : > { %v4052_v39 = vld [vmem:[#allocation2 + $0x24] sm:$0xf0]  ;;  %s4034_s30 = sshll.u32 %s6376_s29, 3  ;;  %v4051_v40 = vor.u32 %v5202_v37, %v4050_v36  ;;  %v4038_v42 = vld [vmem:[#allocation2] sm:$0xf]  ;;  %s5852_s14 = smov 64  }
  0x36   : > { %719 = vmatpush.bf16.msra.mxu0 %v4099_v16  ;;  %v4055_v41 = vor.u32 %v5201_v38, %v4052_v39  ;;  %v5199_v43 = vld [vmem:[#allocation2 + $0x8] sm:$0xf0]  ;;  %s541_s23 = scalar_lea.vmem %s6351_s0, %s4034_s30  ;;  %v5198_v44 = vld [vmem:[#allocation2 + $0x4] sm:$0xf]  ;;  %v4040_v45 = vld [vmem:[#allocation2 + $0xc] sm:$0xf0]  ;;  %s545_s3 = scalar_lea.vmem %s6364_s13, %s4034_s30 }
  0x37   : > { %732 = vmatpush.bf16.msra.mxu1 %v4103_v17  ;;  %v4039_v46 = vor.u32 %v5199_v43, %v4038_v42  ;;  %v6021_v47 = vld [vmem:[%s541_s23] sm:$0xff]  ;;  %v4043_v48 = vor.u32 %v5198_v44, %v4040_v45  ;;  %v5853_v61 = vmov 1983009808   ;;  %vm768_vm0 = vcmask 1047556  }
  0x38   : > { %v6025_v49 = vpack.c.bf16 %v6021_v47, %v6021_v47  ;;  %v6032_v50 = vld [vmem:[%s6353_s2] sm:$0x7]  ;;  %v773_v62 = vunpack.c.l.s4 %v5853_v61  ;;  %v5854_v10 = vmov 1934713408   ;;  %vm1130_vm1 = vcmask 261120  }
  0x39   : > { %v583_v51 = vperm.slane %v6032_v50, 0  ;;  %v584_v52 = vperm.slane %v6032_v50, 1  ;;  %v797_v11 = vunpack.c.l.s4 %v5854_v10  ;;  %vm1207_vm2 = vcmask 64512  }
  0x3a   : > { %720 = vmatpush.bf16.msra.mxu0 %v4087_v23  ;;  %v6043_v6 = vunpack.c.0.s8 %v773_v62  ;;  %vm1259_vm3 = vcmask 1043456   ;;  %vm1456_vm4 = vcmask 523264   ;;  %vm1458_vm5 = vcmask 785408  }
  0x3b   : > { %733 = vmatpush.bf16.msra.mxu1 %v4091_v25  ;;  %v6052_v19 = vunpack.c.0.s8 %v797_v11 }
  0x3e   : > { %721 = vmatpush.bf16.msra.mxu0 %v4075_v28 }
  0x3f   : > { %734 = vmatpush.bf16.msra.mxu1 %v4079_v29 }
  0x42   : > { %722 = vmatpush.bf16.msra.mxu0 %v4063_v34 }
  0x43   : > { %735 = vmatpush.bf16.msra.mxu1 %v4067_v35 }
  0x46   : > { %723 = vmatpush.bf16.msra.mxu0 %v4051_v40 }
  0x47   : > { %736 = vmatpush.bf16.msra.mxu1 %v4055_v41 }
  0x4a   : > { %724 = vmatpush.bf16.msra.mxu0 %v4039_v46 }
  0x4b   : > { %737 = vmatpush.bf16.msra.mxu1 %v4043_v48 }
  0x4d   : > { %725 = vmatmul.bf16.vlgmr.msra.gmra.mxu0 %v6025_v49 }
  0x4e   : > { %738 = vmatmul.bf16.vlgmr.msra.gmra.mxu1 %v6025_v49 }
  0xca   : > { %v726_v53 = vpop.f32.mrf.mxu0 }
  0xcb   : > { %v727_v54 = vadd.f32 %v726_v53, %v583_v51  ;;  %v739_v55 = vpop.f32.mrf.mxu1 }
  0xcc   : > { %v740_v56 = vadd.f32 %v739_v55, %v584_v52 }
  0xcd   : > { %v756_v57 = vmul.f32 0.17677669, %v727_v54 }
  0xce   : > { %831 = vrot.lane.b32.xlu1 %v740_v56, %s5850_s16  ;;  %825 = vrot.lane.b32.xlu0 %v740_v56, %s5851_s20  ;;  %v836_v17 = vrot.slane %v740_v56, 4 }
  0xcf   : > { %761 = vrot.lane.b32.xlu2 %v756_v57, %s5852_s14  ;;  %v770_v4 = vrot.slane %v756_v57, 4 }
  0xd2   : > { %v728_v58 = vpop.f32.mrf.mxu0 }
  0xd3   : > { %v741_v59 = vpop.f32.mrf.mxu1 }
  0xd6   : > { %828 = vrot.lane.b32.xlu0 %v740_v56, %s5852_s14  ;;  %758 = vrot.lane.b32.xlu1 %v756_v57, %s5851_s20 }
  0xd7   : > { %764 = vrot.lane.b32.xlu2 %v756_v57, %s5850_s16 }
 0x129   : > { %v762_v60 = vpop.permute.xlu2 %761 }
 0x12a   : > { %v767_v63 = vrot.slane %v762_v60, 4  ;;  %v771_v12 = vsel %vm768_vm0, %v762_v60, %v770_v4 }
 0x12b   : > { %v779_v18 = vperm.slane %v771_v12, %v6043_v6 }
 0x12c   : > { %v769_v7 = vsel %vm768_vm0, %v767_v63, %v756_v57 }
 0x12d   : > { %v775_v14 = vperm.slane %v769_v7, %v6043_v6  ;;  %v806_v37 = vrot.slane %v779_v18, 4 }
 0x12f   : > { %v794_v29 = vrot.slane %v775_v14, 4 }
 0x131   : > { %v765_v8 = vpop.permute.xlu2 %764 }
 0x132   : > { %v780_v15 = vrot.slane %v765_v8, 4 }
 0x140   : > { %v832_v0 = vpop.permute.xlu1 %831  ;;  %v826_v1 = vpop.permute.xlu0 %825 }
 0x141   : > { %v846_v2 = vrot.slane %v832_v0, 4  ;;  %v848_v3 = vrot.slane %v826_v1, 4 }
 0x143   : > { %v849_v5 = vsel %vm768_vm0, %v832_v0, %v848_v3  ;;  %v847_v9 = vsel %vm768_vm0, %v846_v2, %v826_v1 }
 0x144   : > { %v857_v13 = vperm.slane %v849_v5, %v6043_v6  ;;  %v853_v16 = vperm.slane %v847_v9, %v6043_v6 }
 0x146   : > { %v870_v26 = vrot.slane %v857_v13, 4  ;;  %v858_v30 = vrot.slane %v853_v16, 4 }
 0x148   : > { %v829_v20 = vpop.permute.xlu0 %828  ;;  %v759_v21 = vpop.permute.xlu1 %758 }
 0x149   : > { %v834_v22 = vrot.slane %v829_v20, 4  ;;  %v837_v23 = vsel %vm768_vm0, %v829_v20, %v836_v17  ;;  %v781_v24 = vsel %vm768_vm0, %v780_v15, %v759_v21  ;;  %v782_v25 = vrot.slane %v759_v21, 4 }
 0x14a   : > { %v845_v27 = vperm.slane %v837_v23, %v6043_v6  ;;  %v787_v28 = vperm.slane %v781_v24, %v6043_v6 }
 0x14b   : > { %v835_v31 = vsel %vm768_vm0, %v834_v22, %v740_v56  ;;  %v783_v32 = vsel %vm768_vm0, %v765_v8, %v782_v25 }
 0x14c   : > { %v841_v33 = vperm.slane %v835_v31, %v6043_v6  ;;  %v871_v34 = vsel %vm768_vm0, %v870_v26, %v845_v27  ;;  %v872_v35 = vrot.slane %v845_v27, 4  ;;  %v791_v36 = vperm.slane %v783_v32, %v6043_v6 }
 0x14d   : > { %v877_v38 = vperm.slane %v871_v34, %v6052_v19  ;;  %v792_v39 = vrot.slane %v787_v28, 4  ;;  %v795_v40 = vsel %vm768_vm0, %v787_v28, %v794_v29 }
 0x14e   : > { %v859_v41 = vsel %vm768_vm0, %v858_v30, %v841_v33  ;;  %v860_v42 = vrot.slane %v841_v33, 4  ;;  %v873_v43 = vsel %vm768_vm0, %v857_v13, %v872_v35  ;;  %v803_v44 = vperm.slane %v795_v40, %v6052_v19 }
 0x14f   : > { %v865_v45 = vperm.slane %v859_v41, %v6052_v19  ;;  %v881_v46 = vperm.slane %v873_v43, %v6052_v19  ;;  %v886_v48 = vrot.slane %v877_v38, 4  ;;  %v793_v51 = vsel %vm768_vm0, %v792_v39, %v775_v14  ;;  %v4130_v41 = vld [vmem:[#allocation2 + $0xb0] sm:$0xf] }
 0x150   : > { %v861_v52 = vsel %vm768_vm0, %v853_v16, %v860_v42  ;;  %v799_v53 = vperm.slane %v793_v51, %v6052_v19  ;;  %v804_v54 = vrot.slane %v791_v36, 4  ;;  %v807_v55 = vsel %vm768_vm0, %v791_v36, %v806_v37  ;;  %v5221_v42 = vld [vmem:[#allocation2 + $0xb8] sm:$0xf0] }
 0x151   : > { %v869_v56 = vperm.slane %v861_v52, %v6052_v19  ;;  %v882_v57 = vrot.slane %v865_v45, 4  ;;  %v887_v58 = vsel %vm768_vm0, 0.0, %v886_v48  ;;  %v888_v59 = vrot.slane %v881_v46, 4 }
 0x152   : > { %v805_v60 = vsel %vm768_vm0, %v804_v54, %v779_v18  ;;  %v815_v61 = vperm.slane %v807_v55, %v6052_v19  ;;  %v816_v62 = vrot.slane %v799_v53, 4  ;;  %v818_v63 = vrot.slane %v803_v44, 4 }
 0x153   : > { %v883_v0 = vsel %vm768_vm0, 0.0, %v882_v57  ;;  %v884_v1 = vrot.slane %v869_v56, 4  ;;  %v889_v2 = vsel %vm768_vm0, 0.0, %v888_v59  ;;  %v1025_v3 = vsel %vm768_vm0, %v888_v59, %v877_v38 }
 0x154   : > { %v1029_v4 = vperm.slane %v1025_v3, %v6043_v6  ;;  %v1030_v5 = vrot.slane %v889_v2, 4  ;;  %v811_v7 = vperm.slane %v805_v60, %v6052_v19  ;;  %v817_v8 = vsel %vm768_vm0, 0.0, %v816_v62 }
 0x155   : > { %v885_v9 = vsel %vm768_vm0, 0.0, %v884_v1  ;;  %v819_v10 = vsel %vm768_vm0, 0.0, %v818_v63  ;;  %v822_v11 = vrot.slane %v815_v61, 4  ;;  %v956_v12 = vsel %vm768_vm0, %v818_v63, %v799_v53 }
 0x156   : > { %v1019_v13 = vrot.slane %v885_v9, 4  ;;  %v1031_v14 = vsel %vm768_vm0, %v1030_v5, %v887_v58  ;;  %v820_v15 = vrot.slane %v811_v7, 4  ;;  %v961_v16 = vrot.slane %v819_v10, 4  ;;  %v5218_v5 = vld [vmem:[#allocation2 + $0xa0] sm:$0xf0] }
 0x157   : > { %v1035_v17 = vperm.slane %v1031_v14, %v6043_v6  ;;  %v823_v18 = vsel %vm768_vm0, 0.0, %v822_v11  ;;  %v1014_v20 = vsel %vm768_vm0, %v884_v1, %v865_v45  ;;  %v1050_v21 = vrot.slane %v1029_v4, 4 }
 0x158   : > { %v821_v22 = vsel %vm768_vm0, 0.0, %v820_v15  ;;  %v962_v23 = vsel %vm768_vm0, %v961_v16, %v817_v8  ;;  %v972_v24 = vrot.slane %v823_v18, 4  ;;  %v1018_v25 = vperm.slane %v1014_v20, %v6043_v6  ;;  %v5215_v16 = vld [vmem:[#allocation2 + $0x88] sm:$0xf0] }
 0x159   : > { %v1020_v26 = vsel %vm768_vm0, %v1019_v13, %v883_v0  ;;  %v1048_v27 = vrot.slane %v1035_v17, 4  ;;  %v1051_v28 = vsel %vm768_vm0, %v1035_v17, %v1050_v21  ;;  %v960_v29 = vperm.slane %v956_v12, %v6043_v6 }
 0x15a   : > { %v1024_v30 = vperm.slane %v1020_v26, %v6043_v6  ;;  %v1038_v31 = vrot.slane %v1018_v25, 4  ;;  %v1059_v32 = vperm.slane %v1051_v28, %v6052_v19  ;;  %v966_v33 = vperm.slane %v962_v23, %v6043_v6 }
 0x15b   : > { %v1049_v34 = vsel %vm768_vm0, %v1048_v27, %v1029_v4  ;;  %v967_v35 = vsel %vm768_vm0, %v822_v11, %v811_v7  ;;  %v973_v36 = vsel %vm768_vm0, %v972_v24, %v821_v22  ;;  %v980_v37 = vrot.slane %v960_v29, 4  ;;  %v4118_v4 = vld [vmem:[#allocation2 + $0x98] sm:$0xf]  ;;  %v4106_v11 = vld [vmem:[#allocation2 + $0x80] sm:$0xf] }
 0x15c   : > { %v1036_v38 = vrot.slane %v1024_v30, 4  ;;  %v1055_v39 = vperm.slane %v1049_v34, %v6052_v19  ;;  %v1039_v40 = vsel %vm768_vm0, %v1024_v30, %v1038_v31  ;;  %v971_v44 = vperm.slane %v967_v35, %v6043_v6  ;;  %v5212_v30 = vld [vmem:[#allocation2 + $0x70] sm:$0xf0]  ;;  %v4082_v31 = vld [vmem:[#allocation2 + $0x50] sm:$0xf] }
 0x15d   : > { %v1047_v43 = vperm.slane %v1039_v40, %v6052_v19  ;;  %v977_v45 = vperm.slane %v973_v36, %v6043_v6  ;;  %v978_v46 = vrot.slane %v966_v33, 4  ;;  %v981_v52 = vsel %vm768_vm0, %v966_v33, %v980_v37  ;;  %v5209_v33 = vld [vmem:[#allocation2 + $0x58] sm:$0xf0]  ;;  %v4070_v35 = vld [vmem:[#allocation2 + $0x38] sm:$0xf] }
 0x15e   : > { %v1037_v48 = vsel %vm768_vm0, %v1036_v38, %v1018_v25  ;;  %v1060_v51 = vrot.slane %v1055_v39, 4  ;;  %v4131_v53 = vor.u32 %v5221_v42, %v4130_v41  ;;  %v1064_v55 = vrot.slane %v1059_v32, 4  ;;  %v5206_v36 = vld [vmem:[#allocation2 + $0x40] sm:$0xf0]  ;;  %v5203_v40 = vld [vmem:[#allocation2 + $0x28] sm:$0xf0] }
 0x15f   : > { %v1043_v54 = vperm.slane %v1037_v48, %v6052_v19  ;;  %v1066_v56 = vrot.slane %v1047_v43, 4  ;;  %v990_v57 = vrot.slane %v977_v45, 4  ;;  %v6112_v58 = vperm.slane %v981_v52, %v6052_v19 }
 0x160   : > { %v992_v59 = vrot.slane %v971_v44, 4  ;;  %743 = vmatpush.bf16.msra.mxu2 %v4131_v53  ;;  %v979_v2 = vsel %vm768_vm0, %v978_v46, %v960_v29  ;;  %v1065_v10 = vsel %vm768_vm0, %v1064_v55, %v1047_v43  ;;  %v4119_v20 = vor.u32 %v5218_v5, %v4118_v4  ;;  %v4094_v29 = vld [vmem:[#allocation2 + $0x68] sm:$0xf] }
 0x161   : > { %v1061_v60 = vsel %vm768_vm0, %v1060_v51, %v1043_v54  ;;  %v1067_v61 = vsel %vm768_vm0, %v1059_v32, %v1066_v56  ;;  %v1062_v62 = vrot.slane %v1043_v54, 4  ;;  %v991_v63 = vsel %vm768_vm0, %v990_v57, %v971_v44  ;;  %v4046_v43 = vld [vmem:[#allocation2 + $0x8] sm:$0xf]  ;;  %v5200_v44 = vld [vmem:[#allocation2 + $0x10] sm:$0xf0] }
 0x162   : > { %v1068_v0 = vpack.c.bf16 %v1061_v60, %v1061_v60  ;;  %v1071_v1 = vpack.c.bf16 %v1067_v61, %v1067_v61  ;;  %v997_v3 = vperm.slane %v991_v63, %v6052_v19  ;;  %v993_v8 = vsel %vm768_vm0, %v977_v45, %v992_v59 }
 0x163   : > { %v1063_v7 = vsel %vm768_vm0, %v1055_v39, %v1062_v62  ;;  %v1008_v9 = vrot.slane %v6112_v58, 4  ;;  %v985_v17 = vperm.slane %v979_v2, %v6052_v19  ;;  %v1001_v18 = vperm.slane %v993_v8, %v6052_v19  ;;  %v4058_v39 = vld [vmem:[#allocation2 + $0x20] sm:$0xf] }
 0x164   : > { %v1135_v12 = vsel %vm1130_vm1, %v1068_v0, 0  ;;  %v1192_v13 = vsel %vm1130_vm1, %v1071_v1, 0  ;;  %v1069_v14 = vpack.c.bf16 %v1063_v7, %v1063_v7  ;;  %v1002_v15 = vrot.slane %v997_v3, 4  ;;  %744 = vmatpush.bf16.msra.mxu2 %v4119_v20 }
 0x165   : > { %1144 = vmatpush.bf16.xpose.msra.mxu3 %v1135_v12  ;;  %1201 = vmatpush.bf16.xpose.msrb.mxu0 %v1192_v13  ;;  %v1070_v22 = vpack.c.bf16 %v1065_v10, %v1065_v10  ;;  %v1009_v24 = vsel %vm768_vm0, %v1001_v18, %v1008_v9  ;;  %v4107_v25 = vor.u32 %v5215_v16, %v4106_v11  ;;  %v1004_v37 = vrot.slane %v985_v17, 4 }
 0x166   : > { %v1154_v21 = vsel %vm1130_vm1, %v1069_v14, 0  ;;  %v1003_v23 = vsel %vm768_vm0, %v1002_v15, %v985_v17  ;;  %v1013_v27 = vpack.c.bf16 %v1009_v24, %v1009_v24  ;;  %v4095_v32 = vor.u32 %v5212_v30, %v4094_v29 }
 0x167   : > { %v1010_v26 = vpack.c.bf16 %v1003_v23, %v1003_v23  ;;  %v1173_v28 = vsel %vm1130_vm1, %v1070_v22, 0  ;;  %v4083_v34 = vor.u32 %v5209_v33, %v4082_v31  ;;  %v4071_v38 = vor.u32 %v5206_v36, %v4070_v35 }
 0x168   : > { %745 = vmatpush.bf16.msra.mxu2 %v4107_v25  ;;  %v1005_v41 = vsel %vm768_vm0, %v997_v3, %v1004_v37  ;;  %v4059_v42 = vor.u32 %v5203_v40, %v4058_v39  ;;  %v4047_v46 = vor.u32 %v5200_v44, %v4046_v43  ;;  %v1006_v48 = vrot.slane %v1001_v18, 4 }
 0x169   : > { %v1011_v45 = vpack.c.bf16 %v1005_v41, %v1005_v41 }
 0x16a   : > { %v1007_v51 = vsel %vm768_vm0, %v1006_v48, %v6112_v58  ;;  %v585_v58 = vperm.slane %v6032_v50, 2 }
 0x16b   : > { %v1012_v52 = vpack.c.bf16 %v1007_v51, %v1007_v51 }
 0x16c   : > { %4132 = vmatmul.msk.bf16.vlgmr.msra.gmra.mxu3 %vm1130_vm1, %v1010_v26  ;;  %4135 = vmatmul.msk.bf16.vlgmr.msrb.gmra.mxu0 %vm1130_vm1, %v1013_v27 }
 0x16d   : > { %1163 = vmatpush.bf16.xpose.msrb.mxu3 %v1154_v21  ;;  %746 = vmatpush.bf16.msra.mxu2 %v4095_v32 }
 0x171   : > { %747 = vmatpush.bf16.msra.mxu2 %v4083_v34 }
 0x175   : > { %1182 = vmatpush.bf16.xpose.msra.mxu3 %v1173_v28  ;;  %748 = vmatpush.bf16.msra.mxu2 %v4071_v38 }
 0x179   : > { %749 = vmatpush.bf16.msra.mxu2 %v4059_v42 }
 0x17c   : > { %4133 = vmatmul.msk.bf16.vlgmr.msrb.gmra.mxu3 %vm1130_vm1, %v1011_v45 }
 0x17d   : > { %750 = vmatpush.bf16.msra.mxu2 %v4047_v46 }
 0x180   : > { %751 = vmatmul.bf16.vlgmr.msra.gmra.mxu2 %v6025_v49 }
 0x18c   : > { %4134 = vmatmul.msk.bf16.vlgmr.msra.gmra.mxu3 %vm1130_vm1, %v1012_v52 }
 0x1e9   : > { %v1203_v53 = vpop.f32.mrf.mxu0 }
 0x1ea   : > { %v1217_v54 = vsel %vm1207_vm2, %v1203_v53, -inf }
 0x1eb   : > { %1218 = vmax.xlane.f32.xlu2 %v1217_v54 }
 0x1ef   : > { %v1146_v55 = vpop.f32.mrf.mxu3 }
 0x1f0   : > { %v1208_v56 = vsel %vm1207_vm2, %v1146_v55, -inf }
 0x1f1   : > { %v1205_v57 = vpop.f32.mrf.mxu0  ;;  %1209 = vmax.xlane.f32.xlu0 %v1208_v56 }
 0x1f7   : > { %v1148_v59 = vpop.f32.mrf.mxu3 }
 0x1ff   : > { %v1165_v60 = vpop.f32.mrf.mxu3 }
 0x200   : > { %v1211_v49 = vsel %vm1207_vm2, %v1165_v60, -inf }
 0x201   : > { %1212 = vmax.xlane.f32.xlu2 %v1211_v49 }
 0x203   : > { %v752_v61 = vpop.f32.mrf.mxu2 }
 0x204   : > { %v753_v62 = vadd.f32 %v752_v61, %v585_v58 }
 0x206   : > { %891 = vrot.lane.b32.xlu0 %v753_v62, %s5851_s20  ;;  %v902_v33 = vrot.slane %v753_v62, 4 }
 0x207   : > { %v1167_v63 = vpop.f32.mrf.mxu3 }
 0x20b   : > { %v754_v0 = vpop.f32.mrf.mxu2 }
 0x20f   : > { %v1184_v1 = vpop.f32.mrf.mxu3 }
 0x210   : > { %v1214_v2 = vsel %vm1207_vm2, %v1184_v1, -inf }
 0x211   : > { %1215 = vmax.xlane.f32.xlu1 %v1214_v2 }
 0x217   : > { %v1186_v3 = vpop.f32.mrf.mxu3 }
 0x219   : > { %897 = vrot.lane.b32.xlu2 %v753_v62, %s5850_s16 }
 0x22a   : > { %894 = vrot.lane.b32.xlu1 %v753_v62, %s5852_s14 }
 0x25e   : > { %v1219_v4 = vpop.xlane.xlu2 %1218 }
 0x25f   : > { %v1223_v8 = vsub.f32 %v1203_v53, %v1219_v4 }
 0x261   : > { %v1230_v9 = vmul.f32 1.442695, %v1223_v8 }
 0x264   : > { %v1210_v5 = vpop.xlane.xlu0 %1209 }
 0x265   : > { %v1220_v7 = vsub.f32 %v1146_v55, %v1210_v5 }
 0x267   : > { %v1224_v50 = vmul.f32 1.442695, %v1220_v7 }
 0x269   : > { %5582 = vpow2.f32 %v1224_v50 }
 0x26a   : > { %5584 = vpow2.f32 %v1230_v9 }
 0x26f   : > { %v6147_v10 = vpop.eup %5582 }
 0x270   : > { %v1232_v11 = vsel %vm1207_vm2, %v6147_v10, 0.0  ;;  %v6151_v13 = vpop.eup %5584 }
 0x271   : > { %1233 = vadd.xlane.f32.xlu0 %v1232_v11  ;;  %v1241_v16 = vsel %vm1207_vm2, %v6151_v13, 0.0 }
 0x274   : > { %v1213_v12 = vpop.xlane.xlu2 %1212 }
 0x275   : > { %v1221_v14 = vsub.f32 %v1165_v60, %v1213_v12 }
 0x277   : > { %v1226_v15 = vmul.f32 1.442695, %v1221_v14 }
 0x278   : > { %v892_v23 = vpop.permute.xlu0 %891 }
 0x279   : > { %5586 = vpow2.f32 %v1226_v15  ;;  %1242 = vadd.xlane.f32.xlu0 %v1241_v16  ;;  %v914_v27 = vrot.slane %v892_v23, 4 }
 0x27c   : > { %v898_v26 = vpop.permute.xlu2 %897 }
 0x27d   : > { %v912_v28 = vrot.slane %v898_v26, 4  ;;  %v915_v29 = vsel %vm768_vm0, %v898_v26, %v914_v27 }
 0x27e   : > { %v923_v31 = vperm.slane %v915_v29, %v6043_v6 }
 0x27f   : > { %v6155_v17 = vpop.eup %5586  ;;  %v913_v30 = vsel %vm768_vm0, %v912_v28, %v892_v23 }
 0x280   : > { %v1235_v18 = vsel %vm1207_vm2, %v6155_v17, 0.0  ;;  %v919_v32 = vperm.slane %v913_v30, %v6043_v6  ;;  %v936_v34 = vrot.slane %v923_v31, 4 }
 0x281   : > { %1236 = vadd.xlane.f32.xlu2 %v1235_v18 }
 0x282   : > { %v924_v38 = vrot.slane %v919_v32, 4 }
 0x284   : > { %v1216_v20 = vpop.xlane.xlu1 %1215 }
 0x285   : > { %v1222_v21 = vsub.f32 %v1184_v1, %v1216_v20 }
 0x287   : > { %v1228_v22 = vmul.f32 1.442695, %v1222_v21 }
 0x289   : > { %5588 = vpow2.f32 %v1228_v22 }
 0x28f   : > { %v6159_v24 = vpop.eup %5588 }
 0x290   : > { %v1238_v25 = vsel %vm1207_vm2, %v6159_v24, 0.0 }
 0x291   : > { %1239 = vadd.xlane.f32.xlu1 %v1238_v25 }
 0x29c   : > { %v895_v35 = vpop.permute.xlu1 %894 }
 0x29d   : > { %v900_v36 = vrot.slane %v895_v35, 4  ;;  %v903_v37 = vsel %vm768_vm0, %v895_v35, %v902_v33 }
 0x29e   : > { %v911_v39 = vperm.slane %v903_v37, %v6043_v6 }
 0x29f   : > { %v901_v40 = vsel %vm768_vm0, %v900_v36, %v753_v62 }
 0x2a0   : > { %v907_v41 = vperm.slane %v901_v40, %v6043_v6  ;;  %v937_v42 = vsel %vm768_vm0, %v936_v34, %v911_v39  ;;  %v938_v43 = vrot.slane %v911_v39, 4 }
 0x2a1   : > { %v943_v44 = vperm.slane %v937_v42, %v6052_v19 }
 0x2a2   : > { %v925_v45 = vsel %vm768_vm0, %v924_v38, %v907_v41  ;;  %v926_v46 = vrot.slane %v907_v41, 4  ;;  %v939_v48 = vsel %vm768_vm0, %v923_v31, %v938_v43 }
 0x2a3   : > { %v931_v51 = vperm.slane %v925_v45, %v6052_v19  ;;  %v947_v52 = vperm.slane %v939_v48, %v6052_v19  ;;  %v952_v55 = vrot.slane %v943_v44, 4 }
 0x2a4   : > { %v927_v53 = vsel %vm768_vm0, %v919_v32, %v926_v46 }
 0x2a5   : > { %v935_v54 = vperm.slane %v927_v53, %v6052_v19  ;;  %v954_v56 = vrot.slane %v947_v52, 4  ;;  %v948_v57 = vrot.slane %v931_v51, 4  ;;  %v953_v63 = vsel %vm768_vm0, 0.0, %v952_v55 }
 0x2a7   : > { %v950_v59 = vrot.slane %v935_v54, 4  ;;  %v955_v60 = vsel %vm768_vm0, 0.0, %v954_v56  ;;  %v1083_v49 = vsel %vm768_vm0, %v954_v56, %v943_v44  ;;  %v949_v5 = vsel %vm768_vm0, 0.0, %v948_v57 }
 0x2a8   : > { %v1087_v58 = vperm.slane %v1083_v49, %v6043_v6  ;;  %v1088_v61 = vrot.slane %v955_v60, 4 }
 0x2a9   : > { %v951_v62 = vsel %vm768_vm0, 0.0, %v950_v59  ;;  %v1072_v0 = vsel %vm768_vm0, %v950_v59, %v931_v51 }
 0x2aa   : > { %v1077_v1 = vrot.slane %v951_v62, 4  ;;  %v1089_v2 = vsel %vm768_vm0, %v1088_v61, %v953_v63  ;;  %v1108_v3 = vrot.slane %v1087_v58, 4  ;;  %v1076_v4 = vperm.slane %v1072_v0, %v6043_v6 }
 0x2ab   : > { %v1093_v7 = vperm.slane %v1089_v2, %v6043_v6 }
 0x2ac   : > { %v1078_v8 = vsel %vm768_vm0, %v1077_v1, %v949_v5  ;;  %v1096_v50 = vrot.slane %v1076_v4, 4 }
 0x2ad   : > { %v1082_v9 = vperm.slane %v1078_v8, %v6043_v6  ;;  %v1109_v11 = vsel %vm768_vm0, %v1093_v7, %v1108_v3  ;;  %v1106_v12 = vrot.slane %v1093_v7, 4 }
 0x2ae   : > { %v1117_v14 = vperm.slane %v1109_v11, %v6052_v19 }
 0x2af   : > { %v1097_v15 = vsel %vm768_vm0, %v1082_v9, %v1096_v50  ;;  %v1094_v16 = vrot.slane %v1082_v9, 4  ;;  %v1107_v18 = vsel %vm768_vm0, %v1106_v12, %v1087_v58 }
 0x2b0   : > { %v1105_v20 = vperm.slane %v1097_v15, %v6052_v19  ;;  %v1122_v21 = vrot.slane %v1117_v14, 4  ;;  %v1113_v22 = vperm.slane %v1107_v18, %v6052_v19 }
 0x2b1   : > { %v1095_v23 = vsel %vm768_vm0, %v1094_v16, %v1076_v4 }
 0x2b2   : > { %v1123_v25 = vsel %vm768_vm0, %v1122_v21, %v1105_v20  ;;  %v1101_v26 = vperm.slane %v1095_v23, %v6052_v19  ;;  %v1118_v27 = vrot.slane %v1113_v22, 4  ;;  %v1124_v28 = vrot.slane %v1105_v20, 4 }
 0x2b3   : > { %v1128_v29 = vpack.c.bf16 %v1123_v25, %v1123_v25 }
 0x2b4   : > { %v1119_v30 = vsel %vm768_vm0, %v1118_v27, %v1101_v26  ;;  %v1120_v31 = vrot.slane %v1101_v26, 4  ;;  %v1125_v32 = vsel %vm768_vm0, %v1117_v14, %v1124_v28 }
 0x2b5   : > { %v1299_v33 = vsel %vm1259_vm3, %v1128_v29, 0  ;;  %v1126_v34 = vpack.c.bf16 %v1119_v30, %v1119_v30  ;;  %v1129_v35 = vpack.c.bf16 %v1125_v32, %v1125_v32 }
 0x2b6   : > { %1308 = vmatpush.bf16.msrb.mxu3 %v1299_v33  ;;  %v1121_v36 = vsel %vm768_vm0, %v1113_v22, %v1120_v31 }
 0x2b7   : > { %v1261_v37 = vsel %vm1259_vm3, %v1126_v34, 0  ;;  %v1318_v38 = vsel %vm1259_vm3, %v1129_v35, 0  ;;  %v1127_v39 = vpack.c.bf16 %v1121_v36, %v1121_v36 }
 0x2b8   : > { %1270 = vmatpush.bf16.msrb.mxu2 %v1261_v37  ;;  %1327 = vmatpush.bf16.msra.mxu0 %v1318_v38 }
 0x2b9   : > { %v1280_v40 = vsel %vm1259_vm3, %v1127_v39, 0 }
 0x2bc   : > { %1289 = vmatpush.bf16.msra.mxu2 %v1280_v40 }
 0x2e4   : > { %v1234_v41 = vpop.xlane.xlu0 %1233 }
 0x2e5   : > { %5590 = vrcp.f32 %v1234_v41 }
 0x2eb   : > { %v5591_v42 = vpop.eup %5590 }
 0x2ec   : > { %v1248_v43 = vmul.f32 %v5591_v42, %v6147_v10  ;;  %v1243_v44 = vpop.xlane.xlu0 %1242 }
 0x2ed   : > { %5592 = vrcp.f32 %v1243_v44 }
 0x2ee   : > { %v1252_v45 = vpack.c.bf16 %v1248_v43, %v1248_v43 }
 0x2f0   : > { %4136 = vmatmul.msk.bf16.vlgmr.msrb.gmra.mxu2 %vm1207_vm2, %v1252_v45 }
 0x2f3   : > { %v5593_v46 = vpop.eup %5592 }
 0x2f4   : > { %v1251_v48 = vmul.f32 %v5593_v46, %v6151_v13  ;;  %v1237_v51 = vpop.xlane.xlu2 %1236 }
 0x2f5   : > { %5594 = vrcp.f32 %v1237_v51 }
 0x2f6   : > { %v1255_v52 = vpack.c.bf16 %v1251_v48, %v1251_v48 }
 0x2f8   : > { %4139 = vmatmul.msk.bf16.vlgmr.msra.gmra.mxu0 %vm1207_vm2, %v1255_v52 }
 0x2fb   : > { %v5595_v53 = vpop.eup %5594 }
 0x2fc   : > { %v1249_v54 = vmul.f32 %v5595_v53, %v6155_v17 }
 0x2fe   : > { %v1253_v55 = vpack.c.bf16 %v1249_v54, %v1249_v54 }
 0x300   : > { %4137 = vmatmul.msk.bf16.vlgmr.msra.gmra.mxu2 %vm1207_vm2, %v1253_v55 }
 0x304   : > { %v1240_v10 = vpop.xlane.xlu1 %1239 }
 0x305   : > { %5596 = vrcp.f32 %v1240_v10 }
 0x30b   : > { %v5597_v56 = vpop.eup %5596 }
 0x30c   : > { %v1250_v57 = vmul.f32 %v5597_v56, %v6159_v24 }
 0x30e   : > { %v1254_v59 = vpack.c.bf16 %v1250_v57, %v1250_v57 }
 0x310   : > { %4138 = vmatmul.msk.bf16.vlgmr.msrb.gmra.mxu3 %vm1207_vm2, %v1254_v59 }
 0x373   : > { %v1272_v13 = vpop.f32.mrf.mxu2 }
 0x374   : > { %v1335_v3 = vrot.slane %v1272_v13, 4 }
 0x375   : > { %v1329_v60 = vpop.f32.mrf.mxu0 }
 0x376   : > { %v1345_v0 = vrot.slane %v1329_v60, 4 }
 0x37b   : > { %v1274_v49 = vpop.f32.mrf.mxu2 }
 0x37d   : > { %v1331_v58 = vpop.f32.mrf.mxu0 }
 0x383   : > { %v1291_v61 = vpop.f32.mrf.mxu2 }
 0x384   : > { %v1347_v62 = vrot.slane %v1291_v61, 4  ;;  %v1346_v1 = vsel %vm768_vm0, %v1345_v0, %v1291_v61 }
 0x385   : > { %v1352_v24 = vperm.slane %v1346_v1, %v6043_v6  ;;  %v5228_v1 = vld [vmem:[#allocation4 + $0x30] sm:$0xff] }
 0x386   : > { %v1348_v17 = vsel %vm768_vm0, %v1329_v60, %v1347_v62 }
 0x387   : > { %v1356_v2 = vperm.slane %v1348_v17, %v6043_v6  ;;  %v1357_v11 = vrot.slane %v1352_v24, 4  ;;  %v5229_v17 = vld [vmem:[#allocation4 + $0x38] sm:$0xff] }
 0x388   : > { %1529 = vmatpush.bf16.msrb.mxu1 %v5229_v17  ;;  %v5303_v17 = vld [vmem:[#allocation7 + $0x244] sm:$0xf0] }
 0x389   : > { %v1369_v8 = vrot.slane %v1356_v2, 4 }
 0x38b   : > { %v1293_v63 = vpop.f32.mrf.mxu2 }
 0x38c   : > { %1530 = vmatpush.bf16.msrb.mxu1 %v5228_v1  ;;  %v5295_v1 = vld [vmem:[#allocation7 + $0x20c] sm:$0xf] }
 0x393   : > { %v1310_v4 = vpop.f32.mrf.mxu3 }
 0x394   : > { %v1333_v5 = vrot.slane %v1310_v4, 4  ;;  %v1336_v7 = vsel %vm768_vm0, %v1310_v4, %v1335_v3  ;;  %v5225_v3 = vld [vmem:[#allocation4 + $0x18] sm:$0xff]  ;;  %v5223_v4 = vld [vmem:[#allocation4 + $0x8] sm:$0xff] }
 0x395   : > { %v1344_v50 = vperm.slane %v1336_v7, %v6043_v6 }
 0x396   : > { %v1334_v9 = vsel %vm768_vm0, %v1333_v5, %v1272_v13  ;;  %v5222_v5 = vld [vmem:[#allocation4] sm:$0xff] }
 0x397   : > { %v1340_v12 = vperm.slane %v1334_v9, %v6043_v6  ;;  %v1370_v14 = vsel %vm768_vm0, %v1369_v8, %v1344_v50  ;;  %v1371_v15 = vrot.slane %v1344_v50, 4 }
 0x398   : > { %v1376_v16 = vperm.slane %v1370_v14, %v6052_v19 }
 0x399   : > { %v1358_v18 = vsel %vm768_vm0, %v1357_v11, %v1340_v12  ;;  %v1359_v20 = vrot.slane %v1340_v12, 4  ;;  %v1372_v21 = vsel %vm768_vm0, %v1356_v2, %v1371_v15  ;;  %v5227_v2 = vld [vmem:[#allocation4 + $0x28] sm:$0xff]  ;;  %v5576_v15 = vld [vmem:[%s6355_s4] ss:$0 sm:$0xff] }
 0x39a   : > { %v1364_v22 = vperm.slane %v1358_v18, %v6052_v19  ;;  %v1380_v23 = vperm.slane %v1372_v21, %v6052_v19  ;;  %v1385_v28 = vrot.slane %v1376_v16, 4  ;;  %1531 = vmatpush.bf16.msrb.mxu1 %v5227_v2  ;;  %v4440_v2 = vld [vmem:[#allocation7 + $0x248] sm:$0xf0] }
 0x39b   : > { %v1360_v25 = vsel %vm768_vm0, %v1352_v24, %v1359_v20  ;;  %v1312_v26 = vpop.f32.mrf.mxu3  ;;  %v5224_v24 = vld [vmem:[#allocation4 + $0x10] sm:$0xff] }
 0x39c   : > { %v1368_v27 = vperm.slane %v1360_v25, %v6052_v19  ;;  %v1387_v29 = vrot.slane %v1380_v23, 4  ;;  %v1381_v30 = vrot.slane %v1364_v22, 4  ;;  %v1386_v37 = vsel %vm768_vm0, 0.0, %v1385_v28  ;;  %v4622_v26 = vld [vmem:[#allocation7 + $0x380] sm:$0xf] }
 0x39d   : > { %v5342_v28 = vld [vmem:[#allocation7 + $0x384] sm:$0xf] }
 0x39e   : > { %v1383_v31 = vrot.slane %v1368_v27, 4  ;;  %v1388_v32 = vsel %vm768_vm0, 0.0, %v1387_v29  ;;  %v1400_v33 = vsel %vm768_vm0, %v1387_v29, %v1376_v16  ;;  %v1382_v43 = vsel %vm768_vm0, 0.0, %v1381_v30  ;;  %v5350_v27 = vld [vmem:[#allocation7 + $0x3bc] sm:$0xf0] }
 0x39f   : > { %v1404_v34 = vperm.slane %v1400_v33, %v6043_v6  ;;  %v1405_v35 = vrot.slane %v1388_v32, 4  ;;  %v4623_v29 = vor.u32 %v5350_v27, %v4622_v26  ;;  %v4624_v30 = vld [vmem:[#allocation7 + $0x3c0] sm:$0xf0]  ;;  %v5351_v32 = vld [vmem:[#allocation7 + $0x3c4] sm:$0xf0] }
 0x3a0   : > { %v1384_v36 = vsel %vm768_vm0, 0.0, %v1383_v31  ;;  %v1389_v38 = vsel %vm768_vm0, %v1383_v31, %v1364_v22  ;;  %v5855_v22 = vmov 128.0   ;;  %v4630_v31 = vld [vmem:[#allocation7 + $0x388] sm:$0xf]  ;;  %v4627_v33 = vor.u32 %v5342_v28, %v4624_v30  ;;  %v5270_v26 = vld [vmem:[#allocation7 + $0x13c] sm:$0xf0] }
 0x3a1   : > { %v1406_v39 = vsel %vm768_vm0, %v1405_v35, %v1386_v37  ;;  %v1393_v40 = vperm.slane %v1389_v38, %v6043_v6  ;;  %v1394_v41 = vrot.slane %v1384_v36, 4  ;;  %v1425_v42 = vrot.slane %v1404_v34, 4  ;;  %v4632_v35 = vld [vmem:[#allocation7 + $0x3c8] sm:$0xf0]  ;;  %v4558_v36 = vld [vmem:[#allocation7 + $0x300] sm:$0xf]  ;;  %2385 = vmatpush.bf16.msrb.mxu2 %v4623_v29 }
 0x3a2   : > { %v1410_v44 = vperm.slane %v1406_v39, %v6043_v6  ;;  %5598 = vrcp.f32 %v5855_v22  ;;  %v5334_v38 = vld [vmem:[#allocation7 + $0x33c] sm:$0xf0]  ;;  %v5326_v39 = vld [vmem:[#allocation7 + $0x304] sm:$0xf]  ;;  %2398 = vmatpush.bf16.msra.mxu3 %v4627_v33  ;;  %v4310_v30 = vld [vmem:[#allocation7 + $0x108] sm:$0xf] }
 0x3a3   : > { %v1395_v45 = vsel %vm768_vm0, %v1394_v41, %v1382_v43  ;;  %v1413_v46 = vrot.slane %v1393_v40, 4  ;;  %v4559_v41 = vor.u32 %v5334_v38, %v4558_v36  ;;  %v4566_v43 = vld [vmem:[#allocation7 + $0x308] sm:$0xf]  ;;  %v5262_v27 = vld [vmem:[#allocation7 + $0x104] sm:$0xf] }
 0x3a4   : > { %v1399_v48 = vperm.slane %v1395_v45, %v6043_v6  ;;  %v1426_v51 = vsel %vm768_vm0, %v1410_v44, %v1425_v42  ;;  %v1423_v52 = vrot.slane %v1410_v44, 4  ;;  %v5335_v44 = vld [vmem:[#allocation7 + $0x344] sm:$0xf0]  ;;  %v5327_v45 = vld [vmem:[#allocation7 + $0x30c] sm:$0xf] }
 0x3a5   : > { %v1434_v53 = vperm.slane %v1426_v51, %v6052_v19  ;;  %v4494_v51 = vld [vmem:[#allocation7 + $0x280] sm:$0xf]  ;;  %2386 = vmatpush.bf16.msrb.mxu2 %v4559_v41  ;;  %v4304_v29 = vld [vmem:[#allocation7 + $0x140] sm:$0xf0]  ;;  %v4312_v33 = vld [vmem:[#allocation7 + $0x148] sm:$0xf0] }
 0x3a6   : > { %v1414_v54 = vsel %vm768_vm0, %v1399_v48, %v1413_v46  ;;  %v1411_v55 = vrot.slane %v1399_v48, 4  ;;  %v1424_v10 = vsel %vm768_vm0, %v1423_v52, %v1404_v34  ;;  %v5343_v34 = vld [vmem:[#allocation7 + $0x38c] sm:$0xf]  ;;  %v4567_v46 = vor.u32 %v5335_v44, %v4566_v43  ;;  %v5318_v52 = vld [vmem:[#allocation7 + $0x2bc] sm:$0xf0] }
 0x3a7   : > { %v1422_v56 = vperm.slane %v1414_v54, %v6052_v19  ;;  %v1439_v57 = vrot.slane %v1434_v53, 4  ;;  %v1430_v59 = vperm.slane %v1424_v10, %v6052_v19  ;;  %v4635_v37 = vor.u32 %v5343_v34, %v4632_v35  ;;  %v4568_v48 = vld [vmem:[#allocation7 + $0x348] sm:$0xf0]  ;;  %v5310_v54 = vld [vmem:[#allocation7 + $0x284] sm:$0xf] }
 0x3a8   : > { %v1412_v13 = vsel %vm768_vm0, %v1411_v55, %v1393_v40  ;;  %v6266_v23 = vpop.eup %5598  ;;  %v4560_v40 = vld [vmem:[#allocation7 + $0x340] sm:$0xf0]  ;;  %v4502_v10 = vld [vmem:[#allocation7 + $0x288] sm:$0xf]  ;;  %v4307_v35 = vor.u32 %v5262_v27, %v4304_v29  ;;  %v5254_v38 = vld [vmem:[#allocation7 + $0xbc] sm:$0xf0] }
 0x3a9   : > { %v1440_v60 = vsel %vm768_vm0, %v1439_v57, %v1422_v56  ;;  %v1441_v6 = vrot.slane %v1422_v56, 4  ;;  %v1418_v49 = vperm.slane %v1412_v13, %v6052_v19  ;;  %v1435_v58 = vrot.slane %v1430_v59, 4  ;;  %v5226_v19 = vld [vmem:[#allocation4 + $0x20] sm:$0xff]  ;;  %v5319_v57 = vld [vmem:[#allocation7 + $0x2c4] sm:$0xf0] }
 0x3aa   : > { %1448 = vrot.lane.b32.xlu0 %v1440_v60, %s5852_s14  ;;  %1532 = vmatpush.bf16.msrb.mxu1 %v5226_v19  ;;  %v6269_v25 = vmul.f32 128.0, %v6266_v23  ;;  %v4563_v42 = vor.u32 %v5326_v39, %v4560_v40  ;;  %v4496_v55 = vld [vmem:[#allocation7 + $0x2c0] sm:$0xf0]  ;;  %v4495_v56 = vor.u32 %v5318_v52, %v4494_v51  ;;  %v4504_v13 = vld [vmem:[#allocation7 + $0x2c8] sm:$0xf0]  ;;  %vm1552_vm6 = vweird.f32 %v6266_v23 }
 0x3ab   : > { %v1442_v61 = vsel %vm768_vm0, %v1434_v53, %v1441_v6  ;;  %v1437_v62 = vrot.slane %v1418_v49, 4  ;;  %v1436_v63 = vsel %vm768_vm0, %v1435_v58, %v1418_v49  ;;  %v4571_v53 = vor.u32 %v5327_v45, %v4568_v48  ;;  %v4430_v49 = vld [vmem:[#allocation7 + $0x200] sm:$0xf]  ;;  %v5246_v39 = vld [vmem:[#allocation7 + $0x84] sm:$0xf] }
 0x3ac   : > { %1452 = vrot.lane.b32.xlu2 %v1442_v61, %s5851_s20  ;;  %2399 = vmatpush.bf16.msra.mxu3 %v4563_v42  ;;  %v4499_v60 = vor.u32 %v5310_v54, %v4496_v55  ;;  %v4503_v6 = vor.u32 %v5319_v57, %v4502_v10  ;;  %v5302_v58 = vld [vmem:[#allocation7 + $0x23c] sm:$0xf0]  ;;  %v5294_v61 = vld [vmem:[#allocation7 + $0x204] sm:$0xf]  ;;  %v1549_v19 = vsub.f32 1.0, %v6269_v25 }
 0x3ad   : > { %v1438_v0 = vsel %vm768_vm0, %v1430_v59, %v1437_v62  ;;  %v5311_v59 = vld [vmem:[#allocation7 + $0x28c] sm:$0xf]  ;;  %2387 = vmatpush.bf16.msrb.mxu2 %v4495_v56  ;;  %v4302_v25 = vld [vmem:[#allocation7 + $0x100] sm:$0xf]  ;;  %v4240_v41 = vld [vmem:[#allocation7 + $0xc0] sm:$0xf0] }
 0x3ae   : > { %1444 = vrot.lane.b32.xlu1 %v1438_v0, %s5850_s16  ;;  %1533 = vmatpush.bf16.msrb.mxu1 %v5225_v3  ;;  %v4507_v62 = vor.u32 %v5311_v59, %v4504_v13  ;;  %v4438_v0 = vld [vmem:[#allocation7 + $0x208] sm:$0xf]  ;;  %v4431_v3 = vor.u32 %v5302_v58, %v4430_v49  ;;  %v4303_v34 = vor.u32 %v5270_v26, %v4302_v25  ;;  %v5247_v44 = vld [vmem:[#allocation7 + $0x8c] sm:$0xf]  ;;  %v4174_v56 = vld [vmem:[#allocation7] sm:$0xf] }
 0x3af   : > { %v4246_v42 = vld [vmem:[#allocation7 + $0x88] sm:$0xf]  ;;  %v4248_v45 = vld [vmem:[#allocation7 + $0xc8] sm:$0xf0]  ;;  %v4243_v51 = vor.u32 %v5246_v39, %v4240_v41  ;;  %v5238_v57 = vld [vmem:[#allocation7 + $0x3c] sm:$0xf0] }
 0x3b0   : > { %2400 = vmatpush.bf16.msra.mxu3 %v4499_v60  ;;  %v5255_v43 = vld [vmem:[#allocation7 + $0xc4] sm:$0xf0]  ;;  %v4251_v54 = vor.u32 %v5247_v44, %v4248_v45  ;;  %v5230_v59 = vld [vmem:[#allocation7 + $0x4] sm:$0xf]  ;;  %v4175_v13 = vor.u32 %v5238_v57, %v4174_v56  ;;  %v4584_v25 = vld [vmem:[#allocation7 + $0x358] sm:$0xf0] }
 0x3b1   : > { %2388 = vmatpush.bf16.msrb.mxu2 %v4431_v3  ;;  %v4247_v52 = vor.u32 %v5255_v43, %v4246_v42  ;;  %v4176_v60 = vld [vmem:[#allocation7 + $0x40] sm:$0xf0]  ;;  %v5239_v49 = vld [vmem:[#allocation7 + $0x44] sm:$0xf0]  ;;  %v5320_v29 = vld [vmem:[#allocation7 + $0x2cc] sm:$0xf0] }
 0x3b2   : > { %1534 = vmatpush.bf16.msrb.mxu1 %v5224_v24  ;;  %v4179_v58 = vor.u32 %v5230_v59, %v4176_v60  ;;  %v4446_v39 = vld [vmem:[#allocation7 + $0x210] sm:$0xf]  ;;  %v5296_v41 = vld [vmem:[#allocation7 + $0x214] sm:$0xf]  ;;  %v4454_v44 = vld [vmem:[#allocation7 + $0x218] sm:$0xf] }
 0x3b3   : > { %v4448_v43 = vld [vmem:[#allocation7 + $0x250] sm:$0xf0]  ;;  %v5305_v45 = vld [vmem:[#allocation7 + $0x254] sm:$0xf0] }
 0x3b4   : > { %v5280_v56 = vld [vmem:[#allocation7 + $0x194] sm:$0xf]  ;;  %v5289_v60 = vld [vmem:[#allocation7 + $0x1d4] sm:$0xf0] }
 0x3b5   : > { %v4384_v59 = vld [vmem:[#allocation7 + $0x1d0] sm:$0xf0] }
 0x3b6   : > { %1535 = vmatpush.bf16.msrb.mxu1 %v5223_v4  ;;  %v4439_v4 = vor.u32 %v5303_v17, %v4438_v0  ;;  %v5352_v17 = vld [vmem:[#allocation7 + $0x3cc] sm:$0xf0] }
 0x3ba   : > { %1536 = vmatpush.bf16.msrb.mxu1 %v5222_v5  ;;  %v4366_v5 = vld [vmem:[#allocation7 + $0x180] sm:$0xf] }
 0x3be   : > { %2424 = vmatpush.bf16.msra.mxu1 %v4635_v37  ;;  %v4238_v37 = vld [vmem:[#allocation7 + $0x80] sm:$0xf] }
 0x3bf   : > { %v4239_v48 = vor.u32 %v5254_v38, %v4238_v37  ;;  %v4520_v37 = vld [vmem:[#allocation7 + $0x2d8] sm:$0xf0] }
 0x3c2   : > { %2425 = vmatpush.bf16.msra.mxu1 %v4571_v53 }
 0x3c6   : > { %2426 = vmatpush.bf16.msra.mxu1 %v4507_v62  ;;  %v5231_v62 = vld [vmem:[#allocation7 + $0xc] sm:$0xf] }
 0x406   : > { %v1453_v9 = vpop.permute.xlu2 %1452 }
 0x41c   : > { %v1449_v8 = vpop.permute.xlu0 %1448 }
 0x420   : > { %v1445_v7 = vpop.permute.xlu1 %1444 }
 0x421   : > { %v1455_v50 = vsel %vm1130_vm1, %v1436_v63, %v1445_v7  ;;  %v4432_v63 = vld [vmem:[#allocation7 + $0x240] sm:$0xf0]  ;;  %v5286_v7 = vld [vmem:[#allocation7 + $0x1bc] sm:$0xf0] }
 0x422   : > { %v1457_v11 = vsel %vm1456_vm4, %v1455_v50, %v1449_v8  ;;  %v4435_v24 = vor.u32 %v5294_v61, %v4432_v63  ;;  %v5278_v8 = vld [vmem:[#allocation7 + $0x184] sm:$0xf]  ;;  %v4443_v50 = vor.u32 %v5295_v1, %v4440_v2  ;;  %v4184_v63 = vld [vmem:[#allocation7 + $0x48] sm:$0xf0]  ;;  %v5344_v1 = vld [vmem:[#allocation7 + $0x394] sm:$0xf] }
 0x423   : > { %v1459_v12 = vsel %vm1458_vm5, %v1457_v11, %v1453_v9  ;;  %v4368_v9 = vld [vmem:[#allocation7 + $0x1c0] sm:$0xf0]  ;;  %v4374_v11 = vld [vmem:[#allocation7 + $0x188] sm:$0xf]  ;;  %v4187_v0 = vor.u32 %v5231_v62, %v4184_v63  ;;  %v4640_v2 = vld [vmem:[#allocation7 + $0x3d0] sm:$0xf0] }
 0x424   : > { %v1460_v14 = vpack.c.bf16 %v1459_v12, %v1459_v12  ;;  %v5287_v12 = vld [vmem:[#allocation7 + $0x1c4] sm:$0xf0]  ;;  %2401 = vmatpush.bf16.msra.mxu3 %v4435_v24  ;;  %2427 = vmatpush.bf16.msra.mxu1 %v4443_v50  ;;  %v4643_v3 = vor.u32 %v5344_v1, %v4640_v2  ;;  %v4646_v24 = vld [vmem:[#allocation7 + $0x398] sm:$0xf]  ;;  %v4574_v50 = vld [vmem:[#allocation7 + $0x310] sm:$0xf] }
 0x425   : > { %v4375_v22 = vor.u32 %v5287_v12, %v4374_v11  ;;  %v4318_v63 = vld [vmem:[#allocation7 + $0x110] sm:$0xf]  ;;  %v4320_v1 = vld [vmem:[#allocation7 + $0x150] sm:$0xf0]  ;;  %v4326_v2 = vld [vmem:[#allocation7 + $0x118] sm:$0xf] }
 0x426   : > { %1537 = vmatmul.bf16.vlgmr.msrb.gmra.mxu1 %v1460_v14  ;;  %v5279_v14 = vld [vmem:[#allocation7 + $0x18c] sm:$0xf] }
 0x4a3   : > { %v1538_v16 = vpop.f32.mrf.mxu1 }
 0x4a4   : > { %v1539_v18 = vadd.f32 %v5576_v15, %v1538_v16  ;;  %v4376_v15 = vld [vmem:[#allocation7 + $0x1c8] sm:$0xf0]  ;;  %v1550_v16 = vmul.f32 %v6266_v23, %v1549_v19 }
 0x4a5   : > { %v4379_v28 = vor.u32 %v5279_v14, %v4376_v15  ;;  %v5328_v14 = vld [vmem:[#allocation7 + $0x314] sm:$0xf] }
 0x4a6   : > { %v6263_v20 = vadd.f32 %v1539_v18, %v6021_v47  ;;  %v4631_v47 = vor.u32 %v5351_v32, %v4630_v31  ;;  %v4367_v18 = vor.u32 %v5286_v7, %v4366_v5  ;;  %v5271_v31 = vld [vmem:[#allocation7 + $0x144] sm:$0xf0]  ;;  %v5263_v32 = vld [vmem:[#allocation7 + $0x10c] sm:$0xf]  ;;  %v5345_v5 = vld [vmem:[#allocation7 + $0x39c] sm:$0xf] }
 0x4a7   : > { %v4311_v36 = vor.u32 %v5271_v31, %v4310_v30  ;;  %2428 = vmatpush.bf16.msra.mxu1 %v4379_v28  ;;  %v4315_v40 = vor.u32 %v5263_v32, %v4312_v33  ;;  %v4576_v15 = vld [vmem:[#allocation7 + $0x350] sm:$0xf0]  ;;  %v4510_v28 = vld [vmem:[#allocation7 + $0x290] sm:$0xf]  ;;  %v4518_v33 = vld [vmem:[#allocation7 + $0x298] sm:$0xf] }
 0x4a8   : > { %1545 = vadd.xlane.f32.xlu0 %v6263_v20  ;;  %2411 = vmatpush.bf16.msrb.mxu0 %v4631_v47  ;;  %v1551_v47 = vadd.f32 %v6266_v23, %v1550_v16  ;;  %v4582_v16 = vld [vmem:[#allocation7 + $0x318] sm:$0xf]  ;;  %v5312_v30 = vld [vmem:[#allocation7 + $0x294] sm:$0xf]  ;;  %v4511_v31 = vor.u32 %v5320_v29, %v4510_v28 }
 0x4a9   : > { %2389 = vmatpush.bf16.msrb.mxu2 %v4367_v18  ;;  %v4579_v18 = vor.u32 %v5328_v14, %v4576_v15  ;;  %v4512_v32 = vld [vmem:[#allocation7 + $0x2d0] sm:$0xf0]  ;;  %v4262_v15 = vld [vmem:[#allocation7 + $0x98] sm:$0xf] }
 0x4ab   : > { %v1540_v21 = vpop.f32.mrf.mxu1  ;;  %2429 = vmatpush.bf16.msra.mxu1 %v4315_v40  ;;  %v5304_v40 = vld [vmem:[#allocation7 + $0x24c] sm:$0xf0] }
 0x4ac   : > { %2412 = vmatpush.bf16.msrb.mxu0 %v4567_v46  ;;  %v4371_v21 = vor.u32 %v5278_v8, %v4368_v9  ;;  %v6276_v46 = vsel %vm1552_vm6, %v6266_v23, %v1551_v47  ;;  %v4648_v8 = vld [vmem:[#allocation7 + $0x3d8] sm:$0xf0]  ;;  %v5336_v9 = vld [vmem:[#allocation7 + $0x34c] sm:$0xf0]  ;;  %v5321_v47 = vld [vmem:[#allocation7 + $0x2d4] sm:$0xf0]  ;;  %v4447_v42 = vor.u32 %v5304_v40, %v4446_v39 }
 0x4ad   : > { %2390 = vmatpush.bf16.msrb.mxu2 %v4303_v34  ;;  %v4651_v11 = vor.u32 %v5345_v5, %v4648_v8  ;;  %v4575_v12 = vor.u32 %v5336_v9, %v4574_v50  ;;  %v4515_v34 = vor.u32 %v5312_v30, %v4512_v32  ;;  %v4328_v5 = vld [vmem:[#allocation7 + $0x158] sm:$0xf0]  ;;  %v5256_v9 = vld [vmem:[#allocation7 + $0xcc] sm:$0xf0]  ;;  %v5232_v30 = vld [vmem:[#allocation7 + $0x14] sm:$0xf] }
 0x4ae   : > { %2402 = vmatpush.bf16.msra.mxu3 %v4371_v21  ;;  %v5337_v21 = vld [vmem:[#allocation7 + $0x354] sm:$0xf0] }
 0x4af   : > { %2430 = vmatpush.bf16.msra.mxu1 %v4251_v54  ;;  %v4583_v26 = vor.u32 %v5337_v21, %v4582_v16  ;;  %v5257_v16 = vld [vmem:[#allocation7 + $0xd4] sm:$0xf0] }
 0x4b0   : > { %2413 = vmatpush.bf16.msrb.mxu0 %v4503_v6  ;;  %v4182_v6 = vld [vmem:[#allocation7 + $0x8] sm:$0xf]  ;;  %v4263_v29 = vor.u32 %v5257_v16, %v4262_v15  ;;  %v5315_v16 = vld [vmem:[#allocation7 + $0x2ac] sm:$0xf] }
 0x4b1   : > { %2391 = vmatpush.bf16.msrb.mxu2 %v4239_v48  ;;  %v4183_v61 = vor.u32 %v5239_v49, %v4182_v6  ;;  %v4451_v48 = vor.u32 %v5296_v41, %v4448_v43  ;;  %v4387_v6 = vor.u32 %v5280_v56, %v4384_v59  ;;  %v5346_v56 = vld [vmem:[#allocation7 + $0x3a4] sm:$0xf]  ;;  %v4662_v59 = vld [vmem:[#allocation7 + $0x3a8] sm:$0xf] }
 0x4b2   : > { %2403 = vmatpush.bf16.msra.mxu3 %v4307_v35  ;;  %v4519_v35 = vor.u32 %v5321_v47, %v4518_v33  ;;  %v4198_v33 = vld [vmem:[#allocation7 + $0x18] sm:$0xf]  ;;  %v5323_v15 = vld [vmem:[#allocation7 + $0x2e4] sm:$0xf0] }
 0x4b3   : > { %2431 = vmatpush.bf16.msra.mxu1 %v4187_v0  ;;  %v5264_v0 = vld [vmem:[#allocation7 + $0x114] sm:$0xf]  ;;  %v5241_v47 = vld [vmem:[#allocation7 + $0x54] sm:$0xf0] }
 0x4b4   : > { %2414 = vmatpush.bf16.msrb.mxu0 %v4439_v4  ;;  %v5353_v4 = vld [vmem:[#allocation7 + $0x3d4] sm:$0xf0] }
 0x4b5   : > { %2392 = vmatpush.bf16.msrb.mxu2 %v4175_v13  ;;  %v4647_v7 = vor.u32 %v5353_v4, %v4646_v24  ;;  %v4390_v13 = vld [vmem:[#allocation7 + $0x198] sm:$0xf]  ;;  %v5265_v4 = vld [vmem:[#allocation7 + $0x11c] sm:$0xf] }
 0x4b6   : > { %2404 = vmatpush.bf16.msra.mxu3 %v4243_v51  ;;  %v4455_v51 = vor.u32 %v5305_v45, %v4454_v44  ;;  %v4391_v49 = vor.u32 %v5289_v60, %v4390_v13  ;;  %v4331_v50 = vor.u32 %v5265_v4, %v4328_v5  ;;  %v5355_v60 = vld [vmem:[#allocation7 + $0x3e4] sm:$0xf0] }
 0x4b7   : > { %2476 = vmatpush.bf16.msrb.mxu1 %v4651_v11  ;;  %v5248_v11 = vld [vmem:[#allocation7 + $0x94] sm:$0xf] }
 0x4b8   : > { %2415 = vmatpush.bf16.msrb.mxu0 %v4375_v22  ;;  %v5329_v22 = vld [vmem:[#allocation7 + $0x31c] sm:$0xf] }
 0x4b9   : > { %v4587_v27 = vor.u32 %v5329_v22, %v4584_v25  ;;  %v4264_v25 = vld [vmem:[#allocation7 + $0xd8] sm:$0xf0] }
 0x4ba   : > { %2405 = vmatpush.bf16.msra.mxu3 %v4179_v58  ;;  %v5281_v58 = vld [vmem:[#allocation7 + $0x19c] sm:$0xf] }
 0x4bb   : > { %2477 = vmatpush.bf16.msrb.mxu1 %v4587_v27  ;;  %v5240_v27 = vld [vmem:[#allocation7 + $0x4c] sm:$0xf0] }
 0x4bc   : > { %2416 = vmatpush.bf16.msrb.mxu0 %v4311_v36  ;;  %v5313_v36 = vld [vmem:[#allocation7 + $0x29c] sm:$0xf] }
 0x4bd   : > { %v4523_v38 = vor.u32 %v5313_v36, %v4520_v37 }
 0x4be   : > { %2450 = vmatpush.bf16.msrb.mxu3 %v4643_v3  ;;  %v4323_v3 = vor.u32 %v5264_v0, %v4320_v1  ;;  %v4592_v1 = vld [vmem:[#allocation7 + $0x360] sm:$0xf0] }
 0x4bf   : > { %2478 = vmatpush.bf16.msrb.mxu1 %v4523_v38  ;;  %v4199_v38 = vor.u32 %v5241_v47, %v4198_v33  ;;  %v5299_v33 = vld [vmem:[#allocation7 + $0x22c] sm:$0xf] }
 0x4c0   : > { %2417 = vmatpush.bf16.msrb.mxu0 %v4247_v52  ;;  %v5297_v52 = vld [vmem:[#allocation7 + $0x21c] sm:$0xf]  ;;  %v4472_v47 = vld [vmem:[#allocation7 + $0x268] sm:$0xf0] }
 0x4c2   : > { %2451 = vmatpush.bf16.msrb.mxu3 %v4579_v18  ;;  %v5249_v18 = vld [vmem:[#allocation7 + $0x9c] sm:$0xf] }
 0x4c3   : > { %v4267_v32 = vor.u32 %v5249_v18, %v4264_v25  ;;  %v4536_v18 = vld [vmem:[#allocation7 + $0x2e8] sm:$0xf0]  ;;  %v4462_v25 = vld [vmem:[#allocation7 + $0x220] sm:$0xf] }
 0x4c4   : > { %2418 = vmatpush.bf16.msrb.mxu0 %v4183_v61  ;;  %v4392_v61 = vld [vmem:[#allocation7 + $0x1d8] sm:$0xf0] }
 0x4c5   : > { %v4395_v62 = vor.u32 %v5281_v58, %v4392_v61 }
 0x4c6   : > { %2452 = vmatpush.bf16.msrb.mxu3 %v4515_v34  ;;  %v5233_v34 = vld [vmem:[#allocation7 + $0x1c] sm:$0xf] }
 0x4c8   : > { %2463 = vmatpush.bf16.msra.mxu0 %v4647_v7  ;;  %v4254_v7 = vld [vmem:[#allocation7 + $0x90] sm:$0xf] }
 0x4c9   : > { %v4255_v21 = vor.u32 %v5256_v9, %v4254_v7  ;;  %v4526_v7 = vld [vmem:[#allocation7 + $0x2a0] sm:$0xf] }
 0x4ca   : > { %2453 = vmatpush.bf16.msrb.mxu3 %v4451_v48  ;;  %v5577_v48 = vld [vmem:[%s6356_s5] ss:$0 sm:$0xff] }
 0x4cc   : > { %2464 = vmatpush.bf16.msra.mxu0 %v4583_v26  ;;  %v4190_v26 = vld [vmem:[#allocation7 + $0x10] sm:$0xf] }
 0x4cd   : > { %v4191_v36 = vor.u32 %v5240_v27, %v4190_v26  ;;  %v5306_v26 = vld [vmem:[#allocation7 + $0x25c] sm:$0xf0] }
 0x4ce   : > { %2454 = vmatpush.bf16.msrb.mxu3 %v4387_v6  ;;  %v5347_v6 = vld [vmem:[#allocation7 + $0x3ac] sm:$0xf] }
 0x4d0   : > { %2465 = vmatpush.bf16.msra.mxu0 %v4519_v35  ;;  %v4200_v35 = vld [vmem:[#allocation7 + $0x58] sm:$0xf0] }
 0x4d1   : > { %v4203_v39 = vor.u32 %v5233_v34, %v4200_v35  ;;  %v4463_v34 = vor.u32 %v5306_v26, %v4462_v25  ;;  %v4672_v25 = vld [vmem:[#allocation7 + $0x3f0] sm:$0xf0]  ;;  %v4678_v26 = vld [vmem:[#allocation7 + $0x3b8] sm:$0xf] }
 0x4d2   : > { %2455 = vmatpush.bf16.msrb.mxu3 %v4323_v3  ;;  %v5331_v3 = vld [vmem:[#allocation7 + $0x32c] sm:$0xf] }
 0x4d4   : > { %2466 = vmatpush.bf16.msra.mxu0 %v4455_v51 }
 0x4d8   : > { %2467 = vmatpush.bf16.msra.mxu0 %v4391_v49  ;;  %v4664_v49 = vld [vmem:[#allocation7 + $0x3e8] sm:$0xf0] }
 0x4d9   : > { %v4667_v0 = vor.u32 %v5347_v6, %v4664_v49  ;;  %v4344_v6 = vld [vmem:[#allocation7 + $0x168] sm:$0xf0] }
 0x51b   : > { %v1546_v53 = vpop.xlane.xlu0 %1545 }
 0x51c   : > { %v1554_v55 = vmul.f32 %v6276_v46, %v1546_v53  ;;  %v4456_v53 = vld [vmem:[#allocation7 + $0x258] sm:$0xf0] }
 0x51d   : > { %v4459_v54 = vor.u32 %v5297_v52, %v4456_v53  ;;  %v5578_v52 = vld [vmem:[#allocation6] ss:$0 sm:$0xff] }
 0x51e   : > { %v6280_v10 = vsub.f32 %v6263_v20, %v1554_v55  ;;  %v4638_v20 = vld [vmem:[#allocation7 + $0x390] sm:$0xf] }
 0x51f   : > { %v4639_v19 = vor.u32 %v5352_v17, %v4638_v20  ;;  %v4382_v55 = vld [vmem:[#allocation7 + $0x190] sm:$0xf]  ;;  %2479 = vmatpush.bf16.msrb.mxu1 %v4459_v54 }
 0x520   : > { %v1556_v23 = vmul.f32 %v6280_v10, %v6280_v10  ;;  %v5272_v20 = vld [vmem:[#allocation7 + $0x14c] sm:$0xf0] }
 0x521   : > { %2437 = vmatpush.bf16.msra.mxu2 %v4639_v19  ;;  %v4319_v17 = vor.u32 %v5272_v20, %v4318_v63  ;;  %v5273_v19 = vld [vmem:[#allocation7 + $0x154] sm:$0xf0]  ;;  %v4590_v63 = vld [vmem:[#allocation7 + $0x320] sm:$0xf] }
 0x522   : > { %1557 = vadd.xlane.f32.xlu1 %v1556_v23  ;;  %v5288_v23 = vld [vmem:[#allocation7 + $0x1cc] sm:$0xf0]  ;;  %v4327_v24 = vor.u32 %v5273_v19, %v4326_v2  ;;  %v5338_v20 = vld [vmem:[#allocation7 + $0x35c] sm:$0xf0]  ;;  %v4598_v2 = vld [vmem:[#allocation7 + $0x328] sm:$0xf] }
 0x523   : > { %v4383_v57 = vor.u32 %v5288_v23, %v4382_v55  ;;  %2480 = vmatpush.bf16.msrb.mxu1 %v4395_v62  ;;  %v4654_v55 = vld [vmem:[#allocation7 + $0x3a0] sm:$0xf]  ;;  %v5339_v19 = vld [vmem:[#allocation7 + $0x364] sm:$0xf0]  ;;  %v4591_v4 = vor.u32 %v5338_v20, %v4590_v63 }
 0x524   : > { %2468 = vmatpush.bf16.msra.mxu0 %v4327_v24  ;;  %v5354_v23 = vld [vmem:[#allocation7 + $0x3dc] sm:$0xf0]  ;;  %v4600_v24 = vld [vmem:[#allocation7 + $0x368] sm:$0xf0] }
 0x525   : > { %2438 = vmatpush.bf16.msra.mxu2 %v4575_v12  ;;  %v4256_v12 = vld [vmem:[#allocation7 + $0xd0] sm:$0xf0]  ;;  %v4655_v61 = vor.u32 %v5354_v23, %v4654_v55  ;;  %v4603_v9 = vor.u32 %v5331_v3, %v4600_v24  ;;  %v5266_v23 = vld [vmem:[#allocation7 + $0x124] sm:$0xf]  ;;  %v5258_v63 = vld [vmem:[#allocation7 + $0xdc] sm:$0xf0] }
 0x526   : > { %v4259_v22 = vor.u32 %v5248_v11, %v4256_v12  ;;  %v5314_v11 = vld [vmem:[#allocation7 + $0x2a4] sm:$0xf]  ;;  %v4280_v3 = vld [vmem:[#allocation7 + $0xe8] sm:$0xf0]  ;;  %v4206_v24 = vld [vmem:[#allocation7 + $0x20] sm:$0xf] }
 0x527   : > { %2481 = vmatpush.bf16.msrb.mxu1 %v4331_v50  ;;  %v4599_v50 = vor.u32 %v5339_v19, %v4598_v2  ;;  %v4528_v12 = vld [vmem:[#allocation7 + $0x2e0] sm:$0xf0]  ;;  %v5259_v2 = vld [vmem:[#allocation7 + $0xe4] sm:$0xf0]  ;;  %v5251_v19 = vld [vmem:[#allocation7 + $0xac] sm:$0xf] }
 0x528   : > { %2456 = vmatpush.bf16.msrb.mxu3 %v4259_v22  ;;  %2469 = vmatpush.bf16.msra.mxu0 %v4263_v29  ;;  %v4531_v22 = vor.u32 %v5314_v11, %v4528_v12  ;;  %v5298_v29 = vld [vmem:[#allocation7 + $0x224] sm:$0xf]  ;;  %v4283_v11 = vor.u32 %v5251_v19, %v4280_v3  ;;  %v4214_v12 = vld [vmem:[#allocation7 + $0x28] sm:$0xf]  ;;  %v4488_v19 = vld [vmem:[#allocation7 + $0x278] sm:$0xf0] }
 0x529   : > { %2439 = vmatpush.bf16.msra.mxu2 %v4511_v31  ;;  %v4192_v31 = vld [vmem:[#allocation7 + $0x50] sm:$0xf0] }
 0x52a   : > { %v4195_v37 = vor.u32 %v5232_v30, %v4192_v31  ;;  %v4464_v30 = vld [vmem:[#allocation7 + $0x260] sm:$0xf0]  ;;  %v4470_v31 = vld [vmem:[#allocation7 + $0x228] sm:$0xf] }
 0x52b   : > { %2482 = vmatpush.bf16.msrb.mxu1 %v4267_v32  ;;  %v5307_v32 = vld [vmem:[#allocation7 + $0x264] sm:$0xf0]  ;;  %v4467_v35 = vor.u32 %v5298_v29, %v4464_v30  ;;  %v5357_v29 = vld [vmem:[#allocation7 + $0x3f4] sm:$0xf0]  ;;  %v5349_v30 = vld [vmem:[#allocation7 + $0x3bc] sm:$0xf] }
 0x52c   : > { %2457 = vmatpush.bf16.msrb.mxu3 %v4195_v37  ;;  %2470 = vmatpush.bf16.msra.mxu0 %v4199_v38  ;;  %v5290_v37 = vld [vmem:[#allocation7 + $0x1dc] sm:$0xf0]  ;;  %v4471_v38 = vor.u32 %v5307_v32, %v4470_v31  ;;  %v4680_v31 = vld [vmem:[#allocation7 + $0x3f8] sm:$0xf0] }
 0x52d   : > { %2440 = vmatpush.bf16.msra.mxu2 %v4447_v42 }
 0x52f   : > { %2483 = vmatpush.bf16.msrb.mxu1 %v4203_v39  ;;  %v4475_v39 = vor.u32 %v5299_v33, %v4472_v47 }
 0x531   : > { %2441 = vmatpush.bf16.msra.mxu2 %v4383_v57  ;;  %v4656_v57 = vld [vmem:[#allocation7 + $0x3e0] sm:$0xf0] }
 0x532   : > { %v4659_v62 = vor.u32 %v5346_v56, %v4656_v57  ;;  %v4336_v56 = vld [vmem:[#allocation7 + $0x160] sm:$0xf0]  ;;  %v4342_v57 = vld [vmem:[#allocation7 + $0x128] sm:$0xf] }
 0x535   : > { %2442 = vmatpush.bf16.msra.mxu2 %v4319_v17  ;;  %v5330_v17 = vld [vmem:[#allocation7 + $0x324] sm:$0xf] }
 0x536   : > { %v4595_v5 = vor.u32 %v5330_v17, %v4592_v1  ;;  %v4272_v17 = vld [vmem:[#allocation7 + $0xe0] sm:$0xf0]  ;;  %v4278_v1 = vld [vmem:[#allocation7 + $0xa8] sm:$0xf] }
 0x539   : > { %2443 = vmatpush.bf16.msra.mxu2 %v4255_v21 }
 0x53d   : > { %2444 = vmatpush.bf16.msra.mxu2 %v4191_v36  ;;  %v4398_v36 = vld [vmem:[#allocation7 + $0x1a0] sm:$0xf] }
 0x595   : > { %v1558_v8 = vpop.xlane.xlu1 %1557 }
 0x596   : > { %v1559_v14 = vmul.f32 %v1558_v8, %v6276_v46  ;;  %v5322_v8 = vld [vmem:[#allocation7 + $0x2dc] sm:$0xf0] }
 0x597   : > { %v4527_v21 = vor.u32 %v5322_v8, %v4526_v7  ;;  %v5242_v7 = vld [vmem:[#allocation7 + $0x5c] sm:$0xf0]  ;;  %v5234_v8 = vld [vmem:[#allocation7 + $0x24] sm:$0xf] }
 0x598   : > { %v1560_v28 = vadd.f32 1e-05, %v1559_v14  ;;  %v4534_v14 = vld [vmem:[#allocation7 + $0x2a8] sm:$0xf] }
 0x599   : > { %v4535_v27 = vor.u32 %v5323_v15, %v4534_v14  ;;  %v5243_v14 = vld [vmem:[#allocation7 + $0x64] sm:$0xf0]  ;;  %v5235_v15 = vld [vmem:[#allocation7 + $0x2c] sm:$0xf] }
 0x59a   : > { %5600 = vrsqrt.f32 %v1560_v28  ;;  %vm1567_vm8 = vweird.f32 %v1560_v28  ;;  %v4215_v32 = vor.u32 %v5243_v14, %v4214_v12  ;;  %v5293_v12 = vld [vmem:[#allocation7 + $0x1f4] sm:$0xf0]  ;;  %v5285_v14 = vld [vmem:[#allocation7 + $0x1bc] sm:$0xf] }
 0x5a0   : > { %v5601_v40 = vpop.eup %5600 }
 0x5a1   : > { %v1562_v41 = vmul.f32 %v5601_v40, %v1560_v28  ;;  %vm1568_vm7 = vweird.f32 %v5601_v40  ;;  %v4539_v28 = vor.u32 %v5315_v16, %v4536_v18  ;;  %v4216_v16 = vld [vmem:[#allocation7 + $0x68] sm:$0xf0]  ;;  %v4670_v18 = vld [vmem:[#allocation7 + $0x3b0] sm:$0xf] }
 0x5a2   : > { %vm1569_vm9 = vmor %vm1567_vm8, %vm1568_vm7  ;;  %v4219_v33 = vor.u32 %v5235_v15, %v4216_v16  ;;  %v4424_v15 = vld [vmem:[#allocation7 + $0x1f8] sm:$0xf0] }
 0x5a3   : > { %v1563_v42 = vmul.f32 %v5601_v40, %v1562_v41  ;;  %v4400_v41 = vld [vmem:[#allocation7 + $0x1e0] sm:$0xf0] }
 0x5a5   : > { %v1564_v43 = vmul.f32 0.5, %v1563_v42  ;;  %v4406_v42 = vld [vmem:[#allocation7 + $0x1a8] sm:$0xf] }
 0x5a7   : > { %v1565_v44 = vsub.f32 1.5, %v1564_v43  ;;  %v5291_v43 = vld [vmem:[#allocation7 + $0x1e4] sm:$0xf0] }
 0x5a9   : > { %v1566_v45 = vmul.f32 %v5601_v40, %v1565_v44  ;;  %v5283_v44 = vld [vmem:[#allocation7 + $0x1ac] sm:$0xf] }
 0x5ab   : > { %v1570_v51 = vsel %vm1569_vm9, %v5601_v40, %v1566_v45  ;;  %v5282_v40 = vld [vmem:[#allocation7 + $0x1a4] sm:$0xf]  ;;  %v4408_v45 = vld [vmem:[#allocation7 + $0x1e8] sm:$0xf0] }
 0x5ac   : > { %v1571_v53 = vmul.f32 %v1570_v51, %v6280_v10  ;;  %v4663_v10 = vor.u32 %v5355_v60, %v4662_v59  ;;  %v4403_v51 = vor.u32 %v5282_v40, %v4400_v41  ;;  %v4411_v55 = vor.u32 %v5283_v44, %v4408_v45  ;;  %v5275_v59 = vld [vmem:[#allocation7 + $0x164] sm:$0xf0]  ;;  %v5267_v60 = vld [vmem:[#allocation7 + $0x12c] sm:$0xf]  ;;  %v4608_v40 = vld [vmem:[#allocation7 + $0x370] sm:$0xf0] }
 0x5ad   : > { %v4343_v20 = vor.u32 %v5275_v59, %v4342_v57  ;;  %v4614_v41 = vld [vmem:[#allocation7 + $0x338] sm:$0xf]  ;;  %v4616_v44 = vld [vmem:[#allocation7 + $0x378] sm:$0xf0] }
 0x5ae   : > { %v1575_v54 = vmul.f32 %v5577_v48, %v1571_v53  ;;  %v4399_v48 = vor.u32 %v5290_v37, %v4398_v36  ;;  %v5274_v53 = vld [vmem:[#allocation7 + $0x15c] sm:$0xf0]  ;;  %v5340_v36 = vld [vmem:[#allocation7 + $0x36c] sm:$0xf0]  ;;  %v4679_v37 = vor.u32 %v5357_v29, %v4678_v26  ;;  %v5325_v57 = vld [vmem:[#allocation7 + $0x2f4] sm:$0xf0]  ;;  %v4427_v26 = vor.u32 %v5285_v14, %v4424_v15 }
 0x5af   : > { %v5317_v59 = vld [vmem:[#allocation7 + $0x2bc] sm:$0xf]  ;;  %v4358_v29 = vld [vmem:[#allocation7 + $0x138] sm:$0xf]  ;;  %v5376_v14 = vld [vmem:[#allocation9 + $0x90] sm:$0xff] }
 0x5b0   : > { %v6289_v13 = vadd.f32 %v5578_v52, %v1575_v54  ;;  %v4334_v52 = vld [vmem:[#allocation7 + $0x120] sm:$0xf]  ;;  %v4407_v54 = vor.u32 %v5291_v43, %v4406_v42  ;;  %v5341_v42 = vld [vmem:[#allocation7 + $0x374] sm:$0xf0]  ;;  %v5333_v43 = vld [vmem:[#allocation7 + $0x33c] sm:$0xf] }
 0x5b1   : > { %v4335_v49 = vor.u32 %v5274_v53, %v4334_v52  ;;  %v5324_v52 = vld [vmem:[#allocation7 + $0x2ec] sm:$0xf0]  ;;  %v4615_v53 = vor.u32 %v5341_v42, %v4614_v41  ;;  %v5261_v41 = vld [vmem:[#allocation7 + $0xf4] sm:$0xf0]  ;;  %v5253_v42 = vld [vmem:[#allocation7 + $0xbc] sm:$0xf] }
 0x5b2   : > { %v6293_v58 = vpack.c.bf16 %v6289_v13, %v6289_v13  ;;  %v5384_v15 = vld [vmem:[#allocation9 + $0xd0] sm:$0xff] }
 0x5b4   : > { %2393 = vmatmul.bf16.vlgmr.msrb.gmra.mxu2 %v6293_v58  ;;  %2406 = vmatmul.bf16.vlgmr.msra.gmra.mxu3 %v6293_v58 }
 0x5b5   : > { %2419 = vmatmul.bf16.vlgmr.msrb.gmra.mxu0 %v6293_v58  ;;  %2432 = vmatmul.bf16.vlgmr.msra.gmra.mxu1 %v6293_v58 }
 0x5b6   : > { %2489 = vmatpush.bf16.msrb.mxu2 %v4655_v61  ;;  %2502 = vmatpush.bf16.msra.mxu3 %v4659_v62  ;;  %v4339_v61 = vor.u32 %v5266_v23, %v4336_v56  ;;  %v4270_v62 = vld [vmem:[#allocation7 + $0xa0] sm:$0xf]  ;;  %v4544_v23 = vld [vmem:[#allocation7 + $0x2f0] sm:$0xf0]  ;;  %v4550_v56 = vld [vmem:[#allocation7 + $0x2b8] sm:$0xf] }
 0x5b7   : > { %2515 = vmatpush.bf16.msrb.mxu0 %v4663_v10  ;;  %2528 = vmatpush.bf16.msra.mxu1 %v4667_v0  ;;  %v4347_v10 = vor.u32 %v5267_v60, %v4344_v6  ;;  %v5250_v0 = vld [vmem:[#allocation7 + $0xa4] sm:$0xf]  ;;  %v4552_v60 = vld [vmem:[#allocation7 + $0x2f8] sm:$0xf0] }
 0x5ba   : > { %2490 = vmatpush.bf16.msrb.mxu2 %v4591_v4  ;;  %2503 = vmatpush.bf16.msra.mxu3 %v4595_v5  ;;  %v4271_v4 = vor.u32 %v5258_v63, %v4270_v62  ;;  %v4275_v5 = vor.u32 %v5250_v0, %v4272_v17  ;;  %v5308_v62 = vld [vmem:[#allocation7 + $0x26c] sm:$0xf0]  ;;  %v4551_v63 = vor.u32 %v5325_v57, %v4550_v56  ;;  %v4480_v0 = vld [vmem:[#allocation7 + $0x270] sm:$0xf0]  ;;  %v4486_v17 = vld [vmem:[#allocation7 + $0x238] sm:$0xf] }
 0x5bb   : > { %2516 = vmatpush.bf16.msrb.mxu0 %v4599_v50  ;;  %2529 = vmatpush.bf16.msra.mxu1 %v4603_v9  ;;  %v4208_v50 = vld [vmem:[#allocation7 + $0x60] sm:$0xf0]  ;;  %v4279_v9 = vor.u32 %v5259_v2, %v4278_v1  ;;  %v5309_v1 = vld [vmem:[#allocation7 + $0x274] sm:$0xf0]  ;;  %v5301_v2 = vld [vmem:[#allocation7 + $0x23c] sm:$0xf] }
 0x5bc   : > { %v5245_v56 = vld [vmem:[#allocation7 + $0x74] sm:$0xf0]  ;;  %v5237_v57 = vld [vmem:[#allocation7 + $0x3c] sm:$0xf] }
 0x5be   : > { %2491 = vmatpush.bf16.msrb.mxu2 %v4527_v21  ;;  %2504 = vmatpush.bf16.msra.mxu3 %v4531_v22  ;;  %v5356_v21 = vld [vmem:[#allocation7 + $0x3ec] sm:$0xf0]  ;;  %v5348_v22 = vld [vmem:[#allocation7 + $0x3b4] sm:$0xf] }
 0x5bf   : > { %2517 = vmatpush.bf16.msrb.mxu0 %v4535_v27  ;;  %2530 = vmatpush.bf16.msra.mxu1 %v4539_v28  ;;  %v4207_v27 = vor.u32 %v5242_v7, %v4206_v24  ;;  %v4211_v28 = vor.u32 %v5234_v8, %v4208_v50  ;;  %v4671_v47 = vor.u32 %v5356_v21, %v4670_v18  ;;  %v5284_v50 = vld [vmem:[#allocation7 + $0x1b4] sm:$0xf]  ;;  %v4350_v21 = vld [vmem:[#allocation7 + $0x130] sm:$0xf] }
 0x5c0   : > { %v4487_v7 = vor.u32 %v5309_v1, %v4486_v17  ;;  %v4491_v8 = vor.u32 %v5301_v2, %v4488_v19  ;;  %v5388_v17 = vld [vmem:[#allocation9 + $0xf0] sm:$0xff]  ;;  %v5379_v19 = vld [vmem:[#allocation9 + $0xa8] sm:$0xff] }
 0x5c1   : > { %v5364_v1 = vld [vmem:[#allocation9 + $0x30] sm:$0xff] }
 0x5c2   : > { %2492 = vmatpush.bf16.msrb.mxu2 %v4463_v34  ;;  %2505 = vmatpush.bf16.msra.mxu3 %v4467_v35  ;;  %v4675_v34 = vor.u32 %v5348_v22, %v4672_v25  ;;  %v4606_v35 = vld [vmem:[#allocation7 + $0x330] sm:$0xf] }
 0x5c3   : > { %2518 = vmatpush.bf16.msrb.mxu0 %v4471_v38  ;;  %2531 = vmatpush.bf16.msra.mxu1 %v4475_v39  ;;  %v4683_v38 = vor.u32 %v5349_v30, %v4680_v31  ;;  %v5332_v39 = vld [vmem:[#allocation7 + $0x334] sm:$0xf]  ;;  %v4607_v45 = vor.u32 %v5340_v36, %v4606_v35  ;;  %v5276_v22 = vld [vmem:[#allocation7 + $0x16c] sm:$0xf0]  ;;  %v5277_v30 = vld [vmem:[#allocation7 + $0x174] sm:$0xf0] }
 0x5c4   : > { %2445 = vmatmul.bf16.vlgmr.msra.gmra.mxu2 %v6293_v58  ;;  %2458 = vmatmul.bf16.vlgmr.msrb.gmra.mxu3 %v6293_v58  ;;  %v5269_v31 = vld [vmem:[#allocation7 + $0x13c] sm:$0xf]  ;;  %v5260_v35 = vld [vmem:[#allocation7 + $0xec] sm:$0xf0]  ;;  %v4359_v36 = vor.u32 %v5277_v30, %v4358_v29 }
 0x5c5   : > { %2471 = vmatmul.bf16.vlgmr.msra.gmra.mxu0 %v6293_v58  ;;  %2484 = vmatmul.bf16.vlgmr.msrb.gmra.mxu1 %v6293_v58  ;;  %v5372_v2 = vld [vmem:[#allocation9 + $0x70] sm:$0xff]  ;;  %v5413_v29 = vld [vmem:[#allocation9 + $0x1b8] sm:$0xff] }
 0x5c6   : > { %2493 = vmatpush.bf16.msrb.mxu2 %v4399_v48  ;;  %2506 = vmatpush.bf16.msra.mxu3 %v4403_v51  ;;  %v4611_v48 = vor.u32 %v5332_v39, %v4608_v40  ;;  %v4542_v51 = vld [vmem:[#allocation7 + $0x2b0] sm:$0xf]  ;;  %v4288_v39 = vld [vmem:[#allocation7 + $0xf0] sm:$0xf0]  ;;  %v4294_v40 = vld [vmem:[#allocation7 + $0xb8] sm:$0xf] }
 0x5c7   : > { %2519 = vmatpush.bf16.msrb.mxu0 %v4407_v54  ;;  %2532 = vmatpush.bf16.msra.mxu1 %v4411_v55  ;;  %v4619_v54 = vor.u32 %v5333_v43, %v4616_v44  ;;  %v5316_v55 = vld [vmem:[#allocation7 + $0x2b4] sm:$0xf]  ;;  %v4543_v6 = vor.u32 %v5324_v52, %v4542_v51  ;;  %v4296_v43 = vld [vmem:[#allocation7 + $0xf8] sm:$0xf0]  ;;  %v5244_v51 = vld [vmem:[#allocation7 + $0x6c] sm:$0xf0]  ;;  %v4295_v52 = vor.u32 %v5261_v41, %v4294_v40 }
 0x5c8   : > { %v5421_v30 = vld [vmem:[#allocation9 + $0x1f8] sm:$0xff]  ;;  %v5395_v40 = vld [vmem:[#allocation9 + $0x128] sm:$0xff] }
 0x5c9   : > { %v5403_v41 = vld [vmem:[#allocation9 + $0x168] sm:$0xff] }
 0x5ca   : > { %2494 = vmatpush.bf16.msrb.mxu2 %v4335_v49  ;;  %2507 = vmatpush.bf16.msra.mxu3 %v4339_v61  ;;  %v4547_v49 = vor.u32 %v5316_v55, %v4544_v23  ;;  %v4478_v61 = vld [vmem:[#allocation7 + $0x230] sm:$0xf]  ;;  %v4224_v55 = vld [vmem:[#allocation7 + $0x70] sm:$0xf0]  ;;  %v4230_v23 = vld [vmem:[#allocation7 + $0x38] sm:$0xf] }
 0x5cb   : > { %2520 = vmatpush.bf16.msrb.mxu0 %v4343_v20  ;;  %2533 = vmatpush.bf16.msra.mxu1 %v4347_v10  ;;  %v4555_v20 = vor.u32 %v5317_v59, %v4552_v60  ;;  %v5300_v10 = vld [vmem:[#allocation7 + $0x234] sm:$0xf]  ;;  %v4479_v3 = vor.u32 %v5308_v62, %v4478_v61  ;;  %v4232_v59 = vld [vmem:[#allocation7 + $0x78] sm:$0xf0] }
 0x5cc   : > { %v4483_v24 = vor.u32 %v5300_v10, %v4480_v0  ;;  %v4235_v61 = vor.u32 %v5237_v57, %v4232_v59  ;;  %v5381_v62 = vld [vmem:[#allocation9 + $0xb8] sm:$0xff]  ;;  %v5380_v0 = vld [vmem:[#allocation9 + $0xb0] sm:$0xff]  ;;  %v5407_v57 = vld [vmem:[#allocation9 + $0x188] sm:$0xff] }
 0x5cd   : > { %v5373_v10 = vld [vmem:[#allocation9 + $0x78] sm:$0xff]  ;;  %v5415_v59 = vld [vmem:[#allocation9 + $0x1c8] sm:$0xff] }
 0x5ce   : > { %2495 = vmatpush.bf16.msrb.mxu2 %v4271_v4  ;;  %2508 = vmatpush.bf16.msra.mxu3 %v4275_v5  ;;  %v4414_v4 = vld [vmem:[#allocation7 + $0x1b0] sm:$0xf] }
 0x5cf   : > { %2521 = vmatpush.bf16.msrb.mxu0 %v4279_v9  ;;  %2534 = vmatpush.bf16.msra.mxu1 %v4283_v11  ;;  %v5292_v5 = vld [vmem:[#allocation7 + $0x1ec] sm:$0xf0]  ;;  %v4416_v9 = vld [vmem:[#allocation7 + $0x1f0] sm:$0xf0]  ;;  %v4422_v11 = vld [vmem:[#allocation7 + $0x1b8] sm:$0xf] }
 0x5d0   : > { %v4415_v16 = vor.u32 %v5292_v5, %v4414_v4  ;;  %v4419_v18 = vor.u32 %v5284_v50, %v4416_v9  ;;  %v4423_v25 = vor.u32 %v5293_v12, %v4422_v11  ;;  %v5371_v4 = vld [vmem:[#allocation9 + $0x68] sm:$0xff]  ;;  %v5378_v5 = vld [vmem:[#allocation9 + $0xa0] sm:$0xff]  ;;  %v5377_v50 = vld [vmem:[#allocation9 + $0x98] sm:$0xff] }
 0x5d1   : > { %v5385_v9 = vld [vmem:[#allocation9 + $0xd8] sm:$0xff] }
 0x5d2   : > { %2496 = vmatpush.bf16.msrb.mxu2 %v4207_v27  ;;  %2509 = vmatpush.bf16.msra.mxu3 %v4211_v28  ;;  %v5268_v27 = vld [vmem:[#allocation7 + $0x134] sm:$0xf]  ;;  %v5361_v11 = vld [vmem:[#allocation9 + $0x18] sm:$0xff] }
 0x5d3   : > { %2522 = vmatpush.bf16.msrb.mxu0 %v4215_v32  ;;  %2535 = vmatpush.bf16.msra.mxu1 %v4219_v33  ;;  %v4352_v28 = vld [vmem:[#allocation7 + $0x170] sm:$0xf0]  ;;  %v4360_v32 = vld [vmem:[#allocation7 + $0x178] sm:$0xf0]  ;;  %v4351_v33 = vor.u32 %v5276_v22, %v4350_v21  ;;  %v5375_v21 = vld [vmem:[#allocation9 + $0x88] sm:$0xff] }
 0x5d4   : > { %v5369_v12 = vld [vmem:[#allocation9 + $0x58] sm:$0xff]  ;;  %v5383_v22 = vld [vmem:[#allocation9 + $0xc8] sm:$0xff] }
 0x5d5   : > { %2497 = vmatmul.bf16.vlgmr.msrb.gmra.mxu2 %v6293_v58  ;;  %2510 = vmatmul.bf16.vlgmr.msra.gmra.mxu3 %v6293_v58 }
 0x5d6   : > { %2541 = vmatpush.bf16.msra.mxu2 %v4671_v47  ;;  %2554 = vmatpush.bf16.msrb.mxu3 %v4675_v34  ;;  %v4355_v47 = vor.u32 %v5268_v27, %v4352_v28  ;;  %v4286_v34 = vld [vmem:[#allocation7 + $0xb0] sm:$0xf]  ;;  %v5374_v27 = vld [vmem:[#allocation9 + $0x80] sm:$0xff] }
 0x5d7   : > { %2567 = vmatpush.bf16.msra.mxu0 %v4679_v37  ;;  %2580 = vmatpush.bf16.msrb.mxu1 %v4683_v38  ;;  %v4363_v37 = vor.u32 %v5269_v31, %v4360_v32  ;;  %v5252_v38 = vld [vmem:[#allocation7 + $0xb4] sm:$0xf]  ;;  %v4287_v44 = vor.u32 %v5260_v35, %v4286_v34  ;;  %v5382_v28 = vld [vmem:[#allocation9 + $0xc0] sm:$0xff] }
 0x5d8   : > { %2523 = vmatmul.bf16.vlgmr.msrb.gmra.mxu0 %v6293_v58  ;;  %2536 = vmatmul.bf16.vlgmr.msra.gmra.mxu1 %v6293_v58  ;;  %v5358_v31 = vld [vmem:[#allocation9] sm:$0xff]  ;;  %v5412_v34 = vld [vmem:[#allocation9 + $0x1b0] sm:$0xff] }
 0x5d9   : > { %v5366_v32 = vld [vmem:[#allocation9 + $0x40] sm:$0xff]  ;;  %v5420_v35 = vld [vmem:[#allocation9 + $0x1f0] sm:$0xff] }
 0x5da   : > { %2542 = vmatpush.bf16.msra.mxu2 %v4607_v45  ;;  %2555 = vmatpush.bf16.msrb.mxu3 %v4611_v48  ;;  %v4291_v45 = vor.u32 %v5252_v38, %v4288_v39  ;;  %v4222_v48 = vld [vmem:[#allocation7 + $0x30] sm:$0xf]  ;;  %v5411_v38 = vld [vmem:[#allocation9 + $0x1a8] sm:$0xff] }
 0x5db   : > { %2568 = vmatpush.bf16.msra.mxu0 %v4615_v53  ;;  %2581 = vmatpush.bf16.msrb.mxu1 %v4619_v54  ;;  %v4299_v53 = vor.u32 %v5253_v42, %v4296_v43  ;;  %v5236_v54 = vld [vmem:[#allocation7 + $0x34] sm:$0xf]  ;;  %v4223_v60 = vor.u32 %v5244_v51, %v4222_v48  ;;  %v5419_v39 = vld [vmem:[#allocation9 + $0x1e8] sm:$0xff]  ;;  %v5410_v42 = vld [vmem:[#allocation9 + $0x1a0] sm:$0xff] }
 0x5dc   : > { %v5418_v43 = vld [vmem:[#allocation9 + $0x1e0] sm:$0xff]  ;;  %v5409_v48 = vld [vmem:[#allocation9 + $0x198] sm:$0xff] }
 0x5dd   : > { %v5417_v51 = vld [vmem:[#allocation9 + $0x1d8] sm:$0xff] }
 0x5de   : > { %2543 = vmatpush.bf16.msra.mxu2 %v4543_v6  ;;  %2556 = vmatpush.bf16.msrb.mxu3 %v4547_v49  ;;  %v4227_v6 = vor.u32 %v5236_v54, %v4224_v55  ;;  %v4231_v49 = vor.u32 %v5245_v56, %v4230_v23  ;;  %v5408_v54 = vld [vmem:[#allocation9 + $0x190] sm:$0xff] }
 0x5df   : > { %2569 = vmatpush.bf16.msra.mxu0 %v4551_v63  ;;  %2582 = vmatpush.bf16.msrb.mxu1 %v4555_v20  ;;  %v5389_v63 = vld [vmem:[#allocation9 + $0xf8] sm:$0xff]  ;;  %v5416_v55 = vld [vmem:[#allocation9 + $0x1d0] sm:$0xff] }
 0x5e0   : > { %v5365_v20 = vld [vmem:[#allocation9 + $0x38] sm:$0xff]  ;;  %v5392_v23 = vld [vmem:[#allocation9 + $0x110] sm:$0xff] }
 0x5e1   : > { %v5400_v56 = vld [vmem:[#allocation9 + $0x150] sm:$0xff] }
 0x5e2   : > { %2544 = vmatpush.bf16.msra.mxu2 %v4479_v3  ;;  %2557 = vmatpush.bf16.msrb.mxu3 %v4483_v24  ;;  %v5387_v3 = vld [vmem:[#allocation9 + $0xe8] sm:$0xff] }
 0x5e3   : > { %2570 = vmatpush.bf16.msra.mxu0 %v4487_v7  ;;  %2583 = vmatpush.bf16.msrb.mxu1 %v4491_v8  ;;  %v5363_v24 = vld [vmem:[#allocation9 + $0x28] sm:$0xff]  ;;  %v5386_v7 = vld [vmem:[#allocation9 + $0xe0] sm:$0xff] }
 0x5e4   : > { %v5362_v8 = vld [vmem:[#allocation9 + $0x20] sm:$0xff] }
 0x5e6   : > { %2545 = vmatpush.bf16.msra.mxu2 %v4415_v16  ;;  %2558 = vmatpush.bf16.msrb.mxu3 %v4419_v18  ;;  %v5360_v16 = vld [vmem:[#allocation9 + $0x10] sm:$0xff] }
 0x5e7   : > { %2571 = vmatpush.bf16.msra.mxu0 %v4423_v25  ;;  %2584 = vmatpush.bf16.msrb.mxu1 %v4427_v26  ;;  %v5368_v18 = vld [vmem:[#allocation9 + $0x50] sm:$0xff]  ;;  %v5359_v25 = vld [vmem:[#allocation9 + $0x8] sm:$0xff] }
 0x5e8   : > { %v5367_v26 = vld [vmem:[#allocation9 + $0x48] sm:$0xff] }
 0x5ea   : > { %2546 = vmatpush.bf16.msra.mxu2 %v4351_v33  ;;  %2559 = vmatpush.bf16.msrb.mxu3 %v4355_v47  ;;  %v5397_v33 = vld [vmem:[#allocation9 + $0x138] sm:$0xff] }
 0x5eb   : > { %2572 = vmatpush.bf16.msra.mxu0 %v4359_v36  ;;  %2585 = vmatpush.bf16.msrb.mxu1 %v4363_v37  ;;  %v5405_v47 = vld [vmem:[#allocation9 + $0x178] sm:$0xff]  ;;  %v5396_v36 = vld [vmem:[#allocation9 + $0x130] sm:$0xff] }
 0x5ec   : > { %v5404_v37 = vld [vmem:[#allocation9 + $0x170] sm:$0xff] }
 0x5ee   : > { %2547 = vmatpush.bf16.msra.mxu2 %v4287_v44  ;;  %2560 = vmatpush.bf16.msrb.mxu3 %v4291_v45  ;;  %v5394_v44 = vld [vmem:[#allocation9 + $0x120] sm:$0xff] }
 0x5ef   : > { %2573 = vmatpush.bf16.msra.mxu0 %v4295_v52  ;;  %2586 = vmatpush.bf16.msrb.mxu1 %v4299_v53  ;;  %v5402_v45 = vld [vmem:[#allocation9 + $0x160] sm:$0xff]  ;;  %v5393_v52 = vld [vmem:[#allocation9 + $0x118] sm:$0xff] }
 0x5f0   : > { %v5401_v53 = vld [vmem:[#allocation9 + $0x158] sm:$0xff] }
 0x5f2   : > { %2548 = vmatpush.bf16.msra.mxu2 %v4223_v60  ;;  %2561 = vmatpush.bf16.msrb.mxu3 %v4227_v6  ;;  %v5391_v60 = vld [vmem:[#allocation9 + $0x108] sm:$0xff] }
 0x5f3   : > { %2574 = vmatpush.bf16.msra.mxu0 %v4231_v49  ;;  %2587 = vmatpush.bf16.msrb.mxu1 %v4235_v61  ;;  %v5399_v6 = vld [vmem:[#allocation9 + $0x148] sm:$0xff]  ;;  %v5406_v49 = vld [vmem:[#allocation9 + $0x180] sm:$0xff] }
 0x5f4   : > { %v5414_v61 = vld [vmem:[#allocation9 + $0x1c0] sm:$0xff] }
 0x5f5   : > { %2549 = vmatmul.bf16.vlgmr.msra.gmra.mxu2 %v6293_v58  ;;  %2562 = vmatmul.bf16.vlgmr.msrb.gmra.mxu3 %v6293_v58 }
 0x5f6   : > { %2575 = vmatmul.bf16.vlgmr.msra.gmra.mxu0 %v6293_v58  ;;  %2588 = vmatmul.bf16.vlgmr.msrb.gmra.mxu1 %v6293_v58  ;;  %v5370_v58 = vld [vmem:[#allocation9 + $0x60] sm:$0xff] }
 0x5f7   : > { %3679 = vmatpush.bf16.msrb.mxu0 %v5381_v62  ;;  %3692 = vmatpush.bf16.msra.mxu1 %v5389_v63  ;;  %v5390_v62 = vld [vmem:[#allocation9 + $0x100] sm:$0xff] }
 0x5f8   : > { %3653 = vmatpush.bf16.msrb.mxu2 %v5365_v20  ;;  %3666 = vmatpush.bf16.msra.mxu3 %v5373_v10  ;;  %v5398_v63 = vld [vmem:[#allocation9 + $0x140] sm:$0xff] }
 0x5f9   : > { %v6314_v20 = vld [vmem:[%s6359_s8] sm:$0xff] }
 0x5fa   : > { %v1715_v10 = vperm.slane %v6314_v20, 2 }
 0x5fb   : > { %3680 = vmatpush.bf16.msrb.mxu0 %v5380_v0  ;;  %3693 = vmatpush.bf16.msra.mxu1 %v5388_v17  ;;  %v1716_v0 = vperm.slane %v6314_v20, 3 }
 0x5fc   : > { %3654 = vmatpush.bf16.msrb.mxu2 %v5364_v1  ;;  %3667 = vmatpush.bf16.msra.mxu3 %v5372_v2 }
 0x5ff   : > { %3681 = vmatpush.bf16.msrb.mxu0 %v5379_v19  ;;  %3694 = vmatpush.bf16.msra.mxu1 %v5387_v3  ;;  %v1713_v3 = vperm.slane %v6314_v20, 0 }
 0x600   : > { %3655 = vmatpush.bf16.msrb.mxu2 %v5363_v24  ;;  %3668 = vmatpush.bf16.msra.mxu3 %v5371_v4  ;;  %v1714_v24 = vperm.slane %v6314_v20, 1 }
 0x603   : > { %3682 = vmatpush.bf16.msrb.mxu0 %v5378_v5  ;;  %3695 = vmatpush.bf16.msra.mxu1 %v5386_v7  ;;  %v5445_v7 = vld [vmem:[#allocation9 + $0x2b8] sm:$0xff] }
 0x604   : > { %3656 = vmatpush.bf16.msrb.mxu2 %v5362_v8  ;;  %3669 = vmatpush.bf16.msra.mxu3 %v5370_v58  ;;  %v5453_v8 = vld [vmem:[#allocation9 + $0x2f8] sm:$0xff] }
 0x607   : > { %3683 = vmatpush.bf16.msrb.mxu0 %v5377_v50  ;;  %3696 = vmatpush.bf16.msra.mxu1 %v5385_v9 }
 0x608   : > { %3657 = vmatpush.bf16.msrb.mxu2 %v5361_v11  ;;  %3670 = vmatpush.bf16.msra.mxu3 %v5369_v12 }
 0x60b   : > { %3684 = vmatpush.bf16.msrb.mxu0 %v5376_v14  ;;  %3697 = vmatpush.bf16.msra.mxu1 %v5384_v15 }
 0x60c   : > { %3658 = vmatpush.bf16.msrb.mxu2 %v5360_v16  ;;  %3671 = vmatpush.bf16.msra.mxu3 %v5368_v18 }
 0x60f   : > { %3685 = vmatpush.bf16.msrb.mxu0 %v5375_v21  ;;  %3698 = vmatpush.bf16.msra.mxu1 %v5383_v22  ;;  %v5444_v22 = vld [vmem:[#allocation9 + $0x2b0] sm:$0xff] }
 0x610   : > { %3659 = vmatpush.bf16.msrb.mxu2 %v5359_v25  ;;  %3672 = vmatpush.bf16.msra.mxu3 %v5367_v26  ;;  %v5452_v25 = vld [vmem:[#allocation9 + $0x2f0] sm:$0xff] }
 0x613   : > { %3686 = vmatpush.bf16.msrb.mxu0 %v5374_v27  ;;  %3699 = vmatpush.bf16.msra.mxu1 %v5382_v28  ;;  %v5429_v28 = vld [vmem:[#allocation9 + $0x238] sm:$0xff] }
 0x614   : > { %3660 = vmatpush.bf16.msrb.mxu2 %v5358_v31  ;;  %3673 = vmatpush.bf16.msra.mxu3 %v5366_v32  ;;  %v5451_v31 = vld [vmem:[#allocation9 + $0x2e8] sm:$0xff] }
 0x617   : > { %3731 = vmatpush.bf16.msra.mxu0 %v5413_v29  ;;  %3744 = vmatpush.bf16.msrb.mxu1 %v5421_v30  ;;  %v5437_v29 = vld [vmem:[#allocation9 + $0x278] sm:$0xff]  ;;  %v5443_v30 = vld [vmem:[#allocation9 + $0x2a8] sm:$0xff] }
 0x618   : > { %3705 = vmatpush.bf16.msra.mxu2 %v5397_v33  ;;  %3718 = vmatpush.bf16.msrb.mxu3 %v5405_v47  ;;  %v1719_v47 = vperm.slane %v6314_v20, 6 }
 0x61b   : > { %3732 = vmatpush.bf16.msra.mxu0 %v5412_v34  ;;  %3745 = vmatpush.bf16.msrb.mxu1 %v5420_v35  ;;  %v1720_v34 = vperm.slane %v6314_v20, 7  ;;  %v5428_v35 = vld [vmem:[#allocation9 + $0x230] sm:$0xff] }
 0x61c   : > { %3706 = vmatpush.bf16.msra.mxu2 %v5396_v36  ;;  %3719 = vmatpush.bf16.msrb.mxu3 %v5404_v37  ;;  %v5436_v36 = vld [vmem:[#allocation9 + $0x270] sm:$0xff] }
 0x61f   : > { %3733 = vmatpush.bf16.msra.mxu0 %v5411_v38  ;;  %3746 = vmatpush.bf16.msrb.mxu1 %v5419_v39  ;;  %v5442_v39 = vld [vmem:[#allocation9 + $0x2a0] sm:$0xff] }
 0x620   : > { %3707 = vmatpush.bf16.msra.mxu2 %v5395_v40  ;;  %3720 = vmatpush.bf16.msrb.mxu3 %v5403_v41  ;;  %v5450_v40 = vld [vmem:[#allocation9 + $0x2e0] sm:$0xff] }
 0x623   : > { %3734 = vmatpush.bf16.msra.mxu0 %v5410_v42  ;;  %3747 = vmatpush.bf16.msrb.mxu1 %v5418_v43  ;;  %v5427_v43 = vld [vmem:[#allocation9 + $0x228] sm:$0xff] }
 0x624   : > { %3708 = vmatpush.bf16.msra.mxu2 %v5394_v44  ;;  %3721 = vmatpush.bf16.msrb.mxu3 %v5402_v45  ;;  %v5435_v44 = vld [vmem:[#allocation9 + $0x268] sm:$0xff]  ;;  %v1717_v45 = vperm.slane %v6314_v20, 4 }
 0x627   : > { %3735 = vmatpush.bf16.msra.mxu0 %v5409_v48  ;;  %3748 = vmatpush.bf16.msrb.mxu1 %v5417_v51  ;;  %v1718_v48 = vperm.slane %v6314_v20, 5 }
 0x628   : > { %3709 = vmatpush.bf16.msra.mxu2 %v5393_v52  ;;  %3722 = vmatpush.bf16.msrb.mxu3 %v5401_v53  ;;  %v5441_v53 = vld [vmem:[#allocation9 + $0x298] sm:$0xff] }
 0x62b   : > { %3736 = vmatpush.bf16.msra.mxu0 %v5408_v54  ;;  %3749 = vmatpush.bf16.msrb.mxu1 %v5416_v55  ;;  %v5449_v54 = vld [vmem:[#allocation9 + $0x2d8] sm:$0xff] }
 0x62c   : > { %3710 = vmatpush.bf16.msra.mxu2 %v5392_v23  ;;  %3723 = vmatpush.bf16.msrb.mxu3 %v5400_v56 }
 0x62f   : > { %3737 = vmatpush.bf16.msra.mxu0 %v5407_v57  ;;  %3750 = vmatpush.bf16.msrb.mxu1 %v5415_v59 }
 0x630   : > { %3711 = vmatpush.bf16.msra.mxu2 %v5391_v60  ;;  %3724 = vmatpush.bf16.msrb.mxu3 %v5399_v6  ;;  %v5426_v6 = vld [vmem:[#allocation9 + $0x220] sm:$0xff] }
 0x632   : > { %v2420_v17 = vpop.f32.mrf.mxu0  ;;  %v2433_v1 = vpop.f32.mrf.mxu1 }
 0x633   : > { %3738 = vmatpush.bf16.msra.mxu0 %v5406_v49  ;;  %3751 = vmatpush.bf16.msrb.mxu1 %v5414_v61  ;;  %v2421_v2 = vadd.f32 %v2420_v17, %v1715_v10  ;;  %v2434_v19 = vadd.f32 %v2433_v1, %v1716_v0  ;;  %v5434_v49 = vld [vmem:[#allocation9 + $0x260] sm:$0xff]  ;;  %v5440_v10 = vld [vmem:[#allocation9 + $0x290] sm:$0xff] }
 0x634   : > { %3712 = vmatpush.bf16.msra.mxu2 %v5390_v62  ;;  %3725 = vmatpush.bf16.msrb.mxu3 %v5398_v63  ;;  %v5448_v0 = vld [vmem:[#allocation9 + $0x2d0] sm:$0xff] }
 0x635   : > { %v2595_v4 = vmax.f32 %v2421_v2, 0.0  ;;  %v2596_v5 = vmax.f32 %v2434_v19, 0.0  ;;  %v5425_v2 = vld [vmem:[#allocation9 + $0x218] sm:$0xff] }
 0x636   : > { %v5433_v19 = vld [vmem:[#allocation9 + $0x258] sm:$0xff] }
 0x637   : > { %v2611_v58 = vpack.c.bf16 %v2595_v4, %v2595_v4  ;;  %v2612_v50 = vpack.c.bf16 %v2596_v5, %v2596_v5  ;;  %v2394_v9 = vpop.f32.mrf.mxu2  ;;  %v2407_v11 = vpop.f32.mrf.mxu3  ;;  %v6327_v4 = vld [vmem:[%s6359_s8 + $0x8] sm:$0xff] }
 0x638   : > { %v2395_v12 = vadd.f32 %v2394_v9, %v1713_v3  ;;  %v2408_v14 = vadd.f32 %v2407_v11, %v1714_v24  ;;  %v5439_v3 = vld [vmem:[#allocation9 + $0x288] sm:$0xff]  ;;  %v1724_v9 = vperm.slane %v6327_v4, 3  ;;  %v5438_v11 = vld [vmem:[#allocation9 + $0x280] sm:$0xff] }
 0x639   : > { %3687 = vmatmul.bf16.vlgmr.msrb.gmra.mxu0 %v2611_v58  ;;  %3700 = vmatmul.bf16.vlgmr.msra.gmra.mxu1 %v2612_v50  ;;  %v5447_v24 = vld [vmem:[#allocation9 + $0x2c8] sm:$0xff]  ;;  %v5432_v58 = vld [vmem:[#allocation9 + $0x250] sm:$0xff]  ;;  %v1723_v50 = vperm.slane %v6327_v4, 2 }
 0x63a   : > { %v2593_v15 = vmax.f32 %v2395_v12, 0.0  ;;  %v2594_v16 = vmax.f32 %v2408_v14, 0.0  ;;  %3783 = vmatpush.bf16.msrb.mxu0 %v5445_v7  ;;  %3796 = vmatpush.bf16.msra.mxu1 %v5453_v8  ;;  %v2422_v18 = vpop.f32.mrf.mxu0  ;;  %v2435_v21 = vpop.f32.mrf.mxu1  ;;  %v5424_v8 = vld [vmem:[#allocation9 + $0x210] sm:$0xff]  ;;  %v5446_v12 = vld [vmem:[#allocation9 + $0x2c0] sm:$0xff]  ;;  %v5477_v14 = vld [vmem:[#allocation9 + $0x3b8] sm:$0xff] }
 0x63b   : > { %v5423_v21 = vld [vmem:[#allocation9 + $0x208] sm:$0xff] }
 0x63c   : > { %v2609_v26 = vpack.c.bf16 %v2593_v15, %v2593_v15  ;;  %v2610_v27 = vpack.c.bf16 %v2594_v16, %v2594_v16  ;;  %v5485_v15 = vld [vmem:[#allocation9 + $0x3f8] sm:$0xff] }
 0x63e   : > { %3784 = vmatpush.bf16.msrb.mxu0 %v5444_v22  ;;  %3797 = vmatpush.bf16.msra.mxu1 %v5452_v25  ;;  %v5431_v22 = vld [vmem:[#allocation9 + $0x248] sm:$0xff] }
 0x63f   : > { %3661 = vmatmul.bf16.vlgmr.msrb.gmra.mxu2 %v2609_v26  ;;  %3674 = vmatmul.bf16.vlgmr.msra.gmra.mxu3 %v2610_v27  ;;  %v2396_v32 = vpop.f32.mrf.mxu2  ;;  %v2409_v33 = vpop.f32.mrf.mxu3  ;;  %v1721_v27 = vperm.slane %v6327_v4, 0 }
 0x640   : > { %3757 = vmatpush.bf16.msrb.mxu2 %v5429_v28  ;;  %3770 = vmatpush.bf16.msra.mxu3 %v5437_v29  ;;  %v1722_v28 = vperm.slane %v6327_v4, 1  ;;  %v5484_v32 = vld [vmem:[#allocation9 + $0x3f0] sm:$0xff] }
 0x642   : > { %3785 = vmatpush.bf16.msrb.mxu0 %v5443_v30  ;;  %3798 = vmatpush.bf16.msra.mxu1 %v5451_v31  ;;  %v2472_v37 = vpop.f32.mrf.mxu0  ;;  %v2485_v38 = vpop.f32.mrf.mxu1  ;;  %v5476_v31 = vld [vmem:[#allocation9 + $0x3b0] sm:$0xff] }
 0x643   : > { %v2473_v41 = vadd.f32 %v2472_v37, %v1719_v47  ;;  %v2486_v42 = vadd.f32 %v2485_v38, %v1720_v34  ;;  %v5430_v37 = vld [vmem:[#allocation9 + $0x240] sm:$0xff] }
 0x644   : > { %3758 = vmatpush.bf16.msrb.mxu2 %v5428_v35  ;;  %3771 = vmatpush.bf16.msra.mxu3 %v5436_v36  ;;  %v5422_v36 = vld [vmem:[#allocation9 + $0x200] sm:$0xff] }
 0x645   : > { %v2599_v51 = vmax.f32 %v2473_v41, 0.0  ;;  %v2600_v52 = vmax.f32 %v2486_v42, 0.0  ;;  %v5469_v41 = vld [vmem:[#allocation9 + $0x378] sm:$0xff] }
 0x646   : > { %3786 = vmatpush.bf16.msrb.mxu0 %v5442_v39  ;;  %3799 = vmatpush.bf16.msra.mxu1 %v5450_v40  ;;  %v5461_v40 = vld [vmem:[#allocation9 + $0x338] sm:$0xff] }
 0x647   : > { %v2615_v55 = vpack.c.bf16 %v2599_v51, %v2599_v51  ;;  %v2616_v23 = vpack.c.bf16 %v2600_v52, %v2600_v52  ;;  %v2446_v56 = vpop.f32.mrf.mxu2  ;;  %v2459_v57 = vpop.f32.mrf.mxu3  ;;  %v5483_v51 = vld [vmem:[#allocation9 + $0x3e8] sm:$0xff] }
 0x648   : > { %3759 = vmatpush.bf16.msrb.mxu2 %v5427_v43  ;;  %3772 = vmatpush.bf16.msra.mxu3 %v5435_v44  ;;  %v2447_v59 = vadd.f32 %v2446_v56, %v1717_v45  ;;  %v2460_v60 = vadd.f32 %v2459_v57, %v1718_v48  ;;  %v5475_v48 = vld [vmem:[#allocation9 + $0x3a8] sm:$0xff]  ;;  %v5482_v56 = vld [vmem:[#allocation9 + $0x3e0] sm:$0xff] }
 0x649   : > { %3739 = vmatmul.bf16.vlgmr.msra.gmra.mxu0 %v2615_v55  ;;  %3752 = vmatmul.bf16.vlgmr.msrb.gmra.mxu1 %v2616_v23  ;;  %v5468_v55 = vld [vmem:[#allocation9 + $0x370] sm:$0xff]  ;;  %v5474_v23 = vld [vmem:[#allocation9 + $0x3a0] sm:$0xff] }
 0x64a   : > { %v2597_v61 = vmax.f32 %v2447_v59, 0.0  ;;  %v2598_v62 = vmax.f32 %v2460_v60, 0.0  ;;  %3787 = vmatpush.bf16.msrb.mxu0 %v5441_v53  ;;  %3800 = vmatpush.bf16.msra.mxu1 %v5449_v54  ;;  %v2474_v63 = vpop.f32.mrf.mxu0  ;;  %v2487_v20 = vpop.f32.mrf.mxu1  ;;  %v5460_v54 = vld [vmem:[#allocation9 + $0x330] sm:$0xff]  ;;  %v5459_v60 = vld [vmem:[#allocation9 + $0x328] sm:$0xff] }
 0x64b   : > { %v5466_v63 = vld [vmem:[#allocation9 + $0x360] sm:$0xff]  ;;  %v5472_v20 = vld [vmem:[#allocation9 + $0x390] sm:$0xff] }
 0x64c   : > { %v2613_v17 = vpack.c.bf16 %v2597_v61, %v2597_v61  ;;  %v2614_v1 = vpack.c.bf16 %v2598_v62, %v2598_v62  ;;  %3760 = vmatpush.bf16.msrb.mxu2 %v5426_v6  ;;  %3773 = vmatpush.bf16.msra.mxu3 %v5434_v49  ;;  %v5467_v6 = vld [vmem:[#allocation9 + $0x368] sm:$0xff]  ;;  %v5473_v49 = vld [vmem:[#allocation9 + $0x398] sm:$0xff]  ;;  %v5458_v62 = vld [vmem:[#allocation9 + $0x320] sm:$0xff] }
 0x64d   : > { %v5481_v61 = vld [vmem:[#allocation9 + $0x3d8] sm:$0xff] }
 0x64e   : > { %3788 = vmatpush.bf16.msrb.mxu0 %v5440_v10  ;;  %3801 = vmatpush.bf16.msra.mxu1 %v5448_v0  ;;  %v5480_v10 = vld [vmem:[#allocation9 + $0x3d0] sm:$0xff]  ;;  %v5457_v0 = vld [vmem:[#allocation9 + $0x318] sm:$0xff] }
 0x64f   : > { %3713 = vmatmul.bf16.vlgmr.msra.gmra.mxu2 %v2613_v17  ;;  %3726 = vmatmul.bf16.vlgmr.msrb.gmra.mxu3 %v2614_v1  ;;  %v2448_v5 = vpop.f32.mrf.mxu2  ;;  %v2461_v7 = vpop.f32.mrf.mxu3  ;;  %v5465_v17 = vld [vmem:[#allocation9 + $0x358] sm:$0xff]  ;;  %v5471_v1 = vld [vmem:[#allocation9 + $0x388] sm:$0xff] }
 0x650   : > { %3761 = vmatpush.bf16.msrb.mxu2 %v5425_v2  ;;  %3774 = vmatpush.bf16.msra.mxu3 %v5433_v19  ;;  %v5479_v2 = vld [vmem:[#allocation9 + $0x3c8] sm:$0xff]  ;;  %v1727_v19 = vperm.slane %v6327_v4, 6  ;;  %v5464_v5 = vld [vmem:[#allocation9 + $0x350] sm:$0xff]  ;;  %v5470_v7 = vld [vmem:[#allocation9 + $0x380] sm:$0xff] }
 0x652   : > { %3789 = vmatpush.bf16.msrb.mxu0 %v5439_v3  ;;  %3802 = vmatpush.bf16.msra.mxu1 %v5447_v24  ;;  %v1728_v3 = vperm.slane %v6327_v4, 7  ;;  %v5456_v24 = vld [vmem:[#allocation9 + $0x310] sm:$0xff] }
 0x654   : > { %3762 = vmatpush.bf16.msrb.mxu2 %v5424_v8  ;;  %3775 = vmatpush.bf16.msra.mxu3 %v5432_v58  ;;  %v5478_v8 = vld [vmem:[#allocation9 + $0x3c0] sm:$0xff] }
 0x655   : > { %v2524_v16 = vpop.f32.mrf.mxu0  ;;  %v2537_v18 = vpop.f32.mrf.mxu1 }
 0x656   : > { %v2525_v25 = vadd.f32 %v2524_v16, %v1723_v50  ;;  %v2538_v26 = vadd.f32 %v2537_v18, %v1724_v9  ;;  %3790 = vmatpush.bf16.msrb.mxu0 %v5438_v11  ;;  %3803 = vmatpush.bf16.msra.mxu1 %v5446_v12  ;;  %v5455_v12 = vld [vmem:[#allocation9 + $0x308] sm:$0xff]  ;;  %v1726_v16 = vperm.slane %v6327_v4, 5 }
 0x658   : > { %v2603_v29 = vmax.f32 %v2525_v25, 0.0  ;;  %v2604_v30 = vmax.f32 %v2538_v26, 0.0  ;;  %3763 = vmatpush.bf16.msrb.mxu2 %v5423_v21  ;;  %3776 = vmatpush.bf16.msra.mxu3 %v5431_v22  ;;  %v2498_v34 = vpop.f32.mrf.mxu2  ;;  %v2511_v35 = vpop.f32.mrf.mxu3 }
 0x659   : > { %v2499_v38 = vadd.f32 %v2498_v34, %v1721_v27  ;;  %v2512_v39 = vadd.f32 %v2511_v35, %v1722_v28  ;;  %v5454_v28 = vld [vmem:[#allocation9 + $0x300] sm:$0xff] }
 0x65a   : > { %3835 = vmatpush.bf16.msra.mxu0 %v5477_v14  ;;  %3848 = vmatpush.bf16.msrb.mxu1 %v5485_v15  ;;  %v2619_v33 = vpack.c.bf16 %v2603_v29, %v2603_v29  ;;  %v2620_v47 = vpack.c.bf16 %v2604_v30, %v2604_v30  ;;  %v5463_v14 = vld [vmem:[#allocation9 + $0x348] sm:$0xff]  ;;  %v1725_v15 = vperm.slane %v6327_v4, 4  ;;  %v5462_v29 = vld [vmem:[#allocation9 + $0x340] sm:$0xff] }
 0x65b   : > { %v2601_v42 = vmax.f32 %v2499_v38, 0.0  ;;  %v2602_v43 = vmax.f32 %v2512_v39, 0.0 }
 0x65c   : > { %3791 = vmatmul.bf16.vlgmr.msrb.gmra.mxu0 %v2619_v33  ;;  %3804 = vmatmul.bf16.vlgmr.msra.gmra.mxu1 %v2620_v47 }
 0x65d   : > { %v2526_v44 = vpop.f32.mrf.mxu0  ;;  %v2539_v45 = vpop.f32.mrf.mxu1  ;;  %3764 = vmatpush.bf16.msrb.mxu2 %v5422_v36  ;;  %3777 = vmatpush.bf16.msra.mxu3 %v5430_v37  ;;  %v2617_v52 = vpack.c.bf16 %v2601_v42, %v2601_v42  ;;  %v2618_v53 = vpack.c.bf16 %v2602_v43, %v2602_v43 }
 0x65e   : > { %3836 = vmatpush.bf16.msra.mxu0 %v5476_v31  ;;  %3849 = vmatpush.bf16.msrb.mxu1 %v5484_v32 }
 0x660   : > { %3765 = vmatmul.bf16.vlgmr.msrb.gmra.mxu2 %v2617_v52  ;;  %3778 = vmatmul.bf16.vlgmr.msra.gmra.mxu3 %v2618_v53  ;;  %v2500_v57 = vpop.f32.mrf.mxu2  ;;  %v2513_v59 = vpop.f32.mrf.mxu3 }
 0x661   : > { %3809 = vmatpush.bf16.msra.mxu2 %v5461_v40  ;;  %3822 = vmatpush.bf16.msrb.mxu3 %v5469_v41 }
 0x662   : > { %3837 = vmatpush.bf16.msra.mxu0 %v5475_v48  ;;  %3850 = vmatpush.bf16.msrb.mxu1 %v5483_v51 }
 0x665   : > { %3810 = vmatpush.bf16.msra.mxu2 %v5460_v54  ;;  %3823 = vmatpush.bf16.msrb.mxu3 %v5468_v55 }
 0x666   : > { %3838 = vmatpush.bf16.msra.mxu0 %v5474_v23  ;;  %3851 = vmatpush.bf16.msrb.mxu1 %v5482_v56  ;;  %v5579_v23 = vld [vmem:[#allocation10] ss:$0 sm:$0xff] }
 0x669   : > { %3811 = vmatpush.bf16.msra.mxu2 %v5459_v60  ;;  %3824 = vmatpush.bf16.msrb.mxu3 %v5467_v6 }
 0x66a   : > { %3839 = vmatpush.bf16.msra.mxu0 %v5473_v49  ;;  %3852 = vmatpush.bf16.msrb.mxu1 %v5481_v61 }
 0x66d   : > { %3812 = vmatpush.bf16.msra.mxu2 %v5458_v62  ;;  %3825 = vmatpush.bf16.msrb.mxu3 %v5466_v63 }
 0x66e   : > { %3840 = vmatpush.bf16.msra.mxu0 %v5472_v20  ;;  %3853 = vmatpush.bf16.msrb.mxu1 %v5480_v10 }
 0x671   : > { %3813 = vmatpush.bf16.msra.mxu2 %v5457_v0  ;;  %3826 = vmatpush.bf16.msrb.mxu3 %v5465_v17 }
 0x672   : > { %3841 = vmatpush.bf16.msra.mxu0 %v5471_v1  ;;  %3854 = vmatpush.bf16.msrb.mxu1 %v5479_v2 }
 0x673   : > { %v2576_v58 = vpop.f32.mrf.mxu0  ;;  %v2589_v50 = vpop.f32.mrf.mxu1 }
 0x674   : > { %v2577_v9 = vadd.f32 %v2576_v58, %v1727_v19  ;;  %v2590_v11 = vadd.f32 %v2589_v50, %v1728_v3 }
 0x675   : > { %3814 = vmatpush.bf16.msra.mxu2 %v5456_v24  ;;  %3827 = vmatpush.bf16.msrb.mxu3 %v5464_v5 }
 0x676   : > { %v2607_v18 = vmax.f32 %v2577_v9, 0.0  ;;  %v2608_v21 = vmax.f32 %v2590_v11, 0.0  ;;  %3842 = vmatpush.bf16.msra.mxu0 %v5470_v7  ;;  %3855 = vmatpush.bf16.msrb.mxu1 %v5478_v8 }
 0x678   : > { %v2623_v22 = vpack.c.bf16 %v2607_v18, %v2607_v18  ;;  %v2624_v25 = vpack.c.bf16 %v2608_v21, %v2608_v21  ;;  %v2550_v26 = vpop.f32.mrf.mxu2  ;;  %v2563_v27 = vpop.f32.mrf.mxu3 }
 0x679   : > { %3815 = vmatpush.bf16.msra.mxu2 %v5455_v12  ;;  %3828 = vmatpush.bf16.msrb.mxu3 %v5463_v14  ;;  %v2551_v30 = vadd.f32 %v2550_v26, %v1725_v15  ;;  %v2564_v31 = vadd.f32 %v2563_v27, %v1726_v16 }
 0x67a   : > { %3843 = vmatmul.bf16.vlgmr.msra.gmra.mxu0 %v2623_v22  ;;  %3856 = vmatmul.bf16.vlgmr.msrb.gmra.mxu1 %v2624_v25 }
 0x67b   : > { %v2605_v32 = vmax.f32 %v2551_v30, 0.0  ;;  %v2606_v33 = vmax.f32 %v2564_v31, 0.0  ;;  %v2578_v47 = vpop.f32.mrf.mxu0  ;;  %v2591_v4 = vpop.f32.mrf.mxu1 }
 0x67d   : > { %3816 = vmatpush.bf16.msra.mxu2 %v5454_v28  ;;  %3829 = vmatpush.bf16.msrb.mxu3 %v5462_v29  ;;  %v2621_v34 = vpack.c.bf16 %v2605_v32, %v2605_v32  ;;  %v2622_v35 = vpack.c.bf16 %v2606_v33, %v2606_v33 }
 0x680   : > { %3817 = vmatmul.bf16.vlgmr.msra.gmra.mxu2 %v2621_v34  ;;  %3830 = vmatmul.bf16.vlgmr.msrb.gmra.mxu3 %v2622_v35  ;;  %v2552_v36 = vpop.f32.mrf.mxu2  ;;  %v2565_v37 = vpop.f32.mrf.mxu3 }
 0x6b6   : > { %v3688_v38 = vpop.f32.mrf.mxu0  ;;  %v3701_v39 = vpop.f32.mrf.mxu1 }
 0x6be   : > { %v3690_v40 = vpop.f32.mrf.mxu0  ;;  %v3703_v41 = vpop.f32.mrf.mxu1 }
 0x6bf   : > { %v5581_v40 = vld [vmem:[#allocation12] ss:$0 sm:$0xff] }
 0x6c2   : > { %v3662_v42 = vpop.f32.mrf.mxu2  ;;  %v3675_v43 = vpop.f32.mrf.mxu3 }
 0x6c3   : > { %v3663_v56 = vadd.f32 %v5579_v23, %v3662_v42 }
 0x6c5   : > { %v3676_v49 = vadd.f32 %v3675_v43, %v3663_v56 }
 0x6c6   : > { %v3740_v44 = vpop.f32.mrf.mxu0  ;;  %v3753_v45 = vpop.f32.mrf.mxu1 }
 0x6c7   : > { %v3689_v61 = vadd.f32 %v3688_v38, %v3676_v49  ;;  %v5580_v38 = vld [vmem:[%s6362_s11] ss:$0 sm:$0xff] }
 0x6c9   : > { %v3702_v20 = vadd.f32 %v3701_v39, %v3689_v61 }
 0x6ca   : > { %v3664_v48 = vpop.f32.mrf.mxu2  ;;  %v3677_v51 = vpop.f32.mrf.mxu3 }
 0x6ce   : > { %v3742_v52 = vpop.f32.mrf.mxu0  ;;  %v3755_v53 = vpop.f32.mrf.mxu1 }
 0x6d2   : > { %v3714_v54 = vpop.f32.mrf.mxu2  ;;  %v3727_v55 = vpop.f32.mrf.mxu3 }
 0x6d3   : > { %v3715_v17 = vadd.f32 %v3714_v54, %v3702_v20 }
 0x6d5   : > { %v3728_v1 = vadd.f32 %v3727_v55, %v3715_v17 }
 0x6d7   : > { %v3741_v3 = vadd.f32 %v3740_v44, %v3728_v1 }
 0x6d9   : > { %v3792_v57 = vpop.f32.mrf.mxu0  ;;  %v3805_v59 = vpop.f32.mrf.mxu1  ;;  %v3754_v24 = vadd.f32 %v3753_v45, %v3741_v3 }
 0x6da   : > { %v3716_v60 = vpop.f32.mrf.mxu2  ;;  %v3729_v6 = vpop.f32.mrf.mxu3 }
 0x6e1   : > { %v3794_v62 = vpop.f32.mrf.mxu0  ;;  %v3807_v63 = vpop.f32.mrf.mxu1 }
 0x6e3   : > { %v3766_v10 = vpop.f32.mrf.mxu2  ;;  %v3779_v0 = vpop.f32.mrf.mxu3 }
 0x6e4   : > { %v3767_v5 = vadd.f32 %v3766_v10, %v3754_v24 }
 0x6e6   : > { %v3780_v58 = vadd.f32 %v3779_v0, %v3767_v5 }
 0x6e8   : > { %v3793_v50 = vadd.f32 %v3792_v57, %v3780_v58 }
 0x6ea   : > { %v3806_v12 = vadd.f32 %v3805_v59, %v3793_v50 }
 0x6eb   : > { %v3768_v2 = vpop.f32.mrf.mxu2  ;;  %v3781_v19 = vpop.f32.mrf.mxu3 }
 0x6f7   : > { %v3844_v7 = vpop.f32.mrf.mxu0  ;;  %v3857_v8 = vpop.f32.mrf.mxu1 }
 0x6ff   : > { %v3846_v9 = vpop.f32.mrf.mxu0  ;;  %v3859_v11 = vpop.f32.mrf.mxu1 }
 0x703   : > { %v3818_v14 = vpop.f32.mrf.mxu2  ;;  %v3831_v15 = vpop.f32.mrf.mxu3 }
 0x704   : > { %v3819_v16 = vadd.f32 %v3818_v14, %v3806_v12 }
 0x706   : > { %v3832_v18 = vadd.f32 %v3831_v15, %v3819_v16 }
 0x708   : > { %v3845_v21 = vadd.f32 %v3844_v7, %v3832_v18 }
 0x70a   : > { %v3858_v22 = vadd.f32 %v3857_v8, %v3845_v21 }
 0x70b   : > { %v3820_v25 = vpop.f32.mrf.mxu2  ;;  %v3833_v26 = vpop.f32.mrf.mxu3 }
 0x70c   : > { %v3861_v27 = vadd.f32 %v3858_v22, %v6289_v13 }
 0x70e   : > { %3864 = vadd.xlane.f32.xlu2 %v3861_v27 }
 0x781   : > { %v3865_v28 = vpop.xlane.xlu2 %3864 }
 0x782   : > { %v3866_v29 = vmul.f32 %v3865_v28, %v6276_v46 }
 0x784   : > { %v3867_v30 = vsub.f32 %v3861_v27, %v3866_v29 }
 0x786   : > { %v3868_v31 = vmul.f32 %v3867_v30, %v3867_v30 }
 0x788   : > { %3869 = vadd.xlane.f32.xlu0 %v3868_v31 }
 0x7fb   : > { %v3870_v32 = vpop.xlane.xlu0 %3869 }
 0x7fc   : > { %v3871_v33 = vmul.f32 %v3870_v32, %v6276_v46 }
 0x7fe   : > { %v3872_v47 = vadd.f32 1e-05, %v3871_v33 }
 0x800   : > { %5602 = vrsqrt.f32 %v3872_v47  ;;  %vm3879_vm11 = vweird.f32 %v3872_v47 }
 0x806   : > { %v5603_v4 = vpop.eup %5602 }
 0x807   : > { %v3874_v34 = vmul.f32 %v5603_v4, %v3872_v47  ;;  %vm3880_vm10 = vweird.f32 %v5603_v4 }
 0x808   : > { %vm3881_vm12 = vmor %vm3879_vm11, %vm3880_vm10 }
 0x809   : > { %v3875_v35 = vmul.f32 %v5603_v4, %v3874_v34 }
 0x80b   : > { %v3876_v36 = vmul.f32 0.5, %v3875_v35 }
 0x80d   : > { %v3877_v37 = vsub.f32 1.5, %v3876_v36 }
 0x80f   : > { %v3878_v13 = vmul.f32 %v5603_v4, %v3877_v37 }
 0x811   : > { %v3882_v39 = vsel %vm3881_vm12, %v5603_v4, %v3878_v13 }
 0x812   : > { %v3883_v41 = vmul.f32 %v3882_v39, %v3867_v30 }
 0x814   : > { %v3887_v46 = vmul.f32 %v5580_v38, %v3883_v41 }
 0x816   : > { %v3891_v42 = vadd.f32 %v5581_v40, %v3887_v46 }
 0x818   : > { %3892 = vst [vmem:[%s545_s3] sm:$0xff] %v3891_v42 }
 0x819 PF: > { %s27_s25 = sadd.s32 1, %s5836_s25  }
 0x81a   : > { %p24_p7 = scmp.ge.s32.totalorder %s27_s25, 4  }
 0x81c   :  { %26 = sbr.rel (!%p24_p7) target bundleno = 7 (0x7), region = 131 }
 0x821   :  { %3912 = vsyncpa [#allocation3], 1 }
 0x822   :  { %3914 = vsyncpa [#allocation3 + $0x1], 1 }
 0x823   :  { %3915 = vsyncpa [#allocation5], 1 }
 0x824   :  { %3916 = vsyncpa [#allocation8], 1 }
 0x825   :  { %3917 = vsyncpa [#allocation11], 1 }

</bundles_post_ra>
